<compile_context>
chip_gen: v7x
topology: tpu7x:2x2x1
jax: 0.10.0
libtpu: 0.0.40
codegen_flags: <defaults>
</compile_context>

<pallas_src>
import functools

import jax
import jax.numpy as jnp
import numpy as np
from jax import lax
from jax.experimental import pallas as pl
from jax.experimental.pallas import tpu as pltpu

LANE = 128           # TPU lane width; channel dims are padded to a multiple.
_MIB = 1024 * 1024


def _round_up(x, m):
    return (x + m - 1) // m * m


def _vmem_capacity_bytes():
    """Physical per-core VMEM (v5e/v6e: 128 MiB, v7x: 64 MiB)."""
    try:
        return int(pltpu.get_tpu_info().vmem_capacity_bytes)
    except Exception:            # pragma: no cover - info query unavailable
        return 64 * _MIB         # conservative (v7x-sized) fallback


def _strip_vmem_bytes(strip, width, cin_p, cout_p, single_buffer_weights=True):
    """Rough per-grid-step VMEM working set for a given strip height."""
    in_blk = (strip + 4) * width * cin_p * 2             # bf16 input block
    out_blk = strip * width * cout_p * 2                 # bf16 output block
    w_bufs = 1 if single_buffer_weights else 2
    w_bytes = 9 * (cin_p + cout_p) * cout_p * 2 * w_bufs
    acc = (strip + 2) * width * cout_p * 4               # f32 accumulator
    mid = (strip + 2) * width * cout_p * 2                # bf16 conv1 output
    fused = (strip + 4) * width * 3 * max(cin_p, cout_p) * 2   # K=3C operand
    temps = acc                                           # epilogue f32 temps
    return 2 * (in_blk + out_blk) + w_bytes + acc + mid + fused + temps


def _conv3x3_fused_taps(src, w_ref, out_rows, width, acc_ref):
    """3x3 conv as 3 MXU matmuls with K = 3*C (kw taps fused on the lane axis).

    src:     (out_rows + 2, W, C) bf16 value; the H halo rows are already in
             src.  The W halo is built with two zero-column concats, and the
             three dw-shifted slabs are concatenated along channels so every
             matmul is (out_rows*W, 3C) x (3C, Cout).
    w_ref:   (3, 3*C, Cout) ref; row dh holds [wt[dh,0]; wt[dh,1]; wt[dh,2]].
    acc_ref: (out_rows*W, Cout) f32 VMEM ref (or view); dh == 0 assigns, so
             there is no redundant memset and only 2 read-modify-write passes.
    """
    c = src.shape[-1]
    zcol = jnp.zeros((out_rows + 2, 1, c), src.dtype)
    fused = jnp.concatenate(
        [jnp.concatenate([zcol, src[:, :width - 1, :]], axis=1),   # dw = 0
         src,                                                      # dw = 1
         jnp.concatenate([src[:, 1:, :], zcol], axis=1)],          # dw = 2
        axis=-1)                                                   # (R, W, 3C)
    for dh in range(3):
        xs = fused[dh:dh + out_rows].reshape(out_rows * width, 3 * c)
        contrib = jnp.dot(xs, w_ref[dh], preferred_element_type=jnp.float32)
        if dh == 0:
            acc_ref[...] = contrib
        else:
            acc_ref[...] += contrib


def conv3x3_block_kernel(x_ref, w1_ref, w2_ref, st_ref, o_ref,
                         acc_ref, mid_ref, *, rows, width):
    """One (batch, H-strip) tile per grid step.

    x_ref:   (1, rows+4, W, Cin_p)    bf16 strip of the 2-row zero-padded input
    w1_ref:  (3, 3*Cin_p, Cout_p)     bf16 conv1 taps, kw fused along K
    w2_ref:  (3, 3*Cout_p, Cout_p)    bf16 conv2 taps, kw fused along K
    st_ref:  (4, Cout_p) f32          rows = [scale1, shift1, scale2, shift2]
    o_ref:   (1, rows, W, Cout_p)     bf16 output strip (lane-dense last dim)
    acc_ref: ((rows+2)*W, Cout_p) f32 shared accumulator (conv2 uses a view)
    mid_ref: (rows+2, W, Cout_p) bf16 conv1 output incl. 1-row halo
    """
    strip_id = pl.program_id(1)
    n_strips = pl.num_programs(1)
    cmid = mid_ref.shape[-1]

    # ---- conv1 + folded (bias, BN1) + ReLU over rows+2 rows (conv2's halo) --
    _conv3x3_fused_taps(x_ref[0], w1_ref, rows + 2, width, acc_ref)
    h1 = jnp.maximum(acc_ref[...] * st_ref[0:1, :] + st_ref[1:2, :], 0.0)
    mid_ref[...] = h1.reshape(rows + 2, width, cmid).astype(mid_ref.dtype)

    # conv2's H halo at the image border must be the *zero padding* of the
    # intermediate tensor, not conv1 evaluated on padded input -> zero it.
    @pl.when(strip_id == 0)
    def _():
        mid_ref[0:1] = jnp.zeros((1, width, cmid), mid_ref.dtype)

    @pl.when(strip_id == n_strips - 1)
    def _():
        mid_ref[rows + 1:rows + 2] = jnp.zeros((1, width, cmid), mid_ref.dtype)

    # ---- conv2 + folded (bias, BN2) + ReLU over the strip's own rows --------
    # TODO(synk): on v7x, drive the MXU explicitly (matmul_push_rhs/acc/pop)
    # so tap contributions accumulate in the MRB instead of VMEM RMW passes.
    acc2 = acc_ref.at[0:rows * width]          # reuse conv1's accumulator
    _conv3x3_fused_taps(mid_ref[...], w2_ref, rows, width, acc2)
    y = jnp.maximum(acc2[...] * st_ref[2:3, :] + st_ref[3:4, :], 0.0)
    o_ref[0] = y.reshape(rows, width, o_ref.shape[-1]).astype(o_ref.dtype)


def conv3x3_block_nhwc(x_nhwc, w1, b1, g1, be1, m1, v1,
                       w2, b2, g2, be2, m2, v2, eps=1e-5, strip_rows=None):
    """Fused Conv3x3 block on NHWC input (preferred entry for stage chaining).

    x_nhwc: (N, H, W, C) with C >= Cin (channels beyond Cin are ignored, so a
            zero-padded previous-stage output can be passed directly).
            Conv weights are PyTorch OIHW.
    Returns (N, H, W, Cout_p) bf16 with Cout_p = round_up(Cout, 128); the
    padded output channels are zero, so stages chain without un-padding.
    """
    N, H, W, C = x_nhwc.shape
    Cout, Cin = w1.shape[0], w1.shape[1]
    assert C >= Cin, "input must provide at least Cin channels"
    assert W >= 2, "kernel assumes spatial width >= 2"
    Cin_p = _round_up(Cin, LANE)
    Cout_p = _round_up(Cout, LANE)

    # ---- hardware-aware VMEM limits and budget-driven strip size ------------
    hw_vmem = _vmem_capacity_bytes()
    ceiling = min(100 * _MIB, hw_vmem * 7 // 8)   # ~56 MiB v7x, 100 MiB v5e/v6e
    budget = int(ceiling * 0.85)

    if strip_rows is None:
        divisors = [d for d in range(1, H + 1) if H % d == 0]
        fitting = [d for d in divisors
                   if _strip_vmem_bytes(d, W, Cin_p, Cout_p) <= budget]
        strip_rows = max(fitting) if fitting else min(divisors)
    assert H % strip_rows == 0
    n_strips = H // strip_rows

    working_set = _strip_vmem_bytes(strip_rows, W, Cin_p, Cout_p)
    vmem_limit = int(min(ceiling, max(working_set * 5 // 4, 32 * _MIB)))

    # ---- input: channels on the lane axis, padded; 2 zero rows each side ----
    # TODO(synk): special-case tiny Cin (e.g. the Cin=1 stem) as an im2col
    # matmul with K = 9*Cin instead of padding Cin to 128.
    x = x_nhwc[..., :min(C, Cin_p)]
    x = jnp.pad(x, ((0, 0), (2, 2), (0, 0),
                    (0, max(0, Cin_p - C)))).astype(jnp.bfloat16)

    if n_strips == 1:
        x_strips = x                    # (N, H+4, W, Cin_p): one strip / image
    else:
        # TODO(synk): replace this overlapping-window materialization with an
        # in-kernel manual-DMA window (memory_space=pl.ANY) to remove the extra
        # HBM pass; with budget-driven strips the overlap is <= 4/strip_rows.
        x_strips = jnp.stack(
            [x[:, s * strip_rows:s * strip_rows + strip_rows + 4]
             for s in range(n_strips)], axis=1)
        x_strips = x_strips.reshape(N * n_strips, strip_rows + 4, W, Cin_p)

    def prep_w(w, cin_p, cout_p):
        # OIHW -> (kh, kw, Cin, Cout) -> zero-pad channels -> fuse kw into K:
        # row kh of the result is [wt[kh,0]; wt[kh,1]; wt[kh,2]] along K.
        wt = jnp.transpose(w, (2, 3, 1, 0)).astype(jnp.float32)
        wt = jnp.pad(wt, ((0, 0), (0, 0),
                          (0, cin_p - w.shape[1]), (0, cout_p - w.shape[0])))
        return wt.reshape(3, 3 * cin_p, cout_p).astype(jnp.bfloat16)

    w1_k = prep_w(w1, Cin_p, Cout_p)
    w2_k = prep_w(w2, Cout_p, Cout_p)

    def fold(b, g, be, m, v):
        # Fold conv bias + eval-mode BatchNorm into one per-channel mul-add.
        scale = g / jnp.sqrt(v + eps)
        shift = (b - m) * scale + be
        return (jnp.pad(scale, (0, Cout_p - Cout)),
                jnp.pad(shift, (0, Cout_p - Cout)))

    s1, t1 = fold(b1, g1, be1, m1, v1)
    s2, t2 = fold(b2, g2, be2, m2, v2)
    st = jnp.stack([s1, t1, s2, t2]).astype(jnp.float32)   # (4, Cout_p)

    kernel = functools.partial(conv3x3_block_kernel, rows=strip_rows, width=W)

    flops = 2 * N * H * W * 9 * Cout_p * (Cin_p + Cout_p)
    bytes_accessed = (x_strips.size * 2 + (w1_k.size + w2_k.size) * 2
                      + st.size * 4 + N * H * W * Cout_p * 2)

    def launch(single_buffer_consts):
        if single_buffer_consts:
            # Constant-index inputs: 1-deep buffering halves their VMEM.
            def const_spec(shape, imap):
                return pl.BlockSpec(shape, imap, pipeline_mode=pl.Buffered(1))
        else:
            const_spec = pl.BlockSpec
        grid_spec = pltpu.PrefetchScalarGridSpec(
            num_scalar_prefetch=0,
            grid=(N, n_strips),
            in_specs=[
                pl.BlockSpec((1, strip_rows + 4, W, Cin_p),
                             lambda n, s: (n * n_strips + s, 0, 0, 0)),
                const_spec((3, 3 * Cin_p, Cout_p), lambda n, s: (0, 0, 0)),
                const_spec((3, 3 * Cout_p, Cout_p), lambda n, s: (0, 0, 0)),
                const_spec((4, Cout_p), lambda n, s: (0, 0)),
            ],
            out_specs=pl.BlockSpec((1, strip_rows, W, Cout_p),
                                   lambda n, s: (n, s, 0, 0)),
            scratch_shapes=[
                pltpu.VMEM(((strip_rows + 2) * W, Cout_p), jnp.float32),
                pltpu.VMEM((strip_rows + 2, W, Cout_p), jnp.bfloat16),
            ],
        )
        return pl.pallas_call(
            kernel,
            out_shape=jax.ShapeDtypeStruct((N, H, W, Cout_p), jnp.bfloat16),
            grid_spec=grid_spec,
            compiler_params=pltpu.CompilerParams(
                dimension_semantics=("parallel", "parallel"),
                vmem_limit_bytes=vmem_limit),
            cost_estimate=pl.CostEstimate(flops=flops, transcendentals=0,
                                          bytes_accessed=bytes_accessed),
        )(x_strips, w1_k, w2_k, st)

    try:
        return launch(True)
    except Exception:   # pragma: no cover - jax without pipeline_mode support
        return launch(False)


def conv3x3_block(x_nchw, w1, b1, g1, be1, m1, v1,
                  w2, b2, g2, be2, m2, v2, eps=1e-5, strip_rows=None):
    """PyTorch-layout compatibility wrapper: NCHW f32 in -> NCHW f32 out.

    Prefer conv3x3_block_nhwc when chaining UNet stages: it keeps activations
    in bf16, channel-padded NHWC and skips this extra relayout pass.
    """
    Cout = w1.shape[0]
    x_nhwc = jnp.transpose(x_nchw, (0, 2, 3, 1))
    out = conv3x3_block_nhwc(x_nhwc, w1, b1, g1, be1, m1, v1,
                             w2, b2, g2, be2, m2, v2,
                             eps=eps, strip_rows=strip_rows)
    return jnp.transpose(out[..., :Cout].astype(jnp.float32), (0, 3, 1, 2))


def conv3x3_block_reference(x, w1, b1, g1, be1, m1, v1,
                            w2, b2, g2, be2, m2, v2, eps=1e-5):
    """Pure-JAX NCHW reference mirroring the PyTorch Conv3x3 block (eval)."""
    dn = ("NCHW", "OIHW", "NCHW")

    def stage(y, w, b, g, be, m, v):
        y = lax.conv_general_dilated(y, w, (1, 1), "SAME",
                                     dimension_numbers=dn)
        y = y + b[None, :, None, None]
        y = (y - m[None, :, None, None]) / jnp.sqrt(
            v[None, :, None, None] + eps)
        y = y * g[None, :, None, None] + be[None, :, None, None]
        return jnp.maximum(y, 0.0)

    y = stage(x, w1, b1, g1, be1, m1, v1)
    return stage(y, w2, b2, g2, be2, m2, v2)


if __name__ == "__main__":
    key = jax.random.PRNGKey(0)

    def make_params(k, cin, cout):
        ks = jax.random.split(k, 12)
        w1 = jax.random.normal(ks[0], (cout, cin, 3, 3), jnp.float32) * 0.1
        b1 = jax.random.normal(ks[1], (cout,), jnp.float32) * 0.1
        g1 = 1.0 + 0.1 * jax.random.normal(ks[2], (cout,), jnp.float32)
        be1 = 0.1 * jax.random.normal(ks[3], (cout,), jnp.float32)
        m1 = 0.1 * jax.random.normal(ks[4], (cout,), jnp.float32)
        v1 = jnp.abs(jax.random.normal(ks[5], (cout,), jnp.float32)) + 0.5
        w2 = jax.random.normal(ks[6], (cout, cout, 3, 3), jnp.float32) * 0.1
        b2 = jax.random.normal(ks[7], (cout,), jnp.float32) * 0.1
        g2 = 1.0 + 0.1 * jax.random.normal(ks[8], (cout,), jnp.float32)
        be2 = 0.1 * jax.random.normal(ks[9], (cout,), jnp.float32)
        m2 = 0.1 * jax.random.normal(ks[10], (cout,), jnp.float32)
        v2 = jnp.abs(jax.random.normal(ks[11], (cout,), jnp.float32)) + 0.5
        return (w1, b1, g1, be1, m1, v1, w2, b2, g2, be2, m2, v2)

    k1, k2, k3, k4 = jax.random.split(key, 4)

    # --- Test 1: UNet down1 block (num_channels=1 -> num_feat[0]=64), NCHW ---
    N, Cin, Cout, H, W = 2, 1, 64, 16, 16
    x = jax.random.normal(k1, (N, Cin, H, W), jnp.float32)
    params = make_params(k2, Cin, Cout)
    out = jax.block_until_ready(conv3x3_block(x, *params))
    ref = conv3x3_block_reference(x, *params)
    # bf16 operands / intermediate / output bound the achievable accuracy.
    np.testing.assert_allclose(np.asarray(out), np.asarray(ref),
                               rtol=4e-2, atol=4e-2)

    # --- Test 2: multi-strip path (forced strip_rows) via the NHWC entry -----
    N2, Cin2, Cout2, H2, W2 = 1, 8, 16, 32, 16
    x2 = jax.random.normal(k3, (N2, Cin2, H2, W2), jnp.float32)
    params2 = make_params(k4, Cin2, Cout2)
    out2 = conv3x3_block_nhwc(jnp.transpose(x2, (0, 2, 3, 1)), *params2,
                              strip_rows=8)
    out2 = np.asarray(jax.block_until_ready(out2))[..., :Cout2].astype(np.float32)
    ref2 = np.asarray(jnp.transpose(conv3x3_block_reference(x2, *params2),
                                    (0, 2, 3, 1)))
    np.testing.assert_allclose(out2, ref2, rtol=4e-2, atol=4e-2)

    print("KERNEL_OK")
</pallas_src>

<mosaic_0001>
module attributes {stable_mosaic.version = 11 : i64} {
  func.func @conv3x3_block_kernel(%arg0: i32, %arg1: i32, %arg2: memref<1x20x16x128xbf16, #tpu.memory_space<vmem>>, %arg3: memref<3x384x128xbf16, #tpu.memory_space<vmem>>, %arg4: memref<3x384x128xbf16, #tpu.memory_space<vmem>>, %arg5: memref<4x128xf32, #tpu.memory_space<vmem>>, %arg6: memref<1x16x16x128xbf16, #tpu.memory_space<vmem>>, %arg7: memref<288x128xf32, #tpu.memory_space<vmem>>, %arg8: memref<18x16x128xbf16, #tpu.memory_space<vmem>>) attributes {dimension_semantics = [#tpu.dimension_semantics<parallel>, #tpu.dimension_semantics<parallel>], iteration_bounds = array<i64: 2, 1>, scalar_prefetch = 0 : i64, scratch_operands = 2 : i64, tpu.core_type = #tpu.core_type<tc>, window_params = [{transform_indices = @transform_0, window_bounds = array<i64: 1, 20, 16, 128>}, {pipeline_mode = #tpu.pipeline_mode<synchronous>, transform_indices = @transform_1, window_bounds = array<i64: 3, 384, 128>}, {pipeline_mode = #tpu.pipeline_mode<synchronous>, transform_indices = @transform_2, window_bounds = array<i64: 3, 384, 128>}, {pipeline_mode = #tpu.pipeline_mode<synchronous>, transform_indices = @transform_3, window_bounds = array<i64: 4, 128>}, {transform_indices = @transform_4, window_bounds = array<i64: 1, 16, 16, 128>}]} {
    %c0 = arith.constant 0 : index
    %c0_0 = arith.constant 0 : index
    %c0_1 = arith.constant 0 : index
    %c0_2 = arith.constant 0 : index
    %0 = vector.load %arg2[%c0, %c0_0, %c0_1, %c0_2] : memref<1x20x16x128xbf16, #tpu.memory_space<vmem>>, vector<1x20x16x128xbf16>
    %1 = vector.shape_cast %0 : vector<1x20x16x128xbf16> to vector<20x16x128xbf16>
    %cst = arith.constant 0.000000e+00 : bf16
    %2 = vector.broadcast %cst : bf16 to vector<20x1x128xbf16>
    %3 = vector.extract_strided_slice %1 {offsets = [0, 0, 0], sizes = [20, 15, 128], strides = [1, 1, 1]} : vector<20x16x128xbf16> to vector<20x15x128xbf16>
    %4 = tpu.concatenate %2, %3 in 1 : vector<20x1x128xbf16>, vector<20x15x128xbf16> -> vector<20x16x128xbf16>
    %5 = vector.extract_strided_slice %1 {offsets = [0, 1, 0], sizes = [20, 15, 128], strides = [1, 1, 1]} : vector<20x16x128xbf16> to vector<20x15x128xbf16>
    %6 = tpu.concatenate %5, %2 in 1 : vector<20x15x128xbf16>, vector<20x1x128xbf16> -> vector<20x16x128xbf16>
    %7 = tpu.concatenate %4, %1, %6 in 2 : vector<20x16x128xbf16>, vector<20x16x128xbf16>, vector<20x16x128xbf16> -> vector<20x16x384xbf16>
    %8 = vector.extract_strided_slice %7 {offsets = [0, 0, 0], sizes = [18, 16, 384], strides = [1, 1, 1]} : vector<20x16x384xbf16> to vector<18x16x384xbf16>
    %9 = vector.shape_cast %8 : vector<18x16x384xbf16> to vector<288x384xbf16>
    %c0_3 = arith.constant 0 : index
    %c0_4 = arith.constant 0 : index
    %c0_5 = arith.constant 0 : index
    %10 = vector.load %arg3[%c0_3, %c0_4, %c0_5] : memref<3x384x128xbf16, #tpu.memory_space<vmem>>, vector<1x384x128xbf16>
    %11 = vector.shape_cast %10 : vector<1x384x128xbf16> to vector<384x128xbf16>
    %cst_6 = arith.constant dense<0.000000e+00> : vector<288x128xf32>
    %12 = tpu.matmul %9, %11, %cst_6 {dimension_numbers = #tpu.dot_dimension_numbers<[1], [0], [0], [1], [0, 0, 1, 1], [], []>} : vector<288x384xbf16>, vector<384x128xbf16>, vector<288x128xf32> -> vector<288x128xf32>
    %c0_7 = arith.constant 0 : index
    %c0_8 = arith.constant 0 : index
    %13 = vector.load %arg7[%c0_7, %c0_8] : memref<288x128xf32, #tpu.memory_space<vmem>>, vector<288x128xf32>
    tpu.vector_store %arg7[%c0_7, %c0_8], %12 {strides = array<i32>} : memref<288x128xf32, #tpu.memory_space<vmem>>, vector<288x128xf32>,
    %14 = vector.extract_strided_slice %7 {offsets = [1, 0, 0], sizes = [18, 16, 384], strides = [1, 1, 1]} : vector<20x16x384xbf16> to vector<18x16x384xbf16>
    %15 = vector.shape_cast %14 : vector<18x16x384xbf16> to vector<288x384xbf16>
    %c1 = arith.constant 1 : index
    %c0_9 = arith.constant 0 : index
    %c0_10 = arith.constant 0 : index
    %16 = vector.load %arg3[%c1, %c0_9, %c0_10] : memref<3x384x128xbf16, #tpu.memory_space<vmem>>, vector<1x384x128xbf16>
    %17 = vector.shape_cast %16 : vector<1x384x128xbf16> to vector<384x128xbf16>
    %cst_11 = arith.constant dense<0.000000e+00> : vector<288x128xf32>
    %18 = tpu.matmul %15, %17, %cst_11 {dimension_numbers = #tpu.dot_dimension_numbers<[1], [0], [0], [1], [0, 0, 1, 1], [], []>} : vector<288x384xbf16>, vector<384x128xbf16>, vector<288x128xf32> -> vector<288x128xf32>
    %c0_12 = arith.constant 0 : index
    %c0_13 = arith.constant 0 : index
    %19 = vector.load %arg7[%c0_12, %c0_13] : memref<288x128xf32, #tpu.memory_space<vmem>>, vector<288x128xf32>
    %20 = arith.addf %19, %18 : vector<288x128xf32>
    %c0_14 = arith.constant 0 : index
    %c0_15 = arith.constant 0 : index
    %21 = vector.load %arg7[%c0_14, %c0_15] : memref<288x128xf32, #tpu.memory_space<vmem>>, vector<288x128xf32>
    tpu.vector_store %arg7[%c0_14, %c0_15], %20 {strides = array<i32>} : memref<288x128xf32, #tpu.memory_space<vmem>>, vector<288x128xf32>,
    %22 = vector.extract_strided_slice %7 {offsets = [2, 0, 0], sizes = [18, 16, 384], strides = [1, 1, 1]} : vector<20x16x384xbf16> to vector<18x16x384xbf16>
    %23 = vector.shape_cast %22 : vector<18x16x384xbf16> to vector<288x384xbf16>
    %c2 = arith.constant 2 : index
    %c0_16 = arith.constant 0 : index
    %c0_17 = arith.constant 0 : index
    %24 = vector.load %arg3[%c2, %c0_16, %c0_17] : memref<3x384x128xbf16, #tpu.memory_space<vmem>>, vector<1x384x128xbf16>
    %25 = vector.shape_cast %24 : vector<1x384x128xbf16> to vector<384x128xbf16>
    %cst_18 = arith.constant dense<0.000000e+00> : vector<288x128xf32>
    %26 = tpu.matmul %23, %25, %cst_18 {dimension_numbers = #tpu.dot_dimension_numbers<[1], [0], [0], [1], [0, 0, 1, 1], [], []>} : vector<288x384xbf16>, vector<384x128xbf16>, vector<288x128xf32> -> vector<288x128xf32>
    %c0_19 = arith.constant 0 : index
    %c0_20 = arith.constant 0 : index
    %27 = vector.load %arg7[%c0_19, %c0_20] : memref<288x128xf32, #tpu.memory_space<vmem>>, vector<288x128xf32>
    %28 = arith.addf %27, %26 : vector<288x128xf32>
    %c0_21 = arith.constant 0 : index
    %c0_22 = arith.constant 0 : index
    %29 = vector.load %arg7[%c0_21, %c0_22] : memref<288x128xf32, #tpu.memory_space<vmem>>, vector<288x128xf32>
    tpu.vector_store %arg7[%c0_21, %c0_22], %28 {strides = array<i32>} : memref<288x128xf32, #tpu.memory_space<vmem>>, vector<288x128xf32>,
    %c0_23 = arith.constant 0 : index
    %c0_24 = arith.constant 0 : index
    %30 = vector.load %arg7[%c0_23, %c0_24] : memref<288x128xf32, #tpu.memory_space<vmem>>, vector<288x128xf32>
    %c0_25 = arith.constant 0 : index
    %c0_26 = arith.constant 0 : index
    %31 = vector.load %arg5[%c0_25, %c0_26] : memref<4x128xf32, #tpu.memory_space<vmem>>, vector<1x128xf32>
    %32 = vector.broadcast %31 : vector<1x128xf32> to vector<288x128xf32>
    %33 = arith.mulf %30, %32 : vector<288x128xf32>
    %c1_27 = arith.constant 1 : index
    %c0_28 = arith.constant 0 : index
    %34 = vector.load %arg5[%c1_27, %c0_28] : memref<4x128xf32, #tpu.memory_space<vmem>>, vector<1x128xf32>
    %35 = vector.broadcast %34 : vector<1x128xf32> to vector<288x128xf32>
    %36 = arith.addf %33, %35 : vector<288x128xf32>
    %cst_29 = arith.constant 0.000000e+00 : f32
    %37 = vector.broadcast %cst_29 : f32 to vector<288x128xf32>
    %38 = arith.maximumf %36, %37 : vector<288x128xf32>
    %39 = vector.shape_cast %38 : vector<288x128xf32> to vector<18x16x128xf32>
    %40 = arith.truncf %39 : vector<18x16x128xf32> to vector<18x16x128xbf16>
    %c0_30 = arith.constant 0 : index
    %c0_31 = arith.constant 0 : index
    %c0_32 = arith.constant 0 : index
    %41 = vector.load %arg8[%c0_30, %c0_31, %c0_32] : memref<18x16x128xbf16, #tpu.memory_space<vmem>>, vector<18x16x128xbf16>
    tpu.vector_store %arg8[%c0_30, %c0_31, %c0_32], %40 {strides = array<i32>} : memref<18x16x128xbf16, #tpu.memory_space<vmem>>, vector<18x16x128xbf16>,
    %c0_i32 = arith.constant 0 : i32
    %42 = arith.cmpi eq, %arg1, %c0_i32 : i32
    %43 = arith.extui %42 : i1 to i32
    %c0_i32_33 = arith.constant 0 : i32
    %44 = arith.cmpi ne, %43, %c0_i32_33 : i32
    scf.if %44 {
      %cst_72 = arith.constant 0.000000e+00 : bf16
      %91 = vector.broadcast %cst_72 : bf16 to vector<1x16x128xbf16>
      %c0_73 = arith.constant 0 : index
      %c0_74 = arith.constant 0 : index
      %c0_75 = arith.constant 0 : index
      %92 = vector.load %arg8[%c0_73, %c0_74, %c0_75] : memref<18x16x128xbf16, #tpu.memory_space<vmem>>, vector<1x16x128xbf16>
      tpu.vector_store %arg8[%c0_73, %c0_74, %c0_75], %91 {strides = array<i32>} : memref<18x16x128xbf16, #tpu.memory_space<vmem>>, vector<1x16x128xbf16>,
    } else {
    }
    %c0_i32_34 = arith.constant 0 : i32
    %45 = arith.cmpi eq, %arg1, %c0_i32_34 : i32
    %46 = arith.extui %45 : i1 to i32
    %c0_i32_35 = arith.constant 0 : i32
    %47 = arith.cmpi ne, %46, %c0_i32_35 : i32
    scf.if %47 {
      %cst_72 = arith.constant 0.000000e+00 : bf16
      %91 = vector.broadcast %cst_72 : bf16 to vector<1x16x128xbf16>
      %c17 = arith.constant 17 : index
      %c0_73 = arith.constant 0 : index
      %c0_74 = arith.constant 0 : index
      %92 = vector.load %arg8[%c17, %c0_73, %c0_74] : memref<18x16x128xbf16, #tpu.memory_space<vmem>>, vector<1x16x128xbf16>
      tpu.vector_store %arg8[%c17, %c0_73, %c0_74], %91 {strides = array<i32>} : memref<18x16x128xbf16, #tpu.memory_space<vmem>>, vector<1x16x128xbf16>,
    } else {
    }
    %c0_36 = arith.constant 0 : index
    %c0_37 = arith.constant 0 : index
    %c0_38 = arith.constant 0 : index
    %48 = vector.load %arg8[%c0_36, %c0_37, %c0_38] : memref<18x16x128xbf16, #tpu.memory_space<vmem>>, vector<18x16x128xbf16>
    %cst_39 = arith.constant 0.000000e+00 : bf16
    %49 = vector.broadcast %cst_39 : bf16 to vector<18x1x128xbf16>
    %50 = vector.extract_strided_slice %48 {offsets = [0, 0, 0], sizes = [18, 15, 128], strides = [1, 1, 1]} : vector<18x16x128xbf16> to vector<18x15x128xbf16>
    %51 = tpu.concatenate %49, %50 in 1 : vector<18x1x128xbf16>, vector<18x15x128xbf16> -> vector<18x16x128xbf16>
    %52 = vector.extract_strided_slice %48 {offsets = [0, 1, 0], sizes = [18, 15, 128], strides = [1, 1, 1]} : vector<18x16x128xbf16> to vector<18x15x128xbf16>
    %53 = tpu.concatenate %52, %49 in 1 : vector<18x15x128xbf16>, vector<18x1x128xbf16> -> vector<18x16x128xbf16>
    %54 = tpu.concatenate %51, %48, %53 in 2 : vector<18x16x128xbf16>, vector<18x16x128xbf16>, vector<18x16x128xbf16> -> vector<18x16x384xbf16>
    %55 = vector.extract_strided_slice %54 {offsets = [0, 0, 0], sizes = [16, 16, 384], strides = [1, 1, 1]} : vector<18x16x384xbf16> to vector<16x16x384xbf16>
    %56 = vector.shape_cast %55 : vector<16x16x384xbf16> to vector<256x384xbf16>
    %c0_40 = arith.constant 0 : index
    %c0_41 = arith.constant 0 : index
    %c0_42 = arith.constant 0 : index
    %57 = vector.load %arg4[%c0_40, %c0_41, %c0_42] : memref<3x384x128xbf16, #tpu.memory_space<vmem>>, vector<1x384x128xbf16>
    %58 = vector.shape_cast %57 : vector<1x384x128xbf16> to vector<384x128xbf16>
    %cst_43 = arith.constant dense<0.000000e+00> : vector<256x128xf32>
    %59 = tpu.matmul %56, %58, %cst_43 {dimension_numbers = #tpu.dot_dimension_numbers<[1], [0], [0], [1], [0, 0, 1, 1], [], []>} : vector<256x384xbf16>, vector<384x128xbf16>, vector<256x128xf32> -> vector<256x128xf32>
    %c0_44 = arith.constant 0 : index
    %c0_45 = arith.constant 0 : index
    %60 = vector.load %arg7[%c0_44, %c0_45] : memref<288x128xf32, #tpu.memory_space<vmem>>, vector<256x128xf32>
    tpu.vector_store %arg7[%c0_44, %c0_45], %59 {strides = array<i32>} : memref<288x128xf32, #tpu.memory_space<vmem>>, vector<256x128xf32>,
    %61 = vector.extract_strided_slice %54 {offsets = [1, 0, 0], sizes = [16, 16, 384], strides = [1, 1, 1]} : vector<18x16x384xbf16> to vector<16x16x384xbf16>
    %62 = vector.shape_cast %61 : vector<16x16x384xbf16> to vector<256x384xbf16>
    %c1_46 = arith.constant 1 : index
    %c0_47 = arith.constant 0 : index
    %c0_48 = arith.constant 0 : index
    %63 = vector.load %arg4[%c1_46, %c0_47, %c0_48] : memref<3x384x128xbf16, #tpu.memory_space<vmem>>, vector<1x384x128xbf16>
    %64 = vector.shape_cast %63 : vector<1x384x128xbf16> to vector<384x128xbf16>
    %cst_49 = arith.constant dense<0.000000e+00> : vector<256x128xf32>
    %65 = tpu.matmul %62, %64, %cst_49 {dimension_numbers = #tpu.dot_dimension_numbers<[1], [0], [0], [1], [0, 0, 1, 1], [], []>} : vector<256x384xbf16>, vector<384x128xbf16>, vector<256x128xf32> -> vector<256x128xf32>
    %c0_50 = arith.constant 0 : index
    %c0_51 = arith.constant 0 : index
    %66 = vector.load %arg7[%c0_50, %c0_51] : memref<288x128xf32, #tpu.memory_space<vmem>>, vector<256x128xf32>
    %67 = arith.addf %66, %65 : vector<256x128xf32>
    %c0_52 = arith.constant 0 : index
    %c0_53 = arith.constant 0 : index
    %68 = vector.load %arg7[%c0_52, %c0_53] : memref<288x128xf32, #tpu.memory_space<vmem>>, vector<256x128xf32>
    tpu.vector_store %arg7[%c0_52, %c0_53], %67 {strides = array<i32>} : memref<288x128xf32, #tpu.memory_space<vmem>>, vector<256x128xf32>,
    %69 = vector.extract_strided_slice %54 {offsets = [2, 0, 0], sizes = [16, 16, 384], strides = [1, 1, 1]} : vector<18x16x384xbf16> to vector<16x16x384xbf16>
    %70 = vector.shape_cast %69 : vector<16x16x384xbf16> to vector<256x384xbf16>
    %c2_54 = arith.constant 2 : index
    %c0_55 = arith.constant 0 : index
    %c0_56 = arith.constant 0 : index
    %71 = vector.load %arg4[%c2_54, %c0_55, %c0_56] : memref<3x384x128xbf16, #tpu.memory_space<vmem>>, vector<1x384x128xbf16>
    %72 = vector.shape_cast %71 : vector<1x384x128xbf16> to vector<384x128xbf16>
    %cst_57 = arith.constant dense<0.000000e+00> : vector<256x128xf32>
    %73 = tpu.matmul %70, %72, %cst_57 {dimension_numbers = #tpu.dot_dimension_numbers<[1], [0], [0], [1], [0, 0, 1, 1], [], []>} : vector<256x384xbf16>, vector<384x128xbf16>, vector<256x128xf32> -> vector<256x128xf32>
    %c0_58 = arith.constant 0 : index
    %c0_59 = arith.constant 0 : index
    %74 = vector.load %arg7[%c0_58, %c0_59] : memref<288x128xf32, #tpu.memory_space<vmem>>, vector<256x128xf32>
    %75 = arith.addf %74, %73 : vector<256x128xf32>
    %c0_60 = arith.constant 0 : index
    %c0_61 = arith.constant 0 : index
    %76 = vector.load %arg7[%c0_60, %c0_61] : memref<288x128xf32, #tpu.memory_space<vmem>>, vector<256x128xf32>
    tpu.vector_store %arg7[%c0_60, %c0_61], %75 {strides = array<i32>} : memref<288x128xf32, #tpu.memory_space<vmem>>, vector<256x128xf32>,
    %c0_62 = arith.constant 0 : index
    %c0_63 = arith.constant 0 : index
    %77 = vector.load %arg7[%c0_62, %c0_63] : memref<288x128xf32, #tpu.memory_space<vmem>>, vector<256x128xf32>
    %c2_64 = arith.constant 2 : index
    %c0_65 = arith.constant 0 : index
    %78 = vector.load %arg5[%c2_64, %c0_65] : memref<4x128xf32, #tpu.memory_space<vmem>>, vector<1x128xf32>
    %79 = vector.broadcast %78 : vector<1x128xf32> to vector<256x128xf32>
    %80 = arith.mulf %77, %79 : vector<256x128xf32>
    %c3 = arith.constant 3 : index
    %c0_66 = arith.constant 0 : index
    %81 = vector.load %arg5[%c3, %c0_66] : memref<4x128xf32, #tpu.memory_space<vmem>>, vector<1x128xf32>
    %82 = vector.broadcast %81 : vector<1x128xf32> to vector<256x128xf32>
    %83 = arith.addf %80, %82 : vector<256x128xf32>
    %cst_67 = arith.constant 0.000000e+00 : f32
    %84 = vector.broadcast %cst_67 : f32 to vector<256x128xf32>
    %85 = arith.maximumf %83, %84 : vector<256x128xf32>
    %86 = vector.shape_cast %85 : vector<256x128xf32> to vector<16x16x128xf32>
    %87 = arith.truncf %86 : vector<16x16x128xf32> to vector<16x16x128xbf16>
    %c0_68 = arith.constant 0 : index
    %c0_69 = arith.constant 0 : index
    %c0_70 = arith.constant 0 : index
    %c0_71 = arith.constant 0 : index
    %88 = vector.load %arg6[%c0_68, %c0_69, %c0_70, %c0_71] : memref<1x16x16x128xbf16, #tpu.memory_space<vmem>>, vector<1x16x16x128xbf16>
    %89 = vector.shape_cast %88 : vector<1x16x16x128xbf16> to vector<16x16x128xbf16>
    %90 = vector.shape_cast %87 : vector<16x16x128xbf16> to vector<1x16x16x128xbf16>
    tpu.vector_store %arg6[%c0_68, %c0_69, %c0_70, %c0_71], %90 {strides = array<i32>} : memref<1x16x16x128xbf16, #tpu.memory_space<vmem>>, vector<1x16x16x128xbf16>,
    return
  }
  func.func @transform_0(%arg0: i32, %arg1: i32) -> (i32, i32, i32, i32) {
    %c1_i32 = arith.constant 1 : i32
    %0 = arith.muli %arg0, %c1_i32 : i32
    %1 = arith.addi %0, %arg1 : i32
    %c0_i32 = arith.constant 0 : i32
    %c0_i32_0 = arith.constant 0 : i32
    %c0_i32_1 = arith.constant 0 : i32
    %c0_i32_2 = arith.constant 0 : i32
    return %1, %c0_i32, %c0_i32_0, %c0_i32_1 : i32, i32, i32, i32
  }
  func.func @transform_1(%arg0: i32, %arg1: i32) -> (i32, i32, i32) {
    %c0_i32 = arith.constant 0 : i32
    %c0_i32_0 = arith.constant 0 : i32
    %c0_i32_1 = arith.constant 0 : i32
    %c0_i32_2 = arith.constant 0 : i32
    return %c0_i32, %c0_i32_0, %c0_i32_1 : i32, i32, i32
  }
  func.func @transform_2(%arg0: i32, %arg1: i32) -> (i32, i32, i32) {
    %c0_i32 = arith.constant 0 : i32
    %c0_i32_0 = arith.constant 0 : i32
    %c0_i32_1 = arith.constant 0 : i32
    %c0_i32_2 = arith.constant 0 : i32
    return %c0_i32, %c0_i32_0, %c0_i32_1 : i32, i32, i32
  }
  func.func @transform_3(%arg0: i32, %arg1: i32) -> (i32, i32) {
    %c0_i32 = arith.constant 0 : i32
    %c0_i32_0 = arith.constant 0 : i32
    %c0_i32_1 = arith.constant 0 : i32
    return %c0_i32, %c0_i32_0 : i32, i32
  }
  func.func @transform_4(%arg0: i32, %arg1: i32) -> (i32, i32, i32, i32) {
    %c0_i32 = arith.constant 0 : i32
    %c0_i32_0 = arith.constant 0 : i32
    %c0_i32_1 = arith.constant 0 : i32
    return %arg0, %arg1, %c0_i32, %c0_i32_0 : i32, i32, i32, i32
  }
}

module attributes {stable_mosaic.version = 11 : i64} {
  func.func @conv3x3_block_kernel(%arg0: i32, %arg1: i32, %arg2: memref<1x20x16x128xbf16, #tpu.memory_space<vmem>>, %arg3: memref<3x384x128xbf16, #tpu.memory_space<vmem>>, %arg4: memref<3x384x128xbf16, #tpu.memory_space<vmem>>, %arg5: memref<4x128xf32, #tpu.memory_space<vmem>>, %arg6: memref<1x16x16x128xbf16, #tpu.memory_space<vmem>>, %arg7: memref<288x128xf32, #tpu.memory_space<vmem>>, %arg8: memref<18x16x128xbf16, #tpu.memory_space<vmem>>) attributes {dimension_semantics = [#tpu.dimension_semantics<parallel>, #tpu.dimension_semantics<parallel>], iteration_bounds = array<i64: 2, 1>, scalar_prefetch = 0 : i64, scratch_operands = 2 : i64, tpu.core_type = #tpu.core_type<tc>, window_params = [{transform_indices = @transform_0, window_bounds = array<i64: 1, 20, 16, 128>}, {pipeline_mode = #tpu.pipeline_mode<synchronous>, transform_indices = @transform_1, window_bounds = array<i64: 3, 384, 128>}, {pipeline_mode = #tpu.pipeline_mode<synchronous>, transform_indices = @transform_2, window_bounds = array<i64: 3, 384, 128>}, {pipeline_mode = #tpu.pipeline_mode<synchronous>, transform_indices = @transform_3, window_bounds = array<i64: 4, 128>}, {transform_indices = @transform_4, window_bounds = array<i64: 1, 16, 16, 128>}]} {
    %c0 = arith.constant 0 : index
    %c0_0 = arith.constant 0 : index
    %c0_1 = arith.constant 0 : index
    %c0_2 = arith.constant 0 : index
    %0 = vector.load %arg2[%c0, %c0_0, %c0_1, %c0_2] : memref<1x20x16x128xbf16, #tpu.memory_space<vmem>>, vector<1x20x16x128xbf16>
    %1 = vector.shape_cast %0 : vector<1x20x16x128xbf16> to vector<20x16x128xbf16>
    %cst = arith.constant 0.000000e+00 : bf16
    %2 = vector.broadcast %cst : bf16 to vector<20x1x128xbf16>
    %3 = vector.extract_strided_slice %1 {offsets = [0, 0, 0], sizes = [20, 15, 128], strides = [1, 1, 1]} : vector<20x16x128xbf16> to vector<20x15x128xbf16>
    %4 = tpu.concatenate %2, %3 in 1 : vector<20x1x128xbf16>, vector<20x15x128xbf16> -> vector<20x16x128xbf16>
    %5 = vector.extract_strided_slice %1 {offsets = [0, 1, 0], sizes = [20, 15, 128], strides = [1, 1, 1]} : vector<20x16x128xbf16> to vector<20x15x128xbf16>
    %6 = tpu.concatenate %5, %2 in 1 : vector<20x15x128xbf16>, vector<20x1x128xbf16> -> vector<20x16x128xbf16>
    %7 = tpu.concatenate %4, %1, %6 in 2 : vector<20x16x128xbf16>, vector<20x16x128xbf16>, vector<20x16x128xbf16> -> vector<20x16x384xbf16>
    %8 = vector.extract_strided_slice %7 {offsets = [0, 0, 0], sizes = [18, 16, 384], strides = [1, 1, 1]} : vector<20x16x384xbf16> to vector<18x16x384xbf16>
    %9 = vector.shape_cast %8 : vector<18x16x384xbf16> to vector<288x384xbf16>
    %c0_3 = arith.constant 0 : index
    %c0_4 = arith.constant 0 : index
    %c0_5 = arith.constant 0 : index
    %10 = vector.load %arg3[%c0_3, %c0_4, %c0_5] : memref<3x384x128xbf16, #tpu.memory_space<vmem>>, vector<1x384x128xbf16>
    %11 = vector.shape_cast %10 : vector<1x384x128xbf16> to vector<384x128xbf16>
    %cst_6 = arith.constant dense<0.000000e+00> : vector<288x128xf32>
    %12 = tpu.matmul %9, %11, %cst_6 {dimension_numbers = #tpu.dot_dimension_numbers<[1], [0], [0], [1], [0, 0, 1, 1], [], []>} : vector<288x384xbf16>, vector<384x128xbf16>, vector<288x128xf32> -> vector<288x128xf32>
    %c0_7 = arith.constant 0 : index
    %c0_8 = arith.constant 0 : index
    %13 = vector.load %arg7[%c0_7, %c0_8] : memref<288x128xf32, #tpu.memory_space<vmem>>, vector<288x128xf32>
    tpu.vector_store %arg7[%c0_7, %c0_8], %12 {strides = array<i32>} : memref<288x128xf32, #tpu.memory_space<vmem>>, vector<288x128xf32>,
    %14 = vector.extract_strided_slice %7 {offsets = [1, 0, 0], sizes = [18, 16, 384], strides = [1, 1, 1]} : vector<20x16x384xbf16> to vector<18x16x384xbf16>
    %15 = vector.shape_cast %14 : vector<18x16x384xbf16> to vector<288x384xbf16>
    %c1 = arith.constant 1 : index
    %c0_9 = arith.constant 0 : index
    %c0_10 = arith.constant 0 : index
    %16 = vector.load %arg3[%c1, %c0_9, %c0_10] : memref<3x384x128xbf16, #tpu.memory_space<vmem>>, vector<1x384x128xbf16>
    %17 = vector.shape_cast %16 : vector<1x384x128xbf16> to vector<384x128xbf16>
    %cst_11 = arith.constant dense<0.000000e+00> : vector<288x128xf32>
    %18 = tpu.matmul %15, %17, %cst_11 {dimension_numbers = #tpu.dot_dimension_numbers<[1], [0], [0], [1], [0, 0, 1, 1], [], []>} : vector<288x384xbf16>, vector<384x128xbf16>, vector<288x128xf32> -> vector<288x128xf32>
    %c0_12 = arith.constant 0 : index
    %c0_13 = arith.constant 0 : index
    %19 = vector.load %arg7[%c0_12, %c0_13] : memref<288x128xf32, #tpu.memory_space<vmem>>, vector<288x128xf32>
    %20 = arith.addf %19, %18 : vector<288x128xf32>
    %c0_14 = arith.constant 0 : index
    %c0_15 = arith.constant 0 : index
    %21 = vector.load %arg7[%c0_14, %c0_15] : memref<288x128xf32, #tpu.memory_space<vmem>>, vector<288x128xf32>
    tpu.vector_store %arg7[%c0_14, %c0_15], %20 {strides = array<i32>} : memref<288x128xf32, #tpu.memory_space<vmem>>, vector<288x128xf32>,
    %22 = vector.extract_strided_slice %7 {offsets = [2, 0, 0], sizes = [18, 16, 384], strides = [1, 1, 1]} : vector<20x16x384xbf16> to vector<18x16x384xbf16>
    %23 = vector.shape_cast %22 : vector<18x16x384xbf16> to vector<288x384xbf16>
    %c2 = arith.constant 2 : index
    %c0_16 = arith.constant 0 : index
    %c0_17 = arith.constant 0 : index
    %24 = vector.load %arg3[%c2, %c0_16, %c0_17] : memref<3x384x128xbf16, #tpu.memory_space<vmem>>, vector<1x384x128xbf16>
    %25 = vector.shape_cast %24 : vector<1x384x128xbf16> to vector<384x128xbf16>
    %cst_18 = arith.constant dense<0.000000e+00> : vector<288x128xf32>
    %26 = tpu.matmul %23, %25, %cst_18 {dimension_numbers = #tpu.dot_dimension_numbers<[1], [0], [0], [1], [0, 0, 1, 1], [], []>} : vector<288x384xbf16>, vector<384x128xbf16>, vector<288x128xf32> -> vector<288x128xf32>
    %c0_19 = arith.constant 0 : index
    %c0_20 = arith.constant 0 : index
    %27 = vector.load %arg7[%c0_19, %c0_20] : memref<288x128xf32, #tpu.memory_space<vmem>>, vector<288x128xf32>
    %28 = arith.addf %27, %26 : vector<288x128xf32>
    %c0_21 = arith.constant 0 : index
    %c0_22 = arith.constant 0 : index
    %29 = vector.load %arg7[%c0_21, %c0_22] : memref<288x128xf32, #tpu.memory_space<vmem>>, vector<288x128xf32>
    tpu.vector_store %arg7[%c0_21, %c0_22], %28 {strides = array<i32>} : memref<288x128xf32, #tpu.memory_space<vmem>>, vector<288x128xf32>,
    %c0_23 = arith.constant 0 : index
    %c0_24 = arith.constant 0 : index
    %30 = vector.load %arg7[%c0_23, %c0_24] : memref<288x128xf32, #tpu.memory_space<vmem>>, vector<288x128xf32>
    %c0_25 = arith.constant 0 : index
    %c0_26 = arith.constant 0 : index
    %31 = vector.load %arg5[%c0_25, %c0_26] : memref<4x128xf32, #tpu.memory_space<vmem>>, vector<1x128xf32>
    %32 = vector.broadcast %31 : vector<1x128xf32> to vector<288x128xf32>
    %33 = arith.mulf %30, %32 : vector<288x128xf32>
    %c1_27 = arith.constant 1 : index
    %c0_28 = arith.constant 0 : index
    %34 = vector.load %arg5[%c1_27, %c0_28] : memref<4x128xf32, #tpu.memory_space<vmem>>, vector<1x128xf32>
    %35 = vector.broadcast %34 : vector<1x128xf32> to vector<288x128xf32>
    %36 = arith.addf %33, %35 : vector<288x128xf32>
    %cst_29 = arith.constant 0.000000e+00 : f32
    %37 = vector.broadcast %cst_29 : f32 to vector<288x128xf32>
    %38 = arith.maximumf %36, %37 : vector<288x128xf32>
    %39 = vector.shape_cast %38 : vector<288x128xf32> to vector<18x16x128xf32>
    %40 = arith.truncf %39 : vector<18x16x128xf32> to vector<18x16x128xbf16>
    %c0_30 = arith.constant 0 : index
    %c0_31 = arith.constant 0 : index
    %c0_32 = arith.constant 0 : index
    %41 = vector.load %arg8[%c0_30, %c0_31, %c0_32] : memref<18x16x128xbf16, #tpu.memory_space<vmem>>, vector<18x16x128xbf16>
    tpu.vector_store %arg8[%c0_30, %c0_31, %c0_32], %40 {strides = array<i32>} : memref<18x16x128xbf16, #tpu.memory_space<vmem>>, vector<18x16x128xbf16>,
    %c0_i32 = arith.constant 0 : i32
    %42 = arith.cmpi eq, %arg1, %c0_i32 : i32
    %43 = arith.extui %42 : i1 to i32
    %c0_i32_33 = arith.constant 0 : i32
    %44 = arith.cmpi ne, %43, %c0_i32_33 : i32
    scf.if %44 {
      %cst_72 = arith.constant 0.000000e+00 : bf16
      %91 = vector.broadcast %cst_72 : bf16 to vector<1x16x128xbf16>
      %c0_73 = arith.constant 0 : index
      %c0_74 = arith.constant 0 : index
      %c0_75 = arith.constant 0 : index
      %92 = vector.load %arg8[%c0_73, %c0_74, %c0_75] : memref<18x16x128xbf16, #tpu.memory_space<vmem>>, vector<1x16x128xbf16>
      tpu.vector_store %arg8[%c0_73, %c0_74, %c0_75], %91 {strides = array<i32>} : memref<18x16x128xbf16, #tpu.memory_space<vmem>>, vector<1x16x128xbf16>,
    } else {
    }
    %c0_i32_34 = arith.constant 0 : i32
    %45 = arith.cmpi eq, %arg1, %c0_i32_34 : i32
    %46 = arith.extui %45 : i1 to i32
    %c0_i32_35 = arith.constant 0 : i32
    %47 = arith.cmpi ne, %46, %c0_i32_35 : i32
    scf.if %47 {
      %cst_72 = arith.constant 0.000000e+00 : bf16
      %91 = vector.broadcast %cst_72 : bf16 to vector<1x16x128xbf16>
      %c17 = arith.constant 17 : index
      %c0_73 = arith.constant 0 : index
      %c0_74 = arith.constant 0 : index
      %92 = vector.load %arg8[%c17, %c0_73, %c0_74] : memref<18x16x128xbf16, #tpu.memory_space<vmem>>, vector<1x16x128xbf16>
      tpu.vector_store %arg8[%c17, %c0_73, %c0_74], %91 {strides = array<i32>} : memref<18x16x128xbf16, #tpu.memory_space<vmem>>, vector<1x16x128xbf16>,
    } else {
    }
    %c0_36 = arith.constant 0 : index
    %c0_37 = arith.constant 0 : index
    %c0_38 = arith.constant 0 : index
    %48 = vector.load %arg8[%c0_36, %c0_37, %c0_38] : memref<18x16x128xbf16, #tpu.memory_space<vmem>>, vector<18x16x128xbf16>
    %cst_39 = arith.constant 0.000000e+00 : bf16
    %49 = vector.broadcast %cst_39 : bf16 to vector<18x1x128xbf16>
    %50 = vector.extract_strided_slice %48 {offsets = [0, 0, 0], sizes = [18, 15, 128], strides = [1, 1, 1]} : vector<18x16x128xbf16> to vector<18x15x128xbf16>
    %51 = tpu.concatenate %49, %50 in 1 : vector<18x1x128xbf16>, vector<18x15x128xbf16> -> vector<18x16x128xbf16>
    %52 = vector.extract_strided_slice %48 {offsets = [0, 1, 0], sizes = [18, 15, 128], strides = [1, 1, 1]} : vector<18x16x128xbf16> to vector<18x15x128xbf16>
    %53 = tpu.concatenate %52, %49 in 1 : vector<18x15x128xbf16>, vector<18x1x128xbf16> -> vector<18x16x128xbf16>
    %54 = tpu.concatenate %51, %48, %53 in 2 : vector<18x16x128xbf16>, vector<18x16x128xbf16>, vector<18x16x128xbf16> -> vector<18x16x384xbf16>
    %55 = vector.extract_strided_slice %54 {offsets = [0, 0, 0], sizes = [16, 16, 384], strides = [1, 1, 1]} : vector<18x16x384xbf16> to vector<16x16x384xbf16>
    %56 = vector.shape_cast %55 : vector<16x16x384xbf16> to vector<256x384xbf16>
    %c0_40 = arith.constant 0 : index
    %c0_41 = arith.constant 0 : index
    %c0_42 = arith.constant 0 : index
    %57 = vector.load %arg4[%c0_40, %c0_41, %c0_42] : memref<3x384x128xbf16, #tpu.memory_space<vmem>>, vector<1x384x128xbf16>
    %58 = vector.shape_cast %57 : vector<1x384x128xbf16> to vector<384x128xbf16>
    %cst_43 = arith.constant dense<0.000000e+00> : vector<256x128xf32>
    %59 = tpu.matmul %56, %58, %cst_43 {dimension_numbers = #tpu.dot_dimension_numbers<[1], [0], [0], [1], [0, 0, 1, 1], [], []>} : vector<256x384xbf16>, vector<384x128xbf16>, vector<256x128xf32> -> vector<256x128xf32>
    %c0_44 = arith.constant 0 : index
    %c0_45 = arith.constant 0 : index
    %60 = vector.load %arg7[%c0_44, %c0_45] : memref<288x128xf32, #tpu.memory_space<vmem>>, vector<256x128xf32>
    tpu.vector_store %arg7[%c0_44, %c0_45], %59 {strides = array<i32>} : memref<288x128xf32, #tpu.memory_space<vmem>>, vector<256x128xf32>,
    %61 = vector.extract_strided_slice %54 {offsets = [1, 0, 0], sizes = [16, 16, 384], strides = [1, 1, 1]} : vector<18x16x384xbf16> to vector<16x16x384xbf16>
    %62 = vector.shape_cast %61 : vector<16x16x384xbf16> to vector<256x384xbf16>
    %c1_46 = arith.constant 1 : index
    %c0_47 = arith.constant 0 : index
    %c0_48 = arith.constant 0 : index
    %63 = vector.load %arg4[%c1_46, %c0_47, %c0_48] : memref<3x384x128xbf16, #tpu.memory_space<vmem>>, vector<1x384x128xbf16>
    %64 = vector.shape_cast %63 : vector<1x384x128xbf16> to vector<384x128xbf16>
    %cst_49 = arith.constant dense<0.000000e+00> : vector<256x128xf32>
    %65 = tpu.matmul %62, %64, %cst_49 {dimension_numbers = #tpu.dot_dimension_numbers<[1], [0], [0], [1], [0, 0, 1, 1], [], []>} : vector<256x384xbf16>, vector<384x128xbf16>, vector<256x128xf32> -> vector<256x128xf32>
    %c0_50 = arith.constant 0 : index
    %c0_51 = arith.constant 0 : index
    %66 = vector.load %arg7[%c0_50, %c0_51] : memref<288x128xf32, #tpu.memory_space<vmem>>, vector<256x128xf32>
    %67 = arith.addf %66, %65 : vector<256x128xf32>
    %c0_52 = arith.constant 0 : index
    %c0_53 = arith.constant 0 : index
    %68 = vector.load %arg7[%c0_52, %c0_53] : memref<288x128xf32, #tpu.memory_space<vmem>>, vector<256x128xf32>
    tpu.vector_store %arg7[%c0_52, %c0_53], %67 {strides = array<i32>} : memref<288x128xf32, #tpu.memory_space<vmem>>, vector<256x128xf32>,
    %69 = vector.extract_strided_slice %54 {offsets = [2, 0, 0], sizes = [16, 16, 384], strides = [1, 1, 1]} : vector<18x16x384xbf16> to vector<16x16x384xbf16>
    %70 = vector.shape_cast %69 : vector<16x16x384xbf16> to vector<256x384xbf16>
    %c2_54 = arith.constant 2 : index
    %c0_55 = arith.constant 0 : index
    %c0_56 = arith.constant 0 : index
    %71 = vector.load %arg4[%c2_54, %c0_55, %c0_56] : memref<3x384x128xbf16, #tpu.memory_space<vmem>>, vector<1x384x128xbf16>
    %72 = vector.shape_cast %71 : vector<1x384x128xbf16> to vector<384x128xbf16>
    %cst_57 = arith.constant dense<0.000000e+00> : vector<256x128xf32>
    %73 = tpu.matmul %70, %72, %cst_57 {dimension_numbers = #tpu.dot_dimension_numbers<[1], [0], [0], [1], [0, 0, 1, 1], [], []>} : vector<256x384xbf16>, vector<384x128xbf16>, vector<256x128xf32> -> vector<256x128xf32>
    %c0_58 = arith.constant 0 : index
    %c0_59 = arith.constant 0 : index
    %74 = vector.load %arg7[%c0_58, %c0_59] : memref<288x128xf32, #tpu.memory_space<vmem>>, vector<256x128xf32>
    %75 = arith.addf %74, %73 : vector<256x128xf32>
    %c0_60 = arith.constant 0 : index
    %c0_61 = arith.constant 0 : index
    %76 = vector.load %arg7[%c0_60, %c0_61] : memref<288x128xf32, #tpu.memory_space<vmem>>, vector<256x128xf32>
    tpu.vector_store %arg7[%c0_60, %c0_61], %75 {strides = array<i32>} : memref<288x128xf32, #tpu.memory_space<vmem>>, vector<256x128xf32>,
    %c0_62 = arith.constant 0 : index
    %c0_63 = arith.constant 0 : index
    %77 = vector.load %arg7[%c0_62, %c0_63] : memref<288x128xf32, #tpu.memory_space<vmem>>, vector<256x128xf32>
    %c2_64 = arith.constant 2 : index
    %c0_65 = arith.constant 0 : index
    %78 = vector.load %arg5[%c2_64, %c0_65] : memref<4x128xf32, #tpu.memory_space<vmem>>, vector<1x128xf32>
    %79 = vector.broadcast %78 : vector<1x128xf32> to vector<256x128xf32>
    %80 = arith.mulf %77, %79 : vector<256x128xf32>
    %c3 = arith.constant 3 : index
    %c0_66 = arith.constant 0 : index
    %81 = vector.load %arg5[%c3, %c0_66] : memref<4x128xf32, #tpu.memory_space<vmem>>, vector<1x128xf32>
    %82 = vector.broadcast %81 : vector<1x128xf32> to vector<256x128xf32>
    %83 = arith.addf %80, %82 : vector<256x128xf32>
    %cst_67 = arith.constant 0.000000e+00 : f32
    %84 = vector.broadcast %cst_67 : f32 to vector<256x128xf32>
    %85 = arith.maximumf %83, %84 : vector<256x128xf32>
    %86 = vector.shape_cast %85 : vector<256x128xf32> to vector<16x16x128xf32>
    %87 = arith.truncf %86 : vector<16x16x128xf32> to vector<16x16x128xbf16>
    %c0_68 = arith.constant 0 : index
    %c0_69 = arith.constant 0 : index
    %c0_70 = arith.constant 0 : index
    %c0_71 = arith.constant 0 : index
    %88 = vector.load %arg6[%c0_68, %c0_69, %c0_70, %c0_71] : memref<1x16x16x128xbf16, #tpu.memory_space<vmem>>, vector<1x16x16x128xbf16>
    %89 = vector.shape_cast %88 : vector<1x16x16x128xbf16> to vector<16x16x128xbf16>
    %90 = vector.shape_cast %87 : vector<16x16x128xbf16> to vector<1x16x16x128xbf16>
    tpu.vector_store %arg6[%c0_68, %c0_69, %c0_70, %c0_71], %90 {strides = array<i32>} : memref<1x16x16x128xbf16, #tpu.memory_space<vmem>>, vector<1x16x16x128xbf16>,
    return
  }
  func.func @transform_0(%arg0: i32, %arg1: i32) -> (i32, i32, i32, i32) {
    %c1_i32 = arith.constant 1 : i32
    %0 = arith.muli %arg0, %c1_i32 : i32
    %1 = arith.addi %0, %arg1 : i32
    %c0_i32 = arith.constant 0 : i32
    %c0_i32_0 = arith.constant 0 : i32
    %c0_i32_1 = arith.constant 0 : i32
    %c0_i32_2 = arith.constant 0 : i32
    return %1, %c0_i32, %c0_i32_0, %c0_i32_1 : i32, i32, i32, i32
  }
  func.func @transform_1(%arg0: i32, %arg1: i32) -> (i32, i32, i32) {
    %c0_i32 = arith.constant 0 : i32
    %c0_i32_0 = arith.constant 0 : i32
    %c0_i32_1 = arith.constant 0 : i32
    %c0_i32_2 = arith.constant 0 : i32
    return %c0_i32, %c0_i32_0, %c0_i32_1 : i32, i32, i32
  }
  func.func @transform_2(%arg0: i32, %arg1: i32) -> (i32, i32, i32) {
    %c0_i32 = arith.constant 0 : i32
    %c0_i32_0 = arith.constant 0 : i32
    %c0_i32_1 = arith.constant 0 : i32
    %c0_i32_2 = arith.constant 0 : i32
    return %c0_i32, %c0_i32_0, %c0_i32_1 : i32, i32, i32
  }
  func.func @transform_3(%arg0: i32, %arg1: i32) -> (i32, i32) {
    %c0_i32 = arith.constant 0 : i32
    %c0_i32_0 = arith.constant 0 : i32
    %c0_i32_1 = arith.constant 0 : i32
    return %c0_i32, %c0_i32_0 : i32, i32
  }
  func.func @transform_4(%arg0: i32, %arg1: i32) -> (i32, i32, i32, i32) {
    %c0_i32 = arith.constant 0 : i32
    %c0_i32_0 = arith.constant 0 : i32
    %c0_i32_1 = arith.constant 0 : i32
    return %arg0, %arg1, %c0_i32, %c0_i32_0 : i32, i32, i32, i32
  }
}

</mosaic_0001>

<bundles_post_ra>
// kernel: tpu_custom_call.1
= control target key start
LH: loop header
LB: loop body
LE: loop exit
PB: predicated region body
PF: predicated region fallthrough
CT: control target
= control target key end

     0   :  { %9 = vsyncpa [#allocation5], 0  ;;  %s9301_s0 = inlined_call_operand.hbm [shape: bf16[2,20,16,128], index: 0, kind: input, shape index: {}]   ;;  %s9302_s1 = inlined_call_operand.hbm [shape: bf16[3,384,128], index: 1, kind: input, shape index: {}]   ;;  %s9303_s2 = inlined_call_operand.hbm [shape: bf16[3,384,128], index: 2, kind: input, shape index: {}]   ;;  %s9304_s3 = inlined_call_operand.vmem [shape: f32[4,128], index: 3, kind: input, shape index: {}]   ;;  %s9305_s4 = inlined_call_operand.hbm [shape: bf16[2,16,16,128], index: 4, kind: output, shape index: {}]  }
   0x1   :  { %11 = vsyncpa [#allocation5 + $0x1], 0 }
   0x2   :  { %12 = vsyncpa [#allocation8], 0 }
   0x3   :  { %13 = vsyncpa [#allocation6], 0 }
   0x4   :  { %15 = vsyncpa [#allocation6 + $0x1], 0  ;;  %s7025_s15 = smov 0   ;;  %s7027_s16 = smov 0  }
   0x5   :  { %s7029_s17 = smov 0   ;;  %s7031_s18 = smov 0  }
   0x6   :  { %s7033_s19 = smov 0   ;;  %s7035_s20 = smov 0  }
   0x7 LB: > { %s5219_s21 = sadd.s32 4294967295, %s6989_s20   ;;  %s5220_s22 = sadd.s32 4294967294, %s6989_s20   ;;  %s6989_s20 = sphi %s7035_s20, %s21_s20   ;;  %s6985_s19 = sphi %s7033_s19, %s9563_s19   ;;  %s6981_s18 = sphi %s7031_s18, %s9562_s18   ;;  %s6977_s17 = sphi %s7029_s17, %s9561_s17   ;;  %s6973_s16 = sphi %s7027_s16, %s9560_s16   ;;  %s6969_s15 = sphi %s7025_s15, %s9559_s15  }
   0x8   : > { %p55_p0 = scmp.ne.s32.totalorder %s6973_s16, %s6969_s15  ;;  %p7059_p1 = scmp.eq.s32.totalorder %s5219_s21, 0 }
   0x9   : > { %p7063_p2 = scmp.eq.s32.totalorder %s5219_s21, 1  ;;  %p150_p3 = scmp.eq.s32.totalorder %s5220_s22, 1 }
   0xa   : > { %s9366_s23 = scalar_select %p7059_p1, 1, 0 }
   0xb   : > { %p7069_p4 = por %p7059_p1, %p55_p0  ;;  %p5221_p5 = scmp.ge.s32.totalorder %s6989_s20, 1 }
   0xc   : > { %p7074_p6 = por %p150_p3, %p55_p0  ;;  %p157_p7 = scmp.lt.s32.totalorder %s6989_s20, 3 }
   0xd   : > { %s9368_s25 = scalar_select %p7069_p4, 1, 0 }
   0xe   : > { %s9369_s26 = scalar_select %p7074_p6, 1, 0 }
   0xf   : > { %p7079_p8 = pnand %p5221_p5, %p157_p7  ;;  %s6991_s28 = smov [#allocation7]  }
  0x10   : > { %s169_s29 = sshll.u32 %s6991_s28, 4  ;;  %s6992_s5 = smov [#allocation9]   ;;  %s7083_s29 = int_to_ptr.vmem [resolvable:$true] %s169_s29 }
  0x11   : > { %p6560_p9 = pneg %p7079_p8  ;;  %s182_s6 = sshll.u32 %s6992_s5, 4  ;;  %s7094_s6 = int_to_ptr.vmem [resolvable:$true] %s182_s6 }
  0x12   : > { %s6817_s9 = scalar_lea.hbm %s9302_s1, 9216 }
  0x13   : > { %p7090_p11 = pnand %p6560_p9, %p7059_p1  ;;  %p6818_p12 = scmp.ne.s32.totalorder %s9302_s1, %s6817_s9 }
  0x14   : > { %p6824_p5 = scmp.lt.u32.totalorder %s6817_s9, %s9302_s1 }
  0x15   : > { %p6819_p13 = pneg %p7090_p11 }
  0x17   : > { %p6820_p0 = pnand %p6819_p13, %p6818_p12 }
  0x19   : > { %p6821_p3 = pneg %p6820_p0 }
  0x1b   : > { %p6826_p7 = pnand %p6824_p5, %p6821_p3 }
  0x1d   : > { %6829 = shalt.err (!%p6826_p7)
}
  0x1e   : > { %s6830_s14 = scalar_lea.vmem %s7083_s29, 9216  ;;  %p6838_p1 = scmp.lt.s32.totalorder %s7083_s29, %s7083_s29 }
  0x1f   : > { %p6831_p9 = scmp.ne.s32.totalorder %s7083_s29, %s6830_s14  ;;  %p6839_p12 = scmp.lt.s32.totalorder %s6830_s14, %s6830_s14 }
  0x21   : > { %p6833_p10 = pnand %p6831_p9, %p6819_p13  ;;  %p6840_p0 = por %p6839_p12, %p6838_p1 }
  0x23   : > { %p6834_p6 = pneg %p6833_p10 }
  0x25   : > { %p6841_p4 = pnand %p6840_p0, %p6834_p6 }
  0x27   : > { %6844 = shalt.err (!%p6841_p4)
}
  0x28   : > { %s9309_s21 = smov 64   ;;  %s6994_s22 = smov 4  }
  0x29   : > { %6563 = dma.hbm_to_vmem [thread:$0]  (!%p7090_p11), %s9302_s1, 9216, %s7083_s29, [#allocation8], %s9309_s21, %s9309_s21, %s6994_s22  }
  0x2a   : > { %s6845_s9 = scalar_lea.hbm %s9303_s2, 9216 }
  0x2b   : > { %p6846_p1 = scmp.ne.s32.totalorder %s9303_s2, %s6845_s9  ;;  %p6852_p10 = scmp.lt.u32.totalorder %s6845_s9, %s9303_s2 }
  0x2d   : > { %p6848_p4 = pnand %p6846_p1, %p6819_p13 }
  0x2f   : > { %p6849_p6 = pneg %p6848_p4 }
  0x31   : > { %p6854_p3 = pnand %p6852_p10, %p6849_p6 }
  0x33   : > { %6857 = shalt.err (!%p6854_p3)
}
  0x34   : > { %s6858_s29 = scalar_lea.vmem %s7094_s6, 9216  ;;  %p6866_p12 = scmp.lt.s32.totalorder %s7094_s6, %s7094_s6 }
  0x35   : > { %p6859_p5 = scmp.ne.s32.totalorder %s7094_s6, %s6858_s29  ;;  %p6867_p0 = scmp.lt.s32.totalorder %s6858_s29, %s6858_s29 }
  0x37   : > { %p6861_p7 = pnand %p6859_p5, %p6819_p13  ;;  %p6868_p1 = por %p6867_p0, %p6866_p12 }
  0x39   : > { %p6862_p9 = pneg %p6861_p7 }
  0x3b   : > { %p6869_p4 = pnand %p6868_p1, %p6862_p9 }
  0x3d   : > { %6872 = shalt.err (!%p6869_p4)
}
  0x3e   : > { %6566 = dma.hbm_to_vmem [thread:$0]  (!%p7090_p11), %s9303_s2, 9216, %s7094_s6, [#allocation8], %s9309_s21, %s9309_s21, %s6994_s22  }
  0x3f   : > { %s33_s30 = sadd.s32 1, %s6985_s19  ;;  %s42_s5 = sadd.s32 1, %s6977_s17 }
  0x40   : > { %p35_p13 = scmp.ge.s32.totalorder %s33_s30, 2  ;;  %p49_p6 = scmp.ne.s32.totalorder %s6977_s17, %s6973_s16 }
  0x41   : > { %p50_p10 = scmp.eq.s32.totalorder %s6989_s20, 0  ;;  %p6577_p3 = scmp.lt.s32.totalorder %s6989_s20, 2 }
  0x42   : > { %s9565_s30 = smov (%p35_p13, %s33_s30), 0  ;;  %p7164_p7 = por %p7063_p2, %p49_p6 }
  0x43   : > { %p51_p5 = por %p50_p10, %p49_p6  ;;  %s39_s8 = ssub.s32 %s6985_s19, %s9565_s30 }
  0x44   : > { %s9372_s7 = scalar_select %p7164_p7, 1, 0 }
  0x45   : > { %s199_s9 = sand.u32 1, %s6977_s17   ;;  %p40_p9 = scmp.eq.s32.totalorder %s39_s8, 0 }
  0x46   : > { %s6545_s6 = smul.u32 160, %s199_s9  ;;  %p7171_p11 = pnand %p6577_p3, %p51_p5 }
  0x47   : > { %s7176_s11 = scalar_select %p40_p9, %s6977_s17, %s42_s5  }
  0x48   : > { %s6546_s12 = smul.u32 2560, %s6985_s19  ;;  %s203_s13 = scalar_lea.vmem [#allocation4], %s6545_s6 }
  0x49   : > { %s211_s29 = sshll.u32 %s203_s13, 4  ;;  %s7186_s8 = scalar_lea.sflag [#allocation5], %s199_s9  ;;  %s7184_s29 = int_to_ptr.vmem [resolvable:$true] %s211_s29 }
  0x4a   : > { %s7182_s28 = scalar_lea.hbm %s9301_s0, %s6546_s12  ;;  %p6875_p12 = pneg %p7171_p11 }
  0x4b   : > { %s6873_s21 = scalar_lea.hbm %s7182_s28, 2560  ;;  %s6878_s12 = scalar_lea.hbm %s9301_s0, 5120 }
  0x4c   : > { %p6874_p2 = scmp.ne.s32.totalorder %s7182_s28, %s6873_s21  ;;  %p6879_p4 = scmp.lt.u32.totalorder %s7182_s28, %s9301_s0 }
  0x4d   : > { %p6880_p13 = scmp.lt.u32.totalorder %s6878_s12, %s6873_s21  ;;  %p6882_p10 = scmp.lt.u32.totalorder %s6873_s21, %s7182_s28 }
  0x4e   : > { %p6876_p0 = pnand %p6875_p12, %p6874_p2 }
  0x4f   : > { %p6881_p6 = por %p6880_p13, %p6879_p4 }
  0x50   : > { %p6877_p1 = pneg %p6876_p0 }
  0x51   : > { %p6883_p3 = por %p6882_p10, %p6881_p6 }
  0x53   : > { %p6884_p5 = pnand %p6883_p3, %p6877_p1 }
  0x55   : > { %6887 = shalt.err (!%p6884_p5)
}
  0x56   : > { %s6888_s9 = scalar_lea.vmem %s7184_s29, 2560  ;;  %s6995_s14 = smov [#allocation4]  }
  0x57   : > { %p6889_p9 = scmp.ne.s32.totalorder %s7184_s29, %s6888_s9  ;;  %s6893_s5 = sshll.u32 %s6995_s14, 4  ;;  %s6894_s5 = int_to_ptr.vmem [resolvable:$false] %s6893_s5 }
  0x58   : > { %s6895_s6 = scalar_lea.vmem %s6894_s5, 5120  ;;  %p6896_p7 = scmp.lt.s32.totalorder %s7184_s29, %s6894_s5 }
  0x59   : > { %p6891_p2 = pnand %p6889_p9, %p6875_p12  ;;  %p6897_p4 = scmp.lt.s32.totalorder %s6895_s6, %s6888_s9 }
  0x5b   : > { %p6892_p0 = pneg %p6891_p2  ;;  %p6898_p13 = por %p6897_p4, %p6896_p7 }
  0x5d   : > { %p6899_p6 = pnand %p6898_p13, %p6892_p0 }
  0x5f   : > { %6902 = shalt.err (!%p6899_p6)
}
  0x60   : > { %s9374_s21 = smov 64   ;;  %223 = sbr.rel (%p7079_p8) target bundleno = 1786 (0x6fa), region = 36 }
  0x61   : > { %6570 = dma.hbm_to_vmem [thread:$0]  (!%p7171_p11), %s7182_s28, 2560, %s7184_s29, %s7186_s8, %s9374_s21, %s9374_s21, %s6994_s22  }
  0x67   : > { %s7220_s12 = sand.u32 1, %s6973_s16   ;;  %p9375_p7 = scmp.ne.s32.totalorder %s9368_s25, 0 }
  0x68   : > { %s6547_s13 = smul.u32 160, %s7220_s12  ;;  %s226_s24 = scalar_lea.sflag [#allocation5], %s7220_s12 }
  0x6a   : > { %s7224_s9 = scalar_lea.vmem [#allocation4], %s6547_s13 }
  0x6b   : > { %6956 = dma.done.wait (%p9375_p7), %s226_s24, 2560  }
  0x6c   : > { %6958 = vsyncadd (%p9375_p7), %s226_s24, 4294964736  ;;  %p9376_p11 = scmp.ne.s32.totalorder %s9366_s23, 0 }
  0x6e   : > { %6960 = dma.done.wait (%p9376_p11), [#allocation8], 18432  }
  0x6f   : > { %6962 = vsyncadd (%p9376_p11), [#allocation8], 4294948864  ;;  %v9319_v0 = vmov 0   ;;  %v6636_v1 = vld [vmem:[#allocation7] sm:$0xff]   ;;  %v6637_v2 = vld [vmem:[#allocation7 + $0x8] sm:$0xff]   ;;  %vm565_vm1 = vcmask 1040384  }
  0x70   : > { %883 = vmatprep.subr.bf16.mxu0 %v9319_v0  ;;  %v6638_v3 = vld [vmem:[#allocation7 + $0x10] sm:$0xff]   ;;  %v6639_v4 = vld [vmem:[#allocation7 + $0x18] sm:$0xff]   ;;  %v6640_v5 = vld [vmem:[#allocation7 + $0x20] sm:$0xff]   ;;  %vm566_vm0 = vsmask.f32 256  ;;  %v9377_v16 = vmov 0 }
  0x71   : > { %884 = vmatpush1.bf16.msra.mxu0 %v6636_v1  ;;  %v7240_v6 = vld [vmem:[%s7224_s9] sm:$0xff]   ;;  %v6641_v7 = vld [vmem:[#allocation7 + $0x28] sm:$0xff]   ;;  %v6642_v8 = vld [vmem:[#allocation7 + $0x30] sm:$0xff]   ;;  %vm648_vm3 = vcmask 1047552   ;;  %vm649_vm4 = vsmask.f32 7424 }
  0x72   : > { %885 = vmatprep.subr.bf16.mxu0 %v9319_v0  ;;  %915 = vmatprep.mubr.bf16.mxu0 %v7240_v6  ;;  %v6643_v9 = vld [vmem:[#allocation7 + $0x38] sm:$0xff]   ;;  %v6644_v10 = vld [vmem:[#allocation7 + $0x40] sm:$0xff]   ;;  %v6645_v11 = vld [vmem:[#allocation7 + $0x48] sm:$0xff]   ;;  %v406_v15 = vshrl.u32 %v7240_v6, 16  ;;  %v409_v18 = vshll.u32 %v7240_v6, 16  ;;  %s5229_s14 = sshll.u32 %s7220_s12, 7 }
  0x73   : > { %v6646_v12 = vld [vmem:[#allocation7 + $0x50] sm:$0xff]   ;;  %v6647_v13 = vld [vmem:[#allocation7 + $0x58] sm:$0xff]   ;;  %v6648_v14 = vld [vmem:[#allocation7 + $0x60] sm:$0xff]   ;;  %s9149_s5 = scalar_lea.vmem [#allocation10], %s5229_s14  ;;  %s5467_s6 = sshll.u32 %s6981_s18, 11 }
  0x74   : > { %vm7252_vm2 = vmand %vm565_vm1, %vm566_vm0  ;;  %v6649_v17 = vld [vmem:[#allocation7 + $0x68] sm:$0xff]   ;;  %v6650_v19 = vld [vmem:[#allocation7 + $0x70] sm:$0xff]   ;;  %v408_v20 = vrot.slane %v406_v15, 7  ;;  %v588_v43 = vrot.slane %v409_v18, 1  ;;  %s5115_s21 = sshll.u32 %s9149_s5, 4  ;;  %s5099_s18 = scalar_lea.sflag [#allocation6], %s7220_s12  ;;  %s9250_s21 = int_to_ptr.vmem [resolvable:$true] %s5115_s21 }
  0x75   : > { %886 = vmatpush1.bf16.msra.mxu0 %v6637_v2  ;;  %v9378_v16 = vsel %vm7252_vm2, 4294967295, %v9377_v16  ;;  %v6654_v21 = vld [vmem:[%s7224_s9 + $0x8] sm:$0xff]   ;;  %v6651_v22 = vld [vmem:[#allocation7 + $0x78] sm:$0xff]   ;;  %v6653_v25 = vld [vmem:[#allocation7 + $0x80] sm:$0xff]   ;;  %s6903_s23 = scalar_lea.vmem %s9250_s21, 2048  ;;  %p9556_p12 = scmp.ne.s32.totalorder %s9372_s7, 0 }
  0x76   : > { %887 = vmatprep.subr.bf16.mxu0 %v9319_v0  ;;  %9379 = vst [vmem:[#allocation14_spill] sm:$0xff] %v9378_v16  ;;  %v411_v23 = vor.u32 %v409_v18, %v408_v20  ;;  %v413_v24 = vshrl.u32 %v6654_v21, 16  ;;  %v416_v26 = vshll.u32 %v6654_v21, 16  ;;  %v6655_v27 = vld [vmem:[%s7224_s9 + $0x10] sm:$0xff]   ;;  %v6656_v30 = vld [vmem:[#allocation7 + $0x88] sm:$0xff]   ;;  %v7265_v35 = vld [vmem:[%s7224_s9 + $0x18] sm:$0xff]   ;;  %v7279_v47 = vor.u32 %v588_v43, %v406_v15  ;;  %p6904_p8 = scmp.ne.s32.totalorder %s9250_s21, %s6903_s23 }
  0x77   : > { %v420_v32 = vshrl.u32 %v6655_v27, 16  ;;  %v423_v33 = vshll.u32 %v6655_v27, 16  ;;  %v6659_v36 = vld [vmem:[#allocation7 + $0x90] sm:$0xff]   ;;  %v6662_v39 = vld [vmem:[#allocation7 + $0x98] sm:$0xff]   ;;  %v427_v40 = vshrl.u32 %v7265_v35, 16  ;;  %v7273_v41 = vld [vmem:[%s7224_s9 + $0x20] sm:$0xff]  }
  0x78   : > { %v568_v28 = vsel %vm7252_vm2, 0, %v411_v23  ;;  %v415_v29 = vrot.slane %v413_v24, 7  ;;  %v590_v34 = vrot.slane %v416_v26, 1  ;;  %v430_v44 = vshll.u32 %v7265_v35, 16  ;;  %v6666_v45 = vld [vmem:[#allocation7 + $0xa0] sm:$0xff]   ;;  %v6669_v51 = vld [vmem:[#allocation7 + $0xa8] sm:$0xff]   ;;  %vm7346_vm5 = vmand %vm648_vm3, %vm649_vm4  ;;  %p6905_p1 = pnand %p6904_p8, %p9556_p12 }
  0x79   : > { %888 = vmatpush1.bf16.msra.mxu0 %v6638_v3  ;;  %v422_v38 = vrot.slane %v420_v32, 7  ;;  %v429_v48 = vrot.slane %v427_v40, 7  ;;  %v434_v49 = vshrl.u32 %v7273_v41, 16  ;;  %v437_v54 = vshll.u32 %v7273_v41, 16  ;;  %v7291_v55 = vld [vmem:[%s7224_s9 + $0x28] sm:$0xff]   ;;  %v6672_v56 = vld [vmem:[#allocation7 + $0xb0] sm:$0xff]  }
  0x7a   : > { %889 = vmatprep.subr.bf16.mxu0 %v9319_v0  ;;  %v418_v31 = vor.u32 %v416_v26, %v415_v29  ;;  %v7277_v46 = vor.u32 %v590_v34, %v413_v24  ;;  %v592_v57 = vrot.slane %v423_v33, 1  ;;  %v594_v59 = vrot.slane %v430_v44, 1  ;;  %v7299_v60 = vld [vmem:[%s7224_s9 + $0x30] sm:$0xff]   ;;  %v6675_v1 = vld [vmem:[#allocation7 + $0xb8] sm:$0xff]   ;;  %v7364_v26 = vld [vmem:[%s7224_s9 + $0x48] sm:$0xff]   ;;  %p6906_p10 = pneg %p6905_p1  ;;  %s6997_s25 = smov [#allocation10]  }
  0x7b   : > { %v425_v42 = vor.u32 %v423_v33, %v422_v38  ;;  %v432_v52 = vor.u32 %v430_v44, %v429_v48  ;;  %v436_v53 = vrot.slane %v434_v49, 7  ;;  %v441_v63 = vshrl.u32 %v7291_v55, 16  ;;  %v7404_v48 = vld [vmem:[%s7224_s9 + $0x60] sm:$0xff]   ;;  %s6907_s27 = sshll.u32 %s6997_s25, 4  ;;  %s6908_s27 = int_to_ptr.vmem [resolvable:$false] %s6907_s27 }
  0x7c   : > { %v7269_v37 = vsel %vm7252_vm2, 0, %v418_v31  ;;  %v7301_v61 = vor.u32 %v592_v57, %v420_v32  ;;  %v7303_v62 = vor.u32 %v594_v59, %v427_v40  ;;  %v444_v3 = vshll.u32 %v7291_v55, 16  ;;  %v7375_v32 = vld [vmem:[%s7224_s9 + $0x50] sm:$0xff]   ;;  %v7390_v40 = vld [vmem:[%s7224_s9 + $0x58] sm:$0xff]   ;;  %s6909_s22 = scalar_lea.vmem %s6908_s27, 4096  ;;  %p6910_p3 = scmp.lt.s32.totalorder %s9250_s21, %s6908_s27 }
  0x7d   : > { %890 = vmatpush1.bf16.msra.mxu0 %v6639_v4  ;;  %v7284_v50 = vsel %vm7252_vm2, 0, %v425_v42  ;;  %v7296_v58 = vsel %vm7252_vm2, 0, %v432_v52  ;;  %v439_v2 = vor.u32 %v437_v54, %v436_v53  ;;  %v443_v4 = vrot.slane %v441_v63, 7  ;;  %p6911_p5 = scmp.lt.s32.totalorder %s6909_s22, %s6903_s23 }
  0x7e   : > { %891 = vmatprep.subr.bf16.mxu0 %v9319_v0  ;;  %9380 = vst [vmem:[#allocation15_spill] sm:$0xff] %v7296_v58  ;;  %v9383_v20 = vmov 0  ;;  %v472_v31 = vshll.u32 %v7364_v26, 16  ;;  %v476_v38 = vshrl.u32 %v7375_v32, 16 }
  0x7f   : > { %v7316_v6 = vsel %vm7252_vm2, 0, %v439_v2  ;;  %v9384_v20 = vsel %vm7346_vm5, 4294967295, %v9383_v20  ;;  %v493_v2 = vshll.u32 %v7404_v48, 16  ;;  %p6912_p9 = por %p6911_p5, %p6910_p3 }
  0x80   : > { %9381 = vst [vmem:[#allocation16_spill] sm:$0xff] %v7316_v6  ;;  %9385 = vst [vmem:[#allocation18_spill] sm:$0xff] %v9384_v20  ;;  %v478_v43 = vrot.slane %v476_v38, 7 }
  0x81   : > { %892 = vmatpush1.bf16.msra.mxu0 %v6640_v5  ;;  %v448_v5 = vshrl.u32 %v7299_v60, 16  ;;  %p6913_p2 = pnand %p6912_p9, %p6906_p10 }
  0x82   : > { %893 = vmatprep.subr.bf16.mxu0 %v9319_v0 }
  0x85   : > { %894 = vmatpush1.bf16.msra.mxu0 %v6641_v7  ;;  %v7319_v7 = vld [vmem:[%s7224_s9 + $0x38] sm:$0xff]  }
  0x86   : > { %895 = vmatprep.subr.bf16.mxu0 %v9319_v0 }
  0x89   : > { %896 = vmatpush1.bf16.msra.mxu0 %v6642_v8  ;;  %v446_v8 = vor.u32 %v444_v3, %v443_v4  ;;  %v7426_v4 = vld [vmem:[%s7224_s9 + $0x68] sm:$0xff]  }
  0x8a   : > { %897 = vmatprep.subr.bf16.mxu0 %v9319_v0 }
  0x8d   : > { %898 = vmatpush1.bf16.msra.mxu0 %v6643_v9  ;;  %v451_v9 = vshll.u32 %v7299_v60, 16 }
  0x8e   : > { %899 = vmatprep.subr.bf16.mxu0 %v9319_v0 }
  0x91   : > { %900 = vmatpush1.bf16.msra.mxu0 %v6644_v10  ;;  %v450_v10 = vrot.slane %v448_v5, 7 }
  0x92   : > { %901 = vmatprep.subr.bf16.mxu0 %v9319_v0 }
  0x93   : > { %v453_v18 = vor.u32 %v451_v9, %v450_v10  ;;  %v9315_v10 = vshrl.u32 %v7426_v4, 16 }
  0x95   : > { %902 = vmatpush1.bf16.msra.mxu0 %v6645_v11  ;;  %v455_v11 = vshrl.u32 %v7319_v7, 16  ;;  %v7352_v23 = vsel %vm7252_vm2, 0, %v453_v18  ;;  %v500_v18 = vshll.u32 %v7426_v4, 16 }
  0x96   : > { %903 = vmatprep.subr.bf16.mxu0 %v9319_v0  ;;  %9386 = vst [vmem:[#allocation19_spill] sm:$0xff] %v7352_v23 }
  0x97   : > { %v457_v15 = vrot.slane %v455_v11, 7 }
  0x99   : > { %904 = vmatpush1.bf16.msra.mxu0 %v6646_v12  ;;  %v7332_v12 = vsel %vm7252_vm2, 0, %v446_v8 }
  0x9a   : > { %905 = vmatprep.subr.bf16.mxu0 %v9319_v0  ;;  %9382 = vst [vmem:[#allocation17_spill] sm:$0xff] %v7332_v12 }
  0x9d   : > { %906 = vmatpush1.bf16.msra.mxu0 %v6647_v13  ;;  %v7335_v13 = vld [vmem:[%s7224_s9 + $0x40] sm:$0xff]  }
  0x9e   : > { %907 = vmatprep.subr.bf16.mxu0 %v9319_v0 }
  0xa1   : > { %908 = vmatpush1.bf16.msra.mxu0 %v6648_v14  ;;  %v465_v14 = vshll.u32 %v7335_v13, 16 }
  0xa2   : > { %909 = vmatprep.subr.bf16.mxu0 %v9319_v0 }
  0xa5   : > { %910 = vmatpush1.bf16.msra.mxu0 %v6649_v17  ;;  %v458_v17 = vshll.u32 %v7319_v7, 16 }
  0xa6   : > { %911 = vmatprep.subr.bf16.mxu0 %v9319_v0 }
  0xa9   : > { %912 = vmatpush1.bf16.msra.mxu0 %v6650_v19  ;;  %v462_v19 = vshrl.u32 %v7335_v13, 16 }
  0xaa   : > { %913 = vmatprep.subr.bf16.mxu0 %v9319_v0 }
  0xad   : > { %914 = vmatpush1.bf16.msra.mxu0 %v6651_v22 }
  0xae   : > { %6049 = vmatprep.subr.bf16.mxu0 %v6653_v25 }
  0xb0   : > { %916 = vmatmul.mubr.bf16.vlgmr.msra.gmra.mrb[0].mxu0 %v568_v28  ;;  %v464_v28 = vrot.slane %v462_v19, 7 }
  0xb1   : > { %6050 = vmatpush3.bf16.msra.mxu0 %v6653_v25  ;;  %923 = vmatprep.mubr.bf16.mxu0 %v6654_v21  ;;  %v604_v21 = vrot.slane %v465_v14, 1  ;;  %v460_v25 = vor.u32 %v458_v17, %v457_v15  ;;  %v499_v15 = vrot.slane %v9315_v10, 7 }
  0xb2   : > { %6051 = vmatprep.subr.bf16.mxu0 %v6656_v30  ;;  %v467_v29 = vor.u32 %v465_v14, %v464_v28 }
  0xb3   : > { %v605_v22 = vor.u32 %v604_v21, %v462_v19  ;;  %v7441_v19 = vld [vmem:[%s7224_s9 + $0x70] sm:$0xff]   ;;  %v502_v21 = vor.u32 %v500_v18, %v499_v15 }
  0xb4   : > { %v7379_v33 = vsel %vm7252_vm2, 0, %v467_v29  ;;  %v507_v29 = vshll.u32 %v7441_v19, 16 }
  0xb5   : > { %6052 = vmatpush3.bf16.msra.mxu0 %v6656_v30  ;;  %v7356_v24 = vsel %vm7346_vm5, %v605_v22, 0  ;;  %v469_v30 = vshrl.u32 %v7364_v26, 16  ;;  %9388 = vst [vmem:[#allocation21_spill] sm:$0xff] %v7379_v33  ;;  %v9314_v22 = vshrl.u32 %v7441_v19, 16 }
  0xb6   : > { %6053 = vmatprep.subr.bf16.mxu0 %v6659_v36  ;;  %6181 = vmatprep.mubr.bf16.mxu1 %v7356_v24 }
  0xb7   : > { %v471_v34 = vrot.slane %v469_v30, 7  ;;  %v506_v28 = vrot.slane %v9314_v22, 7 }
  0xb8   : > { %924 = vmatmul.mubr.bf16.gmra.mrb[4].mxu0 %v7269_v37 }
  0xb9   : > { %931 = vmatprep.mubr.bf16.mxu0 %v6655_v27  ;;  %6054 = vmatpush3.bf16.msra.mxu0 %v6659_v36  ;;  %v7368_v27 = vsel %vm7252_vm2, 0, %v460_v25  ;;  %v474_v36 = vor.u32 %v472_v31, %v471_v34  ;;  %v7450_v25 = vsel %vm7252_vm2, 0, %v502_v21  ;;  %v7456_v34 = vld [vmem:[%s7224_s9 + $0x78] sm:$0xff]  }
  0xba   : > { %6055 = vmatprep.subr.bf16.mxu0 %v6662_v39  ;;  %9387 = vst [vmem:[#allocation20_spill] sm:$0xff] %v7368_v27  ;;  %9393 = vst [vmem:[#allocation26_spill] sm:$0xff] %v7450_v25 }
  0xbb   : > { %v7394_v42 = vsel %vm7252_vm2, 0, %v474_v36  ;;  %v509_v36 = vor.u32 %v507_v29, %v506_v28 }
  0xbc   : > { %9389 = vst [vmem:[#allocation22_spill] sm:$0xff] %v7394_v42 }
  0xbd   : > { %6056 = vmatpush3.bf16.msra.mxu0 %v6662_v39  ;;  %v479_v39 = vshll.u32 %v7375_v32, 16 }
  0xbe   : > { %6057 = vmatprep.subr.bf16.mxu0 %v6666_v45 }
  0xbf   : > { %v481_v44 = vor.u32 %v479_v39, %v478_v43  ;;  %v9311_v43 = vshrl.u32 %v7456_v34, 16 }
  0xc0   : > { %932 = vmatmul.mubr.bf16.gmra.mrb[8].mxu0 %v7284_v50 }
  0xc1   : > { %939 = vmatprep.mubr.bf16.mxu0 %v7265_v35  ;;  %6058 = vmatpush3.bf16.msra.mxu0 %v6666_v45  ;;  %v483_v45 = vshrl.u32 %v7390_v40, 16  ;;  %v7409_v52 = vsel %vm7252_vm2, 0, %v481_v44  ;;  %v7465_v44 = vsel %vm7252_vm2, 0, %v509_v36 }
  0xc2   : > { %6059 = vmatprep.subr.bf16.mxu0 %v6669_v51  ;;  %9390 = vst [vmem:[#allocation23_spill] sm:$0xff] %v7409_v52  ;;  %9394 = vst [vmem:[#allocation27_spill] sm:$0xff] %v7465_v44 }
  0xc3   : > { %v485_v53 = vrot.slane %v483_v45, 7 }
  0xc5   : > { %6060 = vmatpush3.bf16.msra.mxu0 %v6669_v51  ;;  %v486_v51 = vshll.u32 %v7390_v40, 16 }
  0xc6   : > { %6061 = vmatprep.subr.bf16.mxu0 %v6672_v56 }
  0xc7   : > { %v488_v57 = vor.u32 %v486_v51, %v485_v53  ;;  %v513_v53 = vrot.slane %v9311_v43, 7  ;;  %v7486_v43 = vld [vmem:[%s7224_s9 + $0x88] sm:$0xff]  }
  0xc8   : > { %940 = vmatmul.mubr.bf16.gmra.mrb[12].mxu0 %v7296_v58  ;;  %v9318_v22 = vshll.u32 %v7486_v43, 16 }
  0xc9   : > { %947 = vmatprep.mubr.bf16.mxu0 %v7273_v41  ;;  %6062 = vmatpush3.bf16.msra.mxu0 %v6672_v56  ;;  %v490_v56 = vshrl.u32 %v7404_v48, 16  ;;  %v7420_v59 = vsel %vm7252_vm2, 0, %v488_v57  ;;  %v9312_v57 = vshll.u32 %v7456_v34, 16 }
  0xca   : > { %6063 = vmatprep.subr.bf16.mxu0 %v6675_v1  ;;  %9391 = vst [vmem:[#allocation24_spill] sm:$0xff] %v7420_v59 }
  0xcd   : > { %6064 = vmatpush3.bf16.msra.mxu0 %v6675_v1  ;;  %v492_v1 = vrot.slane %v490_v56, 7 }
  0xce   : > { %1466 = vmatprep.subr.bf16.mxu0 %v9319_v0 }
  0xcf   : > { %v495_v8 = vor.u32 %v493_v2, %v492_v1  ;;  %v7471_v1 = vld [vmem:[%s7224_s9 + $0x80] sm:$0xff]  }
  0xd0   : > { %948 = vmatmul.mubr.bf16.gmra.mrb[16].mxu0 %v7316_v6  ;;  %v9313_v15 = vshrl.u32 %v7471_v1, 16  ;;  %v9317_v36 = vshll.u32 %v7471_v1, 16 }
  0xd1   : > { %955 = vmatprep.mubr.bf16.mxu0 %v7291_v55  ;;  %v7435_v14 = vsel %vm7252_vm2, 0, %v495_v8  ;;  %v516_v8 = vor.u32 %v9312_v57, %v513_v53  ;;  %v9316_v57 = vshrl.u32 %v7486_v43, 16 }
  0xd2   : > { %9392 = vst [vmem:[#allocation25_spill] sm:$0xff] %v7435_v14  ;;  %v520_v28 = vrot.slane %v9313_v15, 7 }
  0xd3   : > { %v7480_v21 = vsel %vm7252_vm2, 0, %v516_v8  ;;  %v527_v15 = vrot.slane %v9316_v57, 7  ;;  %v7515_v57 = vsel %vm7346_vm5, %v7277_v46, 0 }
  0xd4   : > { %9395 = vst [vmem:[#allocation28_spill] sm:$0xff] %v7480_v21  ;;  %v523_v53 = vor.u32 %v9317_v36, %v520_v28  ;;  %v6678_v36 = vld [vmem:[#allocation7 + $0xc0] sm:$0xff]  }
  0xd5   : > { %v530_v10 = vor.u32 %v9318_v22, %v527_v15  ;;  %v7520_v15 = vsel %vm7346_vm5, %v7301_v61, 0  ;;  %v7532_v61 = vsel %vm7346_vm5, %v7303_v62, 0  ;;  %v600_v22 = vrot.slane %v451_v9, 1  ;;  %v6682_v9 = vld [vmem:[#allocation7 + $0xe0] sm:$0xff]  }
  0xd6   : > { %v7495_v8 = vsel %vm7252_vm2, 0, %v523_v53  ;;  %v651_v53 = vsel %vm7346_vm5, %v7279_v47, 0  ;;  %9397 = vst [vmem:[#allocation30_spill] sm:$0xff] %v7520_v15  ;;  %v6679_v47 = vld [vmem:[#allocation7 + $0xc8] sm:$0xff]   ;;  %9398 = vst [vmem:[#allocation31_spill] sm:$0xff] %v7532_v61 }
  0xd7   : > { %9396 = vst [vmem:[#allocation29_spill] sm:$0xff] %v7495_v8  ;;  %v7506_v28 = vsel %vm7252_vm2, 0, %v530_v10  ;;  %v596_v10 = vrot.slane %v437_v54, 1  ;;  %v598_v54 = vrot.slane %v444_v3, 1  ;;  %v601_v3 = vor.u32 %v600_v22, %v448_v5  ;;  %v6683_v5 = vld [vmem:[#allocation7 + $0xe8] sm:$0xff]   ;;  %v6684_v22 = vld [vmem:[#allocation7 + $0xf0] sm:$0xff]  }
  0xd8   : > { %956 = vmatmul.mubr.bf16.gmra.mrb[20].mxu0 %v7332_v12 }
  0xd9   : > { %963 = vmatprep.mubr.bf16.mxu0 %v7299_v60  ;;  %v597_v46 = vor.u32 %v596_v10, %v434_v49  ;;  %v6681_v49 = vld [vmem:[#allocation7 + $0xd8] sm:$0xff]   ;;  %v599_v62 = vor.u32 %v598_v54, %v441_v63  ;;  %v608_v54 = vrot.slane %v479_v39, 1  ;;  %v6686_v39 = vld [vmem:[#allocation7 + $0x100] sm:$0xff]  }
  0xdb   : > { %v7552_v10 = vsel %vm7346_vm5, %v599_v62, 0  ;;  %v609_v62 = vor.u32 %v608_v54, %v476_v38  ;;  %v6689_v54 = vld [vmem:[#allocation7 + $0x118] sm:$0xff]  }
  0xe0   : > { %964 = vmatmul.mubr.bf16.gmra.mrb[24].mxu0 %v7352_v23 }
  0xe1   : > { %971 = vmatprep.mubr.bf16.mxu0 %v7319_v7 }
  0xe8   : > { %972 = vmatmul.mubr.bf16.gmra.mrb[28].mxu0 %v7368_v27 }
  0xe9   : > { %979 = vmatprep.mubr.bf16.mxu0 %v7335_v13 }
  0xf0   : > { %980 = vmatmul.mubr.bf16.gmra.mrb[32].mxu0 %v7379_v33 }
  0xf1   : > { %987 = vmatprep.mubr.bf16.mxu0 %v7364_v26 }
  0xf8   : > { %988 = vmatmul.mubr.bf16.gmra.mrb[36].mxu0 %v7394_v42 }
  0xf9   : > { %995 = vmatprep.mubr.bf16.mxu0 %v7375_v32 }
 0x100   : > { %996 = vmatmul.mubr.bf16.gmra.mrb[40].mxu0 %v7409_v52 }
 0x101   : > { %1003 = vmatprep.mubr.bf16.mxu0 %v7390_v40 }
 0x108   : > { %1004 = vmatmul.mubr.bf16.gmra.mrb[44].mxu0 %v7420_v59 }
 0x109   : > { %1011 = vmatprep.mubr.bf16.mxu0 %v7404_v48 }
 0x110   : > { %1012 = vmatmul.mubr.bf16.gmra.mrb[48].mxu0 %v7435_v14 }
 0x111   : > { %1019 = vmatprep.mubr.bf16.mxu0 %v7426_v4 }
 0x118   : > { %1020 = vmatmul.mubr.bf16.gmra.mrb[52].mxu0 %v7450_v25 }
 0x119   : > { %1027 = vmatprep.mubr.bf16.mxu0 %v7441_v19 }
 0x120   : > { %1028 = vmatmul.mubr.bf16.gmra.mrb[56].mxu0 %v7465_v44 }
 0x121   : > { %1035 = vmatprep.mubr.bf16.mxu0 %v7456_v34 }
 0x128   : > { %1036 = vmatmul.mubr.bf16.gmra.mrb[60].mxu0 %v7480_v21 }
 0x129   : > { %1043 = vmatprep.mubr.bf16.mxu0 %v7471_v1 }
 0x130   : > { %1044 = vmatmul.mubr.bf16.gmra.mrb[64].mxu0 %v7495_v8 }
 0x131   : > { %1051 = vmatprep.mubr.bf16.mxu0 %v7486_v43 }
 0x138   : > { %1052 = vmatmul.mubr.bf16.gmra.mrb[68].mxu0 %v7506_v28 }
 0x139   : > { %6065 = vmatprep.mubr.bf16.mxu0 %v651_v53  ;;  %v6680_v53 = vld [vmem:[#allocation7 + $0xd0] sm:$0xff]  }
 0x140   : > { %6066 = vmatmul.mubr.bf16.vlgmr.msra.gmra.mrb[4].mxu0 %v7515_v57 }
 0x141   : > { %1467 = vmatpush1.bf16.msra.mxu0 %v6678_v36  ;;  %6069 = vmatprep.mubr.bf16.mxu0 %v7520_v15  ;;  %v7539_v36 = vsel %vm7346_vm5, %v597_v46, 0  ;;  %v7559_v46 = vsel %vm7346_vm5, %v601_v3, 0  ;;  %v610_v3 = vrot.slane %v486_v51, 1 }
 0x142   : > { %1468 = vmatprep.subr.bf16.mxu0 %v9319_v0 }
 0x143   : > { %v611_v38 = vor.u32 %v610_v3, %v483_v45 }
 0x145   : > { %1469 = vmatpush1.bf16.msra.mxu0 %v6679_v47  ;;  %v602_v47 = vrot.slane %v458_v17, 1 }
 0x146   : > { %1470 = vmatprep.subr.bf16.mxu0 %v9319_v0 }
 0x147   : > { %v603_v63 = vor.u32 %v602_v47, %v455_v11  ;;  %v6687_v47 = vld [vmem:[#allocation7 + $0x108] sm:$0xff]  }
 0x148   : > { %6070 = vmatmul.mubr.bf16.gmra.mrb[72].mxu0 %v7532_v61 }
 0x149   : > { %1471 = vmatpush1.bf16.msra.mxu0 %v6680_v53  ;;  %6073 = vmatprep.mubr.bf16.mxu0 %v7539_v36  ;;  %v7568_v17 = vsel %vm7346_vm5, %v603_v63, 0  ;;  %v606_v53 = vrot.slane %v472_v31, 1  ;;  %v7604_v63 = vsel %vm7346_vm5, %v611_v38, 0 }
 0x14a   : > { %1472 = vmatprep.subr.bf16.mxu0 %v9319_v0 }
 0x14b   : > { %v607_v11 = vor.u32 %v606_v53, %v469_v30  ;;  %v7591_v30 = vsel %vm7346_vm5, %v609_v62, 0  ;;  %v9401_v62 = vshll.u32 %v7456_v34, 16 }
 0x14d   : > { %1473 = vmatpush1.bf16.msra.mxu0 %v6681_v49  ;;  %v6685_v49 = vld [vmem:[#allocation7 + $0xf8] sm:$0xff]   ;;  %v7584_v31 = vsel %vm7346_vm5, %v607_v11, 0 }
 0x14e   : > { %1474 = vmatprep.subr.bf16.mxu0 %v9319_v0 }
 0x150   : > { %6074 = vmatmul.mubr.bf16.gmra.mrb[76].mxu0 %v7552_v10 }
 0x151   : > { %1475 = vmatpush1.bf16.msra.mxu0 %v6682_v9  ;;  %6077 = vmatprep.mubr.bf16.mxu0 %v7559_v46  ;;  %v612_v9 = vrot.slane %v493_v2, 1  ;;  %v6688_v2 = vld [vmem:[#allocation7 + $0x110] sm:$0xff]  }
 0x152   : > { %1476 = vmatprep.subr.bf16.mxu0 %v9319_v0 }
 0x153   : > { %v613_v51 = vor.u32 %v612_v9, %v490_v56  ;;  %v9399_v56 = vshrl.u32 %v7426_v4, 16  ;;  %v9402_v9 = vshll.u32 %v7471_v1, 16 }
 0x155   : > { %1477 = vmatpush1.bf16.msra.mxu0 %v6683_v5  ;;  %v614_v5 = vrot.slane %v500_v18, 1  ;;  %v7611_v45 = vsel %vm7346_vm5, %v613_v51, 0  ;;  %v9400_v18 = vshrl.u32 %v7441_v19, 16  ;;  %v620_v38 = vrot.slane %v9402_v9, 1  ;;  %v6694_v9 = vld [vmem:[#allocation7 + $0x140] sm:$0xff]  }
 0x156   : > { %1478 = vmatprep.subr.bf16.mxu0 %v9319_v0 }
 0x157   : > { %v615_v53 = vor.u32 %v614_v5, %v9399_v56  ;;  %v9404_v5 = vshrl.u32 %v7471_v1, 16 }
 0x158   : > { %6078 = vmatmul.mubr.bf16.gmra.mrb[80].mxu0 %v7568_v17 }
 0x159   : > { %1479 = vmatpush1.bf16.msra.mxu0 %v6684_v22  ;;  %6081 = vmatprep.mubr.bf16.mxu0 %v7356_v24  ;;  %v616_v22 = vrot.slane %v507_v29, 1  ;;  %v6690_v29 = vld [vmem:[#allocation7 + $0x120] sm:$0xff]  }
 0x15a   : > { %1480 = vmatprep.subr.bf16.mxu0 %v9319_v0 }
 0x15b   : > { %v617_v11 = vor.u32 %v616_v22, %v9400_v18  ;;  %v621_v22 = vor.u32 %v620_v38, %v9404_v5  ;;  %v6692_v18 = vld [vmem:[#allocation7 + $0x130] sm:$0xff]  }
 0x15d   : > { %1481 = vmatpush1.bf16.msra.mxu0 %v6685_v49  ;;  %v7624_v49 = vsel %vm7346_vm5, %v615_v53, 0  ;;  %v7631_v3 = vsel %vm7346_vm5, %v617_v11, 0  ;;  %v9405_v53 = vshll.u32 %v7486_v43, 16  ;;  %v7650_v11 = vsel %vm7346_vm5, %v621_v22, 0 }
 0x15e   : > { %1482 = vmatprep.subr.bf16.mxu0 %v9319_v0 }
 0x160   : > { %6082 = vmatmul.mubr.bf16.gmra.mrb[84].mxu0 %v7584_v31 }
 0x161   : > { %1483 = vmatpush1.bf16.msra.mxu0 %v6686_v39  ;;  %6085 = vmatprep.mubr.bf16.mxu0 %v7591_v30  ;;  %v618_v39 = vrot.slane %v9401_v62, 1 }
 0x162   : > { %1484 = vmatprep.subr.bf16.mxu0 %v9319_v0 }
 0x165   : > { %1485 = vmatpush1.bf16.msra.mxu0 %v6687_v47  ;;  %v9403_v47 = vshrl.u32 %v7456_v34, 16 }
 0x166   : > { %1486 = vmatprep.subr.bf16.mxu0 %v9319_v0 }
 0x167   : > { %v619_v51 = vor.u32 %v618_v39, %v9403_v47  ;;  %v6693_v39 = vld [vmem:[#allocation7 + $0x138] sm:$0xff]   ;;  %v6800_v47 = vld [vmem:[%s7224_s9 + $0x8] sm:$0xff]  }
 0x168   : > { %6086 = vmatmul.mubr.bf16.gmra.mrb[88].mxu0 %v7604_v63 }
 0x169   : > { %1487 = vmatpush1.bf16.msra.mxu0 %v6688_v2  ;;  %6089 = vmatprep.mubr.bf16.mxu0 %v7611_v45  ;;  %v6691_v2 = vld [vmem:[#allocation7 + $0x128] sm:$0xff]   ;;  %v7644_v56 = vsel %vm7346_vm5, %v619_v51, 0 }
 0x16a   : > { %1488 = vmatprep.subr.bf16.mxu0 %v9319_v0 }
 0x16d   : > { %1489 = vmatpush1.bf16.msra.mxu0 %v6689_v54  ;;  %v622_v54 = vrot.slane %v9405_v53, 1  ;;  %v6695_v53 = vld [vmem:[#allocation7 + $0x148] sm:$0xff]  }
 0x16e   : > { %1490 = vmatprep.subr.bf16.mxu0 %v9319_v0 }
 0x170   : > { %6090 = vmatmul.mubr.bf16.gmra.mrb[92].mxu0 %v7624_v49 }
 0x171   : > { %6093 = vmatprep.mubr.bf16.mxu0 %v7631_v3  ;;  %1491 = vmatpush1.bf16.msra.mxu0 %v6690_v29  ;;  %v9406_v29 = vshrl.u32 %v7486_v43, 16 }
 0x172   : > { %1492 = vmatprep.subr.bf16.mxu0 %v9319_v0 }
 0x173   : > { %v623_v62 = vor.u32 %v622_v54, %v9406_v29  ;;  %v7666_v54 = vld [vmem:[%s7224_s9 + $0x10] sm:$0xff]   ;;  %v6697_v29 = vld [vmem:[#allocation7 + $0x158] sm:$0xff]  }
 0x175   : > { %1493 = vmatpush1.bf16.msra.mxu0 %v6691_v2  ;;  %v7660_v38 = vsel %vm7346_vm5, %v623_v62, 0  ;;  %v6698_v62 = vld [vmem:[#allocation7 + $0x160] sm:$0xff]  }
 0x176   : > { %1494 = vmatprep.subr.bf16.mxu0 %v9319_v0 }
 0x178   : > { %6094 = vmatmul.mubr.bf16.gmra.mrb[96].mxu0 %v7644_v56 }
 0x179   : > { %6097 = vmatprep.mubr.bf16.mxu0 %v7650_v11  ;;  %1495 = vmatpush1.bf16.msra.mxu0 %v6692_v18  ;;  %v6696_v18 = vld [vmem:[#allocation7 + $0x150] sm:$0xff]  }
 0x17a   : > { %1496 = vmatprep.subr.bf16.mxu0 %v9319_v0 }
 0x17d   : > { %1497 = vmatpush1.bf16.msra.mxu0 %v6693_v39 }
 0x17e   : > { %6101 = vmatprep.subr.bf16.mxu0 %v6694_v9 }
 0x180   : > { %6098 = vmatmul.mubr.bf16.gmra.mrb[100].mxu0 %v7660_v38 }
 0x181   : > { %1498 = vmatprep.mubr.bf16.mxu0 %v6800_v47 }
 0x183   : > { %v917_v51 = vpop.f32.mrb[0].mxu0 }
 0x184   : > { %v919_v2 = vpop.f32.mrb[1].mxu0  ;;  %v6699_v51 = vld [vmem:[#allocation7 + $0x168] sm:$0xff]  }
 0x185   : > { %v920_v5 = vpop.f32.mrb[2].mxu0  ;;  %v6700_v2 = vld [vmem:[#allocation7 + $0x170] sm:$0xff]  }
 0x186   : > { %v922_v22 = vpop.f32.mrb[3].mxu0 }
 0x188   : > { %1499 = vmatmul.mubr.bf16.vlgmr.msra.gmra.mrb[104].mxu0 %v7269_v37 }
 0x189   : > { %6102 = vmatpush3.bf16.msra.mxu0 %v6694_v9  ;;  %1506 = vmatprep.mubr.bf16.mxu0 %v7666_v54 }
 0x18a   : > { %6103 = vmatprep.subr.bf16.mxu0 %v6695_v53 }
 0x18d   : > { %6104 = vmatpush3.bf16.msra.mxu0 %v6695_v53 }
 0x18e   : > { %6105 = vmatprep.subr.bf16.mxu0 %v6696_v18 }
 0x190   : > { %1507 = vmatmul.mubr.bf16.gmra.mrb[4].mxu0 %v7284_v50 }
 0x191   : > { %1514 = vmatprep.mubr.bf16.mxu0 %v7265_v35  ;;  %6106 = vmatpush3.bf16.msra.mxu0 %v6696_v18  ;;  %v6701_v18 = vld [vmem:[#allocation7 + $0x178] sm:$0xff]  }
 0x192   : > { %6107 = vmatprep.subr.bf16.mxu0 %v6697_v29 }
 0x193   : > { %v7671_v39 = vpop.f32.mrb[8].mxu0 }
 0x194   : > { %v935_v37 = vpop.f32.mrb[9].mxu0 }
 0x195   : > { %v7673_v9 = vpop.f32.mrb[10].mxu0  ;;  %6108 = vmatpush3.bf16.msra.mxu0 %v6697_v29 }
 0x196   : > { %v938_v47 = vpop.f32.mrb[11].mxu0  ;;  %6109 = vmatprep.subr.bf16.mxu0 %v6698_v62 }
 0x198   : > { %1515 = vmatmul.mubr.bf16.gmra.mrb[108].mxu0 %v7296_v58 }
 0x199   : > { %1522 = vmatprep.mubr.bf16.mxu0 %v7273_v41  ;;  %6110 = vmatpush3.bf16.msra.mxu0 %v6698_v62 }
 0x19a   : > { %6111 = vmatprep.subr.bf16.mxu0 %v6699_v51 }
 0x19b   : > { %v7677_v35 = vpop.f32.mrb[12].mxu0 }
 0x19c   : > { %v943_v5 = vpop.f32.mrb[13].mxu0 }
 0x19d   : > { %v7679_v22 = vpop.f32.mrb[14].mxu0  ;;  %6112 = vmatpush3.bf16.msra.mxu0 %v6699_v51 }
 0x19e   : > { %v946_v53 = vpop.f32.mrb[15].mxu0  ;;  %6113 = vmatprep.subr.bf16.mxu0 %v6700_v2 }
 0x1a0   : > { %1523 = vmatmul.mubr.bf16.gmra.mrb[112].mxu0 %v7316_v6 }
 0x1a1   : > { %1530 = vmatprep.mubr.bf16.mxu0 %v7291_v55  ;;  %6114 = vmatpush3.bf16.msra.mxu0 %v6700_v2 }
 0x1a2   : > { %6115 = vmatprep.subr.bf16.mxu0 %v6701_v18 }
 0x1a3   : > { %v7683_v29 = vpop.f32.mrb[16].mxu0 }
 0x1a4   : > { %v951_v41 = vpop.f32.mrb[17].mxu0 }
 0x1a5   : > { %v7685_v62 = vpop.f32.mrb[18].mxu0  ;;  %6116 = vmatpush3.bf16.msra.mxu0 %v6701_v18 }
 0x1a6   : > { %v954_v37 = vpop.f32.mrb[19].mxu0  ;;  %2121 = vmatprep.subr.bf16.mxu0 %v9319_v0 }
 0x1a8   : > { %1531 = vmatmul.mubr.bf16.gmra.mrb[116].mxu0 %v7332_v12 }
 0x1a9   : > { %1538 = vmatprep.mubr.bf16.mxu0 %v7299_v60 }
 0x1ab   : > { %v7690_v47 = vpop.f32.mrb[20].mxu0 }
 0x1ac   : > { %v959_v51 = vpop.f32.mrb[21].mxu0 }
 0x1ad   : > { %v7692_v5 = vpop.f32.mrb[22].mxu0 }
 0x1ae   : > { %v962_v55 = vpop.f32.mrb[23].mxu0 }
 0x1b0   : > { %1539 = vmatmul.mubr.bf16.gmra.mrb[120].mxu0 %v7352_v23  ;;  %v7773_v23 = vld [vmem:[#allocation7 + $0x220] sm:$0xff]  }
 0x1b1   : > { %1546 = vmatprep.mubr.bf16.mxu0 %v7319_v7  ;;  %9410 = vst [vmem:[#allocation35_spill] sm:$0xff] %v7773_v23 }
 0x1b3   : > { %v7696_v2 = vpop.f32.mrb[24].mxu0 }
 0x1b4   : > { %v967_v53 = vpop.f32.mrb[25].mxu0 }
 0x1b5   : > { %v7698_v18 = vpop.f32.mrb[26].mxu0 }
 0x1b6   : > { %v970_v41 = vpop.f32.mrb[27].mxu0 }
 0x1b8   : > { %1547 = vmatmul.mubr.bf16.gmra.mrb[124].mxu0 %v7368_v27 }
 0x1b9   : > { %1554 = vmatprep.mubr.bf16.mxu0 %v7335_v13 }
 0x1bb   : > { %v7702_v60 = vpop.f32.mrb[28].mxu0 }
 0x1bc   : > { %v975_v37 = vpop.f32.mrb[29].mxu0 }
 0x1bd   : > { %v7704_v51 = vpop.f32.mrb[30].mxu0 }
 0x1be   : > { %v978_v55 = vpop.f32.mrb[31].mxu0 }
 0x1c0   : > { %1555 = vmatmul.mubr.bf16.gmra.mrb[128].mxu0 %v7379_v33 }
 0x1c1   : > { %1562 = vmatprep.mubr.bf16.mxu0 %v7364_v26 }
 0x1c3   : > { %v7708_v7 = vpop.f32.mrb[32].mxu0 }
 0x1c4   : > { %v983_v53 = vpop.f32.mrb[33].mxu0 }
 0x1c5   : > { %v7710_v0 = vpop.f32.mrb[34].mxu0 }
 0x1c6   : > { %v986_v41 = vpop.f32.mrb[35].mxu0 }
 0x1c8   : > { %1563 = vmatmul.mubr.bf16.gmra.mrb[132].mxu0 %v7394_v42 }
 0x1c9   : > { %1570 = vmatprep.mubr.bf16.mxu0 %v7375_v32 }
 0x1cb   : > { %v7714_v13 = vpop.f32.mrb[36].mxu0 }
 0x1cc   : > { %v991_v37 = vpop.f32.mrb[37].mxu0 }
 0x1cd   : > { %v7716_v27 = vpop.f32.mrb[38].mxu0 }
 0x1ce   : > { %v994_v55 = vpop.f32.mrb[39].mxu0 }
 0x1d0   : > { %1571 = vmatmul.mubr.bf16.gmra.mrb[136].mxu0 %v7409_v52  ;;  %v7731_v52 = vld [vmem:[#allocation7 + $0x200] sm:$0xff]  }
 0x1d1   : > { %1578 = vmatprep.mubr.bf16.mxu0 %v7390_v40  ;;  %6349 = vmatprep.subr.bf16.mxu1 %v7731_v52 }
 0x1d2   : > { %6357 = vmatpush3.bf16.msra.mxu1 %v7731_v52 }
 0x1d3   : > { %v7720_v26 = vpop.f32.mrb[40].mxu0 }
 0x1d4   : > { %v999_v53 = vpop.f32.mrb[41].mxu0 }
 0x1d5   : > { %v7722_v33 = vpop.f32.mrb[42].mxu0 }
 0x1d6   : > { %v1002_v41 = vpop.f32.mrb[43].mxu0 }
 0x1d8   : > { %1579 = vmatmul.mubr.bf16.gmra.mrb[140].mxu0 %v7420_v59  ;;  %v7747_v59 = vld [vmem:[#allocation7 + $0x208] sm:$0xff]  }
 0x1d9   : > { %1586 = vmatprep.mubr.bf16.mxu0 %v7404_v48  ;;  %9407 = vst [vmem:[#allocation32_spill] sm:$0xff] %v7747_v59  ;;  %6350 = vmatprep.subr.bf16.mxu1 %v7747_v59 }
 0x1da   : > { %6358 = vmatpush3.bf16.msra.mxu1 %v7747_v59 }
 0x1db   : > { %v7726_v32 = vpop.f32.mrb[44].mxu0 }
 0x1dc   : > { %v1007_v37 = vpop.f32.mrb[45].mxu0 }
 0x1dd   : > { %v7728_v42 = vpop.f32.mrb[46].mxu0 }
 0x1de   : > { %v1010_v55 = vpop.f32.mrb[47].mxu0 }
 0x1e0   : > { %1587 = vmatmul.mubr.bf16.gmra.mrb[144].mxu0 %v7435_v14 }
 0x1e1   : > { %1594 = vmatprep.mubr.bf16.mxu0 %v7426_v4 }
 0x1e3   : > { %v7735_v40 = vpop.f32.mrb[48].mxu0 }
 0x1e4   : > { %v1015_v53 = vpop.f32.mrb[49].mxu0 }
 0x1e5   : > { %v7738_v48 = vpop.f32.mrb[50].mxu0 }
 0x1e6   : > { %v1018_v41 = vpop.f32.mrb[51].mxu0 }
 0x1e8   : > { %1595 = vmatmul.mubr.bf16.gmra.mrb[148].mxu0 %v7450_v25 }
 0x1e9   : > { %1602 = vmatprep.mubr.bf16.mxu0 %v7441_v19 }
 0x1eb   : > { %v7742_v37 = vpop.f32.mrb[52].mxu0 }
 0x1ec   : > { %v1023_v55 = vpop.f32.mrb[53].mxu0 }
 0x1ed   : > { %v7744_v14 = vpop.f32.mrb[54].mxu0  ;;  %v7756_v55 = vld [vmem:[#allocation7 + $0x210] sm:$0xff]  }
 0x1ee   : > { %v1026_v4 = vpop.f32.mrb[55].mxu0  ;;  %9408 = vst [vmem:[#allocation33_spill] sm:$0xff] %v7756_v55  ;;  %6351 = vmatprep.subr.bf16.mxu1 %v7756_v55 }
 0x1ef   : > { %6359 = vmatpush3.bf16.msra.mxu1 %v7756_v55 }
 0x1f0   : > { %1603 = vmatmul.mubr.bf16.gmra.mrb[152].mxu0 %v7465_v44 }
 0x1f1   : > { %1610 = vmatprep.mubr.bf16.mxu0 %v7456_v34  ;;  %v7762_v34 = vld [vmem:[#allocation7 + $0x218] sm:$0xff]  }
 0x1f2   : > { %9409 = vst [vmem:[#allocation34_spill] sm:$0xff] %v7762_v34  ;;  %6352 = vmatprep.subr.bf16.mxu1 %v7762_v34 }
 0x1f3   : > { %v7751_v53 = vpop.f32.mrb[56].mxu0  ;;  %6360 = vmatpush3.bf16.msra.mxu1 %v7762_v34  ;;  %v7791_v34 = vld [vmem:[#allocation7 + $0x230] sm:$0xff]  }
 0x1f4   : > { %v1031_v19 = vpop.f32.mrb[57].mxu0  ;;  %6353 = vmatprep.subr.bf16.mxu1 %v7773_v23 }
 0x1f5   : > { %v7754_v41 = vpop.f32.mrb[58].mxu0 }
 0x1f6   : > { %v1034_v25 = vpop.f32.mrb[59].mxu0 }
 0x1f7   : > { %v7771_v25 = vld [vmem:[%s7224_s9 + $0x90] sm:$0xff]   ;;  %6361 = vmatpush3.bf16.msra.mxu1 %v7773_v23 }
 0x1f8   : > { %1611 = vmatmul.mubr.bf16.gmra.mrb[156].mxu0 %v7480_v21  ;;  %v535_v23 = vshll.u32 %v7771_v25, 16 }
 0x1f9   : > { %1618 = vmatprep.mubr.bf16.mxu0 %v7471_v1  ;;  %v9341_v1 = vshrl.u32 %v7771_v25, 16 }
 0x1fb   : > { %v7764_v4 = vpop.f32.mrb[60].mxu0 }
 0x1fc   : > { %v1039_v19 = vpop.f32.mrb[61].mxu0 }
 0x1fd   : > { %v7768_v44 = vpop.f32.mrb[62].mxu0  ;;  %v7780_v19 = vld [vmem:[#allocation7 + $0x228] sm:$0xff]  }
 0x1fe   : > { %v1042_v21 = vpop.f32.mrb[63].mxu0  ;;  %9411 = vst [vmem:[#allocation36_spill] sm:$0xff] %v7780_v19  ;;  %6354 = vmatprep.subr.bf16.mxu1 %v7780_v19 }
 0x1ff   : > { %6362 = vmatpush3.bf16.msra.mxu1 %v7780_v19  ;;  %v7797_v19 = vld [vmem:[#allocation7 + $0x238] sm:$0xff]  }
 0x200   : > { %1619 = vmatmul.mubr.bf16.gmra.mrb[160].mxu0 %v7495_v8  ;;  %v534_v8 = vrot.slane %v9341_v1, 7  ;;  %6355 = vmatprep.subr.bf16.mxu1 %v7791_v34 }
 0x201   : > { %1626 = vmatprep.mubr.bf16.mxu0 %v7486_v43 }
 0x203   : > { %v7782_v12 = vpop.f32.mrb[64].mxu0  ;;  %6363 = vmatpush3.bf16.msra.mxu1 %v7791_v34 }
 0x204   : > { %v1047_v6 = vpop.f32.mrb[65].mxu0  ;;  %6356 = vmatprep.subr.bf16.mxu1 %v7797_v19 }
 0x205   : > { %v7786_v21 = vpop.f32.mrb[66].mxu0  ;;  %v537_v6 = vor.u32 %v535_v23, %v534_v8  ;;  %v6704_v8 = vld [vmem:[#allocation7 + $0x188] sm:$0xff]  }
 0x206   : > { %v1050_v43 = vpop.f32.mrb[67].mxu0 }
 0x207   : > { %6364 = vmatpush3.bf16.msra.mxu1 %v7797_v19  ;;  %v7803_v43 = vsel %vm7252_vm2, 0, %v537_v6 }
 0x208   : > { %1627 = vmatmul.mubr.bf16.gmra.mrb[164].mxu0 %v7506_v28  ;;  %9412 = vst [vmem:[#allocation37_spill] sm:$0xff] %v7803_v43 }
 0x209   : > { %1634 = vmatprep.mubr.bf16.mxu0 %v7771_v25 }
 0x20a   : > { %6182 = vmatmul.mubr.bf16.vlgmr.msra.gmra.mrb[0].mxu1 %v7584_v31 }
 0x20b   : > { %v1053_v58 = vpop.f32.mrb[68].mxu0  ;;  %6185 = vmatprep.mubr.bf16.mxu1 %v7591_v30 }
 0x20c   : > { %v1055_v1 = vpop.f32.mrb[69].mxu0  ;;  %v6703_v58 = vld [vmem:[#allocation7 + $0x180] sm:$0xff]  }
 0x20d   : > { %v1056_v55 = vpop.f32.mrb[70].mxu0 }
 0x20e   : > { %v1058_v59 = vpop.f32.mrb[71].mxu0 }
 0x20f   : > { %v9413_v59 = vmov 0  }
 0x210   : > { %1635 = vmatmul.mubr.bf16.gmra.mrb[168].mxu0 %v7803_v43  ;;  %v6705_v43 = vld [vmem:[#allocation7 + $0x190] sm:$0xff]  }
 0x211   : > { %6117 = vmatprep.mubr.bf16.mxu0 %v7515_v57 }
 0x212   : > { %6186 = vmatmul.mubr.bf16.gmra.mrb[4].mxu1 %v7604_v63 }
 0x213   : > { %6189 = vmatprep.mubr.bf16.mxu1 %v7611_v45 }
 0x218   : > { %6118 = vmatmul.mubr.bf16.vlgmr.msra.gmra.mrb[4].mxu0 %v7520_v15 }
 0x219   : > { %2122 = vmatpush1.bf16.msra.mxu0 %v6703_v58  ;;  %6121 = vmatprep.mubr.bf16.mxu0 %v7532_v61 }
 0x21a   : > { %2123 = vmatprep.subr.bf16.mxu0 %v9413_v59  ;;  %6190 = vmatmul.mubr.bf16.gmra.mrb[8].mxu1 %v7624_v49 }
 0x21b   : > { %v6071_v55 = vpop.f32.mrb[72].mxu0  ;;  %6193 = vmatprep.mubr.bf16.mxu1 %v7631_v3 }
 0x21c   : > { %v7815_v1 = vadd.f32 %v6071_v55, %v7677_v35  ;;  %v1110_v6 = vpop.f32.mrb[73].mxu0  ;;  %v6707_v55 = vld [vmem:[#allocation7 + $0x1a0] sm:$0xff]  }
 0x21d   : > { %v7818_v57 = vadd.f32 %v1110_v6, %v7671_v39  ;;  %v6072_v16 = vpop.f32.mrb[74].mxu0  ;;  %2124 = vmatpush1.bf16.msra.mxu0 %v6704_v8  ;;  %v6706_v39 = vld [vmem:[#allocation7 + $0x198] sm:$0xff]  }
 0x21e   : > { %v7821_v15 = vadd.f32 %v6072_v16, %v7679_v22  ;;  %v1113_v58 = vpop.f32.mrb[75].mxu0  ;;  %2125 = vmatprep.subr.bf16.mxu0 %v9413_v59 }
 0x21f   : > { %v7825_v61 = vadd.f32 %v1113_v58, %v7673_v9 }
 0x220   : > { %6122 = vmatmul.mubr.bf16.gmra.mrb[172].mxu0 %v7539_v36 }
 0x221   : > { %9414 = vst [vmem:[#allocation38_spill] sm:$0xff] %v7825_v61  ;;  %2126 = vmatpush1.bf16.msra.mxu0 %v6705_v43  ;;  %6125 = vmatprep.mubr.bf16.mxu0 %v7552_v10  ;;  %v624_v61 = vrot.slane %v535_v23, 1 }
 0x222   : > { %2127 = vmatprep.subr.bf16.mxu0 %v9413_v59  ;;  %6194 = vmatmul.mubr.bf16.gmra.mrb[12].mxu1 %v7644_v56 }
 0x223   : > { %v6075_v16 = vpop.f32.mrb[76].mxu0  ;;  %6197 = vmatprep.mubr.bf16.mxu1 %v7650_v11 }
 0x224   : > { %v7833_v35 = vadd.f32 %v6075_v16, %v7690_v47  ;;  %v1126_v22 = vpop.f32.mrb[77].mxu0 }
 0x225   : > { %v7836_v9 = vadd.f32 %v1126_v22, %v7683_v29  ;;  %v6076_v8 = vpop.f32.mrb[78].mxu0  ;;  %2128 = vmatpush1.bf16.msra.mxu0 %v6706_v39  ;;  %v6708_v29 = vld [vmem:[#allocation7 + $0x1a8] sm:$0xff]  }
 0x226   : > { %v7839_v6 = vadd.f32 %v6076_v8, %v7692_v5  ;;  %v1129_v43 = vpop.f32.mrb[79].mxu0  ;;  %2129 = vmatprep.subr.bf16.mxu0 %v9413_v59  ;;  %v9416_v5 = vshrl.u32 %v7771_v25, 16  ;;  %v6709_v8 = vld [vmem:[#allocation7 + $0x1b0] sm:$0xff]  }
 0x227   : > { %v7843_v58 = vadd.f32 %v1129_v43, %v7685_v62 }
 0x228   : > { %6126 = vmatmul.mubr.bf16.gmra.mrb[176].mxu0 %v7559_v46  ;;  %v625_v39 = vor.u32 %v624_v61, %v9416_v5  ;;  %v6711_v5 = vld [vmem:[#allocation7 + $0x1c0] sm:$0xff]  }
 0x229   : > { %9415 = vst [vmem:[#allocation39_spill] sm:$0xff] %v7843_v58  ;;  %2130 = vmatpush1.bf16.msra.mxu0 %v6707_v55  ;;  %6129 = vmatprep.mubr.bf16.mxu0 %v7568_v17 }
 0x22a   : > { %2131 = vmatprep.subr.bf16.mxu0 %v9413_v59  ;;  %v7867_v61 = vsel %vm7346_vm5, %v625_v39, 0  ;;  %6198 = vmatmul.mubr.bf16.gmra.mrb[16].mxu1 %v7660_v38 }
 0x22b   : > { %v6079_v47 = vpop.f32.mrb[80].mxu0  ;;  %6201 = vmatprep.mubr.bf16.mxu1 %v7867_v61 }
 0x22c   : > { %v7853_v62 = vadd.f32 %v6079_v47, %v7702_v60  ;;  %v1142_v23 = vpop.f32.mrb[81].mxu0 }
 0x22d   : > { %v7856_v16 = vadd.f32 %v1142_v23, %v7696_v2  ;;  %v6080_v22 = vpop.f32.mrb[82].mxu0  ;;  %2132 = vmatpush1.bf16.msra.mxu0 %v6708_v29  ;;  %v6710_v2 = vld [vmem:[#allocation7 + $0x1b8] sm:$0xff]  }
 0x22e   : > { %v7859_v55 = vadd.f32 %v6080_v22, %v7704_v51  ;;  %v1145_v43 = vpop.f32.mrb[83].mxu0  ;;  %2133 = vmatprep.subr.bf16.mxu0 %v9413_v59 }
 0x22f   : > { %v7863_v58 = vadd.f32 %v1145_v43, %v7698_v18 }
 0x230   : > { %6130 = vmatmul.mubr.bf16.gmra.mrb[180].mxu0 %v7356_v24 }
 0x231   : > { %2134 = vmatpush1.bf16.msra.mxu0 %v6709_v8  ;;  %6133 = vmatprep.mubr.bf16.mxu0 %v7584_v31 }
 0x232   : > { %2135 = vmatprep.subr.bf16.mxu0 %v9413_v59 }
 0x233   : > { %v6083_v60 = vpop.f32.mrb[84].mxu0 }
 0x234   : > { %v7875_v18 = vadd.f32 %v6083_v60, %v7714_v13  ;;  %v1158_v51 = vpop.f32.mrb[85].mxu0  ;;  %v6712_v13 = vld [vmem:[#allocation7 + $0x1c8] sm:$0xff]  }
 0x235   : > { %v7878_v29 = vadd.f32 %v1158_v51, %v7708_v7  ;;  %v6084_v47 = vpop.f32.mrb[86].mxu0  ;;  %2136 = vmatpush1.bf16.msra.mxu0 %v6710_v2 }
 0x236   : > { %v7881_v24 = vadd.f32 %v6084_v47, %v7716_v27  ;;  %v1161_v39 = vpop.f32.mrb[87].mxu0  ;;  %2137 = vmatprep.subr.bf16.mxu0 %v9413_v59 }
 0x237   : > { %v7885_v31 = vadd.f32 %v1161_v39, %v7710_v0  ;;  %v6713_v0 = vld [vmem:[#allocation7 + $0x1d0] sm:$0xff]  }
 0x238   : > { %6134 = vmatmul.mubr.bf16.gmra.mrb[184].mxu0 %v7591_v30 }
 0x239   : > { %2138 = vmatpush1.bf16.msra.mxu0 %v6711_v5  ;;  %6137 = vmatprep.mubr.bf16.mxu0 %v7604_v63 }
 0x23a   : > { %2139 = vmatprep.subr.bf16.mxu0 %v9413_v59 }
 0x23b   : > { %v6087_v7 = vpop.f32.mrb[88].mxu0 }
 0x23c   : > { %v7891_v23 = vadd.f32 %v6087_v7, %v7726_v32  ;;  %v1174_v27 = vpop.f32.mrb[89].mxu0  ;;  %v6714_v32 = vld [vmem:[#allocation7 + $0x1d8] sm:$0xff]  }
 0x23d   : > { %v7894_v22 = vadd.f32 %v1174_v27, %v7720_v26  ;;  %v6088_v8 = vpop.f32.mrb[90].mxu0  ;;  %2140 = vmatpush1.bf16.msra.mxu0 %v6712_v13 }
 0x23e   : > { %v7897_v43 = vadd.f32 %v6088_v8, %v7728_v42  ;;  %v1177_v30 = vpop.f32.mrb[91].mxu0  ;;  %2141 = vmatprep.subr.bf16.mxu0 %v9413_v59 }
 0x23f   : > { %v7901_v63 = vadd.f32 %v1177_v30, %v7722_v33  ;;  %v6715_v33 = vld [vmem:[#allocation7 + $0x1e0] sm:$0xff]  }
 0x240   : > { %6138 = vmatmul.mubr.bf16.gmra.mrb[188].mxu0 %v7611_v45 }
 0x241   : > { %2142 = vmatpush1.bf16.msra.mxu0 %v6713_v0  ;;  %6141 = vmatprep.mubr.bf16.mxu0 %v7624_v49 }
 0x242   : > { %2143 = vmatprep.subr.bf16.mxu0 %v9413_v59 }
 0x243   : > { %v6091_v26 = vpop.f32.mrb[92].mxu0 }
 0x244   : > { %v7907_v2 = vadd.f32 %v6091_v26, %v7742_v37  ;;  %v1190_v42 = vpop.f32.mrb[93].mxu0  ;;  %v6716_v37 = vld [vmem:[#allocation7 + $0x1e8] sm:$0xff]  }
 0x245   : > { %v7910_v60 = vadd.f32 %v1190_v42, %v7735_v40  ;;  %v6092_v51 = vpop.f32.mrb[94].mxu0  ;;  %2144 = vmatpush1.bf16.msra.mxu0 %v6714_v32 }
 0x246   : > { %v7913_v47 = vadd.f32 %v6092_v51, %v7744_v14  ;;  %v1193_v45 = vpop.f32.mrb[95].mxu0  ;;  %2145 = vmatprep.subr.bf16.mxu0 %v9413_v59 }
 0x247   : > { %v7917_v49 = vadd.f32 %v1193_v45, %v7738_v48  ;;  %v6717_v48 = vld [vmem:[#allocation7 + $0x1f0] sm:$0xff]  }
 0x248   : > { %9417 = vst [vmem:[#allocation40_spill] sm:$0xff] %v7913_v47  ;;  %6142 = vmatmul.mubr.bf16.gmra.mrb[192].mxu0 %v7631_v3 }
 0x249   : > { %9418 = vst [vmem:[#allocation41_spill] sm:$0xff] %v7917_v49  ;;  %6145 = vmatprep.mubr.bf16.mxu0 %v7644_v56  ;;  %2146 = vmatpush1.bf16.msra.mxu0 %v6715_v33  ;;  %v9444_v49 = vld [vmem:[#allocation29_spill] sm:$0xff] }
 0x24a   : > { %2147 = vmatprep.subr.bf16.mxu0 %v9413_v59 }
 0x24b   : > { %v6095_v40 = vpop.f32.mrb[96].mxu0 }
 0x24c   : > { %v7923_v5 = vadd.f32 %v6095_v40, %v7764_v4  ;;  %v1206_v14 = vpop.f32.mrb[97].mxu0  ;;  %v9426_v40 = vld [vmem:[#allocation33_spill] sm:$0xff] }
 0x24d   : > { %v7926_v39 = vadd.f32 %v1206_v14, %v7751_v53  ;;  %v6096_v13 = vpop.f32.mrb[98].mxu0  ;;  %2148 = vmatpush1.bf16.msra.mxu0 %v6716_v37  ;;  %v6718_v53 = vld [vmem:[#allocation7 + $0x1f8] sm:$0xff]   ;;  %v9425_v37 = vld [vmem:[#allocation32_spill] sm:$0xff]  ;;  %v9427_v14 = vld [vmem:[#allocation15_spill] sm:$0xff] }
 0x24e   : > { %9419 = vst [vmem:[#allocation42_spill] sm:$0xff] %v7923_v5  ;;  %v7929_v7 = vadd.f32 %v6096_v13, %v7768_v44  ;;  %v1209_v3 = vpop.f32.mrb[99].mxu0  ;;  %2149 = vmatprep.subr.bf16.mxu0 %v9413_v59  ;;  %v6803_v13 = vld [vmem:[%s7224_s9 + $0x20] sm:$0xff]  }
 0x24f   : > { %9420 = vst [vmem:[#allocation43_spill] sm:$0xff] %v7926_v39  ;;  %v7933_v56 = vadd.f32 %v1209_v3, %v7754_v41  ;;  %v7943_v41 = vld [vmem:[%s7224_s9 + $0x98] sm:$0xff]  }
 0x250   : > { %9421 = vst [vmem:[#allocation44_spill] sm:$0xff] %v7929_v7  ;;  %6146 = vmatmul.mubr.bf16.gmra.mrb[196].mxu0 %v7650_v11 }
 0x251   : > { %9422 = vst [vmem:[#allocation45_spill] sm:$0xff] %v7933_v56  ;;  %6149 = vmatprep.mubr.bf16.mxu0 %v7660_v38  ;;  %2150 = vmatpush1.bf16.msra.mxu0 %v6717_v48  ;;  %v542_v38 = vshll.u32 %v7943_v41, 16 }
 0x252   : > { %2151 = vmatprep.subr.bf16.mxu0 %v9413_v59 }
 0x253   : > { %v6099_v4 = vpop.f32.mrb[100].mxu0  ;;  %v626_v30 = vrot.slane %v542_v38, 1 }
 0x254   : > { %v1222_v27 = vpop.f32.mrb[101].mxu0  ;;  %v9429_v4 = vld [vmem:[#allocation35_spill] sm:$0xff] }
 0x255   : > { %v7939_v44 = vadd.f32 %v1222_v27, %v7782_v12  ;;  %v6100_v8 = vpop.f32.mrb[102].mxu0  ;;  %2152 = vmatpush1.bf16.msra.mxu0 %v6718_v53  ;;  %v539_v12 = vshrl.u32 %v7943_v41, 16  ;;  %v9430_v27 = vld [vmem:[#allocation16_spill] sm:$0xff] }
 0x256   : > { %v1225_v0 = vpop.f32.mrb[103].mxu0  ;;  %6153 = vmatprep.subr.bf16.mxu0 %v7731_v52  ;;  %v6804_v8 = vld [vmem:[%s7224_s9 + $0x28] sm:$0xff]  }
 0x257   : > { %9423 = vst [vmem:[#allocation46_spill] sm:$0xff] %v7939_v44  ;;  %v7946_v11 = vadd.f32 %v1225_v0, %v7786_v21  ;;  %v627_v42 = vor.u32 %v626_v30, %v539_v12  ;;  %v541_v45 = vrot.slane %v539_v12, 7  ;;  %v9431_v0 = vld [vmem:[#allocation36_spill] sm:$0xff] }
 0x258   : > { %6150 = vmatmul.mubr.bf16.gmra.mrb[200].mxu0 %v7867_v61 }
 0x259   : > { %9424 = vst [vmem:[#allocation47_spill] sm:$0xff] %v7946_v11  ;;  %2153 = vmatprep.mubr.bf16.mxu0 %v7666_v54  ;;  %v670_v21 = vsel %vm7346_vm5, %v627_v42, 0  ;;  %v7955_v61 = vor.u32 %v542_v38, %v541_v45  ;;  %v6802_v54 = vld [vmem:[%s7224_s9 + $0x18] sm:$0xff]   ;;  %v6805_v42 = vld [vmem:[%s7224_s9 + $0x30] sm:$0xff]  }
 0x25a   : > { %6202 = vmatmul.mubr.bf16.gmra.mrb[20].mxu1 %v670_v21 }
 0x25b   : > { %v1500_v32 = vpop.f32.mrb[104].mxu0  ;;  %3256 = vmatprep.mubr.bf16.mxu1 %v9413_v59 }
 0x25c   : > { %v1502_v26 = vpop.f32.mrb[105].mxu0 }
 0x25d   : > { %v1503_v51 = vpop.f32.mrb[106].mxu0  ;;  %v9432_v26 = vld [vmem:[#allocation17_spill] sm:$0xff] }
 0x25e   : > { %v1505_v33 = vpop.f32.mrb[107].mxu0 }
 0x260   : > { %2154 = vmatmul.mubr.bf16.vlgmr.msra.gmra.mrb[204].mxu0 %v7284_v50  ;;  %v9428_v50 = vld [vmem:[#allocation34_spill] sm:$0xff] }
 0x261   : > { %6154 = vmatpush3.bf16.msra.mxu0 %v7731_v52  ;;  %2161 = vmatprep.mubr.bf16.mxu0 %v6802_v54  ;;  %v9433_v54 = vld [vmem:[#allocation19_spill] sm:$0xff] }
 0x262   : > { %6155 = vmatprep.subr.bf16.mxu0 %v9425_v37 }
 0x265   : > { %6156 = vmatpush3.bf16.msra.mxu0 %v9425_v37  ;;  %v6806_v37 = vld [vmem:[%s7224_s9 + $0x38] sm:$0xff]  }
 0x266   : > { %6157 = vmatprep.subr.bf16.mxu0 %v9426_v40 }
 0x268   : > { %2162 = vmatmul.mubr.bf16.gmra.mrb[4].mxu0 %v9427_v14 }
 0x269   : > { %2169 = vmatprep.mubr.bf16.mxu0 %v6803_v13  ;;  %6158 = vmatpush3.bf16.msra.mxu0 %v9426_v40 }
 0x26a   : > { %6159 = vmatprep.subr.bf16.mxu0 %v9428_v50 }
 0x26b   : > { %v7967_v48 = vpop.f32.mrb[108].mxu0 }
 0x26c   : > { %v1518_v52 = vpop.f32.mrb[109].mxu0 }
 0x26d   : > { %v7969_v3 = vpop.f32.mrb[110].mxu0  ;;  %6160 = vmatpush3.bf16.msra.mxu0 %v9428_v50  ;;  %v9434_v50 = vld [vmem:[#allocation20_spill] sm:$0xff]  ;;  %v6807_v52 = vld [vmem:[%s7224_s9 + $0x40] sm:$0xff]  }
 0x26e   : > { %v1521_v53 = vpop.f32.mrb[111].mxu0  ;;  %6161 = vmatprep.subr.bf16.mxu0 %v9429_v4 }
 0x270   : > { %2170 = vmatmul.mubr.bf16.gmra.mrb[208].mxu0 %v9430_v27 }
 0x271   : > { %2177 = vmatprep.mubr.bf16.mxu0 %v6804_v8  ;;  %6162 = vmatpush3.bf16.msra.mxu0 %v9429_v4  ;;  %v9435_v8 = vld [vmem:[#allocation21_spill] sm:$0xff] }
 0x272   : > { %6163 = vmatprep.subr.bf16.mxu0 %v9431_v0 }
 0x273   : > { %v7977_v38 = vpop.f32.mrb[112].mxu0 }
 0x274   : > { %v1526_v12 = vpop.f32.mrb[113].mxu0 }
 0x275   : > { %v7979_v30 = vpop.f32.mrb[114].mxu0  ;;  %6164 = vmatpush3.bf16.msra.mxu0 %v9431_v0  ;;  %v6808_v0 = vld [vmem:[%s7224_s9 + $0x48] sm:$0xff]  }
 0x276   : > { %v1529_v32 = vpop.f32.mrb[115].mxu0  ;;  %6165 = vmatprep.subr.bf16.mxu0 %v7791_v34 }
 0x278   : > { %2178 = vmatmul.mubr.bf16.gmra.mrb[212].mxu0 %v9432_v26 }
 0x279   : > { %2185 = vmatprep.mubr.bf16.mxu0 %v6805_v42  ;;  %6166 = vmatpush3.bf16.msra.mxu0 %v7791_v34 }
 0x27a   : > { %6167 = vmatprep.subr.bf16.mxu0 %v7797_v19 }
 0x27b   : > { %v7987_v51 = vpop.f32.mrb[116].mxu0 }
 0x27c   : > { %v1534_v33 = vpop.f32.mrb[117].mxu0 }
 0x27d   : > { %v7989_v45 = vpop.f32.mrb[118].mxu0  ;;  %6168 = vmatpush3.bf16.msra.mxu0 %v7797_v19  ;;  %v9436_v33 = vld [vmem:[#allocation22_spill] sm:$0xff] }
 0x27e   : > { %v1537_v21 = vpop.f32.mrb[119].mxu0 }
 0x27f   : > { %v6809_v21 = vld [vmem:[%s7224_s9 + $0x50] sm:$0xff]  }
 0x280   : > { %2186 = vmatmul.mubr.bf16.gmra.mrb[216].mxu0 %v9433_v54 }
 0x281   : > { %2193 = vmatprep.mubr.bf16.mxu0 %v6806_v37 }
 0x283   : > { %v7994_v40 = vpop.f32.mrb[120].mxu0 }
 0x284   : > { %v1542_v14 = vpop.f32.mrb[121].mxu0 }
 0x285   : > { %v7996_v13 = vpop.f32.mrb[122].mxu0 }
 0x286   : > { %v1545_v34 = vpop.f32.mrb[123].mxu0 }
 0x288   : > { %2194 = vmatmul.mubr.bf16.gmra.mrb[220].mxu0 %v9434_v50  ;;  %v9437_v50 = vld [vmem:[#allocation23_spill] sm:$0xff] }
 0x289   : > { %2201 = vmatprep.mubr.bf16.mxu0 %v6807_v52  ;;  %v6810_v52 = vld [vmem:[%s7224_s9 + $0x58] sm:$0xff]  }
 0x28b   : > { %v8000_v53 = vpop.f32.mrb[124].mxu0 }
 0x28c   : > { %v1550_v19 = vpop.f32.mrb[125].mxu0 }
 0x28d   : > { %v8002_v4 = vpop.f32.mrb[126].mxu0 }
 0x28e   : > { %v1553_v27 = vpop.f32.mrb[127].mxu0 }
 0x290   : > { %2202 = vmatmul.mubr.bf16.gmra.mrb[224].mxu0 %v9435_v8 }
 0x291   : > { %2209 = vmatprep.mubr.bf16.mxu0 %v6808_v0 }
 0x293   : > { %v8006_v12 = vpop.f32.mrb[128].mxu0 }
 0x294   : > { %v1558_v32 = vpop.f32.mrb[129].mxu0 }
 0x295   : > { %v8008_v26 = vpop.f32.mrb[130].mxu0  ;;  %v9438_v32 = vld [vmem:[#allocation24_spill] sm:$0xff] }
 0x296   : > { %v1561_v42 = vpop.f32.mrb[131].mxu0 }
 0x297   : > { %v6811_v42 = vld [vmem:[%s7224_s9 + $0x60] sm:$0xff]  }
 0x298   : > { %2210 = vmatmul.mubr.bf16.gmra.mrb[228].mxu0 %v9436_v33 }
 0x299   : > { %2217 = vmatprep.mubr.bf16.mxu0 %v6809_v21 }
 0x29b   : > { %v8012_v54 = vpop.f32.mrb[132].mxu0 }
 0x29c   : > { %v1566_v37 = vpop.f32.mrb[133].mxu0 }
 0x29d   : > { %v8014_v14 = vpop.f32.mrb[134].mxu0 }
 0x29e   : > { %v1569_v34 = vpop.f32.mrb[135].mxu0 }
 0x2a0   : > { %2218 = vmatmul.mubr.bf16.gmra.mrb[232].mxu0 %v9437_v50  ;;  %v9439_v50 = vld [vmem:[#allocation25_spill] sm:$0xff] }
 0x2a1   : > { %2225 = vmatprep.mubr.bf16.mxu0 %v6810_v52  ;;  %v6812_v52 = vld [vmem:[%s7224_s9 + $0x68] sm:$0xff]  }
 0x2a3   : > { %v8018_v19 = vpop.f32.mrb[136].mxu0 }
 0x2a4   : > { %v1574_v27 = vpop.f32.mrb[137].mxu0 }
 0x2a5   : > { %v8020_v8 = vpop.f32.mrb[138].mxu0 }
 0x2a6   : > { %v1577_v0 = vpop.f32.mrb[139].mxu0 }
 0x2a8   : > { %2226 = vmatmul.mubr.bf16.gmra.mrb[236].mxu0 %v9438_v32  ;;  %v9440_v32 = vld [vmem:[#allocation26_spill] sm:$0xff] }
 0x2a9   : > { %2233 = vmatprep.mubr.bf16.mxu0 %v6811_v42  ;;  %v6813_v42 = vld [vmem:[%s7224_s9 + $0x70] sm:$0xff]  }
 0x2ab   : > { %v8024_v33 = vpop.f32.mrb[140].mxu0 }
 0x2ac   : > { %v1582_v21 = vpop.f32.mrb[141].mxu0 }
 0x2ad   : > { %v8026_v37 = vpop.f32.mrb[142].mxu0 }
 0x2ae   : > { %v1585_v34 = vpop.f32.mrb[143].mxu0 }
 0x2b0   : > { %2234 = vmatmul.mubr.bf16.gmra.mrb[240].mxu0 %v9439_v50  ;;  %v9441_v50 = vld [vmem:[#allocation27_spill] sm:$0xff] }
 0x2b1   : > { %2241 = vmatprep.mubr.bf16.mxu0 %v6812_v52  ;;  %v6814_v52 = vld [vmem:[%s7224_s9 + $0x78] sm:$0xff]  }
 0x2b3   : > { %v8030_v27 = vpop.f32.mrb[144].mxu0 }
 0x2b4   : > { %v1590_v20 = vpop.f32.mrb[145].mxu0 }
 0x2b5   : > { %v8032_v0 = vpop.f32.mrb[146].mxu0 }
 0x2b6   : > { %v1593_v59 = vpop.f32.mrb[147].mxu0 }
 0x2b8   : > { %2242 = vmatmul.mubr.bf16.gmra.mrb[244].mxu0 %v9440_v32  ;;  %v9442_v32 = vld [vmem:[#allocation28_spill] sm:$0xff] }
 0x2b9   : > { %2249 = vmatprep.mubr.bf16.mxu0 %v6813_v42  ;;  %v6815_v42 = vld [vmem:[%s7224_s9 + $0x80] sm:$0xff]  }
 0x2bb   : > { %v8036_v21 = vpop.f32.mrb[148].mxu0 }
 0x2bc   : > { %v1598_v11 = vpop.f32.mrb[149].mxu0 }
 0x2bd   : > { %v8038_v34 = vpop.f32.mrb[150].mxu0 }
 0x2be   : > { %v1601_v44 = vpop.f32.mrb[151].mxu0 }
 0x2c0   : > { %2250 = vmatmul.mubr.bf16.gmra.mrb[248].mxu0 %v9441_v50  ;;  %v6816_v50 = vld [vmem:[%s7224_s9 + $0x88] sm:$0xff]   ;;  %s9248_s9 = scalar_lea.hbm %s9305_s4, %s5467_s6 }
 0x2c1   : > { %2257 = vmatprep.mubr.bf16.mxu0 %v6814_v52 }
 0x2c3   : > { %v8042_v20 = vpop.f32.mrb[152].mxu0 }
 0x2c4   : > { %v1606_v56 = vpop.f32.mrb[153].mxu0 }
 0x2c5   : > { %v8044_v59 = vpop.f32.mrb[154].mxu0 }
 0x2c6   : > { %v1609_v7 = vpop.f32.mrb[155].mxu0 }
 0x2c8   : > { %2258 = vmatmul.mubr.bf16.gmra.mrb[252].mxu0 %v9442_v32 }
 0x2c9   : > { %2265 = vmatprep.mubr.bf16.mxu0 %v6815_v42 }
 0x2cb   : > { %v8048_v39 = vpop.f32.mrb[156].mxu0 }
 0x2cc   : > { %v1614_v11 = vpop.f32.mrb[157].mxu0 }
 0x2cd   : > { %v8050_v5 = vpop.f32.mrb[158].mxu0 }
 0x2ce   : > { %9443 = vst [vmem:[#allocation32_spill] sm:$0xff] %v8050_v5  ;;  %v1617_v44 = vpop.f32.mrb[159].mxu0  ;;  %v9447_v5 = vld [vmem:[#allocation37_spill] sm:$0xff] }
 0x2d0   : > { %2266 = vmatmul.mubr.bf16.gmra.mrb[0].mxu0 %v9444_v49 }
 0x2d1   : > { %2273 = vmatprep.mubr.bf16.mxu0 %v6816_v50 }
 0x2d3   : > { %v8054_v52 = vpop.f32.mrb[160].mxu0 }
 0x2d4   : > { %v1622_v56 = vpop.f32.mrb[161].mxu0 }
 0x2d5   : > { %v8056_v47 = vpop.f32.mrb[162].mxu0 }
 0x2d6   : > { %9445 = vst [vmem:[#allocation33_spill] sm:$0xff] %v8056_v47  ;;  %v1625_v7 = vpop.f32.mrb[163].mxu0 }
 0x2d8   : > { %2274 = vmatmul.mubr.bf16.gmra.mrb[8].mxu0 %v7506_v28 }
 0x2d9   : > { %2281 = vmatprep.mubr.bf16.mxu0 %v7771_v25 }
 0x2db   : > { %v8060_v32 = vpop.f32.mrb[164].mxu0 }
 0x2dc   : > { %9446 = vst [vmem:[#allocation15_spill] sm:$0xff] %v8060_v32  ;;  %v1630_v42 = vpop.f32.mrb[165].mxu0 }
 0x2dd   : > { %v8062_v11 = vpop.f32.mrb[166].mxu0  ;;  %v8066_v49 = vpop.f32.mrb[0].mxu1  ;;  %v587_v42 = vsel %vm7252_vm2, 0, %v7955_v61 }
 0x2de   : > { %v1633_v44 = vpop.f32.mrb[167].mxu0  ;;  %9448 = vst [vmem:[#allocation34_spill] sm:$0xff] %v8066_v49  ;;  %v8068_v56 = vpop.f32.mrb[1].mxu1 }
 0x2df   : > { %9449 = vst [vmem:[#allocation35_spill] sm:$0xff] %v8068_v56  ;;  %v8070_v47 = vpop.f32.mrb[2].mxu1 }
 0x2e0   : > { %2282 = vmatmul.mubr.bf16.gmra.mrb[12].mxu0 %v9447_v5  ;;  %9450 = vst [vmem:[#allocation16_spill] sm:$0xff] %v8070_v47  ;;  %v8075_v32 = vpop.f32.mrb[3].mxu1  ;;  %v9452_v5 = vld [vmem:[#allocation30_spill] sm:$0xff] }
 0x2e1   : > { %2289 = vmatprep.mubr.bf16.mxu0 %v7943_v41  ;;  %v9453_v41 = vld [vmem:[#allocation31_spill] sm:$0xff] }
 0x2e3   : > { %v1636_v50 = vpop.f32.mrb[168].mxu0 }
 0x2e4   : > { %v1638_v7 = vpop.f32.mrb[169].mxu0 }
 0x2e5   : > { %v1639_v28 = vpop.f32.mrb[170].mxu0  ;;  %v8080_v50 = vpop.f32.mrb[4].mxu1 }
 0x2e6   : > { %v1641_v44 = vpop.f32.mrb[171].mxu0  ;;  %9454 = vst [vmem:[#allocation36_spill] sm:$0xff] %v8080_v50  ;;  %v8082_v49 = vpop.f32.mrb[5].mxu1 }
 0x2e7   : > { %9455 = vst [vmem:[#allocation17_spill] sm:$0xff] %v8082_v49  ;;  %v8085_v56 = vpop.f32.mrb[6].mxu1  ;;  %v9482_v25 = vld [vmem:[#allocation16_spill] sm:$0xff] }
 0x2e8   : > { %2290 = vmatmul.mubr.bf16.gmra.mrb[16].mxu0 %v587_v42  ;;  %v8088_v42 = vpop.f32.mrb[7].mxu1 }
 0x2e9   : > { %6169 = vmatprep.mubr.bf16.mxu0 %v9452_v5 }
 0x2f0   : > { %6170 = vmatmul.mubr.bf16.vlgmr.msra.gmra.mrb[4].mxu0 %v9453_v41 }
 0x2f1   : > { %6173 = vmatprep.mubr.bf16.mxu0 %v7539_v36 }
 0x2f3   : > { %v6123_v7 = vpop.f32.mrb[172].mxu0 }
 0x2f4   : > { %v1702_v28 = vadd.f32 %v6123_v7, %v7977_v38  ;;  %v1693_v47 = vpop.f32.mrb[173].mxu0 }
 0x2f5   : > { %v1694_v61 = vadd.f32 %v1693_v47, %v7967_v48  ;;  %v6124_v44 = vpop.f32.mrb[174].mxu0  ;;  %v9456_v47 = vld [vmem:[#allocation38_spill] sm:$0xff] }
 0x2f6   : > { %v8091_v5 = vadd.f32 %v1702_v28, %v7815_v1  ;;  %v1705_v36 = vadd.f32 %v6124_v44, %v7979_v30  ;;  %v1696_v41 = vpop.f32.mrb[175].mxu0 }
 0x2f7   : > { %v8095_v50 = vadd.f32 %v1694_v61, %v7818_v57  ;;  %v1697_v49 = vadd.f32 %v1696_v41, %v7969_v3 }
 0x2f8   : > { %v8099_v38 = vadd.f32 %v1705_v36, %v7821_v15  ;;  %6174 = vmatmul.mubr.bf16.gmra.mrb[20].mxu0 %v7552_v10 }
 0x2f9   : > { %v8103_v48 = vadd.f32 %v1697_v49, %v9456_v47  ;;  %6177 = vmatprep.mubr.bf16.mxu0 %v7559_v46 }
 0x2fb   : > { %9457 = vst [vmem:[#allocation19_spill] sm:$0xff] %v8103_v48  ;;  %v6127_v1 = vpop.f32.mrb[176].mxu0 }
 0x2fc   : > { %v1718_v7 = vadd.f32 %v6127_v1, %v7994_v40  ;;  %v1709_v30 = vpop.f32.mrb[177].mxu0  ;;  %v9461_v40 = vld [vmem:[#allocation39_spill] sm:$0xff] }
 0x2fd   : > { %v1710_v28 = vadd.f32 %v1709_v30, %v7987_v51  ;;  %v6128_v57 = vpop.f32.mrb[178].mxu0  ;;  %v8123_v51 = vpop.f32.mrb[8].mxu1 }
 0x2fe   : > { %v8109_v61 = vadd.f32 %v1718_v7, %v7833_v35  ;;  %v1721_v15 = vadd.f32 %v6128_v57, %v7996_v13  ;;  %v1712_v3 = vpop.f32.mrb[179].mxu0  ;;  %v8125_v36 = vpop.f32.mrb[9].mxu1 }
 0x2ff   : > { %v8113_v10 = vadd.f32 %v1710_v28, %v7836_v9  ;;  %v1713_v49 = vadd.f32 %v1712_v3, %v7989_v45  ;;  %v8128_v9 = vpop.f32.mrb[10].mxu1 }
 0x300   : > { %9458 = vst [vmem:[#allocation20_spill] sm:$0xff] %v8109_v61  ;;  %v8117_v46 = vadd.f32 %v1721_v15, %v7839_v6  ;;  %6178 = vmatmul.mubr.bf16.gmra.mrb[24].mxu0 %v7568_v17  ;;  %v8131_v6 = vpop.f32.mrb[11].mxu1 }
 0x301   : > { %9459 = vst [vmem:[#allocation21_spill] sm:$0xff] %v8113_v10  ;;  %v8121_v44 = vadd.f32 %v1713_v49, %v9461_v40 }
 0x302   : > { %9460 = vst [vmem:[#allocation22_spill] sm:$0xff] %v8117_v46  ;;  %v9480_v46 = vld [vmem:[#allocation35_spill] sm:$0xff] }
 0x303   : > { %9462 = vst [vmem:[#allocation23_spill] sm:$0xff] %v8121_v44  ;;  %v6131_v35 = vpop.f32.mrb[180].mxu0 }
 0x304   : > { %v1734_v13 = vadd.f32 %v6131_v35, %v8006_v12  ;;  %v1725_v41 = vpop.f32.mrb[181].mxu0  ;;  %v8163_v35 = vpop.f32.mrb[12].mxu1 }
 0x305   : > { %v1726_v45 = vadd.f32 %v1725_v41, %v8000_v53  ;;  %v6132_v47 = vpop.f32.mrb[182].mxu0 }
 0x306   : > { %v8134_v17 = vadd.f32 %v1734_v13, %v7853_v62  ;;  %v1737_v1 = vadd.f32 %v6132_v47, %v8008_v26  ;;  %v1728_v7 = vpop.f32.mrb[183].mxu0  ;;  %v8165_v13 = vpop.f32.mrb[13].mxu1 }
 0x307   : > { %v8138_v30 = vadd.f32 %v1726_v45, %v7856_v16  ;;  %v1729_v28 = vadd.f32 %v1728_v7, %v8002_v4  ;;  %v8168_v41 = vpop.f32.mrb[14].mxu1 }
 0x308   : > { %v8142_v12 = vadd.f32 %v1737_v1, %v7859_v55 }
 0x309   : > { %v8145_v57 = vadd.f32 %v1729_v28, %v7863_v58 }
 0x30b   : > { %v6135_v53 = vpop.f32.mrb[184].mxu0 }
 0x30c   : > { %v1750_v15 = vadd.f32 %v6135_v53, %v8018_v19  ;;  %v1741_v3 = vpop.f32.mrb[185].mxu0 }
 0x30d   : > { %v1742_v62 = vadd.f32 %v1741_v3, %v8012_v54  ;;  %v6136_v49 = vpop.f32.mrb[186].mxu0 }
 0x30e   : > { %v8150_v26 = vadd.f32 %v1750_v15, %v7875_v18  ;;  %v1753_v16 = vadd.f32 %v6136_v49, %v8020_v8  ;;  %v1744_v40 = vpop.f32.mrb[187].mxu0 }
 0x30f   : > { %v8154_v4 = vadd.f32 %v1742_v62, %v7878_v29  ;;  %v1745_v55 = vadd.f32 %v1744_v40, %v8014_v14  ;;  %v8171_v14 = vpop.f32.mrb[15].mxu1 }
 0x310   : > { %v8158_v58 = vadd.f32 %v1753_v16, %v7881_v24  ;;  %v9464_v16 = vld [vmem:[#allocation41_spill] sm:$0xff]  ;;  %v8203_v40 = vpop.f32.mrb[16].mxu1 }
 0x311   : > { %v8161_v19 = vadd.f32 %v1745_v55, %v7885_v31  ;;  %v8205_v55 = vpop.f32.mrb[17].mxu1 }
 0x313   : > { %v6139_v54 = vpop.f32.mrb[188].mxu0 }
 0x314   : > { %v1766_v18 = vadd.f32 %v6139_v54, %v8030_v27  ;;  %v1757_v8 = vpop.f32.mrb[189].mxu0  ;;  %v8208_v54 = vpop.f32.mrb[18].mxu1 }
 0x315   : > { %v1758_v29 = vadd.f32 %v1757_v8, %v8024_v33  ;;  %v6140_v45 = vpop.f32.mrb[190].mxu0  ;;  %v9465_v8 = vld [vmem:[#allocation42_spill] sm:$0xff] }
 0x316   : > { %v8174_v24 = vadd.f32 %v1766_v18, %v7891_v23  ;;  %v1769_v31 = vadd.f32 %v6140_v45, %v8032_v0  ;;  %v1760_v47 = vpop.f32.mrb[191].mxu0  ;;  %v9466_v45 = vld [vmem:[#allocation33_spill] sm:$0xff] }
 0x317   : > { %v8178_v1 = vadd.f32 %v1758_v29, %v7894_v22  ;;  %v1761_v7 = vadd.f32 %v1760_v47, %v8026_v37 }
 0x318   : > { %v8182_v27 = vadd.f32 %v1769_v31, %v7897_v43 }
 0x319   : > { %v8185_v28 = vadd.f32 %v1761_v7, %v7901_v63  ;;  %v9463_v63 = vld [vmem:[#allocation40_spill] sm:$0xff]  ;;  %v9467_v7 = vld [vmem:[#allocation43_spill] sm:$0xff] }
 0x31b   : > { %v6143_v33 = vpop.f32.mrb[192].mxu0 }
 0x31c   : > { %v1782_v53 = vadd.f32 %v6143_v33, %v8042_v20  ;;  %v1773_v15 = vpop.f32.mrb[193].mxu0 }
 0x31d   : > { %v1774_v23 = vadd.f32 %v1773_v15, %v8036_v21  ;;  %v6144_v3 = vpop.f32.mrb[194].mxu0 }
 0x31e   : > { %v8190_v0 = vadd.f32 %v1782_v53, %v7907_v2  ;;  %v1785_v22 = vadd.f32 %v6144_v3, %v8044_v59  ;;  %v1776_v62 = vpop.f32.mrb[195].mxu0  ;;  %v9468_v53 = vld [vmem:[#allocation32_spill] sm:$0xff]  ;;  %v6728_v3 = vld [vmem:[#allocation9 + $0x40] sm:$0xff]  }
 0x31f   : > { %v8194_v37 = vadd.f32 %v1774_v23, %v7910_v60  ;;  %v1777_v43 = vadd.f32 %v1776_v62, %v8038_v34  ;;  %v8211_v34 = vpop.f32.mrb[19].mxu1  ;;  %5641 = vmatprep.subr.bf16.mxu1 %v6728_v3 }
 0x320   : > { %v8198_v49 = vadd.f32 %v1785_v22, %v9463_v63  ;;  %v9470_v22 = vld [vmem:[#allocation45_spill] sm:$0xff]  ;;  %v6729_v63 = vld [vmem:[#allocation9] sm:$0xff]  }
 0x321   : > { %v8201_v20 = vadd.f32 %v1777_v43, %v9464_v16  ;;  %v9471_v16 = vld [vmem:[#allocation15_spill] sm:$0xff]  ;;  %5642 = vmatpush3.bf16.msra.mxu1 %v6729_v63 }
 0x323   : > { %v6147_v21 = vpop.f32.mrb[196].mxu0 }
 0x324   : > { %v1798_v2 = vadd.f32 %v6147_v21, %v8054_v52  ;;  %v1789_v59 = vpop.f32.mrb[197].mxu0  ;;  %v9469_v52 = vld [vmem:[#allocation44_spill] sm:$0xff] }
 0x325   : > { %v1790_v60 = vadd.f32 %v1789_v59, %v8048_v39  ;;  %v6148_v18 = vpop.f32.mrb[198].mxu0 }
 0x326   : > { %v8214_v29 = vadd.f32 %v1798_v2, %v9465_v8  ;;  %v1801_v31 = vadd.f32 %v6148_v18, %v9466_v45  ;;  %v1792_v47 = vpop.f32.mrb[199].mxu0  ;;  %v6730_v45 = vld [vmem:[#allocation9 + $0x48] sm:$0xff]  }
 0x327   : > { %v8218_v33 = vadd.f32 %v1790_v60, %v9467_v7  ;;  %v1793_v15 = vadd.f32 %v1792_v47, %v9468_v53  ;;  %v9472_v60 = vld [vmem:[#allocation46_spill] sm:$0xff]  ;;  %v9473_v47 = vld [vmem:[#allocation47_spill] sm:$0xff]  ;;  %5643 = vmatprep.subr.bf16.mxu1 %v6730_v45 }
 0x328   : > { %v8222_v23 = vadd.f32 %v1801_v31, %v9469_v52  ;;  %v6731_v31 = vld [vmem:[#allocation9 + $0x8] sm:$0xff]   ;;  %v6732_v52 = vld [vmem:[#allocation9 + $0x50] sm:$0xff]  }
 0x329   : > { %v8225_v39 = vadd.f32 %v1793_v15, %v9470_v22  ;;  %5644 = vmatpush3.bf16.msra.mxu1 %v6731_v31  ;;  %v6739_v45 = vld [vmem:[#allocation9 + $0x28] sm:$0xff]  }
 0x32a   : > { %5645 = vmatprep.subr.bf16.mxu1 %v6732_v52 }
 0x32b   : > { %v6151_v62 = vpop.f32.mrb[200].mxu0 }
 0x32c   : > { %v1805_v43 = vpop.f32.mrb[201].mxu0  ;;  %v6733_v62 = vld [vmem:[#allocation9 + $0x10] sm:$0xff]  }
 0x32d   : > { %v1806_v21 = vadd.f32 %v1805_v43, %v9471_v16  ;;  %v6152_v2 = vpop.f32.mrb[202].mxu0  ;;  %v6203_v53 = vpop.f32.mrb[20].mxu1  ;;  %5646 = vmatpush3.bf16.msra.mxu1 %v6733_v62  ;;  %v6742_v62 = vld [vmem:[#allocation9 + $0x78] sm:$0xff]  }
 0x32e   : > { %v1808_v59 = vpop.f32.mrb[203].mxu0  ;;  %v8235_v3 = vpop.f32.mrb[21].mxu1  ;;  %v6735_v2 = vld [vmem:[#allocation9 + $0x18] sm:$0xff]  }
 0x32f   : > { %v8229_v18 = vadd.f32 %v1806_v21, %v9472_v60  ;;  %v1809_v8 = vadd.f32 %v1808_v59, %v8062_v11  ;;  %v6204_v43 = vpop.f32.mrb[22].mxu1  ;;  %v6734_v21 = vld [vmem:[#allocation9 + $0x58] sm:$0xff]   ;;  %v6736_v59 = vld [vmem:[#allocation9 + $0x60] sm:$0xff]  }
 0x330   : > { %v8237_v16 = vpop.f32.mrb[23].mxu1  ;;  %5647 = vmatprep.subr.bf16.mxu1 %v6734_v21  ;;  %v6737_v60 = vld [vmem:[#allocation9 + $0x20] sm:$0xff]   ;;  %v6743_v43 = vld [vmem:[#allocation9 + $0x38] sm:$0xff]  }
 0x331   : > { %v8233_v7 = vadd.f32 %v1809_v8, %v9473_v47  ;;  %5648 = vmatpush3.bf16.msra.mxu1 %v6735_v2  ;;  %v6738_v8 = vld [vmem:[#allocation9 + $0x68] sm:$0xff]   ;;  %v6740_v47 = vld [vmem:[#allocation9 + $0x70] sm:$0xff]  }
 0x332   : > { %5649 = vmatprep.subr.bf16.mxu1 %v6736_v59 }
 0x333   : > { %v2155_v15 = vpop.f32.mrb[204].mxu0 }
 0x334   : > { %v2157_v22 = vpop.f32.mrb[205].mxu0  ;;  %v6741_v15 = vld [vmem:[#allocation9 + $0x30] sm:$0xff]  }
 0x335   : > { %v2158_v63 = vpop.f32.mrb[206].mxu0  ;;  %5650 = vmatpush3.bf16.msra.mxu1 %v6737_v60 }
 0x336   : > { %v2160_v11 = vpop.f32.mrb[207].mxu0  ;;  %5651 = vmatprep.subr.bf16.mxu1 %v6738_v8  ;;  %v9474_v63 = vmov 0  }
 0x337   : > { %v2801_v11 = vrot.slane %v9474_v63, 7  ;;  %v6745_v63 = vld [vmem:[#allocation9 + $0x88] sm:$0xff]  }
 0x339   : > { %5652 = vmatpush3.bf16.msra.mxu1 %v6739_v45  ;;  %v8248_v59 = vsel %vm7252_vm2, 0, %v2801_v11 }
 0x33a   : > { %5653 = vmatprep.subr.bf16.mxu1 %v6740_v47  ;;  %9475 = vst [vmem:[#allocation24_spill] sm:$0xff] %v8248_v59 }
 0x33d   : > { %5654 = vmatpush3.bf16.msra.mxu1 %v6741_v15 }
 0x33e   : > { %5655 = vmatprep.subr.bf16.mxu1 %v6742_v62 }
 0x341   : > { %5656 = vmatpush3.bf16.msra.mxu1 %v6743_v43 }
 0x343   : > { %v8239_v31 = vpop.f32.mrb[208].mxu0 }
 0x344   : > { %v2173_v53 = vpop.f32.mrb[209].mxu0  ;;  %3257 = vmatmul.mubr.bf16.vlgmr.msra.gmra.mrb[24].mxu1 %v8248_v59 }
 0x345   : > { %v8241_v52 = vpop.f32.mrb[210].mxu0 }
 0x346   : > { %v2176_v22 = vpop.f32.mrb[211].mxu0 }
 0x347   : > { %v6744_v22 = vld [vmem:[#allocation9 + $0x80] sm:$0xff]  }
 0x348   : > { %6205 = vmatprep.subr.bf16.mxu1 %v6744_v22 }
 0x349   : > { %6206 = vmatpush3.bf16.msra.mxu1 %v6744_v22 }
 0x34a   : > { %6207 = vmatprep.subr.bf16.mxu1 %v6745_v63 }
 0x34b   : > { %v8244_v21 = vpop.f32.mrb[212].mxu0 }
 0x34c   : > { %v2181_v2 = vpop.f32.mrb[213].mxu0 }
 0x34d   : > { %v8250_v60 = vpop.f32.mrb[214].mxu0  ;;  %6208 = vmatpush3.bf16.msra.mxu1 %v6745_v63 }
 0x34e   : > { %v2184_v8 = vpop.f32.mrb[215].mxu0 }
 0x353   : > { %v8253_v45 = vpop.f32.mrb[216].mxu0 }
 0x354   : > { %9476 = vst [vmem:[#allocation25_spill] sm:$0xff] %v8253_v45  ;;  %v2189_v47 = vpop.f32.mrb[217].mxu0 }
 0x355   : > { %v8255_v53 = vpop.f32.mrb[218].mxu0  ;;  %v8265_v47 = vld [vmem:[%s9304_s3] ss:$0 sm:$0xff] }
 0x356   : > { %9477 = vst [vmem:[#allocation26_spill] sm:$0xff] %v8255_v53  ;;  %v2192_v15 = vpop.f32.mrb[219].mxu0 }
 0x35b   : > { %v8257_v62 = vpop.f32.mrb[220].mxu0 }
 0x35c   : > { %9478 = vst [vmem:[#allocation27_spill] sm:$0xff] %v8257_v62  ;;  %v2197_v43 = vpop.f32.mrb[221].mxu0 }
 0x35d   : > { %v8259_v2 = vpop.f32.mrb[222].mxu0 }
 0x35e   : > { %9479 = vst [vmem:[#allocation28_spill] sm:$0xff] %v8259_v2  ;;  %v2200_v11 = vpop.f32.mrb[223].mxu0 }
 0x35f   : > { %v8272_v11 = vld [vmem:[%s9304_s3 + $0x1] ss:$0 sm:$0xff] }
 0x363   : > { %v2203_v44 = vpop.f32.mrb[224].mxu0 }
 0x364   : > { %v2381_v59 = vadd.f32 %v9480_v46, %v2203_v44  ;;  %v2205_v8 = vpop.f32.mrb[225].mxu0 }
 0x365   : > { %v2206_v15 = vpop.f32.mrb[226].mxu0 }
 0x366   : > { %v2523_v53 = vadd.f32 %v2381_v59, %v8138_v30  ;;  %v2384_v22 = vadd.f32 %v8075_v32, %v2206_v15  ;;  %v2208_v43 = vpop.f32.mrb[227].mxu0  ;;  %v9481_v30 = vld [vmem:[#allocation34_spill] sm:$0xff] }
 0x368   : > { %v2636_v46 = vmul.f32 %v8265_v47, %v2523_v53  ;;  %v2524_v44 = vadd.f32 %v2384_v22, %v8145_v57 }
 0x36a   : > { %v2677_v8 = vadd.f32 %v8272_v11, %v2636_v46  ;;  %v2637_v10 = vmul.f32 %v8265_v47, %v2524_v44 }
 0x36b   : > { %v2211_v2 = vpop.f32.mrb[228].mxu0 }
 0x36c   : > { %v2678_v63 = vadd.f32 %v8272_v11, %v2637_v10  ;;  %v2389_v59 = vadd.f32 %v9481_v30, %v2211_v2  ;;  %v2213_v32 = vpop.f32.mrb[229].mxu0  ;;  %v2713_v43 = vmax.f32 %v2677_v8, 0.0  ;;  %v6746_v2 = vld [vmem:[#allocation9 + $0x90] sm:$0xff]  }
 0x36d   : > { %v2214_v15 = vpop.f32.mrb[230].mxu0  ;;  %6209 = vmatprep.subr.bf16.mxu1 %v6746_v2 }
 0x36e   : > { %v2714_v61 = vmax.f32 %v2678_v63, 0.0  ;;  %v2525_v45 = vadd.f32 %v2389_v59, %v8134_v17  ;;  %v2392_v62 = vadd.f32 %v9482_v25, %v2214_v15  ;;  %v2216_v53 = vpop.f32.mrb[231].mxu0  ;;  %v9483_v17 = vld [vmem:[#allocation17_spill] sm:$0xff]  ;;  %6210 = vmatpush3.bf16.msra.mxu1 %v6746_v2 }
 0x370   : > { %v8282_v48 = vpack.c.bf16 %v2714_v61, %v2713_v43  ;;  %v2638_v57 = vmul.f32 %v8265_v47, %v2525_v45  ;;  %v2526_v22 = vadd.f32 %v2392_v62, %v8142_v12 }
 0x372   : > { %v2679_v46 = vadd.f32 %v8272_v11, %v2638_v57  ;;  %v2639_v10 = vmul.f32 %v8265_v47, %v2526_v22  ;;  %v2844_v44 = vshll.u32 %v8282_v48, 16  ;;  %v2841_v45 = vshrl.u32 %v8282_v48, 16 }
 0x373   : > { %v2219_v8 = vpop.f32.mrb[232].mxu0 }
 0x374   : > { %v2680_v63 = vadd.f32 %v8272_v11, %v2639_v10  ;;  %v2397_v30 = vadd.f32 %v9483_v17, %v2219_v8  ;;  %v2221_v25 = vpop.f32.mrb[233].mxu0  ;;  %v2972_v12 = vrot.slane %v2844_v44, 1  ;;  %v2715_v62 = vmax.f32 %v2679_v46, 0.0 }
 0x375   : > { %v2222_v61 = vpop.f32.mrb[234].mxu0 }
 0x376   : > { %v2716_v59 = vmax.f32 %v2680_v63, 0.0  ;;  %v2527_v32 = vadd.f32 %v2397_v30, %v8154_v4  ;;  %v2400_v15 = vadd.f32 %v8088_v42, %v2222_v61  ;;  %v2224_v43 = vpop.f32.mrb[235].mxu0  ;;  %v8298_v53 = vor.u32 %v2972_v12, %v2841_v45  ;;  %v9484_v63 = vld [vmem:[#allocation36_spill] sm:$0xff] }
 0x378   : > { %v8300_v57 = vpack.c.bf16 %v2716_v59, %v2715_v62  ;;  %v2640_v22 = vmul.f32 %v8265_v47, %v2527_v32  ;;  %v2528_v10 = vadd.f32 %v2400_v15, %v8161_v19 }
 0x37a   : > { %v2681_v2 = vadd.f32 %v8272_v11, %v2640_v22  ;;  %v2641_v46 = vmul.f32 %v8265_v47, %v2528_v10  ;;  %v2851_v8 = vshll.u32 %v8300_v57, 16  ;;  %v2848_v61 = vshrl.u32 %v8300_v57, 16 }
 0x37b   : > { %v2227_v4 = vpop.f32.mrb[236].mxu0 }
 0x37c   : > { %v2682_v42 = vadd.f32 %v8272_v11, %v2641_v46  ;;  %v2405_v17 = vadd.f32 %v9484_v63, %v2227_v4  ;;  %v2229_v30 = vpop.f32.mrb[237].mxu0  ;;  %v2974_v12 = vrot.slane %v2851_v8, 1  ;;  %v2717_v62 = vmax.f32 %v2681_v2, 0.0 }
 0x37d   : > { %v2230_v25 = vpop.f32.mrb[238].mxu0 }
 0x37e   : > { %v2718_v19 = vmax.f32 %v2682_v42, 0.0  ;;  %v2529_v59 = vadd.f32 %v2405_v17, %v8150_v26  ;;  %v2408_v32 = vadd.f32 %v8085_v56, %v2230_v25  ;;  %v2232_v15 = vpop.f32.mrb[239].mxu0  ;;  %v8316_v43 = vor.u32 %v2974_v12, %v2848_v61  ;;  %v6747_v42 = vld [vmem:[#allocation9 + $0x98] sm:$0xff]  }
 0x37f   : > { %6211 = vmatprep.subr.bf16.mxu1 %v6747_v42 }
 0x380   : > { %v8318_v22 = vpack.c.bf16 %v2718_v19, %v2717_v62  ;;  %v2642_v10 = vmul.f32 %v8265_v47, %v2529_v59  ;;  %v2530_v46 = vadd.f32 %v2408_v32, %v8158_v58  ;;  %6212 = vmatpush3.bf16.msra.mxu1 %v6747_v42 }
 0x382   : > { %v2683_v4 = vadd.f32 %v8272_v11, %v2642_v10  ;;  %v2643_v2 = vmul.f32 %v8265_v47, %v2530_v46  ;;  %v2858_v26 = vshll.u32 %v8318_v22, 16  ;;  %v2855_v12 = vshrl.u32 %v8318_v22, 16 }
 0x383   : > { %v2235_v63 = vpop.f32.mrb[240].mxu0 }
 0x384   : > { %v2684_v56 = vadd.f32 %v8272_v11, %v2643_v2  ;;  %v2413_v17 = vadd.f32 %v8125_v36, %v2235_v63  ;;  %v2237_v30 = vpop.f32.mrb[241].mxu0  ;;  %v2976_v58 = vrot.slane %v2858_v26, 1  ;;  %v2719_v62 = vmax.f32 %v2683_v4, 0.0 }
 0x385   : > { %v2238_v25 = vpop.f32.mrb[242].mxu0 }
 0x386   : > { %v2720_v19 = vmax.f32 %v2684_v56, 0.0  ;;  %v2531_v59 = vadd.f32 %v2413_v17, %v8178_v1  ;;  %v2416_v32 = vadd.f32 %v8131_v6, %v2238_v25  ;;  %v2240_v15 = vpop.f32.mrb[243].mxu0  ;;  %v8334_v10 = vor.u32 %v2976_v58, %v2855_v12 }
 0x388   : > { %v8336_v36 = vpack.c.bf16 %v2720_v19, %v2719_v62  ;;  %v2644_v46 = vmul.f32 %v8265_v47, %v2531_v59  ;;  %v2532_v2 = vadd.f32 %v2416_v32, %v8185_v28 }
 0x38a   : > { %v2685_v42 = vadd.f32 %v8272_v11, %v2644_v46  ;;  %v2645_v4 = vmul.f32 %v8265_v47, %v2532_v2  ;;  %v2865_v63 = vshll.u32 %v8336_v36, 16  ;;  %v2862_v25 = vshrl.u32 %v8336_v36, 16 }
 0x38b   : > { %v2243_v1 = vpop.f32.mrb[244].mxu0 }
 0x38c   : > { %v2686_v6 = vadd.f32 %v8272_v11, %v2645_v4  ;;  %v2421_v56 = vadd.f32 %v8123_v51, %v2243_v1  ;;  %v2245_v17 = vpop.f32.mrb[245].mxu0  ;;  %v2978_v58 = vrot.slane %v2865_v63, 1  ;;  %v2721_v62 = vmax.f32 %v2685_v42, 0.0  ;;  %v6748_v1 = vld [vmem:[#allocation9 + $0xa0] sm:$0xff]  }
 0x38d   : > { %v2246_v30 = vpop.f32.mrb[246].mxu0  ;;  %6213 = vmatprep.subr.bf16.mxu1 %v6748_v1 }
 0x38e   : > { %v2722_v28 = vmax.f32 %v2686_v6, 0.0  ;;  %v2533_v19 = vadd.f32 %v2421_v56, %v8174_v24  ;;  %v2424_v59 = vadd.f32 %v8128_v9, %v2246_v30  ;;  %v2248_v32 = vpop.f32.mrb[247].mxu0  ;;  %v8352_v15 = vor.u32 %v2978_v58, %v2862_v25  ;;  %6214 = vmatpush3.bf16.msra.mxu1 %v6748_v1 }
 0x390   : > { %v8354_v46 = vpack.c.bf16 %v2722_v28, %v2721_v62  ;;  %v2646_v51 = vmul.f32 %v8265_v47, %v2533_v19  ;;  %v2534_v2 = vadd.f32 %v2424_v59, %v8182_v27 }
 0x392   : > { %v2687_v4 = vadd.f32 %v8272_v11, %v2646_v51  ;;  %v2647_v42 = vmul.f32 %v8265_v47, %v2534_v2  ;;  %v2872_v24 = vshll.u32 %v8354_v46, 16  ;;  %v2869_v58 = vshrl.u32 %v8354_v46, 16 }
 0x393   : > { %v2251_v6 = vpop.f32.mrb[248].mxu0 }
 0x394   : > { %v2688_v9 = vadd.f32 %v8272_v11, %v2647_v42  ;;  %v2429_v56 = vadd.f32 %v8165_v13, %v2251_v6  ;;  %v2253_v17 = vpop.f32.mrb[249].mxu0  ;;  %v2980_v27 = vrot.slane %v2872_v24, 1  ;;  %v2723_v62 = vmax.f32 %v2687_v4, 0.0 }
 0x395   : > { %v2254_v30 = vpop.f32.mrb[250].mxu0 }
 0x396   : > { %v2724_v28 = vmax.f32 %v2688_v9, 0.0  ;;  %v2535_v19 = vadd.f32 %v2429_v56, %v8194_v37  ;;  %v2432_v59 = vadd.f32 %v8171_v14, %v2254_v30  ;;  %v2256_v32 = vpop.f32.mrb[251].mxu0  ;;  %v8370_v51 = vor.u32 %v2980_v27, %v2869_v58 }
 0x398   : > { %v8372_v13 = vpack.c.bf16 %v2724_v28, %v2723_v62  ;;  %v2648_v2 = vmul.f32 %v8265_v47, %v2535_v19  ;;  %v2536_v42 = vadd.f32 %v2432_v59, %v8201_v20 }
 0x39a   : > { %v2689_v1 = vadd.f32 %v8272_v11, %v2648_v2  ;;  %v2649_v4 = vmul.f32 %v8265_v47, %v2536_v42  ;;  %v2879_v6 = vshll.u32 %v8372_v13, 16  ;;  %v2876_v30 = vshrl.u32 %v8372_v13, 16 }
 0x39b   : > { %v2259_v37 = vpop.f32.mrb[252].mxu0 }
 0x39c   : > { %v2690_v14 = vadd.f32 %v8272_v11, %v2649_v4  ;;  %v2437_v9 = vadd.f32 %v8163_v35, %v2259_v37  ;;  %v2261_v56 = vpop.f32.mrb[253].mxu0  ;;  %v2982_v27 = vrot.slane %v2879_v6, 1  ;;  %v2725_v62 = vmax.f32 %v2689_v1, 0.0  ;;  %v6749_v37 = vld [vmem:[#allocation9 + $0xa8] sm:$0xff]  }
 0x39d   : > { %v2262_v17 = vpop.f32.mrb[254].mxu0  ;;  %6215 = vmatprep.subr.bf16.mxu1 %v6749_v37 }
 0x39e   : > { %v2726_v20 = vmax.f32 %v2690_v14, 0.0  ;;  %v2537_v28 = vadd.f32 %v2437_v9, %v8190_v0  ;;  %v2440_v19 = vadd.f32 %v8168_v41, %v2262_v17  ;;  %v2264_v59 = vpop.f32.mrb[255].mxu0  ;;  %v8388_v32 = vor.u32 %v2982_v27, %v2876_v30  ;;  %6216 = vmatpush3.bf16.msra.mxu1 %v6749_v37 }
 0x3a0   : > { %v8390_v2 = vpack.c.bf16 %v2726_v20, %v2725_v62  ;;  %v2650_v35 = vmul.f32 %v8265_v47, %v2537_v28  ;;  %v2538_v42 = vadd.f32 %v2440_v19, %v8198_v49 }
 0x3a2   : > { %v2691_v4 = vadd.f32 %v8272_v11, %v2650_v35  ;;  %v2651_v1 = vmul.f32 %v8265_v47, %v2538_v42  ;;  %v9360_v0 = vshll.u32 %v8390_v2, 16  ;;  %v2883_v27 = vshrl.u32 %v8390_v2, 16 }
 0x3a3   : > { %v2267_v14 = vpop.f32.mrb[0].mxu0 }
 0x3a4   : > { %v2692_v41 = vadd.f32 %v8272_v11, %v2651_v1  ;;  %v2445_v9 = vadd.f32 %v8205_v55, %v2267_v14  ;;  %v2269_v56 = vpop.f32.mrb[1].mxu0  ;;  %v2984_v49 = vrot.slane %v9360_v0, 1  ;;  %v2727_v62 = vmax.f32 %v2691_v4, 0.0 }
 0x3a5   : > { %v2270_v17 = vpop.f32.mrb[2].mxu0 }
 0x3a6   : > { %v2728_v20 = vmax.f32 %v2692_v41, 0.0  ;;  %v2539_v28 = vadd.f32 %v2445_v9, %v8218_v33  ;;  %v2448_v19 = vadd.f32 %v8211_v34, %v2270_v17  ;;  %v2272_v59 = vpop.f32.mrb[3].mxu0  ;;  %v8406_v35 = vor.u32 %v2984_v49, %v2883_v27 }
 0x3a8   : > { %v8408_v55 = vpack.c.bf16 %v2728_v20, %v2727_v62  ;;  %v2652_v42 = vmul.f32 %v8265_v47, %v2539_v28  ;;  %v2540_v1 = vadd.f32 %v2448_v19, %v8225_v39 }
 0x3aa   : > { %v2693_v37 = vadd.f32 %v8272_v11, %v2652_v42  ;;  %v2653_v4 = vmul.f32 %v8265_v47, %v2540_v1  ;;  %v9358_v14 = vshll.u32 %v8408_v55, 16  ;;  %v9359_v17 = vshrl.u32 %v8408_v55, 16 }
 0x3ab   : > { %v2275_v33 = vpop.f32.mrb[8].mxu0 }
 0x3ac   : > { %v2694_v34 = vadd.f32 %v8272_v11, %v2653_v4  ;;  %v2453_v41 = vadd.f32 %v8203_v40, %v2275_v33  ;;  %v2277_v9 = vpop.f32.mrb[9].mxu0  ;;  %v2986_v49 = vrot.slane %v9358_v14, 1  ;;  %v2729_v62 = vmax.f32 %v2693_v37, 0.0  ;;  %v6750_v33 = vld [vmem:[#allocation9 + $0xb0] sm:$0xff]   ;;  %v9493_v14 = vld [vmem:[#allocation26_spill] sm:$0xff] }
 0x3ad   : > { %v2278_v56 = vpop.f32.mrb[10].mxu0  ;;  %6217 = vmatprep.subr.bf16.mxu1 %v6750_v33 }
 0x3ae   : > { %v2730_v39 = vmax.f32 %v2694_v34, 0.0  ;;  %v2541_v20 = vadd.f32 %v2453_v41, %v8214_v29  ;;  %v2456_v28 = vadd.f32 %v8208_v54, %v2278_v56  ;;  %v2280_v19 = vpop.f32.mrb[11].mxu0  ;;  %v8424_v59 = vor.u32 %v2986_v49, %v9359_v17  ;;  %6218 = vmatpush3.bf16.msra.mxu1 %v6750_v33 }
 0x3b0   : > { %v8426_v42 = vpack.c.bf16 %v2730_v39, %v2729_v62  ;;  %v2654_v40 = vmul.f32 %v8265_v47, %v2541_v20  ;;  %v2542_v1 = vadd.f32 %v2456_v28, %v8222_v23 }
 0x3b2   : > { %9485 = vst [vmem:[#allocation29_spill] sm:$0xff] %v8426_v42  ;;  %v2695_v4 = vadd.f32 %v8272_v11, %v2654_v40  ;;  %v2655_v37 = vmul.f32 %v8265_v47, %v2542_v1  ;;  %v9356_v29 = vshll.u32 %v8426_v42, 16  ;;  %v9357_v49 = vshrl.u32 %v8426_v42, 16 }
 0x3b3   : > { %v2283_v34 = vpop.f32.mrb[12].mxu0 }
 0x3b4   : > { %v2696_v54 = vadd.f32 %v8272_v11, %v2655_v37  ;;  %v2461_v41 = vadd.f32 %v8235_v3, %v2283_v34  ;;  %v2285_v9 = vpop.f32.mrb[13].mxu0  ;;  %v2988_v23 = vrot.slane %v9356_v29, 1  ;;  %v2731_v62 = vmax.f32 %v2695_v4, 0.0 }
 0x3b5   : > { %v2286_v56 = vpop.f32.mrb[14].mxu0 }
 0x3b6   : > { %v2732_v39 = vmax.f32 %v2696_v54, 0.0  ;;  %v2543_v20 = vadd.f32 %v2461_v41, %v8229_v18  ;;  %v2464_v28 = vadd.f32 %v8237_v16, %v2286_v56  ;;  %v2288_v19 = vpop.f32.mrb[15].mxu0  ;;  %v8442_v40 = vor.u32 %v2988_v23, %v9357_v49  ;;  %v9492_v49 = vld [vmem:[#allocation21_spill] sm:$0xff] }
 0x3b8   : > { %v8444_v3 = vpack.c.bf16 %v2732_v39, %v2731_v62  ;;  %v2656_v1 = vmul.f32 %v8265_v47, %v2543_v20  ;;  %v2544_v37 = vadd.f32 %v2464_v28, %v8233_v7  ;;  %v6751_v62 = vld [vmem:[#allocation9 + $0xb8] sm:$0xff]  }
 0x3b9   : > { %6219 = vmatprep.subr.bf16.mxu1 %v6751_v62 }
 0x3ba   : > { %v2697_v33 = vadd.f32 %v8272_v11, %v2656_v1  ;;  %v2657_v4 = vmul.f32 %v8265_v47, %v2544_v37  ;;  %6220 = vmatpush3.bf16.msra.mxu1 %v6751_v62 }
 0x3bb   : > { %v2291_v34 = vpop.f32.mrb[16].mxu0 }
 0x3bc   : > { %v2698_v18 = vadd.f32 %v8272_v11, %v2657_v4  ;;  %v2293_v54 = vpop.f32.mrb[17].mxu0  ;;  %v2733_v41 = vmax.f32 %v2697_v33, 0.0 }
 0x3bd   : > { %v2294_v16 = vpop.f32.mrb[18].mxu0 }
 0x3be   : > { %v2734_v9 = vmax.f32 %v2698_v18, 0.0  ;;  %v2296_v56 = vpop.f32.mrb[19].mxu0 }
 0x3c0   : > { %v8451_v23 = vpack.c.bf16 %v2734_v9, %v2733_v41 }
 0x3c3   : > { %v6171_v39 = vpop.f32.mrb[4].mxu0 }
 0x3c4   : > { %v2626_v20 = vmul.f32 %v6171_v39, %v8265_v47  ;;  %v2332_v19 = vpop.f32.mrb[5].mxu0 }
 0x3c5   : > { %v6172_v7 = vpop.f32.mrb[6].mxu0 }
 0x3c6   : > { %v2667_v28 = vadd.f32 %v8272_v11, %v2626_v20  ;;  %v2627_v1 = vmul.f32 %v6172_v7, %v8265_v47  ;;  %v2335_v37 = vpop.f32.mrb[7].mxu0 }
 0x3c8   : > { %v2668_v4 = vadd.f32 %v8272_v11, %v2627_v1  ;;  %v2703_v33 = vmax.f32 %v2667_v28, 0.0 }
 0x3ca   : > { %v2704_v34 = vmax.f32 %v2668_v4, 0.0 }
 0x3cb   : > { %v6175_v18 = vpop.f32.mrb[20].mxu0 }
 0x3cc   : > { %v8457_v54 = vpack.c.bf16 %v2704_v34, %v2703_v33  ;;  %v2357_v16 = vadd.f32 %v6175_v18, %v8244_v21  ;;  %v2348_v41 = vpop.f32.mrb[21].mxu0 }
 0x3cd   : > { %v2349_v9 = vadd.f32 %v2348_v41, %v8239_v31  ;;  %v6176_v56 = vpop.f32.mrb[22].mxu0 }
 0x3ce   : > { %v2517_v62 = vadd.f32 %v2357_v16, %v8091_v5  ;;  %v2360_v39 = vadd.f32 %v6176_v56, %v8250_v60  ;;  %v2351_v20 = vpop.f32.mrb[23].mxu0  ;;  %3264 = vmatprep.mubr.bf16.mxu1 %v8457_v54  ;;  %v2806_v19 = vshrl.u32 %v8457_v54, 16  ;;  %v2809_v7 = vshll.u32 %v8457_v54, 16  ;;  %v9486_v60 = vld [vmem:[#allocation19_spill] sm:$0xff] }
 0x3cf   : > { %v2515_v28 = vadd.f32 %v2349_v9, %v8095_v50  ;;  %v2352_v1 = vadd.f32 %v2351_v20, %v8241_v52  ;;  %v6752_v50 = vld [vmem:[#allocation9 + $0x100] sm:$0xff]  }
 0x3d0   : > { %v2630_v21 = vmul.f32 %v8265_v47, %v2517_v62  ;;  %v2518_v31 = vadd.f32 %v2360_v39, %v8099_v38  ;;  %v2808_v37 = vrot.slane %v2806_v19, 7  ;;  %v2962_v4 = vrot.slane %v2809_v7, 1  ;;  %v9487_v62 = vld [vmem:[#allocation27_spill] sm:$0xff]  ;;  %5777 = vmatprep.subr.bf16.mxu1 %v6752_v50 }
 0x3d1   : > { %v2628_v5 = vmul.f32 %v8265_v47, %v2515_v28  ;;  %v2516_v33 = vadd.f32 %v2352_v1, %v9486_v60  ;;  %v6779_v28 = vld [vmem:[#allocation9 + $0x188] sm:$0xff]  }
 0x3d2   : > { %v2671_v34 = vadd.f32 %v8272_v11, %v2630_v21  ;;  %v2631_v18 = vmul.f32 %v8265_v47, %v2518_v31  ;;  %v2811_v16 = vor.u32 %v2809_v7, %v2808_v37  ;;  %v8474_v41 = vor.u32 %v2962_v4, %v2806_v19  ;;  %v9489_v19 = vld [vmem:[#allocation25_spill] sm:$0xff] }
 0x3d3   : > { %v2669_v52 = vadd.f32 %v8272_v11, %v2628_v5  ;;  %v2629_v9 = vmul.f32 %v8265_v47, %v2516_v33  ;;  %v6179_v56 = vpop.f32.mrb[24].mxu0  ;;  %v9490_v5 = vld [vmem:[#allocation20_spill] sm:$0xff] }
 0x3d4   : > { %v2672_v38 = vadd.f32 %v8272_v11, %v2631_v18  ;;  %v2373_v39 = vadd.f32 %v6179_v56, %v9487_v62  ;;  %v2364_v20 = vpop.f32.mrb[25].mxu0  ;;  %v8482_v1 = vsel %vm7252_vm2, 0, %v2811_v16  ;;  %v2707_v37 = vmax.f32 %v2671_v34, 0.0  ;;  %v9491_v33 = vld [vmem:[#allocation28_spill] sm:$0xff] }
 0x3d5   : > { %v2670_v7 = vadd.f32 %v8272_v11, %v2629_v9  ;;  %v2365_v21 = vadd.f32 %v2364_v20, %v9489_v19  ;;  %v6180_v31 = vpop.f32.mrb[26].mxu0  ;;  %3265 = vmatmul.mubr.bf16.gmra.mrb[28].mxu1 %v8482_v1  ;;  %v2705_v62 = vmax.f32 %v2669_v52, 0.0  ;;  %v9494_v20 = vld [vmem:[#allocation22_spill] sm:$0xff] }
 0x3d6   : > { %v2708_v4 = vmax.f32 %v2672_v38, 0.0  ;;  %v2521_v60 = vadd.f32 %v2373_v39, %v9490_v5  ;;  %v2376_v18 = vadd.f32 %v6180_v31, %v9491_v33  ;;  %v2367_v56 = vpop.f32.mrb[27].mxu0  ;;  %v9495_v38 = vld [vmem:[#allocation23_spill] sm:$0xff] }
 0x3d7   : > { %v2706_v29 = vmax.f32 %v2670_v7, 0.0  ;;  %v2519_v16 = vadd.f32 %v2365_v21, %v9492_v49  ;;  %v2368_v50 = vadd.f32 %v2367_v56, %v9493_v14 }
 0x3d8   : > { %v8491_v17 = vpack.c.bf16 %v2708_v4, %v2707_v37  ;;  %v2634_v9 = vmul.f32 %v8265_v47, %v2521_v60  ;;  %v2522_v19 = vadd.f32 %v2376_v18, %v9494_v20 }
 0x3d9   : > { %v8495_v0 = vpack.c.bf16 %v2706_v29, %v2705_v62  ;;  %v2632_v34 = vmul.f32 %v8265_v47, %v2519_v16  ;;  %v2520_v39 = vadd.f32 %v2368_v50, %v9495_v38 }
 0x3da   : > { %v2675_v31 = vadd.f32 %v8272_v11, %v2634_v9  ;;  %v2635_v52 = vmul.f32 %v8265_v47, %v2522_v19  ;;  %v2823_v49 = vshll.u32 %v8491_v17, 16  ;;  %v2820_v4 = vshrl.u32 %v8491_v17, 16 }
 0x3db   : > { %v2673_v14 = vadd.f32 %v8272_v11, %v2632_v34  ;;  %v2633_v7 = vmul.f32 %v8265_v47, %v2520_v39  ;;  %3272 = vmatprep.mubr.bf16.mxu1 %v8495_v0  ;;  %v2813_v21 = vshrl.u32 %v8495_v0, 16  ;;  %v2816_v29 = vshll.u32 %v8495_v0, 16 }
 0x3dc   : > { %v2676_v37 = vadd.f32 %v8272_v11, %v2635_v52  ;;  %v2966_v5 = vrot.slane %v2823_v49, 1  ;;  %v2711_v56 = vmax.f32 %v2675_v31, 0.0 }
 0x3dd   : > { %v2674_v60 = vadd.f32 %v8272_v11, %v2633_v7  ;;  %v2815_v33 = vrot.slane %v2813_v21, 7  ;;  %v2964_v18 = vrot.slane %v2816_v29, 1  ;;  %v2709_v47 = vmax.f32 %v2673_v14, 0.0 }
 0x3de   : > { %v2712_v62 = vmax.f32 %v2676_v37, 0.0  ;;  %v8510_v16 = vor.u32 %v2966_v5, %v2820_v4  ;;  %v2822_v11 = vrot.slane %v2820_v4, 7 }
 0x3df   : > { %v2710_v50 = vmax.f32 %v2674_v60, 0.0  ;;  %v2818_v9 = vor.u32 %v2816_v29, %v2815_v33  ;;  %v8512_v20 = vor.u32 %v2964_v18, %v2813_v21 }
 0x3e0   : > { %v8514_v19 = vpack.c.bf16 %v2712_v62, %v2711_v56  ;;  %v2825_v7 = vor.u32 %v2823_v49, %v2822_v11  ;;  %v2850_v11 = vrot.slane %v2848_v61, 7 }
 0x3e1   : > { %v8516_v34 = vpack.c.bf16 %v2710_v50, %v2709_v47  ;;  %v8520_v38 = vsel %vm7252_vm2, 0, %v2818_v9  ;;  %v2843_v47 = vrot.slane %v2841_v45, 7 }
 0x3e2   : > { %3273 = vmatmul.mubr.bf16.gmra.mrb[32].mxu1 %v8520_v38  ;;  %v2837_v39 = vshll.u32 %v8514_v19, 16  ;;  %v2834_v52 = vshrl.u32 %v8514_v19, 16  ;;  %v8534_v4 = vsel %vm7252_vm2, 0, %v2825_v7  ;;  %v2853_v45 = vor.u32 %v2851_v8, %v2850_v11 }
 0x3e3   : > { %3280 = vmatprep.mubr.bf16.mxu1 %v8491_v17  ;;  %v2830_v31 = vshll.u32 %v8516_v34, 16  ;;  %v2827_v21 = vshrl.u32 %v8516_v34, 16  ;;  %v2846_v50 = vor.u32 %v2844_v44, %v2843_v47  ;;  %v2857_v44 = vrot.slane %v2855_v12, 7 }
 0x3e4   : > { %v2970_v14 = vrot.slane %v2837_v39, 1  ;;  %v2836_v18 = vrot.slane %v2834_v52, 7  ;;  %v2864_v8 = vrot.slane %v2862_v25, 7 }
 0x3e5   : > { %v2968_v29 = vrot.slane %v2830_v31, 1  ;;  %v2829_v60 = vrot.slane %v2827_v21, 7  ;;  %v8556_v9 = vsel %vm7252_vm2, 0, %v2846_v50  ;;  %v2860_v61 = vor.u32 %v2858_v26, %v2857_v44 }
 0x3e6   : > { %v8528_v37 = vor.u32 %v2970_v14, %v2834_v52  ;;  %v2839_v56 = vor.u32 %v2837_v39, %v2836_v18  ;;  %v8566_v39 = vsel %vm7252_vm2, 0, %v2853_v45  ;;  %v2867_v12 = vor.u32 %v2865_v63, %v2864_v8 }
 0x3e7   : > { %v8530_v5 = vor.u32 %v2968_v29, %v2827_v21  ;;  %v2832_v33 = vor.u32 %v2830_v31, %v2829_v60  ;;  %v8576_v31 = vsel %vm7252_vm2, 0, %v2860_v61  ;;  %v2871_v26 = vrot.slane %v2869_v58, 7 }
 0x3e8   : > { %v8546_v62 = vsel %vm7252_vm2, 0, %v2839_v56  ;;  %v8586_v52 = vsel %vm7252_vm2, 0, %v2867_v12  ;;  %v2878_v63 = vrot.slane %v2876_v30, 7  ;;  %v2885_v30 = vrot.slane %v2883_v27, 7 }
 0x3e9   : > { %v8540_v49 = vsel %vm7252_vm2, 0, %v2832_v33  ;;  %v2874_v25 = vor.u32 %v2872_v24, %v2871_v26  ;;  %v9496_v56 = vshll.u32 %v8390_v2, 16  ;;  %v9497_v50 = vshrl.u32 %v8408_v55, 16 }
 0x3ea   : > { %3281 = vmatmul.mubr.bf16.gmra.mrb[36].mxu1 %v8534_v4  ;;  %v2881_v60 = vor.u32 %v2879_v6, %v2878_v63  ;;  %v9498_v27 = vshll.u32 %v8408_v55, 16  ;;  %v9499_v61 = vshrl.u32 %v8426_v42, 16  ;;  %v9500_v12 = vshll.u32 %v8426_v42, 16 }
 0x3eb   : > { %3288 = vmatprep.mubr.bf16.mxu1 %v8516_v34  ;;  %v8596_v14 = vsel %vm7252_vm2, 0, %v2874_v25  ;;  %v2888_v47 = vor.u32 %v9496_v56, %v2885_v30  ;;  %v2892_v11 = vrot.slane %v9497_v50, 7  ;;  %v2904_v25 = vshrl.u32 %v8444_v3, 16  ;;  %v6753_v50 = vld [vmem:[#allocation9 + $0xc0] sm:$0xff]  }
 0x3ec   : > { %v8610_v18 = vsel %vm7252_vm2, 0, %v2881_v60  ;;  %v2899_v8 = vrot.slane %v9499_v61, 7  ;;  %v6755_v61 = vld [vmem:[#allocation9 + $0xc8] sm:$0xff]   ;;  %v6796_v30 = vld [vmem:[#allocation9 + $0x220] sm:$0xff]  }
 0x3ed   : > { %v8620_v6 = vsel %vm7252_vm2, 0, %v2888_v47  ;;  %v2895_v45 = vor.u32 %v9498_v27, %v2892_v11  ;;  %v6754_v11 = vld [vmem:[#allocation9 + $0x108] sm:$0xff]   ;;  %v8664_v27 = vsel %vm7346_vm5, %v8474_v41, 0  ;;  %v8676_v41 = vsel %vm7346_vm5, %v8510_v16, 0 }
 0x3ee   : > { %v2902_v26 = vor.u32 %v9500_v12, %v2899_v8  ;;  %v6756_v8 = vld [vmem:[#allocation9 + $0x110] sm:$0xff]   ;;  %v8688_v16 = vsel %vm7346_vm5, %v8528_v37, 0  ;;  %v8700_v37 = vsel %vm7346_vm5, %v8316_v43, 0  ;;  %v8712_v43 = vsel %vm7346_vm5, %v8352_v15, 0 }
 0x3ef   : > { %v8630_v44 = vsel %vm7252_vm2, 0, %v2895_v45  ;;  %v8670_v45 = vsel %vm7346_vm5, %v8512_v20, 0  ;;  %v6757_v12 = vld [vmem:[#allocation9 + $0xd0] sm:$0xff]   ;;  %v8682_v20 = vsel %vm7346_vm5, %v8530_v5, 0  ;;  %v8694_v5 = vsel %vm7346_vm5, %v8298_v53, 0 }
 0x3f0   : > { %v8641_v63 = vsel %vm7252_vm2, 0, %v2902_v26  ;;  %v6758_v26 = vld [vmem:[#allocation9 + $0x118] sm:$0xff]   ;;  %v8706_v53 = vsel %vm7346_vm5, %v8334_v10, 0  ;;  %v8718_v10 = vsel %vm7346_vm5, %v8370_v51, 0  ;;  %v8730_v15 = vsel %vm7346_vm5, %v8406_v35, 0 }
 0x3f1   : > { %v8736_v51 = vsel %vm7346_vm5, %v8424_v59, 0  ;;  %v6769_v59 = vld [vmem:[#allocation9 + $0x148] sm:$0xff]  }
 0x3f2   : > { %3289 = vmatmul.mubr.bf16.gmra.mrb[40].mxu1 %v8540_v49 }
 0x3f3   : > { %3296 = vmatprep.mubr.bf16.mxu1 %v8514_v19 }
 0x3fa   : > { %3297 = vmatmul.mubr.bf16.gmra.mrb[44].mxu1 %v8546_v62 }
 0x3fb   : > { %3304 = vmatprep.mubr.bf16.mxu1 %v8282_v48 }
 0x402   : > { %3305 = vmatmul.mubr.bf16.gmra.mrb[48].mxu1 %v8556_v9 }
 0x403   : > { %3312 = vmatprep.mubr.bf16.mxu1 %v8300_v57 }
 0x40a   : > { %3313 = vmatmul.mubr.bf16.gmra.mrb[52].mxu1 %v8566_v39 }
 0x40b   : > { %3320 = vmatprep.mubr.bf16.mxu1 %v8318_v22 }
 0x412   : > { %3321 = vmatmul.mubr.bf16.gmra.mrb[56].mxu1 %v8576_v31 }
 0x413   : > { %3328 = vmatprep.mubr.bf16.mxu1 %v8336_v36 }
 0x417   : > { %v5657_v7 = vpop.f32.mrb[24].mxu1 }
 0x418   : > { %v5658_v58 = vpop.f32.mrb[25].mxu1 }
 0x419   : > { %v8602_v21 = vadd.f32 %v5658_v58, %v5657_v7  ;;  %v5660_v29 = vpop.f32.mrb[26].mxu1  ;;  %v2906_v7 = vrot.slane %v2904_v25, 7  ;;  %v2907_v58 = vshll.u32 %v8444_v3, 16 }
 0x41a   : > { %3329 = vmatmul.mubr.bf16.gmra.mrb[60].mxu1 %v8586_v52  ;;  %v5661_v24 = vpop.f32.mrb[27].mxu1 }
 0x41b   : > { %3336 = vmatprep.mubr.bf16.mxu1 %v8354_v46  ;;  %v8606_v33 = vadd.f32 %v5661_v24, %v5660_v29  ;;  %v9501_v29 = vmov 0   ;;  %v2909_v24 = vor.u32 %v2907_v58, %v2906_v7  ;;  %v6759_v7 = vld [vmem:[#allocation9 + $0xd8] sm:$0xff]  }
 0x41c   : > { %v2960_v60 = vrot.slane %v9501_v29, 1 }
 0x41d   : > { %v8657_v47 = vsel %vm7252_vm2, 0, %v2909_v24  ;;  %v6761_v24 = vld [vmem:[#allocation9 + $0xe0] sm:$0xff]  }
 0x41e   : > { %v8653_v56 = vsel %vm7346_vm5, %v2960_v60, 0  ;;  %9504 = vst [vmem:[#allocation30_spill] sm:$0xff] %v8657_v47  ;;  %v6760_v60 = vld [vmem:[#allocation9 + $0x120] sm:$0xff]  }
 0x41f   : > { %9503 = vst [vmem:[#allocation37_spill] sm:$0xff] %v8653_v56 }
 0x422   : > { %3337 = vmatmul.mubr.bf16.gmra.mrb[64].mxu1 %v8596_v14 }
 0x423   : > { %3344 = vmatprep.mubr.bf16.mxu1 %v8372_v13 }
 0x42a   : > { %3345 = vmatmul.mubr.bf16.gmra.mrb[68].mxu1 %v8610_v18 }
 0x42b   : > { %3352 = vmatprep.mubr.bf16.mxu1 %v8390_v2 }
 0x432   : > { %3353 = vmatmul.mubr.bf16.gmra.mrb[72].mxu1 %v8620_v6 }
 0x433   : > { %3360 = vmatprep.mubr.bf16.mxu1 %v8408_v55 }
 0x43a   : > { %3361 = vmatmul.mubr.bf16.gmra.mrb[76].mxu1 %v8630_v44 }
 0x43b   : > { %3368 = vmatprep.mubr.bf16.mxu1 %v8426_v42 }
 0x442   : > { %3369 = vmatmul.mubr.bf16.gmra.mrb[80].mxu1 %v8641_v63 }
 0x443   : > { %3376 = vmatprep.mubr.bf16.mxu1 %v8444_v3 }
 0x44a   : > { %3377 = vmatmul.mubr.bf16.gmra.mrb[84].mxu1 %v8657_v47 }
 0x44b   : > { %6221 = vmatprep.mubr.bf16.mxu1 %v8653_v56 }
 0x452   : > { %6222 = vmatmul.mubr.bf16.vlgmr.msra.gmra.mrb[88].mxu1 %v8664_v27 }
 0x453   : > { %6225 = vmatprep.mubr.bf16.mxu1 %v8670_v45  ;;  %5778 = vmatpush3.bf16.msra.mxu1 %v6753_v50  ;;  %v6762_v50 = vld [vmem:[#allocation9 + $0x128] sm:$0xff]  }
 0x454   : > { %5779 = vmatprep.subr.bf16.mxu1 %v6754_v11  ;;  %v6763_v11 = vld [vmem:[#allocation9 + $0xe8] sm:$0xff]  }
 0x457   : > { %5780 = vmatpush3.bf16.msra.mxu1 %v6755_v61  ;;  %v6764_v61 = vld [vmem:[#allocation9 + $0x130] sm:$0xff]  }
 0x458   : > { %5781 = vmatprep.subr.bf16.mxu1 %v6756_v8  ;;  %v6765_v8 = vld [vmem:[#allocation9 + $0xf0] sm:$0xff]  }
 0x45a   : > { %6226 = vmatmul.mubr.bf16.gmra.mrb[92].mxu1 %v8676_v41 }
 0x45b   : > { %6229 = vmatprep.mubr.bf16.mxu1 %v8682_v20  ;;  %5782 = vmatpush3.bf16.msra.mxu1 %v6757_v12  ;;  %v6766_v12 = vld [vmem:[#allocation9 + $0x138] sm:$0xff]  }
 0x45c   : > { %5783 = vmatprep.subr.bf16.mxu1 %v6758_v26  ;;  %v6767_v26 = vld [vmem:[#allocation9 + $0xf8] sm:$0xff]  }
 0x45f   : > { %5784 = vmatpush3.bf16.msra.mxu1 %v6759_v7  ;;  %v6768_v7 = vld [vmem:[#allocation9 + $0x140] sm:$0xff]  }
 0x460   : > { %5785 = vmatprep.subr.bf16.mxu1 %v6760_v60  ;;  %v8724_v60 = vsel %vm7346_vm5, %v8388_v32, 0  ;;  %v8744_v32 = vsel %vm7346_vm5, %v8442_v40, 0  ;;  %v6770_v40 = vld [vmem:[#allocation9 + $0x150] sm:$0xff]  }
 0x462   : > { %6230 = vmatmul.mubr.bf16.gmra.mrb[96].mxu1 %v8688_v16 }
 0x463   : > { %6233 = vmatprep.mubr.bf16.mxu1 %v8694_v5  ;;  %5786 = vmatpush3.bf16.msra.mxu1 %v6761_v24  ;;  %v2990_v24 = vrot.slane %v2907_v58, 1  ;;  %v6771_v58 = vld [vmem:[#allocation9 + $0x158] sm:$0xff]  }
 0x464   : > { %5787 = vmatprep.subr.bf16.mxu1 %v6762_v50 }
 0x465   : > { %v2991_v35 = vor.u32 %v2990_v24, %v2904_v25  ;;  %v6772_v25 = vld [vmem:[#allocation9 + $0x160] sm:$0xff]  }
 0x467   : > { %5788 = vmatpush3.bf16.msra.mxu1 %v6763_v11  ;;  %v8751_v50 = vsel %vm7346_vm5, %v2991_v35, 0  ;;  %v6776_v35 = vld [vmem:[#allocation9 + $0x1c0] sm:$0xff]  }
 0x468   : > { %5789 = vmatprep.subr.bf16.mxu1 %v6764_v61  ;;  %v6775_v61 = vld [vmem:[#allocation9 + $0x178] sm:$0xff]  }
 0x46a   : > { %6234 = vmatmul.mubr.bf16.gmra.mrb[100].mxu1 %v8700_v37 }
 0x46b   : > { %6237 = vmatprep.mubr.bf16.mxu1 %v8706_v53  ;;  %5790 = vmatpush3.bf16.msra.mxu1 %v6765_v8 }
 0x46c   : > { %5791 = vmatprep.subr.bf16.mxu1 %v6766_v12 }
 0x46f   : > { %5792 = vmatpush3.bf16.msra.mxu1 %v6767_v26 }
 0x470   : > { %6253 = vmatprep.subr.bf16.mxu1 %v6768_v7 }
 0x472   : > { %6238 = vmatmul.mubr.bf16.gmra.mrb[104].mxu1 %v8712_v43 }
 0x473   : > { %6241 = vmatprep.mubr.bf16.mxu1 %v8718_v10 }
 0x47a   : > { %6242 = vmatmul.mubr.bf16.gmra.mrb[108].mxu1 %v8724_v60 }
 0x47b   : > { %6245 = vmatprep.mubr.bf16.mxu1 %v8730_v15 }
 0x482   : > { %6246 = vmatmul.mubr.bf16.gmra.mrb[112].mxu1 %v8736_v51 }
 0x483   : > { %6249 = vmatprep.mubr.bf16.mxu1 %v8744_v32 }
 0x48a   : > { %6250 = vmatmul.mubr.bf16.gmra.mrb[116].mxu1 %v8751_v50 }
 0x48b   : > { %3803 = vmatprep.mubr.bf16.mxu1 %v8457_v54  ;;  %v6773_v54 = vld [vmem:[#allocation9 + $0x168] sm:$0xff]  }
 0x492   : > { %3804 = vmatmul.mubr.bf16.vlgmr.msra.gmra.mrb[120].mxu1 %v8482_v1  ;;  %v6774_v1 = vld [vmem:[#allocation9 + $0x170] sm:$0xff]  }
 0x493   : > { %3811 = vmatprep.mubr.bf16.mxu1 %v8495_v0  ;;  %6254 = vmatpush3.bf16.msra.mxu1 %v6768_v7 }
 0x494   : > { %6255 = vmatprep.subr.bf16.mxu1 %v6769_v59 }
 0x497   : > { %6256 = vmatpush3.bf16.msra.mxu1 %v6769_v59 }
 0x498   : > { %6257 = vmatprep.subr.bf16.mxu1 %v6770_v40 }
 0x49a   : > { %3812 = vmatmul.mubr.bf16.gmra.mrb[124].mxu1 %v8520_v38 }
 0x49b   : > { %3819 = vmatprep.mubr.bf16.mxu1 %v8491_v17  ;;  %6258 = vmatpush3.bf16.msra.mxu1 %v6770_v40 }
 0x49c   : > { %6259 = vmatprep.subr.bf16.mxu1 %v6771_v58 }
 0x49f   : > { %6260 = vmatpush3.bf16.msra.mxu1 %v6771_v58 }
 0x4a0   : > { %6261 = vmatprep.subr.bf16.mxu1 %v6772_v25 }
 0x4a2   : > { %3820 = vmatmul.mubr.bf16.gmra.mrb[128].mxu1 %v8534_v4 }
 0x4a3   : > { %3827 = vmatprep.mubr.bf16.mxu1 %v8516_v34  ;;  %6262 = vmatpush3.bf16.msra.mxu1 %v6772_v25 }
 0x4a4   : > { %6263 = vmatprep.subr.bf16.mxu1 %v6773_v54 }
 0x4a7   : > { %6264 = vmatpush3.bf16.msra.mxu1 %v6773_v54 }
 0x4a8   : > { %v5663_v11 = vpop.f32.mrb[28].mxu1  ;;  %6265 = vmatprep.subr.bf16.mxu1 %v6774_v1 }
 0x4a9   : > { %v5664_v8 = vpop.f32.mrb[29].mxu1 }
 0x4aa   : > { %v8761_v12 = vadd.f32 %v5664_v8, %v5663_v11  ;;  %v5666_v26 = vpop.f32.mrb[30].mxu1  ;;  %3828 = vmatmul.mubr.bf16.gmra.mrb[132].mxu1 %v8540_v49 }
 0x4ab   : > { %v5667_v7 = vpop.f32.mrb[31].mxu1  ;;  %3835 = vmatprep.mubr.bf16.mxu1 %v8514_v19  ;;  %6266 = vmatpush3.bf16.msra.mxu1 %v6774_v1 }
 0x4ac   : > { %v8765_v24 = vadd.f32 %v5667_v7, %v5666_v26  ;;  %6267 = vmatprep.subr.bf16.mxu1 %v6775_v61 }
 0x4af   : > { %6268 = vmatpush3.bf16.msra.mxu1 %v6775_v61 }
 0x4b0   : > { %5913 = vmatprep.subr.bf16.mxu1 %v6776_v35 }
 0x4b2   : > { %3836 = vmatmul.mubr.bf16.gmra.mrb[136].mxu1 %v8546_v62 }
 0x4b3   : > { %3843 = vmatprep.mubr.bf16.mxu1 %v8282_v48 }
 0x4b5   : > { %v5669_v59 = vpop.f32.mrb[32].mxu1 }
 0x4b6   : > { %v5670_v40 = vpop.f32.mrb[33].mxu1 }
 0x4b7   : > { %v8769_v58 = vadd.f32 %v5670_v40, %v5669_v59  ;;  %v5672_v25 = vpop.f32.mrb[34].mxu1 }
 0x4b8   : > { %v5673_v54 = vpop.f32.mrb[35].mxu1 }
 0x4b9   : > { %v8771_v11 = vadd.f32 %v5673_v54, %v5672_v25 }
 0x4ba   : > { %3844 = vmatmul.mubr.bf16.gmra.mrb[140].mxu1 %v8556_v9 }
 0x4bb   : > { %3851 = vmatprep.mubr.bf16.mxu1 %v8300_v57 }
 0x4bd   : > { %v5675_v1 = vpop.f32.mrb[36].mxu1 }
 0x4be   : > { %v5676_v8 = vpop.f32.mrb[37].mxu1 }
 0x4bf   : > { %v8775_v61 = vadd.f32 %v5676_v8, %v5675_v1  ;;  %v5678_v26 = vpop.f32.mrb[38].mxu1 }
 0x4c0   : > { %v5679_v7 = vpop.f32.mrb[39].mxu1 }
 0x4c1   : > { %9505 = vst [vmem:[#allocation31_spill] sm:$0xff] %v8775_v61  ;;  %v8777_v35 = vadd.f32 %v5679_v7, %v5678_v26 }
 0x4c2   : > { %3852 = vmatmul.mubr.bf16.gmra.mrb[144].mxu1 %v8566_v39 }
 0x4c3   : > { %9506 = vst [vmem:[#allocation38_spill] sm:$0xff] %v8777_v35  ;;  %3859 = vmatprep.mubr.bf16.mxu1 %v8318_v22 }
 0x4c5   : > { %v5681_v59 = vpop.f32.mrb[40].mxu1 }
 0x4c6   : > { %v5682_v40 = vpop.f32.mrb[41].mxu1 }
 0x4c7   : > { %v8781_v25 = vadd.f32 %v5682_v40, %v5681_v59  ;;  %v5684_v54 = vpop.f32.mrb[42].mxu1 }
 0x4c8   : > { %v5685_v56 = vpop.f32.mrb[43].mxu1 }
 0x4c9   : > { %9507 = vst [vmem:[#allocation39_spill] sm:$0xff] %v8781_v25  ;;  %v8783_v29 = vadd.f32 %v5685_v56, %v5684_v54 }
 0x4ca   : > { %3860 = vmatmul.mubr.bf16.gmra.mrb[148].mxu1 %v8576_v31 }
 0x4cb   : > { %9508 = vst [vmem:[#allocation40_spill] sm:$0xff] %v8783_v29  ;;  %3867 = vmatprep.mubr.bf16.mxu1 %v8336_v36 }
 0x4cd   : > { %v5687_v1 = vpop.f32.mrb[44].mxu1 }
 0x4ce   : > { %v5688_v8 = vpop.f32.mrb[45].mxu1 }
 0x4cf   : > { %v8787_v26 = vadd.f32 %v5688_v8, %v5687_v1  ;;  %v5690_v7 = vpop.f32.mrb[46].mxu1 }
 0x4d0   : > { %v5691_v35 = vpop.f32.mrb[47].mxu1 }
 0x4d1   : > { %9509 = vst [vmem:[#allocation41_spill] sm:$0xff] %v8787_v26  ;;  %v8789_v61 = vadd.f32 %v5691_v35, %v5690_v7 }
 0x4d2   : > { %3868 = vmatmul.mubr.bf16.gmra.mrb[152].mxu1 %v8586_v52 }
 0x4d3   : > { %9510 = vst [vmem:[#allocation42_spill] sm:$0xff] %v8789_v61  ;;  %3875 = vmatprep.mubr.bf16.mxu1 %v8354_v46 }
 0x4d5   : > { %v5693_v59 = vpop.f32.mrb[48].mxu1 }
 0x4d6   : > { %v5694_v40 = vpop.f32.mrb[49].mxu1 }
 0x4d7   : > { %v8793_v56 = vadd.f32 %v5694_v40, %v5693_v59  ;;  %v5696_v54 = vpop.f32.mrb[50].mxu1 }
 0x4d8   : > { %v5697_v29 = vpop.f32.mrb[51].mxu1 }
 0x4d9   : > { %9511 = vst [vmem:[#allocation33_spill] sm:$0xff] %v8793_v56  ;;  %v8795_v25 = vadd.f32 %v5697_v29, %v5696_v54 }
 0x4da   : > { %3876 = vmatmul.mubr.bf16.gmra.mrb[156].mxu1 %v8596_v14 }
 0x4db   : > { %9512 = vst [vmem:[#allocation43_spill] sm:$0xff] %v8795_v25  ;;  %3883 = vmatprep.mubr.bf16.mxu1 %v8372_v13 }
 0x4dd   : > { %v5699_v1 = vpop.f32.mrb[52].mxu1 }
 0x4de   : > { %v5700_v8 = vpop.f32.mrb[53].mxu1 }
 0x4df   : > { %v8799_v35 = vadd.f32 %v5700_v8, %v5699_v1  ;;  %v5702_v7 = vpop.f32.mrb[54].mxu1 }
 0x4e0   : > { %v5703_v61 = vpop.f32.mrb[55].mxu1 }
 0x4e1   : > { %9513 = vst [vmem:[#allocation32_spill] sm:$0xff] %v8799_v35  ;;  %v8801_v26 = vadd.f32 %v5703_v61, %v5702_v7 }
 0x4e2   : > { %3884 = vmatmul.mubr.bf16.gmra.mrb[160].mxu1 %v8610_v18 }
 0x4e3   : > { %9514 = vst [vmem:[#allocation44_spill] sm:$0xff] %v8801_v26  ;;  %3891 = vmatprep.mubr.bf16.mxu1 %v8390_v2 }
 0x4e5   : > { %v5705_v59 = vpop.f32.mrb[56].mxu1 }
 0x4e6   : > { %v5706_v40 = vpop.f32.mrb[57].mxu1 }
 0x4e7   : > { %v8805_v29 = vadd.f32 %v5706_v40, %v5705_v59  ;;  %v5708_v54 = vpop.f32.mrb[58].mxu1 }
 0x4e8   : > { %v5709_v25 = vpop.f32.mrb[59].mxu1 }
 0x4e9   : > { %9515 = vst [vmem:[#allocation45_spill] sm:$0xff] %v8805_v29  ;;  %v8807_v56 = vadd.f32 %v5709_v25, %v5708_v54 }
 0x4ea   : > { %3892 = vmatmul.mubr.bf16.gmra.mrb[164].mxu1 %v8620_v6 }
 0x4eb   : > { %9516 = vst [vmem:[#allocation15_spill] sm:$0xff] %v8807_v56  ;;  %3899 = vmatprep.mubr.bf16.mxu1 %v8408_v55 }
 0x4ed   : > { %v5711_v1 = vpop.f32.mrb[60].mxu1 }
 0x4ee   : > { %v5712_v8 = vpop.f32.mrb[61].mxu1 }
 0x4ef   : > { %v8811_v61 = vadd.f32 %v5712_v8, %v5711_v1  ;;  %v5714_v7 = vpop.f32.mrb[62].mxu1 }
 0x4f0   : > { %v5715_v26 = vpop.f32.mrb[63].mxu1 }
 0x4f1   : > { %9517 = vst [vmem:[#allocation46_spill] sm:$0xff] %v8811_v61  ;;  %v8813_v35 = vadd.f32 %v5715_v26, %v5714_v7  ;;  %v9363_v26 = vshrl.u32 %v8451_v23, 16 }
 0x4f2   : > { %3900 = vmatmul.mubr.bf16.gmra.mrb[168].mxu1 %v8630_v44 }
 0x4f3   : > { %9518 = vst [vmem:[#allocation47_spill] sm:$0xff] %v8813_v35  ;;  %3907 = vmatprep.mubr.bf16.mxu1 %v8426_v42 }
 0x4f5   : > { %v5717_v59 = vpop.f32.mrb[64].mxu1 }
 0x4f6   : > { %v5718_v40 = vpop.f32.mrb[65].mxu1 }
 0x4f7   : > { %v8817_v25 = vadd.f32 %v5718_v40, %v5717_v59  ;;  %v5720_v54 = vpop.f32.mrb[66].mxu1  ;;  %v2913_v59 = vrot.slane %v9363_v26, 7 }
 0x4f8   : > { %v5721_v56 = vpop.f32.mrb[67].mxu1 }
 0x4f9   : > { %v8819_v29 = vadd.f32 %v5721_v56, %v5720_v54  ;;  %v9365_v56 = vshll.u32 %v8451_v23, 16 }
 0x4fa   : > { %3908 = vmatmul.mubr.bf16.gmra.mrb[172].mxu1 %v8641_v63 }
 0x4fb   : > { %9519 = vst [vmem:[#allocation35_spill] sm:$0xff] %v8819_v29  ;;  %3915 = vmatprep.mubr.bf16.mxu1 %v8444_v3  ;;  %v2916_v54 = vor.u32 %v9365_v56, %v2913_v59  ;;  %v6777_v56 = vld [vmem:[#allocation9 + $0x180] sm:$0xff]  }
 0x4fd   : > { %v5723_v1 = vpop.f32.mrb[68].mxu1 }
 0x4fe   : > { %v5724_v8 = vpop.f32.mrb[69].mxu1 }
 0x4ff   : > { %v8824_v7 = vadd.f32 %v5724_v8, %v5723_v1  ;;  %v5726_v35 = vpop.f32.mrb[70].mxu1 }
 0x500   : > { %v5727_v61 = vpop.f32.mrb[71].mxu1 }
 0x501   : > { %9520 = vst [vmem:[#allocation34_spill] sm:$0xff] %v8824_v7  ;;  %v8826_v42 = vadd.f32 %v5727_v61, %v5726_v35  ;;  %v8841_v61 = vsel %vm7252_vm2, 0, %v2916_v54 }
 0x502   : > { %3916 = vmatmul.mubr.bf16.gmra.mrb[176].mxu1 %v8657_v47 }
 0x503   : > { %9521 = vst [vmem:[#allocation16_spill] sm:$0xff] %v8826_v42  ;;  %3923 = vmatprep.mubr.bf16.mxu1 %v8451_v23 }
 0x505   : > { %v5729_v40 = vpop.f32.mrb[72].mxu1 }
 0x506   : > { %v5730_v29 = vpop.f32.mrb[73].mxu1 }
 0x507   : > { %v8835_v1 = vadd.f32 %v5730_v29, %v5729_v40  ;;  %v5732_v8 = vpop.f32.mrb[74].mxu1  ;;  %v6778_v40 = vld [vmem:[#allocation9 + $0x1c8] sm:$0xff]  }
 0x508   : > { %v5733_v7 = vpop.f32.mrb[75].mxu1 }
 0x509   : > { %9522 = vst [vmem:[#allocation17_spill] sm:$0xff] %v8835_v1  ;;  %v8837_v35 = vadd.f32 %v5733_v7, %v5732_v8  ;;  %v6780_v7 = vld [vmem:[#allocation9 + $0x1d0] sm:$0xff]  }
 0x50a   : > { %3924 = vmatmul.mubr.bf16.gmra.mrb[180].mxu1 %v8841_v61 }
 0x50b   : > { %9523 = vst [vmem:[#allocation36_spill] sm:$0xff] %v8837_v35  ;;  %6269 = vmatprep.mubr.bf16.mxu1 %v8664_v27  ;;  %v6782_v35 = vld [vmem:[#allocation9 + $0x1d8] sm:$0xff]  }
 0x50d   : > { %v5735_v26 = vpop.f32.mrb[76].mxu1 }
 0x50e   : > { %v5736_v42 = vpop.f32.mrb[77].mxu1 }
 0x50f   : > { %v8845_v47 = vadd.f32 %v5736_v42, %v5735_v26  ;;  %v5738_v59 = vpop.f32.mrb[78].mxu1  ;;  %v6781_v26 = vld [vmem:[#allocation9 + $0x190] sm:$0xff]  }
 0x510   : > { %v5739_v29 = vpop.f32.mrb[79].mxu1 }
 0x511   : > { %9524 = vst [vmem:[#allocation19_spill] sm:$0xff] %v8845_v47  ;;  %v8847_v1 = vadd.f32 %v5739_v29, %v5738_v59  ;;  %v6784_v29 = vld [vmem:[#allocation9 + $0x1e0] sm:$0xff]  }
 0x512   : > { %6270 = vmatmul.mubr.bf16.vlgmr.msra.gmra.mrb[88].mxu1 %v8670_v45 }
 0x513   : > { %9525 = vst [vmem:[#allocation27_spill] sm:$0xff] %v8847_v1  ;;  %6273 = vmatprep.mubr.bf16.mxu1 %v8676_v41  ;;  %5914 = vmatpush3.bf16.msra.mxu1 %v6777_v56  ;;  %v6783_v56 = vld [vmem:[#allocation9 + $0x198] sm:$0xff]  }
 0x514   : > { %5915 = vmatprep.subr.bf16.mxu1 %v6778_v40 }
 0x515   : > { %v5741_v54 = vpop.f32.mrb[80].mxu1 }
 0x516   : > { %v5742_v27 = vpop.f32.mrb[81].mxu1 }
 0x517   : > { %v8851_v8 = vadd.f32 %v5742_v27, %v5741_v54  ;;  %v5744_v42 = vpop.f32.mrb[82].mxu1  ;;  %5916 = vmatpush3.bf16.msra.mxu1 %v6779_v28  ;;  %v6785_v28 = vld [vmem:[#allocation9 + $0x1a0] sm:$0xff]  }
 0x518   : > { %v5745_v47 = vpop.f32.mrb[83].mxu1  ;;  %5917 = vmatprep.subr.bf16.mxu1 %v6780_v7  ;;  %v6786_v7 = vld [vmem:[#allocation9 + $0x1e8] sm:$0xff]  }
 0x519   : > { %9526 = vst [vmem:[#allocation14_spill] sm:$0xff] %v8851_v8  ;;  %v8853_v59 = vadd.f32 %v5745_v47, %v5744_v42  ;;  %v6787_v42 = vld [vmem:[#allocation9 + $0x1a8] sm:$0xff]  }
 0x51a   : > { %6274 = vmatmul.mubr.bf16.gmra.mrb[92].mxu1 %v8682_v20 }
 0x51b   : > { %6277 = vmatprep.mubr.bf16.mxu1 %v8688_v16  ;;  %5918 = vmatpush3.bf16.msra.mxu1 %v6781_v26  ;;  %v6789_v26 = vld [vmem:[#allocation9 + $0x1b0] sm:$0xff]  }
 0x51c   : > { %5919 = vmatprep.subr.bf16.mxu1 %v6782_v35  ;;  %v6788_v35 = vld [vmem:[#allocation9 + $0x1f0] sm:$0xff]  }
 0x51d   : > { %v5747_v40 = vpop.f32.mrb[84].mxu1 }
 0x51e   : > { %v5748_v1 = vpop.f32.mrb[85].mxu1 }
 0x51f   : > { %v8857_v54 = vadd.f32 %v5748_v1, %v5747_v40  ;;  %v5750_v27 = vpop.f32.mrb[86].mxu1  ;;  %5920 = vmatpush3.bf16.msra.mxu1 %v6783_v56  ;;  %v6790_v1 = vld [vmem:[#allocation9 + $0x1f8] sm:$0xff]  }
 0x520   : > { %v5751_v8 = vpop.f32.mrb[87].mxu1  ;;  %5921 = vmatprep.subr.bf16.mxu1 %v6784_v29  ;;  %v6791_v56 = vld [vmem:[#allocation9 + $0x1b8] sm:$0xff]   ;;  %v9527_v29 = vshll.u32 %v8451_v23, 16 }
 0x521   : > { %v8859_v47 = vadd.f32 %v5751_v8, %v5750_v27  ;;  %v6792_v8 = vld [vmem:[#allocation9 + $0x200] sm:$0xff]   ;;  %v9528_v27 = vshrl.u32 %v8451_v23, 16 }
 0x522   : > { %6278 = vmatmul.mubr.bf16.gmra.mrb[96].mxu1 %v8694_v5  ;;  %v2992_v40 = vrot.slane %v9527_v29, 1 }
 0x523   : > { %6281 = vmatprep.mubr.bf16.mxu1 %v8700_v37  ;;  %5922 = vmatpush3.bf16.msra.mxu1 %v6785_v28 }
 0x524   : > { %5923 = vmatprep.subr.bf16.mxu1 %v6786_v7  ;;  %v2993_v28 = vor.u32 %v2992_v40, %v9528_v27 }
 0x526   : > { %v8877_v7 = vsel %vm7346_vm5, %v2993_v28, 0 }
 0x527   : > { %5924 = vmatpush3.bf16.msra.mxu1 %v6787_v42  ;;  %v6793_v42 = vld [vmem:[#allocation9 + $0x208] sm:$0xff]  }
 0x528   : > { %5925 = vmatprep.subr.bf16.mxu1 %v6788_v35  ;;  %v6794_v35 = vld [vmem:[#allocation9 + $0x210] sm:$0xff]  }
 0x52a   : > { %6282 = vmatmul.mubr.bf16.gmra.mrb[100].mxu1 %v8706_v53 }
 0x52b   : > { %6285 = vmatprep.mubr.bf16.mxu1 %v8712_v43  ;;  %5926 = vmatpush3.bf16.msra.mxu1 %v6789_v26  ;;  %v6795_v26 = vld [vmem:[#allocation9 + $0x218] sm:$0xff]  }
 0x52c   : > { %5927 = vmatprep.subr.bf16.mxu1 %v6790_v1 }
 0x52f   : > { %5928 = vmatpush3.bf16.msra.mxu1 %v6791_v56 }
 0x530   : > { %6301 = vmatprep.subr.bf16.mxu1 %v6792_v8 }
 0x532   : > { %6286 = vmatmul.mubr.bf16.gmra.mrb[104].mxu1 %v8718_v10 }
 0x533   : > { %6289 = vmatprep.mubr.bf16.mxu1 %v8724_v60 }
 0x53a   : > { %6290 = vmatmul.mubr.bf16.gmra.mrb[108].mxu1 %v8730_v15 }
 0x53b   : > { %6293 = vmatprep.mubr.bf16.mxu1 %v8736_v51 }
 0x542   : > { %6294 = vmatmul.mubr.bf16.gmra.mrb[112].mxu1 %v8744_v32 }
 0x543   : > { %6297 = vmatprep.mubr.bf16.mxu1 %v8751_v50 }
 0x54a   : > { %6298 = vmatmul.mubr.bf16.gmra.mrb[116].mxu1 %v8877_v7 }
 0x54b   : > { %4414 = vmatprep.mubr.bf16.mxu1 %v8495_v0  ;;  %v6797_v0 = vld [vmem:[#allocation9 + $0x228] sm:$0xff]  }
 0x552   : > { %4415 = vmatmul.mubr.bf16.vlgmr.msra.gmra.mrb[184].mxu1 %v8520_v38 }
 0x553   : > { %4422 = vmatprep.mubr.bf16.mxu1 %v8491_v17  ;;  %6302 = vmatpush3.bf16.msra.mxu1 %v6792_v8  ;;  %v6798_v17 = vld [vmem:[#allocation9 + $0x230] sm:$0xff]  }
 0x554   : > { %6303 = vmatprep.subr.bf16.mxu1 %v6793_v42 }
 0x557   : > { %6304 = vmatpush3.bf16.msra.mxu1 %v6793_v42 }
 0x558   : > { %6305 = vmatprep.subr.bf16.mxu1 %v6794_v35 }
 0x55a   : > { %4423 = vmatmul.mubr.bf16.gmra.mrb[188].mxu1 %v8534_v4 }
 0x55b   : > { %4430 = vmatprep.mubr.bf16.mxu1 %v8516_v34  ;;  %6306 = vmatpush3.bf16.msra.mxu1 %v6794_v35  ;;  %v6799_v34 = vld [vmem:[#allocation9 + $0x238] sm:$0xff]  }
 0x55c   : > { %6307 = vmatprep.subr.bf16.mxu1 %v6795_v26 }
 0x55f   : > { %6308 = vmatpush3.bf16.msra.mxu1 %v6795_v26 }
 0x560   : > { %6309 = vmatprep.subr.bf16.mxu1 %v6796_v30 }
 0x562   : > { %4431 = vmatmul.mubr.bf16.gmra.mrb[192].mxu1 %v8540_v49 }
 0x563   : > { %4438 = vmatprep.mubr.bf16.mxu1 %v8514_v19  ;;  %6310 = vmatpush3.bf16.msra.mxu1 %v6796_v30 }
 0x564   : > { %6311 = vmatprep.subr.bf16.mxu1 %v6797_v0 }
 0x565   : > { %v5793_v38 = vpop.f32.mrb[120].mxu1 }
 0x566   : > { %v5794_v1 = vpop.f32.mrb[121].mxu1 }
 0x567   : > { %v5795_v56 = vadd.f32 %v5794_v1, %v5793_v38  ;;  %v5796_v8 = vpop.f32.mrb[122].mxu1  ;;  %6312 = vmatpush3.bf16.msra.mxu1 %v6797_v0 }
 0x568   : > { %v5797_v4 = vpop.f32.mrb[123].mxu1  ;;  %6313 = vmatprep.subr.bf16.mxu1 %v6798_v17 }
 0x569   : > { %v8888_v29 = vadd.f32 %v5795_v56, %v8602_v21  ;;  %v5798_v40 = vadd.f32 %v5797_v4, %v5796_v8  ;;  %v9529_v4 = vld [vmem:[#allocation31_spill] sm:$0xff] }
 0x56a   : > { %4439 = vmatmul.mubr.bf16.gmra.mrb[196].mxu1 %v8546_v62 }
 0x56b   : > { %v8892_v49 = vadd.f32 %v5798_v40, %v8606_v33  ;;  %4446 = vmatprep.mubr.bf16.mxu1 %v8282_v48  ;;  %6314 = vmatpush3.bf16.msra.mxu1 %v6798_v17 }
 0x56c   : > { %6315 = vmatprep.subr.bf16.mxu1 %v6799_v34 }
 0x56d   : > { %v5799_v19 = vpop.f32.mrb[124].mxu1 }
 0x56e   : > { %v5800_v27 = vpop.f32.mrb[125].mxu1 }
 0x56f   : > { %v5801_v28 = vadd.f32 %v5800_v27, %v5799_v19  ;;  %v5802_v42 = vpop.f32.mrb[126].mxu1  ;;  %6316 = vmatpush3.bf16.msra.mxu1 %v6799_v34 }
 0x570   : > { %v5803_v35 = vpop.f32.mrb[127].mxu1 }
 0x571   : > { %v8896_v26 = vadd.f32 %v5801_v28, %v8761_v12  ;;  %v5804_v21 = vadd.f32 %v5803_v35, %v5802_v42  ;;  %v9531_v42 = vld [vmem:[#allocation39_spill] sm:$0xff] }
 0x572   : > { %4447 = vmatmul.mubr.bf16.gmra.mrb[200].mxu1 %v8556_v9 }
 0x573   : > { %v8900_v62 = vadd.f32 %v5804_v21, %v8765_v24  ;;  %4454 = vmatprep.mubr.bf16.mxu1 %v8300_v57 }
 0x575   : > { %v5805_v48 = vpop.f32.mrb[128].mxu1 }
 0x576   : > { %v5806_v33 = vpop.f32.mrb[129].mxu1 }
 0x577   : > { %v5807_v30 = vadd.f32 %v5806_v33, %v5805_v48  ;;  %v5808_v0 = vpop.f32.mrb[130].mxu1  ;;  %v9532_v48 = vld [vmem:[#allocation40_spill] sm:$0xff] }
 0x578   : > { %v5809_v17 = vpop.f32.mrb[131].mxu1 }
 0x579   : > { %v8904_v38 = vadd.f32 %v5807_v30, %v8769_v58  ;;  %v5810_v1 = vadd.f32 %v5809_v17, %v5808_v0  ;;  %v9530_v58 = vld [vmem:[#allocation38_spill] sm:$0xff] }
 0x57a   : > { %4455 = vmatmul.mubr.bf16.gmra.mrb[204].mxu1 %v8566_v39 }
 0x57b   : > { %v8908_v12 = vadd.f32 %v5810_v1, %v8771_v11  ;;  %4462 = vmatprep.mubr.bf16.mxu1 %v8318_v22  ;;  %v9533_v1 = vld [vmem:[#allocation41_spill] sm:$0xff] }
 0x57d   : > { %v5811_v9 = vpop.f32.mrb[132].mxu1 }
 0x57e   : > { %v5812_v24 = vpop.f32.mrb[133].mxu1 }
 0x57f   : > { %v5813_v56 = vadd.f32 %v5812_v24, %v5811_v9  ;;  %v5814_v57 = vpop.f32.mrb[134].mxu1 }
 0x580   : > { %v5815_v8 = vpop.f32.mrb[135].mxu1 }
 0x581   : > { %v8912_v34 = vadd.f32 %v5813_v56, %v9529_v4  ;;  %v5816_v40 = vadd.f32 %v5815_v8, %v5814_v57  ;;  %v9534_v56 = vld [vmem:[#allocation42_spill] sm:$0xff] }
 0x582   : > { %4463 = vmatmul.mubr.bf16.gmra.mrb[208].mxu1 %v8576_v31 }
 0x583   : > { %v8916_v19 = vadd.f32 %v5816_v40, %v9530_v58  ;;  %4470 = vmatprep.mubr.bf16.mxu1 %v8336_v36  ;;  %v9535_v58 = vld [vmem:[#allocation33_spill] sm:$0xff] }
 0x585   : > { %v5817_v39 = vpop.f32.mrb[136].mxu1 }
 0x586   : > { %v5818_v11 = vpop.f32.mrb[137].mxu1 }
 0x587   : > { %v5819_v27 = vadd.f32 %v5818_v11, %v5817_v39  ;;  %v5820_v22 = vpop.f32.mrb[138].mxu1 }
 0x588   : > { %v5821_v28 = vpop.f32.mrb[139].mxu1 }
 0x589   : > { %v8920_v35 = vadd.f32 %v5819_v27, %v9531_v42  ;;  %v5822_v21 = vadd.f32 %v5821_v28, %v5820_v22  ;;  %v9536_v27 = vld [vmem:[#allocation43_spill] sm:$0xff] }
 0x58a   : > { %4471 = vmatmul.mubr.bf16.gmra.mrb[212].mxu1 %v8586_v52 }
 0x58b   : > { %v8924_v33 = vadd.f32 %v5822_v21, %v9532_v48  ;;  %4478 = vmatprep.mubr.bf16.mxu1 %v8354_v46  ;;  %v9537_v48 = vld [vmem:[#allocation32_spill] sm:$0xff] }
 0x58d   : > { %v5823_v31 = vpop.f32.mrb[140].mxu1 }
 0x58e   : > { %v5824_v30 = vpop.f32.mrb[141].mxu1 }
 0x58f   : > { %v5825_v0 = vadd.f32 %v5824_v30, %v5823_v31  ;;  %v5826_v36 = vpop.f32.mrb[142].mxu1 }
 0x590   : > { %v5827_v17 = vpop.f32.mrb[143].mxu1 }
 0x591   : > { %v8928_v9 = vadd.f32 %v5825_v0, %v9533_v1  ;;  %v5828_v24 = vadd.f32 %v5827_v17, %v5826_v36  ;;  %v9538_v0 = vld [vmem:[#allocation44_spill] sm:$0xff] }
 0x592   : > { %4479 = vmatmul.mubr.bf16.gmra.mrb[216].mxu1 %v8596_v14 }
 0x593   : > { %v8932_v57 = vadd.f32 %v5828_v24, %v9534_v56  ;;  %4486 = vmatprep.mubr.bf16.mxu1 %v8372_v13  ;;  %v9539_v56 = vld [vmem:[#allocation45_spill] sm:$0xff] }
 0x595   : > { %v5829_v52 = vpop.f32.mrb[144].mxu1 }
 0x596   : > { %v5830_v8 = vpop.f32.mrb[145].mxu1 }
 0x597   : > { %v5831_v4 = vadd.f32 %v5830_v8, %v5829_v52  ;;  %v5832_v46 = vpop.f32.mrb[146].mxu1 }
 0x598   : > { %v5833_v40 = vpop.f32.mrb[147].mxu1 }
 0x599   : > { %v8936_v39 = vadd.f32 %v5831_v4, %v9535_v58  ;;  %v5834_v11 = vadd.f32 %v5833_v40, %v5832_v46  ;;  %v9540_v4 = vld [vmem:[#allocation15_spill] sm:$0xff] }
 0x59a   : > { %4487 = vmatmul.mubr.bf16.gmra.mrb[220].mxu1 %v8610_v18 }
 0x59b   : > { %v8940_v22 = vadd.f32 %v5834_v11, %v9536_v27  ;;  %4494 = vmatprep.mubr.bf16.mxu1 %v8390_v2 }
 0x59d   : > { %v5835_v14 = vpop.f32.mrb[148].mxu1 }
 0x59e   : > { %v5836_v28 = vpop.f32.mrb[149].mxu1 }
 0x59f   : > { %v5837_v42 = vadd.f32 %v5836_v28, %v5835_v14  ;;  %v5838_v13 = vpop.f32.mrb[150].mxu1  ;;  %v9542_v14 = vld [vmem:[#allocation46_spill] sm:$0xff] }
 0x5a0   : > { %v5839_v21 = vpop.f32.mrb[151].mxu1 }
 0x5a1   : > { %v8944_v31 = vadd.f32 %v5837_v42, %v9537_v48  ;;  %v5840_v30 = vadd.f32 %v5839_v21, %v5838_v13  ;;  %v9543_v13 = vld [vmem:[#allocation47_spill] sm:$0xff] }
 0x5a2   : > { %4495 = vmatmul.mubr.bf16.gmra.mrb[224].mxu1 %v8620_v6  ;;  %v9541_v6 = vld [vmem:[#allocation29_spill] sm:$0xff] }
 0x5a3   : > { %v8948_v36 = vadd.f32 %v5840_v30, %v9538_v0  ;;  %4502 = vmatprep.mubr.bf16.mxu1 %v8408_v55 }
 0x5a5   : > { %v5841_v18 = vpop.f32.mrb[152].mxu1 }
 0x5a6   : > { %v5842_v17 = vpop.f32.mrb[153].mxu1 }
 0x5a7   : > { %v5843_v1 = vadd.f32 %v5842_v17, %v5841_v18  ;;  %v5844_v2 = vpop.f32.mrb[154].mxu1 }
 0x5a8   : > { %v5845_v24 = vpop.f32.mrb[155].mxu1 }
 0x5a9   : > { %v8952_v52 = vadd.f32 %v5843_v1, %v9539_v56  ;;  %v5846_v8 = vadd.f32 %v5845_v24, %v5844_v2  ;;  %v9544_v2 = vld [vmem:[#allocation30_spill] sm:$0xff]  ;;  %v9545_v24 = vld [vmem:[#allocation35_spill] sm:$0xff] }
 0x5aa   : > { %4503 = vmatmul.mubr.bf16.gmra.mrb[228].mxu1 %v8630_v44 }
 0x5ab   : > { %v8956_v46 = vadd.f32 %v5846_v8, %v9540_v4  ;;  %4510 = vmatprep.mubr.bf16.mxu1 %v9541_v6 }
 0x5ad   : > { %v5847_v40 = vpop.f32.mrb[156].mxu1 }
 0x5ae   : > { %v5848_v58 = vpop.f32.mrb[157].mxu1 }
 0x5af   : > { %v5849_v11 = vadd.f32 %v5848_v58, %v5847_v40  ;;  %v5850_v55 = vpop.f32.mrb[158].mxu1  ;;  %v9546_v40 = vld [vmem:[#allocation34_spill] sm:$0xff] }
 0x5b0   : > { %v5851_v27 = vpop.f32.mrb[159].mxu1 }
 0x5b1   : > { %v8960_v28 = vadd.f32 %v5849_v11, %v9542_v14  ;;  %v5852_v42 = vadd.f32 %v5851_v27, %v5850_v55  ;;  %v9548_v27 = vmov 0  }
 0x5b2   : > { %4511 = vmatmul.mubr.bf16.gmra.mrb[232].mxu1 %v8641_v63 }
 0x5b3   : > { %v8964_v21 = vadd.f32 %v5852_v42, %v9543_v13  ;;  %4518 = vmatprep.mubr.bf16.mxu1 %v8444_v3 }
 0x5b5   : > { %v5853_v44 = vpop.f32.mrb[160].mxu1 }
 0x5b6   : > { %v5854_v48 = vpop.f32.mrb[161].mxu1 }
 0x5b7   : > { %v5855_v30 = vadd.f32 %v5854_v48, %v5853_v44  ;;  %v5856_v0 = vpop.f32.mrb[162].mxu1  ;;  %v9549_v48 = vld [vmem:[#allocation17_spill] sm:$0xff] }
 0x5b8   : > { %v5857_v18 = vpop.f32.mrb[163].mxu1 }
 0x5b9   : > { %v8968_v17 = vadd.f32 %v5855_v30, %v8817_v25  ;;  %v5858_v1 = vadd.f32 %v5857_v18, %v5856_v0  ;;  %v9547_v25 = vld [vmem:[#allocation16_spill] sm:$0xff] }
 0x5ba   : > { %4519 = vmatmul.mubr.bf16.gmra.mrb[236].mxu1 %v9544_v2  ;;  %v9550_v18 = vld [vmem:[#allocation24_spill] sm:$0xff] }
 0x5bb   : > { %v8972_v56 = vadd.f32 %v5858_v1, %v9545_v24  ;;  %4526 = vmatprep.mubr.bf16.mxu1 %v8451_v23  ;;  %v9551_v1 = vld [vmem:[#allocation36_spill] sm:$0xff] }
 0x5bd   : > { %v5859_v63 = vpop.f32.mrb[164].mxu1 }
 0x5be   : > { %v5860_v8 = vpop.f32.mrb[165].mxu1 }
 0x5bf   : > { %v5861_v4 = vadd.f32 %v5860_v8, %v5859_v63  ;;  %v5862_v3 = vpop.f32.mrb[166].mxu1 }
 0x5c0   : > { %v5863_v6 = vpop.f32.mrb[167].mxu1 }
 0x5c1   : > { %v8976_v58 = vadd.f32 %v5861_v4, %v9546_v40  ;;  %v5864_v11 = vadd.f32 %v5863_v6, %v5862_v3  ;;  %v9552_v3 = vld [vmem:[#allocation19_spill] sm:$0xff] }
 0x5c2   : > { %4527 = vmatmul.mubr.bf16.gmra.mrb[240].mxu1 %v8841_v61 }
 0x5c3   : > { %v8980_v55 = vadd.f32 %v5864_v11, %v9547_v25  ;;  %4534 = vmatprep.mubr.bf16.mxu1 %v9548_v27  ;;  %v9553_v11 = vld [vmem:[#allocation27_spill] sm:$0xff] }
 0x5c5   : > { %v5865_v14 = vpop.f32.mrb[168].mxu1 }
 0x5c6   : > { %v5866_v42 = vpop.f32.mrb[169].mxu1 }
 0x5c7   : > { %v5867_v13 = vadd.f32 %v5866_v42, %v5865_v14  ;;  %v5868_v23 = vpop.f32.mrb[170].mxu1 }
 0x5c8   : > { %v5869_v44 = vpop.f32.mrb[171].mxu1 }
 0x5c9   : > { %v8984_v30 = vadd.f32 %v5867_v13, %v9549_v48  ;;  %v5870_v0 = vadd.f32 %v5869_v44, %v5868_v23  ;;  %v9554_v23 = vld [vmem:[#allocation14_spill] sm:$0xff] }
 0x5ca   : > { %4535 = vmatmul.mubr.bf16.gmra.mrb[244].mxu1 %v9550_v18 }
 0x5cb   : > { %v8988_v2 = vadd.f32 %v5870_v0, %v9551_v1  ;;  %6317 = vmatprep.mubr.bf16.mxu1 %v8670_v45 }
 0x5cd   : > { %v5871_v61 = vpop.f32.mrb[172].mxu1 }
 0x5ce   : > { %v5872_v24 = vpop.f32.mrb[173].mxu1 }
 0x5cf   : > { %v5873_v63 = vadd.f32 %v5872_v24, %v5871_v61  ;;  %v5874_v8 = vpop.f32.mrb[174].mxu1 }
 0x5d0   : > { %v5875_v4 = vpop.f32.mrb[175].mxu1 }
 0x5d1   : > { %v8992_v6 = vadd.f32 %v5873_v63, %v9552_v3  ;;  %v5876_v40 = vadd.f32 %v5875_v4, %v5874_v8 }
 0x5d2   : > { %6318 = vmatmul.mubr.bf16.vlgmr.msra.gmra.mrb[88].mxu1 %v8676_v41 }
 0x5d3   : > { %v8996_v25 = vadd.f32 %v5876_v40, %v9553_v11  ;;  %6321 = vmatprep.mubr.bf16.mxu1 %v8682_v20 }
 0x5d5   : > { %v5877_v27 = vpop.f32.mrb[176].mxu1 }
 0x5d6   : > { %v5878_v14 = vpop.f32.mrb[177].mxu1 }
 0x5d7   : > { %v5879_v42 = vadd.f32 %v5878_v14, %v5877_v27  ;;  %v5880_v45 = vpop.f32.mrb[178].mxu1 }
 0x5d8   : > { %v5881_v13 = vpop.f32.mrb[179].mxu1 }
 0x5d9   : > { %v9000_v44 = vadd.f32 %v5879_v42, %v9554_v23  ;;  %v5882_v48 = vadd.f32 %v5881_v13, %v5880_v45 }
 0x5da   : > { %6322 = vmatmul.mubr.bf16.gmra.mrb[92].mxu1 %v8688_v16  ;;  %v9555_v16 = vld [vmem:[#allocation37_spill] sm:$0xff] }
 0x5db   : > { %v9004_v0 = vadd.f32 %v5882_v48, %v8853_v59  ;;  %6325 = vmatprep.mubr.bf16.mxu1 %v8694_v5 }
 0x5dd   : > { %v5883_v41 = vpop.f32.mrb[180].mxu1 }
 0x5de   : > { %v5884_v18 = vpop.f32.mrb[181].mxu1 }
 0x5df   : > { %v5885_v1 = vadd.f32 %v5884_v18, %v5883_v41  ;;  %v5886_v20 = vpop.f32.mrb[182].mxu1 }
 0x5e0   : > { %v5887_v61 = vpop.f32.mrb[183].mxu1 }
 0x5e1   : > { %v9008_v24 = vadd.f32 %v5885_v1, %v8857_v54  ;;  %v5888_v63 = vadd.f32 %v5887_v61, %v5886_v20 }
 0x5e2   : > { %6326 = vmatmul.mubr.bf16.gmra.mrb[96].mxu1 %v8700_v37 }
 0x5e3   : > { %v9012_v8 = vadd.f32 %v5888_v63, %v8859_v47  ;;  %6329 = vmatprep.mubr.bf16.mxu1 %v8706_v53 }
 0x5ea   : > { %6330 = vmatmul.mubr.bf16.gmra.mrb[100].mxu1 %v8712_v43 }
 0x5eb   : > { %6333 = vmatprep.mubr.bf16.mxu1 %v8718_v10 }
 0x5f2   : > { %6334 = vmatmul.mubr.bf16.gmra.mrb[104].mxu1 %v8724_v60 }
 0x5f3   : > { %6337 = vmatprep.mubr.bf16.mxu1 %v8730_v15 }
 0x5fa   : > { %6338 = vmatmul.mubr.bf16.gmra.mrb[108].mxu1 %v8736_v51 }
 0x5fb   : > { %6341 = vmatprep.mubr.bf16.mxu1 %v8744_v32 }
 0x602   : > { %6342 = vmatmul.mubr.bf16.gmra.mrb[112].mxu1 %v8751_v50 }
 0x603   : > { %6345 = vmatprep.mubr.bf16.mxu1 %v8877_v7 }
 0x60a   : > { %6346 = vmatmul.mubr.bf16.gmra.mrb[116].mxu1 %v9555_v16 }
 0x625   : > { %v5929_v5 = vpop.f32.mrb[184].mxu1 }
 0x626   : > { %v5930_v37 = vpop.f32.mrb[185].mxu1 }
 0x627   : > { %v5931_v53 = vadd.f32 %v5930_v37, %v5929_v5  ;;  %v5932_v43 = vpop.f32.mrb[186].mxu1 }
 0x628   : > { %v5933_v59 = vpop.f32.mrb[187].mxu1 }
 0x629   : > { %v5934_v10 = vadd.f32 %v5933_v59, %v5932_v43  ;;  %v9025_v60 = vadd.f32 %v8888_v29, %v5931_v53 }
 0x62b   : > { %v9028_v15 = vadd.f32 %v8892_v49, %v5934_v10 }
 0x62d   : > { %v5935_v51 = vpop.f32.mrb[188].mxu1 }
 0x62e   : > { %v5936_v32 = vpop.f32.mrb[189].mxu1 }
 0x62f   : > { %v5937_v54 = vadd.f32 %v5936_v32, %v5935_v51  ;;  %v5938_v50 = vpop.f32.mrb[190].mxu1 }
 0x630   : > { %v5939_v47 = vpop.f32.mrb[191].mxu1 }
 0x631   : > { %v5940_v7 = vadd.f32 %v5939_v47, %v5938_v50  ;;  %v9031_v4 = vadd.f32 %v8896_v26, %v5937_v54 }
 0x633   : > { %v9034_v3 = vadd.f32 %v8900_v62, %v5940_v7 }
 0x635   : > { %v5941_v40 = vpop.f32.mrb[192].mxu1 }
 0x636   : > { %v5942_v11 = vpop.f32.mrb[193].mxu1 }
 0x637   : > { %v5943_v27 = vadd.f32 %v5942_v11, %v5941_v40  ;;  %v5944_v29 = vpop.f32.mrb[194].mxu1 }
 0x638   : > { %v5945_v14 = vpop.f32.mrb[195].mxu1 }
 0x639   : > { %v5946_v42 = vadd.f32 %v5945_v14, %v5944_v29  ;;  %v9037_v49 = vadd.f32 %v8904_v38, %v5943_v27 }
 0x63b   : > { %v9040_v45 = vadd.f32 %v8908_v12, %v5946_v42 }
 0x63d   : > { %v5947_v13 = vpop.f32.mrb[196].mxu1 }
 0x63e   : > { %v5948_v23 = vpop.f32.mrb[197].mxu1 }
 0x63f   : > { %v5949_v48 = vadd.f32 %v5948_v23, %v5947_v13  ;;  %v5950_v26 = vpop.f32.mrb[198].mxu1 }
 0x640   : > { %v5951_v41 = vpop.f32.mrb[199].mxu1 }
 0x641   : > { %v5952_v18 = vadd.f32 %v5951_v41, %v5950_v26  ;;  %v9043_v62 = vadd.f32 %v8912_v34, %v5949_v48 }
 0x643   : > { %v9046_v1 = vadd.f32 %v8916_v19, %v5952_v18 }
 0x645   : > { %v5953_v20 = vpop.f32.mrb[200].mxu1 }
 0x646   : > { %v5954_v61 = vpop.f32.mrb[201].mxu1 }
 0x647   : > { %v5955_v63 = vadd.f32 %v5954_v61, %v5953_v20  ;;  %v5956_v38 = vpop.f32.mrb[202].mxu1 }
 0x648   : > { %v5957_v16 = vpop.f32.mrb[203].mxu1 }
 0x649   : > { %v5958_v5 = vadd.f32 %v5957_v16, %v5956_v38  ;;  %v9049_v12 = vadd.f32 %v8920_v35, %v5955_v63 }
 0x64b   : > { %v9052_v37 = vadd.f32 %v8924_v33, %v5958_v5 }
 0x64d   : > { %v5959_v53 = vpop.f32.mrb[204].mxu1 }
 0x64e   : > { %v5960_v43 = vpop.f32.mrb[205].mxu1 }
 0x64f   : > { %v5961_v59 = vadd.f32 %v5960_v43, %v5959_v53  ;;  %v5962_v34 = vpop.f32.mrb[206].mxu1 }
 0x650   : > { %v5963_v10 = vpop.f32.mrb[207].mxu1 }
 0x651   : > { %v5964_v51 = vadd.f32 %v5963_v10, %v5962_v34  ;;  %v9055_v19 = vadd.f32 %v8928_v9, %v5961_v59 }
 0x653   : > { %v9058_v32 = vadd.f32 %v8932_v57, %v5964_v51 }
 0x655   : > { %v5965_v54 = vpop.f32.mrb[208].mxu1 }
 0x656   : > { %v5966_v50 = vpop.f32.mrb[209].mxu1 }
 0x657   : > { %v5967_v47 = vadd.f32 %v5966_v50, %v5965_v54  ;;  %v5968_v35 = vpop.f32.mrb[210].mxu1 }
 0x658   : > { %v5969_v7 = vpop.f32.mrb[211].mxu1 }
 0x659   : > { %v5970_v40 = vadd.f32 %v5969_v7, %v5968_v35  ;;  %v9061_v33 = vadd.f32 %v8936_v39, %v5967_v47 }
 0x65b   : > { %v9064_v11 = vadd.f32 %v8940_v22, %v5970_v40 }
 0x65d   : > { %v5971_v27 = vpop.f32.mrb[212].mxu1 }
 0x65e   : > { %v5972_v29 = vpop.f32.mrb[213].mxu1 }
 0x65f   : > { %v5973_v14 = vadd.f32 %v5972_v29, %v5971_v27  ;;  %v5974_v9 = vpop.f32.mrb[214].mxu1 }
 0x660   : > { %v5975_v42 = vpop.f32.mrb[215].mxu1 }
 0x661   : > { %v5976_v13 = vadd.f32 %v5975_v42, %v5974_v9  ;;  %v9067_v57 = vadd.f32 %v8944_v31, %v5973_v14 }
 0x663   : > { %v9070_v23 = vadd.f32 %v8948_v36, %v5976_v13 }
 0x665   : > { %v5977_v48 = vpop.f32.mrb[216].mxu1 }
 0x666   : > { %v5978_v26 = vpop.f32.mrb[217].mxu1 }
 0x667   : > { %v5979_v41 = vadd.f32 %v5978_v26, %v5977_v48  ;;  %v5980_v39 = vpop.f32.mrb[218].mxu1 }
 0x668   : > { %v5981_v18 = vpop.f32.mrb[219].mxu1 }
 0x669   : > { %v5982_v20 = vadd.f32 %v5981_v18, %v5980_v39  ;;  %v9073_v22 = vadd.f32 %v8952_v52, %v5979_v41 }
 0x66b   : > { %v9076_v61 = vadd.f32 %v8956_v46, %v5982_v20 }
 0x66d   : > { %v5983_v63 = vpop.f32.mrb[220].mxu1 }
 0x66e   : > { %v5984_v38 = vpop.f32.mrb[221].mxu1 }
 0x66f   : > { %v5985_v16 = vadd.f32 %v5984_v38, %v5983_v63  ;;  %v5986_v31 = vpop.f32.mrb[222].mxu1 }
 0x670   : > { %v5987_v5 = vpop.f32.mrb[223].mxu1 }
 0x671   : > { %v5988_v53 = vadd.f32 %v5987_v5, %v5986_v31  ;;  %v9079_v36 = vadd.f32 %v8960_v28, %v5985_v16 }
 0x673   : > { %v9082_v43 = vadd.f32 %v8964_v21, %v5988_v53 }
 0x675   : > { %v5989_v59 = vpop.f32.mrb[224].mxu1 }
 0x676   : > { %v5990_v34 = vpop.f32.mrb[225].mxu1 }
 0x677   : > { %v5991_v10 = vadd.f32 %v5990_v34, %v5989_v59  ;;  %v5992_v52 = vpop.f32.mrb[226].mxu1 }
 0x678   : > { %v5993_v51 = vpop.f32.mrb[227].mxu1 }
 0x679   : > { %v5994_v54 = vadd.f32 %v5993_v51, %v5992_v52  ;;  %v9085_v46 = vadd.f32 %v8968_v17, %v5991_v10 }
 0x67b   : > { %v9088_v50 = vadd.f32 %v8972_v56, %v5994_v54 }
 0x67d   : > { %v5995_v47 = vpop.f32.mrb[228].mxu1 }
 0x67e   : > { %v5996_v35 = vpop.f32.mrb[229].mxu1 }
 0x67f   : > { %v5997_v7 = vadd.f32 %v5996_v35, %v5995_v47  ;;  %v5998_v28 = vpop.f32.mrb[230].mxu1 }
 0x680   : > { %v5999_v40 = vpop.f32.mrb[231].mxu1 }
 0x681   : > { %v6000_v27 = vadd.f32 %v5999_v40, %v5998_v28  ;;  %v9091_v21 = vadd.f32 %v8976_v58, %v5997_v7  ;;  %v9129_v40 = vld [vmem:[%s9304_s3 + $0x3] ss:$0 sm:$0xff] }
 0x683   : > { %v9094_v29 = vadd.f32 %v8980_v55, %v6000_v27 }
 0x685   : > { %v6001_v14 = vpop.f32.mrb[232].mxu1 }
 0x686   : > { %v6002_v9 = vpop.f32.mrb[233].mxu1 }
 0x687   : > { %v6003_v42 = vadd.f32 %v6002_v9, %v6001_v14  ;;  %v6004_v17 = vpop.f32.mrb[234].mxu1 }
 0x688   : > { %v6005_v13 = vpop.f32.mrb[235].mxu1 }
 0x689   : > { %v6006_v48 = vadd.f32 %v6005_v13, %v6004_v17  ;;  %v9097_v56 = vadd.f32 %v8984_v30, %v6003_v42 }
 0x68b   : > { %v9100_v26 = vadd.f32 %v8988_v2, %v6006_v48 }
 0x68d   : > { %v6007_v41 = vpop.f32.mrb[236].mxu1 }
 0x68e   : > { %v6008_v39 = vpop.f32.mrb[237].mxu1 }
 0x68f   : > { %v6009_v18 = vadd.f32 %v6008_v39, %v6007_v41  ;;  %v6010_v58 = vpop.f32.mrb[238].mxu1 }
 0x690   : > { %v6011_v20 = vpop.f32.mrb[239].mxu1 }
 0x691   : > { %v6012_v63 = vadd.f32 %v6011_v20, %v6010_v58  ;;  %v9103_v55 = vadd.f32 %v8992_v6, %v6009_v18 }
 0x693   : > { %v9106_v38 = vadd.f32 %v8996_v25, %v6012_v63 }
 0x695   : > { %v6013_v16 = vpop.f32.mrb[240].mxu1 }
 0x696   : > { %v6014_v31 = vpop.f32.mrb[241].mxu1 }
 0x697   : > { %v6015_v5 = vadd.f32 %v6014_v31, %v6013_v16  ;;  %v6016_v30 = vpop.f32.mrb[242].mxu1 }
 0x698   : > { %v6017_v53 = vpop.f32.mrb[243].mxu1 }
 0x699   : > { %v6018_v59 = vadd.f32 %v6017_v53, %v6016_v30  ;;  %v9109_v2 = vadd.f32 %v9000_v44, %v6015_v5  ;;  %v9123_v44 = vld [vmem:[%s9304_s3 + $0x2] ss:$0 sm:$0xff] }
 0x69b   : > { %v9112_v34 = vadd.f32 %v9004_v0, %v6018_v59 }
 0x69d   : > { %v6019_v10 = vpop.f32.mrb[244].mxu1 }
 0x69e   : > { %v6020_v52 = vpop.f32.mrb[245].mxu1 }
 0x69f   : > { %v6021_v51 = vadd.f32 %v6020_v52, %v6019_v10  ;;  %v6022_v6 = vpop.f32.mrb[246].mxu1 }
 0x6a0   : > { %v6023_v54 = vpop.f32.mrb[247].mxu1 }
 0x6a1   : > { %v6024_v47 = vadd.f32 %v6023_v54, %v6022_v6  ;;  %v9115_v25 = vadd.f32 %v9008_v24, %v6021_v51 }
 0x6a3   : > { %v9118_v35 = vadd.f32 %v9012_v8, %v6024_v47 }
 0x6a5   : > { %v6319_v7 = vpop.f32.mrb[88].mxu1 }
 0x6a6   : > { %v6367_v0 = vadd.f32 %v9031_v4, %v6319_v7  ;;  %v4577_v28 = vpop.f32.mrb[89].mxu1 }
 0x6a7   : > { %v6370_v24 = vadd.f32 %v9025_v60, %v4577_v28  ;;  %v6320_v27 = vpop.f32.mrb[90].mxu1 }
 0x6a8   : > { %v4839_v8 = vmul.f32 %v6367_v0, %v9123_v44  ;;  %v6373_v14 = vadd.f32 %v9034_v3, %v6320_v27  ;;  %v4580_v9 = vpop.f32.mrb[91].mxu1 }
 0x6a9   : > { %v4837_v42 = vmul.f32 %v6370_v24, %v9123_v44  ;;  %v6376_v17 = vadd.f32 %v9028_v15, %v4580_v9 }
 0x6aa   : > { %v4876_v4 = vadd.f32 %v9129_v40, %v4839_v8  ;;  %v4840_v13 = vmul.f32 %v6373_v14, %v9123_v44 }
 0x6ab   : > { %v4874_v48 = vadd.f32 %v9129_v40, %v4837_v42  ;;  %v4838_v41 = vmul.f32 %v6376_v17, %v9123_v44 }
 0x6ac   : > { %v4877_v60 = vadd.f32 %v9129_v40, %v4840_v13  ;;  %v4908_v3 = vmax.f32 %v4876_v4, 0.0 }
 0x6ad   : > { %v4875_v39 = vadd.f32 %v9129_v40, %v4838_v41  ;;  %v6323_v18 = vpop.f32.mrb[92].mxu1  ;;  %v4906_v15 = vmax.f32 %v4874_v48, 0.0 }
 0x6ae   : > { %v4909_v58 = vmax.f32 %v4877_v60, 0.0  ;;  %v6379_v20 = vadd.f32 %v9043_v62, %v6323_v18  ;;  %v4593_v63 = vpop.f32.mrb[93].mxu1 }
 0x6af   : > { %v4907_v16 = vmax.f32 %v4875_v39, 0.0  ;;  %v6382_v31 = vadd.f32 %v9037_v49, %v4593_v63  ;;  %v6324_v5 = vpop.f32.mrb[94].mxu1 }
 0x6b0   : > { %v5476_v30 = vpack.c.bf16 %v4909_v58, %v4908_v3  ;;  %v4843_v53 = vmul.f32 %v6379_v20, %v9123_v44  ;;  %v6385_v59 = vadd.f32 %v9046_v1, %v6324_v5  ;;  %v4596_v10 = vpop.f32.mrb[95].mxu1 }
 0x6b1   : > { %v5471_v52 = vpack.c.bf16 %v4907_v16, %v4906_v15  ;;  %v4841_v51 = vmul.f32 %v6382_v31, %v9123_v44  ;;  %v6388_v6 = vadd.f32 %v9040_v45, %v4596_v10 }
 0x6b2   : > { %5548 = vst [vmem:[%s9149_s5 + $0x8] sm:$0xff] %v5476_v30   ;;  %v4880_v62 = vadd.f32 %v9129_v40, %v4843_v53  ;;  %v4844_v49 = vmul.f32 %v6385_v59, %v9123_v44 }
 0x6b3   : > { %5472 = vst [vmem:[%s9149_s5] sm:$0xff] %v5471_v52   ;;  %v4878_v54 = vadd.f32 %v9129_v40, %v4841_v51  ;;  %v4842_v1 = vmul.f32 %v6388_v6, %v9123_v44 }
 0x6b4   : > { %v4881_v47 = vadd.f32 %v9129_v40, %v4844_v49  ;;  %v4912_v45 = vmax.f32 %v4880_v62, 0.0 }
 0x6b5   : > { %v4879_v7 = vadd.f32 %v9129_v40, %v4842_v1  ;;  %v6327_v0 = vpop.f32.mrb[96].mxu1  ;;  %v4910_v8 = vmax.f32 %v4878_v54, 0.0 }
 0x6b6   : > { %v4913_v28 = vmax.f32 %v4881_v47, 0.0  ;;  %v6391_v24 = vadd.f32 %v9055_v19, %v6327_v0  ;;  %v4609_v27 = vpop.f32.mrb[97].mxu1 }
 0x6b7   : > { %v4911_v14 = vmax.f32 %v4879_v7, 0.0  ;;  %v6394_v9 = vadd.f32 %v9049_v12, %v4609_v27  ;;  %v6328_v42 = vpop.f32.mrb[98].mxu1 }
 0x6b8   : > { %v5486_v17 = vpack.c.bf16 %v4913_v28, %v4912_v45  ;;  %v4847_v4 = vmul.f32 %v6391_v24, %v9123_v44  ;;  %v6397_v13 = vadd.f32 %v9058_v32, %v6328_v42  ;;  %v4612_v48 = vpop.f32.mrb[99].mxu1 }
 0x6b9   : > { %v5481_v41 = vpack.c.bf16 %v4911_v14, %v4910_v8  ;;  %v4845_v60 = vmul.f32 %v6394_v9, %v9123_v44  ;;  %v6400_v39 = vadd.f32 %v9052_v37, %v4612_v48 }
 0x6ba   : > { %5550 = vst [vmem:[%s9149_s5 + $0x18] sm:$0xff] %v5486_v17   ;;  %v4884_v19 = vadd.f32 %v9129_v40, %v4847_v4  ;;  %v4848_v18 = vmul.f32 %v6397_v13, %v9123_v44 }
 0x6bb   : > { %5549 = vst [vmem:[%s9149_s5 + $0x10] sm:$0xff] %v5481_v41   ;;  %v4882_v12 = vadd.f32 %v9129_v40, %v4845_v60  ;;  %v4846_v3 = vmul.f32 %v6400_v39, %v9123_v44 }
 0x6bc   : > { %v4885_v58 = vadd.f32 %v9129_v40, %v4848_v18  ;;  %v4916_v63 = vmax.f32 %v4884_v19, 0.0 }
 0x6bd   : > { %v4883_v32 = vadd.f32 %v9129_v40, %v4846_v3  ;;  %v6331_v20 = vpop.f32.mrb[100].mxu1  ;;  %v4914_v31 = vmax.f32 %v4882_v12, 0.0 }
 0x6be   : > { %v4917_v15 = vmax.f32 %v4885_v58, 0.0  ;;  %v6403_v37 = vadd.f32 %v9067_v57, %v6331_v20  ;;  %v4625_v16 = vpop.f32.mrb[101].mxu1 }
 0x6bf   : > { %v4915_v5 = vmax.f32 %v4883_v32, 0.0  ;;  %v6406_v30 = vadd.f32 %v9061_v33, %v4625_v16  ;;  %v6332_v53 = vpop.f32.mrb[102].mxu1 }
 0x6c0   : > { %v5496_v59 = vpack.c.bf16 %v4917_v15, %v4916_v63  ;;  %v4851_v10 = vmul.f32 %v6403_v37, %v9123_v44  ;;  %v6409_v52 = vadd.f32 %v9070_v23, %v6332_v53  ;;  %v4628_v51 = vpop.f32.mrb[103].mxu1 }
 0x6c1   : > { %v5491_v6 = vpack.c.bf16 %v4915_v5, %v4914_v31  ;;  %v4849_v62 = vmul.f32 %v6406_v30, %v9123_v44  ;;  %v6412_v49 = vadd.f32 %v9064_v11, %v4628_v51 }
 0x6c2   : > { %5552 = vst [vmem:[%s9149_s5 + $0x28] sm:$0xff] %v5496_v59   ;;  %v4888_v57 = vadd.f32 %v9129_v40, %v4851_v10  ;;  %v4852_v54 = vmul.f32 %v6409_v52, %v9123_v44 }
 0x6c3   : > { %5551 = vst [vmem:[%s9149_s5 + $0x20] sm:$0xff] %v5491_v6   ;;  %v4886_v33 = vadd.f32 %v9129_v40, %v4849_v62  ;;  %v4850_v1 = vmul.f32 %v6412_v49, %v9123_v44 }
 0x6c4   : > { %v4889_v47 = vadd.f32 %v9129_v40, %v4852_v54  ;;  %v4920_v0 = vmax.f32 %v4888_v57, 0.0 }
 0x6c5   : > { %v4887_v23 = vadd.f32 %v9129_v40, %v4850_v1  ;;  %v6335_v7 = vpop.f32.mrb[104].mxu1  ;;  %v4918_v24 = vmax.f32 %v4886_v33, 0.0 }
 0x6c6   : > { %v4921_v45 = vmax.f32 %v4889_v47, 0.0  ;;  %v6415_v11 = vadd.f32 %v9079_v36, %v6335_v7  ;;  %v4641_v28 = vpop.f32.mrb[105].mxu1 }
 0x6c7   : > { %v4919_v27 = vmax.f32 %v4887_v23, 0.0  ;;  %v6418_v8 = vadd.f32 %v9073_v22, %v4641_v28  ;;  %v6336_v14 = vpop.f32.mrb[106].mxu1 }
 0x6c8   : > { %v5506_v9 = vpack.c.bf16 %v4921_v45, %v4920_v0  ;;  %v4855_v42 = vmul.f32 %v6415_v11, %v9123_v44  ;;  %v6421_v17 = vadd.f32 %v9082_v43, %v6336_v14  ;;  %v4644_v4 = vpop.f32.mrb[107].mxu1 }
 0x6c9   : > { %v5501_v13 = vpack.c.bf16 %v4919_v27, %v4918_v24  ;;  %v4853_v48 = vmul.f32 %v6418_v8, %v9123_v44  ;;  %v6424_v41 = vadd.f32 %v9076_v61, %v4644_v4 }
 0x6ca   : > { %5554 = vst [vmem:[%s9149_s5 + $0x38] sm:$0xff] %v5506_v9   ;;  %v4892_v36 = vadd.f32 %v9129_v40, %v4855_v42  ;;  %v4856_v60 = vmul.f32 %v6421_v17, %v9123_v44 }
 0x6cb   : > { %5553 = vst [vmem:[%s9149_s5 + $0x30] sm:$0xff] %v5501_v13   ;;  %v4890_v22 = vadd.f32 %v9129_v40, %v4853_v48  ;;  %v4854_v39 = vmul.f32 %v6424_v41, %v9123_v44 }
 0x6cc   : > { %v4893_v19 = vadd.f32 %v9129_v40, %v4856_v60  ;;  %v4924_v12 = vmax.f32 %v4892_v36, 0.0 }
 0x6cd   : > { %v4891_v43 = vadd.f32 %v9129_v40, %v4854_v39  ;;  %v6339_v18 = vpop.f32.mrb[108].mxu1  ;;  %v4922_v32 = vmax.f32 %v4890_v22, 0.0 }
 0x6ce   : > { %v4925_v3 = vmax.f32 %v4893_v19, 0.0  ;;  %v6427_v61 = vadd.f32 %v9091_v21, %v6339_v18  ;;  %v4657_v58 = vpop.f32.mrb[109].mxu1 }
 0x6cf   : > { %v4923_v20 = vmax.f32 %v4891_v43, 0.0  ;;  %v6430_v63 = vadd.f32 %v9085_v46, %v4657_v58  ;;  %v6340_v15 = vpop.f32.mrb[110].mxu1 }
 0x6d0   : > { %v5516_v37 = vpack.c.bf16 %v4925_v3, %v4924_v12  ;;  %v4859_v16 = vmul.f32 %v6427_v61, %v9123_v44  ;;  %v6433_v31 = vadd.f32 %v9094_v29, %v6340_v15  ;;  %v4660_v5 = vpop.f32.mrb[111].mxu1 }
 0x6d1   : > { %v5511_v30 = vpack.c.bf16 %v4923_v20, %v4922_v32  ;;  %v4857_v53 = vmul.f32 %v6430_v63, %v9123_v44  ;;  %v6436_v59 = vadd.f32 %v9088_v50, %v4660_v5 }
 0x6d2   : > { %5556 = vst [vmem:[%s9149_s5 + $0x48] sm:$0xff] %v5516_v37   ;;  %v4896_v21 = vadd.f32 %v9129_v40, %v4859_v16  ;;  %v4860_v10 = vmul.f32 %v6433_v31, %v9123_v44 }
 0x6d3   : > { %5555 = vst [vmem:[%s9149_s5 + $0x40] sm:$0xff] %v5511_v30   ;;  %v4894_v46 = vadd.f32 %v9129_v40, %v4857_v53  ;;  %v4858_v52 = vmul.f32 %v6436_v59, %v9123_v44 }
 0x6d4   : > { %v4897_v51 = vadd.f32 %v9129_v40, %v4860_v10  ;;  %v4928_v62 = vmax.f32 %v4896_v21, 0.0 }
 0x6d5   : > { %v4895_v29 = vadd.f32 %v9129_v40, %v4858_v52  ;;  %v6343_v6 = vpop.f32.mrb[112].mxu1  ;;  %v4926_v54 = vmax.f32 %v4894_v46, 0.0 }
 0x6d6   : > { %v4929_v49 = vmax.f32 %v4897_v51, 0.0  ;;  %v6439_v50 = vadd.f32 %v9103_v55, %v6343_v6  ;;  %v4673_v57 = vpop.f32.mrb[113].mxu1 }
 0x6d7   : > { %v4927_v33 = vmax.f32 %v4895_v29, 0.0  ;;  %v6442_v1 = vadd.f32 %v9097_v56, %v4673_v57  ;;  %v6344_v47 = vpop.f32.mrb[114].mxu1 }
 0x6d8   : > { %v5526_v23 = vpack.c.bf16 %v4929_v49, %v4928_v62  ;;  %v4863_v7 = vmul.f32 %v6439_v50, %v9123_v44  ;;  %v6445_v0 = vadd.f32 %v9106_v38, %v6344_v47  ;;  %v4676_v45 = vpop.f32.mrb[115].mxu1 }
 0x6d9   : > { %v5521_v11 = vpack.c.bf16 %v4927_v33, %v4926_v54  ;;  %v4861_v28 = vmul.f32 %v6442_v1, %v9123_v44  ;;  %v6448_v24 = vadd.f32 %v9100_v26, %v4676_v45 }
 0x6da   : > { %5558 = vst [vmem:[%s9149_s5 + $0x58] sm:$0xff] %v5526_v23   ;;  %v4900_v55 = vadd.f32 %v9129_v40, %v4863_v7  ;;  %v4864_v27 = vmul.f32 %v6445_v0, %v9123_v44 }
 0x6db   : > { %5557 = vst [vmem:[%s9149_s5 + $0x50] sm:$0xff] %v5521_v11   ;;  %v4898_v56 = vadd.f32 %v9129_v40, %v4861_v28  ;;  %v4862_v8 = vmul.f32 %v6448_v24, %v9123_v44 }
 0x6dc   : > { %v4901_v14 = vadd.f32 %v9129_v40, %v4864_v27  ;;  %v4932_v42 = vmax.f32 %v4900_v55, 0.0 }
 0x6dd   : > { %v4899_v38 = vadd.f32 %v9129_v40, %v4862_v8  ;;  %v6347_v9 = vpop.f32.mrb[116].mxu1  ;;  %v4930_v13 = vmax.f32 %v4898_v56, 0.0 }
 0x6de   : > { %v4933_v17 = vmax.f32 %v4901_v14, 0.0  ;;  %v6451_v26 = vadd.f32 %v9115_v25, %v6347_v9  ;;  %v4689_v4 = vpop.f32.mrb[117].mxu1 }
 0x6df   : > { %v4931_v48 = vmax.f32 %v4899_v38, 0.0  ;;  %v6454_v41 = vadd.f32 %v9109_v2, %v4689_v4  ;;  %v6348_v36 = vpop.f32.mrb[118].mxu1 }
 0x6e0   : > { %v5536_v60 = vpack.c.bf16 %v4933_v17, %v4932_v42  ;;  %v4867_v22 = vmul.f32 %v6451_v26, %v9123_v44  ;;  %v6457_v39 = vadd.f32 %v9118_v35, %v6348_v36  ;;  %v4692_v19 = vpop.f32.mrb[119].mxu1 }
 0x6e1   : > { %v5531_v43 = vpack.c.bf16 %v4931_v48, %v4930_v13  ;;  %v4865_v18 = vmul.f32 %v6454_v41, %v9123_v44  ;;  %v6460_v25 = vadd.f32 %v9112_v34, %v4692_v19 }
 0x6e2   : > { %5560 = vst [vmem:[%s9149_s5 + $0x68] sm:$0xff] %v5536_v60   ;;  %v4904_v12 = vadd.f32 %v9129_v40, %v4867_v22  ;;  %v4868_v3 = vmul.f32 %v6457_v39, %v9123_v44 }
 0x6e3   : > { %5559 = vst [vmem:[%s9149_s5 + $0x60] sm:$0xff] %v5531_v43   ;;  %v4902_v2 = vadd.f32 %v9129_v40, %v4865_v18  ;;  %v4866_v61 = vmul.f32 %v6460_v25, %v9123_v44 }
 0x6e4   : > { %v4905_v35 = vadd.f32 %v9129_v40, %v4868_v3  ;;  %v4936_v34 = vmax.f32 %v4904_v12, 0.0 }
 0x6e5   : > { %v4903_v58 = vadd.f32 %v9129_v40, %v4866_v61  ;;  %v4934_v20 = vmax.f32 %v4902_v2, 0.0 }
 0x6e6   : > { %v4937_v32 = vmax.f32 %v4905_v35, 0.0 }
 0x6e7   : > { %v4935_v63 = vmax.f32 %v4903_v58, 0.0 }
 0x6e8   : > { %v5546_v15 = vpack.c.bf16 %v4937_v32, %v4936_v34 }
 0x6e9   : > { %v5541_v44 = vpack.c.bf16 %v4935_v63, %v4934_v20 }
 0x6ea   : > { %5562 = vst [vmem:[%s9149_s5 + $0x78] sm:$0xff] %v5546_v15  }
 0x6eb   : > { %5561 = vst [vmem:[%s9149_s5 + $0x70] sm:$0xff] %v5541_v44  }
 0x6ec   : > { %6916 = shalt.err (!%p6913_p2)
}
 0x6ed   : > { %s6917_s10 = scalar_lea.hbm %s9248_s9, 2048  ;;  %s6921_s8 = scalar_lea.hbm %s9305_s4, 4096 }
 0x6ee   : > { %p6918_p0 = scmp.ne.s32.totalorder %s9248_s9, %s6917_s10  ;;  %p6922_p6 = scmp.lt.u32.totalorder %s9248_s9, %s9305_s4 }
 0x6ef   : > { %p6923_p7 = scmp.lt.u32.totalorder %s6921_s8, %s6917_s10  ;;  %p6925_p8 = scmp.lt.u32.totalorder %s6917_s10, %s9248_s9 }
 0x6f0   : > { %p6919_p4 = pnand %p6918_p0, %p9556_p12 }
 0x6f1   : > { %p6924_p11 = por %p6923_p7, %p6922_p6 }
 0x6f2   : > { %p6920_p13 = pneg %p6919_p4 }
 0x6f3   : > { %p6926_p1 = por %p6925_p8, %p6924_p11 }
 0x6f5   : > { %p6927_p10 = pnand %p6926_p1, %p6920_p13 }
 0x6f7   : > { %6930 = shalt.err (!%p6927_p10)
}
 0x6f8   : > { %s6998_s6 = smov 64   ;;  %s6999_s13 = smov 4  }
 0x6f9   : > { %6558 = dma.vmem_to_hbm [thread:$0]  (%p9556_p12), %s9250_s21, 2048, %s9248_s9, %s5099_s18, %s6998_s6, %s6998_s6, %s6999_s13  }
 0x6fa PF: > { %s5130_s24 = sand.u32 1, %s6969_s15   ;;  %p9557_p3 = scmp.ne.s32.totalorder %s9369_s26, 0 }
 0x6fb   : > { %p9558_p5 = scmp.ge.s32.totalorder %s6989_s20, 2  ;;  %s5131_s23 = scalar_lea.sflag [#allocation6], %s5130_s24 }
 0x6fd   : > { %p6572_p9 = pnand %p9558_p5, %p9557_p3 }
 0x6ff   : > { %6964 = dma.done.wait (!%p6572_p9), %s5131_s23, 2048  }
 0x700   : > { %6966 = vsyncadd (!%p6572_p9), %s5131_s23, 4294965248  ;;  %s21_s20 = sadd.s32 1, %s6989_s20   ;;  %s9559_s15 = smov %s6973_s16 }
 0x701   : > { %p18_p2 = scmp.ge.s32.totalorder %s21_s20, 4   ;;  %s9560_s16 = smov %s6977_s17 }
 0x702   : > { %s9561_s17 = smov %s7176_s11  ;;  %s9562_s18 = smov %s6985_s19 }
 0x703   : > { %s9563_s19 = smov %s9565_s30  ;;  %20 = sbr.rel (!%p18_p2) target bundleno = 7 (0x7), region = 98 }
 0x70a   :  { %5136 = vsyncpa [#allocation5], 1 }
 0x70b   :  { %5138 = vsyncpa [#allocation5 + $0x1], 1 }
 0x70c   :  { %5139 = vsyncpa [#allocation8], 1 }
 0x70d   :  { %5140 = vsyncpa [#allocation6], 1 }
 0x70e   :  { %5142 = vsyncpa [#allocation6 + $0x1], 1 }

// kernel: tpu_custom_call.1
= control target key start
LH: loop header
LB: loop body
LE: loop exit
PB: predicated region body
PF: predicated region fallthrough
CT: control target
= control target key end

     0   :  { %9 = vsyncpa [#allocation5], 0  ;;  %s9301_s0 = inlined_call_operand.hbm [shape: bf16[2,20,16,128], index: 0, kind: input, shape index: {}]   ;;  %s9302_s1 = inlined_call_operand.hbm [shape: bf16[3,384,128], index: 1, kind: input, shape index: {}]   ;;  %s9303_s2 = inlined_call_operand.hbm [shape: bf16[3,384,128], index: 2, kind: input, shape index: {}]   ;;  %s9304_s3 = inlined_call_operand.vmem [shape: f32[4,128], index: 3, kind: input, shape index: {}]   ;;  %s9305_s4 = inlined_call_operand.hbm [shape: bf16[2,16,16,128], index: 4, kind: output, shape index: {}]  }
   0x1   :  { %11 = vsyncpa [#allocation5 + $0x1], 0 }
   0x2   :  { %12 = vsyncpa [#allocation8], 0 }
   0x3   :  { %13 = vsyncpa [#allocation6], 0 }
   0x4   :  { %15 = vsyncpa [#allocation6 + $0x1], 0  ;;  %s7025_s15 = smov 0   ;;  %s7027_s16 = smov 0  }
   0x5   :  { %s7029_s17 = smov 0   ;;  %s7031_s18 = smov 0  }
   0x6   :  { %s7033_s19 = smov 0   ;;  %s7035_s20 = smov 0  }
   0x7 LB: > { %s5219_s21 = sadd.s32 4294967295, %s6989_s20   ;;  %s5220_s22 = sadd.s32 4294967294, %s6989_s20   ;;  %s6989_s20 = sphi %s7035_s20, %s21_s20   ;;  %s6985_s19 = sphi %s7033_s19, %s9563_s19   ;;  %s6981_s18 = sphi %s7031_s18, %s9562_s18   ;;  %s6977_s17 = sphi %s7029_s17, %s9561_s17   ;;  %s6973_s16 = sphi %s7027_s16, %s9560_s16   ;;  %s6969_s15 = sphi %s7025_s15, %s9559_s15  }
   0x8   : > { %p55_p0 = scmp.ne.s32.totalorder %s6973_s16, %s6969_s15  ;;  %p7059_p1 = scmp.eq.s32.totalorder %s5219_s21, 0 }
   0x9   : > { %p7063_p2 = scmp.eq.s32.totalorder %s5219_s21, 1  ;;  %p150_p3 = scmp.eq.s32.totalorder %s5220_s22, 1 }
   0xa   : > { %s9366_s23 = scalar_select %p7059_p1, 1, 0 }
   0xb   : > { %p7069_p4 = por %p7059_p1, %p55_p0  ;;  %p5221_p5 = scmp.ge.s32.totalorder %s6989_s20, 1 }
   0xc   : > { %p7074_p6 = por %p150_p3, %p55_p0  ;;  %p157_p7 = scmp.lt.s32.totalorder %s6989_s20, 3 }
   0xd   : > { %s9368_s25 = scalar_select %p7069_p4, 1, 0 }
   0xe   : > { %s9369_s26 = scalar_select %p7074_p6, 1, 0 }
   0xf   : > { %p7079_p8 = pnand %p5221_p5, %p157_p7  ;;  %s6991_s28 = smov [#allocation7]  }
  0x10   : > { %s169_s29 = sshll.u32 %s6991_s28, 4  ;;  %s6992_s5 = smov [#allocation9]   ;;  %s7083_s29 = int_to_ptr.vmem [resolvable:$true] %s169_s29 }
  0x11   : > { %p6560_p9 = pneg %p7079_p8  ;;  %s182_s6 = sshll.u32 %s6992_s5, 4  ;;  %s7094_s6 = int_to_ptr.vmem [resolvable:$true] %s182_s6 }
  0x12   : > { %s6817_s9 = scalar_lea.hbm %s9302_s1, 9216 }
  0x13   : > { %p7090_p11 = pnand %p6560_p9, %p7059_p1  ;;  %p6818_p12 = scmp.ne.s32.totalorder %s9302_s1, %s6817_s9 }
  0x14   : > { %p6824_p5 = scmp.lt.u32.totalorder %s6817_s9, %s9302_s1 }
  0x15   : > { %p6819_p13 = pneg %p7090_p11 }
  0x17   : > { %p6820_p0 = pnand %p6819_p13, %p6818_p12 }
  0x19   : > { %p6821_p3 = pneg %p6820_p0 }
  0x1b   : > { %p6826_p7 = pnand %p6824_p5, %p6821_p3 }
  0x1d   : > { %6829 = shalt.err (!%p6826_p7)
}
  0x1e   : > { %s6830_s14 = scalar_lea.vmem %s7083_s29, 9216  ;;  %p6838_p1 = scmp.lt.s32.totalorder %s7083_s29, %s7083_s29 }
  0x1f   : > { %p6831_p9 = scmp.ne.s32.totalorder %s7083_s29, %s6830_s14  ;;  %p6839_p12 = scmp.lt.s32.totalorder %s6830_s14, %s6830_s14 }
  0x21   : > { %p6833_p10 = pnand %p6831_p9, %p6819_p13  ;;  %p6840_p0 = por %p6839_p12, %p6838_p1 }
  0x23   : > { %p6834_p6 = pneg %p6833_p10 }
  0x25   : > { %p6841_p4 = pnand %p6840_p0, %p6834_p6 }
  0x27   : > { %6844 = shalt.err (!%p6841_p4)
}
  0x28   : > { %s9309_s21 = smov 64   ;;  %s6994_s22 = smov 4  }
  0x29   : > { %6563 = dma.hbm_to_vmem [thread:$0]  (!%p7090_p11), %s9302_s1, 9216, %s7083_s29, [#allocation8], %s9309_s21, %s9309_s21, %s6994_s22  }
  0x2a   : > { %s6845_s9 = scalar_lea.hbm %s9303_s2, 9216 }
  0x2b   : > { %p6846_p1 = scmp.ne.s32.totalorder %s9303_s2, %s6845_s9  ;;  %p6852_p10 = scmp.lt.u32.totalorder %s6845_s9, %s9303_s2 }
  0x2d   : > { %p6848_p4 = pnand %p6846_p1, %p6819_p13 }
  0x2f   : > { %p6849_p6 = pneg %p6848_p4 }
  0x31   : > { %p6854_p3 = pnand %p6852_p10, %p6849_p6 }
  0x33   : > { %6857 = shalt.err (!%p6854_p3)
}
  0x34   : > { %s6858_s29 = scalar_lea.vmem %s7094_s6, 9216  ;;  %p6866_p12 = scmp.lt.s32.totalorder %s7094_s6, %s7094_s6 }
  0x35   : > { %p6859_p5 = scmp.ne.s32.totalorder %s7094_s6, %s6858_s29  ;;  %p6867_p0 = scmp.lt.s32.totalorder %s6858_s29, %s6858_s29 }
  0x37   : > { %p6861_p7 = pnand %p6859_p5, %p6819_p13  ;;  %p6868_p1 = por %p6867_p0, %p6866_p12 }
  0x39   : > { %p6862_p9 = pneg %p6861_p7 }
  0x3b   : > { %p6869_p4 = pnand %p6868_p1, %p6862_p9 }
  0x3d   : > { %6872 = shalt.err (!%p6869_p4)
}
  0x3e   : > { %6566 = dma.hbm_to_vmem [thread:$0]  (!%p7090_p11), %s9303_s2, 9216, %s7094_s6, [#allocation8], %s9309_s21, %s9309_s21, %s6994_s22  }
  0x3f   : > { %s33_s30 = sadd.s32 1, %s6985_s19  ;;  %s42_s5 = sadd.s32 1, %s6977_s17 }
  0x40   : > { %p35_p13 = scmp.ge.s32.totalorder %s33_s30, 2  ;;  %p49_p6 = scmp.ne.s32.totalorder %s6977_s17, %s6973_s16 }
  0x41   : > { %p50_p10 = scmp.eq.s32.totalorder %s6989_s20, 0  ;;  %p6577_p3 = scmp.lt.s32.totalorder %s6989_s20, 2 }
  0x42   : > { %s9565_s30 = smov (%p35_p13, %s33_s30), 0  ;;  %p7164_p7 = por %p7063_p2, %p49_p6 }
  0x43   : > { %p51_p5 = por %p50_p10, %p49_p6  ;;  %s39_s8 = ssub.s32 %s6985_s19, %s9565_s30 }
  0x44   : > { %s9372_s7 = scalar_select %p7164_p7, 1, 0 }
  0x45   : > { %s199_s9 = sand.u32 1, %s6977_s17   ;;  %p40_p9 = scmp.eq.s32.totalorder %s39_s8, 0 }
  0x46   : > { %s6545_s6 = smul.u32 160, %s199_s9  ;;  %p7171_p11 = pnand %p6577_p3, %p51_p5 }
  0x47   : > { %s7176_s11 = scalar_select %p40_p9, %s6977_s17, %s42_s5  }
  0x48   : > { %s6546_s12 = smul.u32 2560, %s6985_s19  ;;  %s203_s13 = scalar_lea.vmem [#allocation4], %s6545_s6 }
  0x49   : > { %s211_s29 = sshll.u32 %s203_s13, 4  ;;  %s7186_s8 = scalar_lea.sflag [#allocation5], %s199_s9  ;;  %s7184_s29 = int_to_ptr.vmem [resolvable:$true] %s211_s29 }
  0x4a   : > { %s7182_s28 = scalar_lea.hbm %s9301_s0, %s6546_s12  ;;  %p6875_p12 = pneg %p7171_p11 }
  0x4b   : > { %s6873_s21 = scalar_lea.hbm %s7182_s28, 2560  ;;  %s6878_s12 = scalar_lea.hbm %s9301_s0, 5120 }
  0x4c   : > { %p6874_p2 = scmp.ne.s32.totalorder %s7182_s28, %s6873_s21  ;;  %p6879_p4 = scmp.lt.u32.totalorder %s7182_s28, %s9301_s0 }
  0x4d   : > { %p6880_p13 = scmp.lt.u32.totalorder %s6878_s12, %s6873_s21  ;;  %p6882_p10 = scmp.lt.u32.totalorder %s6873_s21, %s7182_s28 }
  0x4e   : > { %p6876_p0 = pnand %p6875_p12, %p6874_p2 }
  0x4f   : > { %p6881_p6 = por %p6880_p13, %p6879_p4 }
  0x50   : > { %p6877_p1 = pneg %p6876_p0 }
  0x51   : > { %p6883_p3 = por %p6882_p10, %p6881_p6 }
  0x53   : > { %p6884_p5 = pnand %p6883_p3, %p6877_p1 }
  0x55   : > { %6887 = shalt.err (!%p6884_p5)
}
  0x56   : > { %s6888_s9 = scalar_lea.vmem %s7184_s29, 2560  ;;  %s6995_s14 = smov [#allocation4]  }
  0x57   : > { %p6889_p9 = scmp.ne.s32.totalorder %s7184_s29, %s6888_s9  ;;  %s6893_s5 = sshll.u32 %s6995_s14, 4  ;;  %s6894_s5 = int_to_ptr.vmem [resolvable:$false] %s6893_s5 }
  0x58   : > { %s6895_s6 = scalar_lea.vmem %s6894_s5, 5120  ;;  %p6896_p7 = scmp.lt.s32.totalorder %s7184_s29, %s6894_s5 }
  0x59   : > { %p6891_p2 = pnand %p6889_p9, %p6875_p12  ;;  %p6897_p4 = scmp.lt.s32.totalorder %s6895_s6, %s6888_s9 }
  0x5b   : > { %p6892_p0 = pneg %p6891_p2  ;;  %p6898_p13 = por %p6897_p4, %p6896_p7 }
  0x5d   : > { %p6899_p6 = pnand %p6898_p13, %p6892_p0 }
  0x5f   : > { %6902 = shalt.err (!%p6899_p6)
}
  0x60   : > { %s9374_s21 = smov 64   ;;  %223 = sbr.rel (%p7079_p8) target bundleno = 1786 (0x6fa), region = 36 }
  0x61   : > { %6570 = dma.hbm_to_vmem [thread:$0]  (!%p7171_p11), %s7182_s28, 2560, %s7184_s29, %s7186_s8, %s9374_s21, %s9374_s21, %s6994_s22  }
  0x67   : > { %s7220_s12 = sand.u32 1, %s6973_s16   ;;  %p9375_p7 = scmp.ne.s32.totalorder %s9368_s25, 0 }
  0x68   : > { %s6547_s13 = smul.u32 160, %s7220_s12  ;;  %s226_s24 = scalar_lea.sflag [#allocation5], %s7220_s12 }
  0x6a   : > { %s7224_s9 = scalar_lea.vmem [#allocation4], %s6547_s13 }
  0x6b   : > { %6956 = dma.done.wait (%p9375_p7), %s226_s24, 2560  }
  0x6c   : > { %6958 = vsyncadd (%p9375_p7), %s226_s24, 4294964736  ;;  %p9376_p11 = scmp.ne.s32.totalorder %s9366_s23, 0 }
  0x6e   : > { %6960 = dma.done.wait (%p9376_p11), [#allocation8], 18432  }
  0x6f   : > { %6962 = vsyncadd (%p9376_p11), [#allocation8], 4294948864  ;;  %v9319_v0 = vmov 0   ;;  %v6636_v1 = vld [vmem:[#allocation7] sm:$0xff]   ;;  %v6637_v2 = vld [vmem:[#allocation7 + $0x8] sm:$0xff]   ;;  %vm565_vm1 = vcmask 1040384  }
  0x70   : > { %883 = vmatprep.subr.bf16.mxu0 %v9319_v0  ;;  %v6638_v3 = vld [vmem:[#allocation7 + $0x10] sm:$0xff]   ;;  %v6639_v4 = vld [vmem:[#allocation7 + $0x18] sm:$0xff]   ;;  %v6640_v5 = vld [vmem:[#allocation7 + $0x20] sm:$0xff]   ;;  %vm566_vm0 = vsmask.f32 256  ;;  %v9377_v16 = vmov 0 }
  0x71   : > { %884 = vmatpush1.bf16.msra.mxu0 %v6636_v1  ;;  %v7240_v6 = vld [vmem:[%s7224_s9] sm:$0xff]   ;;  %v6641_v7 = vld [vmem:[#allocation7 + $0x28] sm:$0xff]   ;;  %v6642_v8 = vld [vmem:[#allocation7 + $0x30] sm:$0xff]   ;;  %vm648_vm3 = vcmask 1047552   ;;  %vm649_vm4 = vsmask.f32 7424 }
  0x72   : > { %885 = vmatprep.subr.bf16.mxu0 %v9319_v0  ;;  %915 = vmatprep.mubr.bf16.mxu0 %v7240_v6  ;;  %v6643_v9 = vld [vmem:[#allocation7 + $0x38] sm:$0xff]   ;;  %v6644_v10 = vld [vmem:[#allocation7 + $0x40] sm:$0xff]   ;;  %v6645_v11 = vld [vmem:[#allocation7 + $0x48] sm:$0xff]   ;;  %v406_v15 = vshrl.u32 %v7240_v6, 16  ;;  %v409_v18 = vshll.u32 %v7240_v6, 16  ;;  %s5229_s14 = sshll.u32 %s7220_s12, 7 }
  0x73   : > { %v6646_v12 = vld [vmem:[#allocation7 + $0x50] sm:$0xff]   ;;  %v6647_v13 = vld [vmem:[#allocation7 + $0x58] sm:$0xff]   ;;  %v6648_v14 = vld [vmem:[#allocation7 + $0x60] sm:$0xff]   ;;  %s9149_s5 = scalar_lea.vmem [#allocation10], %s5229_s14  ;;  %s5467_s6 = sshll.u32 %s6981_s18, 11 }
  0x74   : > { %vm7252_vm2 = vmand %vm565_vm1, %vm566_vm0  ;;  %v6649_v17 = vld [vmem:[#allocation7 + $0x68] sm:$0xff]   ;;  %v6650_v19 = vld [vmem:[#allocation7 + $0x70] sm:$0xff]   ;;  %v408_v20 = vrot.slane %v406_v15, 7  ;;  %v588_v43 = vrot.slane %v409_v18, 1  ;;  %s5115_s21 = sshll.u32 %s9149_s5, 4  ;;  %s5099_s18 = scalar_lea.sflag [#allocation6], %s7220_s12  ;;  %s9250_s21 = int_to_ptr.vmem [resolvable:$true] %s5115_s21 }
  0x75   : > { %886 = vmatpush1.bf16.msra.mxu0 %v6637_v2  ;;  %v9378_v16 = vsel %vm7252_vm2, 4294967295, %v9377_v16  ;;  %v6654_v21 = vld [vmem:[%s7224_s9 + $0x8] sm:$0xff]   ;;  %v6651_v22 = vld [vmem:[#allocation7 + $0x78] sm:$0xff]   ;;  %v6653_v25 = vld [vmem:[#allocation7 + $0x80] sm:$0xff]   ;;  %s6903_s23 = scalar_lea.vmem %s9250_s21, 2048  ;;  %p9556_p12 = scmp.ne.s32.totalorder %s9372_s7, 0 }
  0x76   : > { %887 = vmatprep.subr.bf16.mxu0 %v9319_v0  ;;  %9379 = vst [vmem:[#allocation14_spill] sm:$0xff] %v9378_v16  ;;  %v411_v23 = vor.u32 %v409_v18, %v408_v20  ;;  %v413_v24 = vshrl.u32 %v6654_v21, 16  ;;  %v416_v26 = vshll.u32 %v6654_v21, 16  ;;  %v6655_v27 = vld [vmem:[%s7224_s9 + $0x10] sm:$0xff]   ;;  %v6656_v30 = vld [vmem:[#allocation7 + $0x88] sm:$0xff]   ;;  %v7265_v35 = vld [vmem:[%s7224_s9 + $0x18] sm:$0xff]   ;;  %v7279_v47 = vor.u32 %v588_v43, %v406_v15  ;;  %p6904_p8 = scmp.ne.s32.totalorder %s9250_s21, %s6903_s23 }
  0x77   : > { %v420_v32 = vshrl.u32 %v6655_v27, 16  ;;  %v423_v33 = vshll.u32 %v6655_v27, 16  ;;  %v6659_v36 = vld [vmem:[#allocation7 + $0x90] sm:$0xff]   ;;  %v6662_v39 = vld [vmem:[#allocation7 + $0x98] sm:$0xff]   ;;  %v427_v40 = vshrl.u32 %v7265_v35, 16  ;;  %v7273_v41 = vld [vmem:[%s7224_s9 + $0x20] sm:$0xff]  }
  0x78   : > { %v568_v28 = vsel %vm7252_vm2, 0, %v411_v23  ;;  %v415_v29 = vrot.slane %v413_v24, 7  ;;  %v590_v34 = vrot.slane %v416_v26, 1  ;;  %v430_v44 = vshll.u32 %v7265_v35, 16  ;;  %v6666_v45 = vld [vmem:[#allocation7 + $0xa0] sm:$0xff]   ;;  %v6669_v51 = vld [vmem:[#allocation7 + $0xa8] sm:$0xff]   ;;  %vm7346_vm5 = vmand %vm648_vm3, %vm649_vm4  ;;  %p6905_p1 = pnand %p6904_p8, %p9556_p12 }
  0x79   : > { %888 = vmatpush1.bf16.msra.mxu0 %v6638_v3  ;;  %v422_v38 = vrot.slane %v420_v32, 7  ;;  %v429_v48 = vrot.slane %v427_v40, 7  ;;  %v434_v49 = vshrl.u32 %v7273_v41, 16  ;;  %v437_v54 = vshll.u32 %v7273_v41, 16  ;;  %v7291_v55 = vld [vmem:[%s7224_s9 + $0x28] sm:$0xff]   ;;  %v6672_v56 = vld [vmem:[#allocation7 + $0xb0] sm:$0xff]  }
  0x7a   : > { %889 = vmatprep.subr.bf16.mxu0 %v9319_v0  ;;  %v418_v31 = vor.u32 %v416_v26, %v415_v29  ;;  %v7277_v46 = vor.u32 %v590_v34, %v413_v24  ;;  %v592_v57 = vrot.slane %v423_v33, 1  ;;  %v594_v59 = vrot.slane %v430_v44, 1  ;;  %v7299_v60 = vld [vmem:[%s7224_s9 + $0x30] sm:$0xff]   ;;  %v6675_v1 = vld [vmem:[#allocation7 + $0xb8] sm:$0xff]   ;;  %v7364_v26 = vld [vmem:[%s7224_s9 + $0x48] sm:$0xff]   ;;  %p6906_p10 = pneg %p6905_p1  ;;  %s6997_s25 = smov [#allocation10]  }
  0x7b   : > { %v425_v42 = vor.u32 %v423_v33, %v422_v38  ;;  %v432_v52 = vor.u32 %v430_v44, %v429_v48  ;;  %v436_v53 = vrot.slane %v434_v49, 7  ;;  %v441_v63 = vshrl.u32 %v7291_v55, 16  ;;  %v7404_v48 = vld [vmem:[%s7224_s9 + $0x60] sm:$0xff]   ;;  %s6907_s27 = sshll.u32 %s6997_s25, 4  ;;  %s6908_s27 = int_to_ptr.vmem [resolvable:$false] %s6907_s27 }
  0x7c   : > { %v7269_v37 = vsel %vm7252_vm2, 0, %v418_v31  ;;  %v7301_v61 = vor.u32 %v592_v57, %v420_v32  ;;  %v7303_v62 = vor.u32 %v594_v59, %v427_v40  ;;  %v444_v3 = vshll.u32 %v7291_v55, 16  ;;  %v7375_v32 = vld [vmem:[%s7224_s9 + $0x50] sm:$0xff]   ;;  %v7390_v40 = vld [vmem:[%s7224_s9 + $0x58] sm:$0xff]   ;;  %s6909_s22 = scalar_lea.vmem %s6908_s27, 4096  ;;  %p6910_p3 = scmp.lt.s32.totalorder %s9250_s21, %s6908_s27 }
  0x7d   : > { %890 = vmatpush1.bf16.msra.mxu0 %v6639_v4  ;;  %v7284_v50 = vsel %vm7252_vm2, 0, %v425_v42  ;;  %v7296_v58 = vsel %vm7252_vm2, 0, %v432_v52  ;;  %v439_v2 = vor.u32 %v437_v54, %v436_v53  ;;  %v443_v4 = vrot.slane %v441_v63, 7  ;;  %p6911_p5 = scmp.lt.s32.totalorder %s6909_s22, %s6903_s23 }
  0x7e   : > { %891 = vmatprep.subr.bf16.mxu0 %v9319_v0  ;;  %9380 = vst [vmem:[#allocation15_spill] sm:$0xff] %v7296_v58  ;;  %v9383_v20 = vmov 0  ;;  %v472_v31 = vshll.u32 %v7364_v26, 16  ;;  %v476_v38 = vshrl.u32 %v7375_v32, 16 }
  0x7f   : > { %v7316_v6 = vsel %vm7252_vm2, 0, %v439_v2  ;;  %v9384_v20 = vsel %vm7346_vm5, 4294967295, %v9383_v20  ;;  %v493_v2 = vshll.u32 %v7404_v48, 16  ;;  %p6912_p9 = por %p6911_p5, %p6910_p3 }
  0x80   : > { %9381 = vst [vmem:[#allocation16_spill] sm:$0xff] %v7316_v6  ;;  %9385 = vst [vmem:[#allocation18_spill] sm:$0xff] %v9384_v20  ;;  %v478_v43 = vrot.slane %v476_v38, 7 }
  0x81   : > { %892 = vmatpush1.bf16.msra.mxu0 %v6640_v5  ;;  %v448_v5 = vshrl.u32 %v7299_v60, 16  ;;  %p6913_p2 = pnand %p6912_p9, %p6906_p10 }
  0x82   : > { %893 = vmatprep.subr.bf16.mxu0 %v9319_v0 }
  0x85   : > { %894 = vmatpush1.bf16.msra.mxu0 %v6641_v7  ;;  %v7319_v7 = vld [vmem:[%s7224_s9 + $0x38] sm:$0xff]  }
  0x86   : > { %895 = vmatprep.subr.bf16.mxu0 %v9319_v0 }
  0x89   : > { %896 = vmatpush1.bf16.msra.mxu0 %v6642_v8  ;;  %v446_v8 = vor.u32 %v444_v3, %v443_v4  ;;  %v7426_v4 = vld [vmem:[%s7224_s9 + $0x68] sm:$0xff]  }
  0x8a   : > { %897 = vmatprep.subr.bf16.mxu0 %v9319_v0 }
  0x8d   : > { %898 = vmatpush1.bf16.msra.mxu0 %v6643_v9  ;;  %v451_v9 = vshll.u32 %v7299_v60, 16 }
  0x8e   : > { %899 = vmatprep.subr.bf16.mxu0 %v9319_v0 }
  0x91   : > { %900 = vmatpush1.bf16.msra.mxu0 %v6644_v10  ;;  %v450_v10 = vrot.slane %v448_v5, 7 }
  0x92   : > { %901 = vmatprep.subr.bf16.mxu0 %v9319_v0 }
  0x93   : > { %v453_v18 = vor.u32 %v451_v9, %v450_v10  ;;  %v9315_v10 = vshrl.u32 %v7426_v4, 16 }
  0x95   : > { %902 = vmatpush1.bf16.msra.mxu0 %v6645_v11  ;;  %v455_v11 = vshrl.u32 %v7319_v7, 16  ;;  %v7352_v23 = vsel %vm7252_vm2, 0, %v453_v18  ;;  %v500_v18 = vshll.u32 %v7426_v4, 16 }
  0x96   : > { %903 = vmatprep.subr.bf16.mxu0 %v9319_v0  ;;  %9386 = vst [vmem:[#allocation19_spill] sm:$0xff] %v7352_v23 }
  0x97   : > { %v457_v15 = vrot.slane %v455_v11, 7 }
  0x99   : > { %904 = vmatpush1.bf16.msra.mxu0 %v6646_v12  ;;  %v7332_v12 = vsel %vm7252_vm2, 0, %v446_v8 }
  0x9a   : > { %905 = vmatprep.subr.bf16.mxu0 %v9319_v0  ;;  %9382 = vst [vmem:[#allocation17_spill] sm:$0xff] %v7332_v12 }
  0x9d   : > { %906 = vmatpush1.bf16.msra.mxu0 %v6647_v13  ;;  %v7335_v13 = vld [vmem:[%s7224_s9 + $0x40] sm:$0xff]  }
  0x9e   : > { %907 = vmatprep.subr.bf16.mxu0 %v9319_v0 }
  0xa1   : > { %908 = vmatpush1.bf16.msra.mxu0 %v6648_v14  ;;  %v465_v14 = vshll.u32 %v7335_v13, 16 }
  0xa2   : > { %909 = vmatprep.subr.bf16.mxu0 %v9319_v0 }
  0xa5   : > { %910 = vmatpush1.bf16.msra.mxu0 %v6649_v17  ;;  %v458_v17 = vshll.u32 %v7319_v7, 16 }
  0xa6   : > { %911 = vmatprep.subr.bf16.mxu0 %v9319_v0 }
  0xa9   : > { %912 = vmatpush1.bf16.msra.mxu0 %v6650_v19  ;;  %v462_v19 = vshrl.u32 %v7335_v13, 16 }
  0xaa   : > { %913 = vmatprep.subr.bf16.mxu0 %v9319_v0 }
  0xad   : > { %914 = vmatpush1.bf16.msra.mxu0 %v6651_v22 }
  0xae   : > { %6049 = vmatprep.subr.bf16.mxu0 %v6653_v25 }
  0xb0   : > { %916 = vmatmul.mubr.bf16.vlgmr.msra.gmra.mrb[0].mxu0 %v568_v28  ;;  %v464_v28 = vrot.slane %v462_v19, 7 }
  0xb1   : > { %6050 = vmatpush3.bf16.msra.mxu0 %v6653_v25  ;;  %923 = vmatprep.mubr.bf16.mxu0 %v6654_v21  ;;  %v604_v21 = vrot.slane %v465_v14, 1  ;;  %v460_v25 = vor.u32 %v458_v17, %v457_v15  ;;  %v499_v15 = vrot.slane %v9315_v10, 7 }
  0xb2   : > { %6051 = vmatprep.subr.bf16.mxu0 %v6656_v30  ;;  %v467_v29 = vor.u32 %v465_v14, %v464_v28 }
  0xb3   : > { %v605_v22 = vor.u32 %v604_v21, %v462_v19  ;;  %v7441_v19 = vld [vmem:[%s7224_s9 + $0x70] sm:$0xff]   ;;  %v502_v21 = vor.u32 %v500_v18, %v499_v15 }
  0xb4   : > { %v7379_v33 = vsel %vm7252_vm2, 0, %v467_v29  ;;  %v507_v29 = vshll.u32 %v7441_v19, 16 }
  0xb5   : > { %6052 = vmatpush3.bf16.msra.mxu0 %v6656_v30  ;;  %v7356_v24 = vsel %vm7346_vm5, %v605_v22, 0  ;;  %v469_v30 = vshrl.u32 %v7364_v26, 16  ;;  %9388 = vst [vmem:[#allocation21_spill] sm:$0xff] %v7379_v33  ;;  %v9314_v22 = vshrl.u32 %v7441_v19, 16 }
  0xb6   : > { %6053 = vmatprep.subr.bf16.mxu0 %v6659_v36  ;;  %6181 = vmatprep.mubr.bf16.mxu1 %v7356_v24 }
  0xb7   : > { %v471_v34 = vrot.slane %v469_v30, 7  ;;  %v506_v28 = vrot.slane %v9314_v22, 7 }
  0xb8   : > { %924 = vmatmul.mubr.bf16.gmra.mrb[4].mxu0 %v7269_v37 }
  0xb9   : > { %931 = vmatprep.mubr.bf16.mxu0 %v6655_v27  ;;  %6054 = vmatpush3.bf16.msra.mxu0 %v6659_v36  ;;  %v7368_v27 = vsel %vm7252_vm2, 0, %v460_v25  ;;  %v474_v36 = vor.u32 %v472_v31, %v471_v34  ;;  %v7450_v25 = vsel %vm7252_vm2, 0, %v502_v21  ;;  %v7456_v34 = vld [vmem:[%s7224_s9 + $0x78] sm:$0xff]  }
  0xba   : > { %6055 = vmatprep.subr.bf16.mxu0 %v6662_v39  ;;  %9387 = vst [vmem:[#allocation20_spill] sm:$0xff] %v7368_v27  ;;  %9393 = vst [vmem:[#allocation26_spill] sm:$0xff] %v7450_v25 }
  0xbb   : > { %v7394_v42 = vsel %vm7252_vm2, 0, %v474_v36  ;;  %v509_v36 = vor.u32 %v507_v29, %v506_v28 }
  0xbc   : > { %9389 = vst [vmem:[#allocation22_spill] sm:$0xff] %v7394_v42 }
  0xbd   : > { %6056 = vmatpush3.bf16.msra.mxu0 %v6662_v39  ;;  %v479_v39 = vshll.u32 %v7375_v32, 16 }
  0xbe   : > { %6057 = vmatprep.subr.bf16.mxu0 %v6666_v45 }
  0xbf   : > { %v481_v44 = vor.u32 %v479_v39, %v478_v43  ;;  %v9311_v43 = vshrl.u32 %v7456_v34, 16 }
  0xc0   : > { %932 = vmatmul.mubr.bf16.gmra.mrb[8].mxu0 %v7284_v50 }
  0xc1   : > { %939 = vmatprep.mubr.bf16.mxu0 %v7265_v35  ;;  %6058 = vmatpush3.bf16.msra.mxu0 %v6666_v45  ;;  %v483_v45 = vshrl.u32 %v7390_v40, 16  ;;  %v7409_v52 = vsel %vm7252_vm2, 0, %v481_v44  ;;  %v7465_v44 = vsel %vm7252_vm2, 0, %v509_v36 }
  0xc2   : > { %6059 = vmatprep.subr.bf16.mxu0 %v6669_v51  ;;  %9390 = vst [vmem:[#allocation23_spill] sm:$0xff] %v7409_v52  ;;  %9394 = vst [vmem:[#allocation27_spill] sm:$0xff] %v7465_v44 }
  0xc3   : > { %v485_v53 = vrot.slane %v483_v45, 7 }
  0xc5   : > { %6060 = vmatpush3.bf16.msra.mxu0 %v6669_v51  ;;  %v486_v51 = vshll.u32 %v7390_v40, 16 }
  0xc6   : > { %6061 = vmatprep.subr.bf16.mxu0 %v6672_v56 }
  0xc7   : > { %v488_v57 = vor.u32 %v486_v51, %v485_v53  ;;  %v513_v53 = vrot.slane %v9311_v43, 7  ;;  %v7486_v43 = vld [vmem:[%s7224_s9 + $0x88] sm:$0xff]  }
  0xc8   : > { %940 = vmatmul.mubr.bf16.gmra.mrb[12].mxu0 %v7296_v58  ;;  %v9318_v22 = vshll.u32 %v7486_v43, 16 }
  0xc9   : > { %947 = vmatprep.mubr.bf16.mxu0 %v7273_v41  ;;  %6062 = vmatpush3.bf16.msra.mxu0 %v6672_v56  ;;  %v490_v56 = vshrl.u32 %v7404_v48, 16  ;;  %v7420_v59 = vsel %vm7252_vm2, 0, %v488_v57  ;;  %v9312_v57 = vshll.u32 %v7456_v34, 16 }
  0xca   : > { %6063 = vmatprep.subr.bf16.mxu0 %v6675_v1  ;;  %9391 = vst [vmem:[#allocation24_spill] sm:$0xff] %v7420_v59 }
  0xcd   : > { %6064 = vmatpush3.bf16.msra.mxu0 %v6675_v1  ;;  %v492_v1 = vrot.slane %v490_v56, 7 }
  0xce   : > { %1466 = vmatprep.subr.bf16.mxu0 %v9319_v0 }
  0xcf   : > { %v495_v8 = vor.u32 %v493_v2, %v492_v1  ;;  %v7471_v1 = vld [vmem:[%s7224_s9 + $0x80] sm:$0xff]  }
  0xd0   : > { %948 = vmatmul.mubr.bf16.gmra.mrb[16].mxu0 %v7316_v6  ;;  %v9313_v15 = vshrl.u32 %v7471_v1, 16  ;;  %v9317_v36 = vshll.u32 %v7471_v1, 16 }
  0xd1   : > { %955 = vmatprep.mubr.bf16.mxu0 %v7291_v55  ;;  %v7435_v14 = vsel %vm7252_vm2, 0, %v495_v8  ;;  %v516_v8 = vor.u32 %v9312_v57, %v513_v53  ;;  %v9316_v57 = vshrl.u32 %v7486_v43, 16 }
  0xd2   : > { %9392 = vst [vmem:[#allocation25_spill] sm:$0xff] %v7435_v14  ;;  %v520_v28 = vrot.slane %v9313_v15, 7 }
  0xd3   : > { %v7480_v21 = vsel %vm7252_vm2, 0, %v516_v8  ;;  %v527_v15 = vrot.slane %v9316_v57, 7  ;;  %v7515_v57 = vsel %vm7346_vm5, %v7277_v46, 0 }
  0xd4   : > { %9395 = vst [vmem:[#allocation28_spill] sm:$0xff] %v7480_v21  ;;  %v523_v53 = vor.u32 %v9317_v36, %v520_v28  ;;  %v6678_v36 = vld [vmem:[#allocation7 + $0xc0] sm:$0xff]  }
  0xd5   : > { %v530_v10 = vor.u32 %v9318_v22, %v527_v15  ;;  %v7520_v15 = vsel %vm7346_vm5, %v7301_v61, 0  ;;  %v7532_v61 = vsel %vm7346_vm5, %v7303_v62, 0  ;;  %v600_v22 = vrot.slane %v451_v9, 1  ;;  %v6682_v9 = vld [vmem:[#allocation7 + $0xe0] sm:$0xff]  }
  0xd6   : > { %v7495_v8 = vsel %vm7252_vm2, 0, %v523_v53  ;;  %v651_v53 = vsel %vm7346_vm5, %v7279_v47, 0  ;;  %9397 = vst [vmem:[#allocation30_spill] sm:$0xff] %v7520_v15  ;;  %v6679_v47 = vld [vmem:[#allocation7 + $0xc8] sm:$0xff]   ;;  %9398 = vst [vmem:[#allocation31_spill] sm:$0xff] %v7532_v61 }
  0xd7   : > { %9396 = vst [vmem:[#allocation29_spill] sm:$0xff] %v7495_v8  ;;  %v7506_v28 = vsel %vm7252_vm2, 0, %v530_v10  ;;  %v596_v10 = vrot.slane %v437_v54, 1  ;;  %v598_v54 = vrot.slane %v444_v3, 1  ;;  %v601_v3 = vor.u32 %v600_v22, %v448_v5  ;;  %v6683_v5 = vld [vmem:[#allocation7 + $0xe8] sm:$0xff]   ;;  %v6684_v22 = vld [vmem:[#allocation7 + $0xf0] sm:$0xff]  }
  0xd8   : > { %956 = vmatmul.mubr.bf16.gmra.mrb[20].mxu0 %v7332_v12 }
  0xd9   : > { %963 = vmatprep.mubr.bf16.mxu0 %v7299_v60  ;;  %v597_v46 = vor.u32 %v596_v10, %v434_v49  ;;  %v6681_v49 = vld [vmem:[#allocation7 + $0xd8] sm:$0xff]   ;;  %v599_v62 = vor.u32 %v598_v54, %v441_v63  ;;  %v608_v54 = vrot.slane %v479_v39, 1  ;;  %v6686_v39 = vld [vmem:[#allocation7 + $0x100] sm:$0xff]  }
  0xdb   : > { %v7552_v10 = vsel %vm7346_vm5, %v599_v62, 0  ;;  %v609_v62 = vor.u32 %v608_v54, %v476_v38  ;;  %v6689_v54 = vld [vmem:[#allocation7 + $0x118] sm:$0xff]  }
  0xe0   : > { %964 = vmatmul.mubr.bf16.gmra.mrb[24].mxu0 %v7352_v23 }
  0xe1   : > { %971 = vmatprep.mubr.bf16.mxu0 %v7319_v7 }
  0xe8   : > { %972 = vmatmul.mubr.bf16.gmra.mrb[28].mxu0 %v7368_v27 }
  0xe9   : > { %979 = vmatprep.mubr.bf16.mxu0 %v7335_v13 }
  0xf0   : > { %980 = vmatmul.mubr.bf16.gmra.mrb[32].mxu0 %v7379_v33 }
  0xf1   : > { %987 = vmatprep.mubr.bf16.mxu0 %v7364_v26 }
  0xf8   : > { %988 = vmatmul.mubr.bf16.gmra.mrb[36].mxu0 %v7394_v42 }
  0xf9   : > { %995 = vmatprep.mubr.bf16.mxu0 %v7375_v32 }
 0x100   : > { %996 = vmatmul.mubr.bf16.gmra.mrb[40].mxu0 %v7409_v52 }
 0x101   : > { %1003 = vmatprep.mubr.bf16.mxu0 %v7390_v40 }
 0x108   : > { %1004 = vmatmul.mubr.bf16.gmra.mrb[44].mxu0 %v7420_v59 }
 0x109   : > { %1011 = vmatprep.mubr.bf16.mxu0 %v7404_v48 }
 0x110   : > { %1012 = vmatmul.mubr.bf16.gmra.mrb[48].mxu0 %v7435_v14 }
 0x111   : > { %1019 = vmatprep.mubr.bf16.mxu0 %v7426_v4 }
 0x118   : > { %1020 = vmatmul.mubr.bf16.gmra.mrb[52].mxu0 %v7450_v25 }
 0x119   : > { %1027 = vmatprep.mubr.bf16.mxu0 %v7441_v19 }
 0x120   : > { %1028 = vmatmul.mubr.bf16.gmra.mrb[56].mxu0 %v7465_v44 }
 0x121   : > { %1035 = vmatprep.mubr.bf16.mxu0 %v7456_v34 }
 0x128   : > { %1036 = vmatmul.mubr.bf16.gmra.mrb[60].mxu0 %v7480_v21 }
 0x129   : > { %1043 = vmatprep.mubr.bf16.mxu0 %v7471_v1 }
 0x130   : > { %1044 = vmatmul.mubr.bf16.gmra.mrb[64].mxu0 %v7495_v8 }
 0x131   : > { %1051 = vmatprep.mubr.bf16.mxu0 %v7486_v43 }
 0x138   : > { %1052 = vmatmul.mubr.bf16.gmra.mrb[68].mxu0 %v7506_v28 }
 0x139   : > { %6065 = vmatprep.mubr.bf16.mxu0 %v651_v53  ;;  %v6680_v53 = vld [vmem:[#allocation7 + $0xd0] sm:$0xff]  }
 0x140   : > { %6066 = vmatmul.mubr.bf16.vlgmr.msra.gmra.mrb[4].mxu0 %v7515_v57 }
 0x141   : > { %1467 = vmatpush1.bf16.msra.mxu0 %v6678_v36  ;;  %6069 = vmatprep.mubr.bf16.mxu0 %v7520_v15  ;;  %v7539_v36 = vsel %vm7346_vm5, %v597_v46, 0  ;;  %v7559_v46 = vsel %vm7346_vm5, %v601_v3, 0  ;;  %v610_v3 = vrot.slane %v486_v51, 1 }
 0x142   : > { %1468 = vmatprep.subr.bf16.mxu0 %v9319_v0 }
 0x143   : > { %v611_v38 = vor.u32 %v610_v3, %v483_v45 }
 0x145   : > { %1469 = vmatpush1.bf16.msra.mxu0 %v6679_v47  ;;  %v602_v47 = vrot.slane %v458_v17, 1 }
 0x146   : > { %1470 = vmatprep.subr.bf16.mxu0 %v9319_v0 }
 0x147   : > { %v603_v63 = vor.u32 %v602_v47, %v455_v11  ;;  %v6687_v47 = vld [vmem:[#allocation7 + $0x108] sm:$0xff]  }
 0x148   : > { %6070 = vmatmul.mubr.bf16.gmra.mrb[72].mxu0 %v7532_v61 }
 0x149   : > { %1471 = vmatpush1.bf16.msra.mxu0 %v6680_v53  ;;  %6073 = vmatprep.mubr.bf16.mxu0 %v7539_v36  ;;  %v7568_v17 = vsel %vm7346_vm5, %v603_v63, 0  ;;  %v606_v53 = vrot.slane %v472_v31, 1  ;;  %v7604_v63 = vsel %vm7346_vm5, %v611_v38, 0 }
 0x14a   : > { %1472 = vmatprep.subr.bf16.mxu0 %v9319_v0 }
 0x14b   : > { %v607_v11 = vor.u32 %v606_v53, %v469_v30  ;;  %v7591_v30 = vsel %vm7346_vm5, %v609_v62, 0  ;;  %v9401_v62 = vshll.u32 %v7456_v34, 16 }
 0x14d   : > { %1473 = vmatpush1.bf16.msra.mxu0 %v6681_v49  ;;  %v6685_v49 = vld [vmem:[#allocation7 + $0xf8] sm:$0xff]   ;;  %v7584_v31 = vsel %vm7346_vm5, %v607_v11, 0 }
 0x14e   : > { %1474 = vmatprep.subr.bf16.mxu0 %v9319_v0 }
 0x150   : > { %6074 = vmatmul.mubr.bf16.gmra.mrb[76].mxu0 %v7552_v10 }
 0x151   : > { %1475 = vmatpush1.bf16.msra.mxu0 %v6682_v9  ;;  %6077 = vmatprep.mubr.bf16.mxu0 %v7559_v46  ;;  %v612_v9 = vrot.slane %v493_v2, 1  ;;  %v6688_v2 = vld [vmem:[#allocation7 + $0x110] sm:$0xff]  }
 0x152   : > { %1476 = vmatprep.subr.bf16.mxu0 %v9319_v0 }
 0x153   : > { %v613_v51 = vor.u32 %v612_v9, %v490_v56  ;;  %v9399_v56 = vshrl.u32 %v7426_v4, 16  ;;  %v9402_v9 = vshll.u32 %v7471_v1, 16 }
 0x155   : > { %1477 = vmatpush1.bf16.msra.mxu0 %v6683_v5  ;;  %v614_v5 = vrot.slane %v500_v18, 1  ;;  %v7611_v45 = vsel %vm7346_vm5, %v613_v51, 0  ;;  %v9400_v18 = vshrl.u32 %v7441_v19, 16  ;;  %v620_v38 = vrot.slane %v9402_v9, 1  ;;  %v6694_v9 = vld [vmem:[#allocation7 + $0x140] sm:$0xff]  }
 0x156   : > { %1478 = vmatprep.subr.bf16.mxu0 %v9319_v0 }
 0x157   : > { %v615_v53 = vor.u32 %v614_v5, %v9399_v56  ;;  %v9404_v5 = vshrl.u32 %v7471_v1, 16 }
 0x158   : > { %6078 = vmatmul.mubr.bf16.gmra.mrb[80].mxu0 %v7568_v17 }
 0x159   : > { %1479 = vmatpush1.bf16.msra.mxu0 %v6684_v22  ;;  %6081 = vmatprep.mubr.bf16.mxu0 %v7356_v24  ;;  %v616_v22 = vrot.slane %v507_v29, 1  ;;  %v6690_v29 = vld [vmem:[#allocation7 + $0x120] sm:$0xff]  }
 0x15a   : > { %1480 = vmatprep.subr.bf16.mxu0 %v9319_v0 }
 0x15b   : > { %v617_v11 = vor.u32 %v616_v22, %v9400_v18  ;;  %v621_v22 = vor.u32 %v620_v38, %v9404_v5  ;;  %v6692_v18 = vld [vmem:[#allocation7 + $0x130] sm:$0xff]  }
 0x15d   : > { %1481 = vmatpush1.bf16.msra.mxu0 %v6685_v49  ;;  %v7624_v49 = vsel %vm7346_vm5, %v615_v53, 0  ;;  %v7631_v3 = vsel %vm7346_vm5, %v617_v11, 0  ;;  %v9405_v53 = vshll.u32 %v7486_v43, 16  ;;  %v7650_v11 = vsel %vm7346_vm5, %v621_v22, 0 }
 0x15e   : > { %1482 = vmatprep.subr.bf16.mxu0 %v9319_v0 }
 0x160   : > { %6082 = vmatmul.mubr.bf16.gmra.mrb[84].mxu0 %v7584_v31 }
 0x161   : > { %1483 = vmatpush1.bf16.msra.mxu0 %v6686_v39  ;;  %6085 = vmatprep.mubr.bf16.mxu0 %v7591_v30  ;;  %v618_v39 = vrot.slane %v9401_v62, 1 }
 0x162   : > { %1484 = vmatprep.subr.bf16.mxu0 %v9319_v0 }
 0x165   : > { %1485 = vmatpush1.bf16.msra.mxu0 %v6687_v47  ;;  %v9403_v47 = vshrl.u32 %v7456_v34, 16 }
 0x166   : > { %1486 = vmatprep.subr.bf16.mxu0 %v9319_v0 }
 0x167   : > { %v619_v51 = vor.u32 %v618_v39, %v9403_v47  ;;  %v6693_v39 = vld [vmem:[#allocation7 + $0x138] sm:$0xff]   ;;  %v6800_v47 = vld [vmem:[%s7224_s9 + $0x8] sm:$0xff]  }
 0x168   : > { %6086 = vmatmul.mubr.bf16.gmra.mrb[88].mxu0 %v7604_v63 }
 0x169   : > { %1487 = vmatpush1.bf16.msra.mxu0 %v6688_v2  ;;  %6089 = vmatprep.mubr.bf16.mxu0 %v7611_v45  ;;  %v6691_v2 = vld [vmem:[#allocation7 + $0x128] sm:$0xff]   ;;  %v7644_v56 = vsel %vm7346_vm5, %v619_v51, 0 }
 0x16a   : > { %1488 = vmatprep.subr.bf16.mxu0 %v9319_v0 }
 0x16d   : > { %1489 = vmatpush1.bf16.msra.mxu0 %v6689_v54  ;;  %v622_v54 = vrot.slane %v9405_v53, 1  ;;  %v6695_v53 = vld [vmem:[#allocation7 + $0x148] sm:$0xff]  }
 0x16e   : > { %1490 = vmatprep.subr.bf16.mxu0 %v9319_v0 }
 0x170   : > { %6090 = vmatmul.mubr.bf16.gmra.mrb[92].mxu0 %v7624_v49 }
 0x171   : > { %6093 = vmatprep.mubr.bf16.mxu0 %v7631_v3  ;;  %1491 = vmatpush1.bf16.msra.mxu0 %v6690_v29  ;;  %v9406_v29 = vshrl.u32 %v7486_v43, 16 }
 0x172   : > { %1492 = vmatprep.subr.bf16.mxu0 %v9319_v0 }
 0x173   : > { %v623_v62 = vor.u32 %v622_v54, %v9406_v29  ;;  %v7666_v54 = vld [vmem:[%s7224_s9 + $0x10] sm:$0xff]   ;;  %v6697_v29 = vld [vmem:[#allocation7 + $0x158] sm:$0xff]  }
 0x175   : > { %1493 = vmatpush1.bf16.msra.mxu0 %v6691_v2  ;;  %v7660_v38 = vsel %vm7346_vm5, %v623_v62, 0  ;;  %v6698_v62 = vld [vmem:[#allocation7 + $0x160] sm:$0xff]  }
 0x176   : > { %1494 = vmatprep.subr.bf16.mxu0 %v9319_v0 }
 0x178   : > { %6094 = vmatmul.mubr.bf16.gmra.mrb[96].mxu0 %v7644_v56 }
 0x179   : > { %6097 = vmatprep.mubr.bf16.mxu0 %v7650_v11  ;;  %1495 = vmatpush1.bf16.msra.mxu0 %v6692_v18  ;;  %v6696_v18 = vld [vmem:[#allocation7 + $0x150] sm:$0xff]  }
 0x17a   : > { %1496 = vmatprep.subr.bf16.mxu0 %v9319_v0 }
 0x17d   : > { %1497 = vmatpush1.bf16.msra.mxu0 %v6693_v39 }
 0x17e   : > { %6101 = vmatprep.subr.bf16.mxu0 %v6694_v9 }
 0x180   : > { %6098 = vmatmul.mubr.bf16.gmra.mrb[100].mxu0 %v7660_v38 }
 0x181   : > { %1498 = vmatprep.mubr.bf16.mxu0 %v6800_v47 }
 0x183   : > { %v917_v51 = vpop.f32.mrb[0].mxu0 }
 0x184   : > { %v919_v2 = vpop.f32.mrb[1].mxu0  ;;  %v6699_v51 = vld [vmem:[#allocation7 + $0x168] sm:$0xff]  }
 0x185   : > { %v920_v5 = vpop.f32.mrb[2].mxu0  ;;  %v6700_v2 = vld [vmem:[#allocation7 + $0x170] sm:$0xff]  }
 0x186   : > { %v922_v22 = vpop.f32.mrb[3].mxu0 }
 0x188   : > { %1499 = vmatmul.mubr.bf16.vlgmr.msra.gmra.mrb[104].mxu0 %v7269_v37 }
 0x189   : > { %6102 = vmatpush3.bf16.msra.mxu0 %v6694_v9  ;;  %1506 = vmatprep.mubr.bf16.mxu0 %v7666_v54 }
 0x18a   : > { %6103 = vmatprep.subr.bf16.mxu0 %v6695_v53 }
 0x18d   : > { %6104 = vmatpush3.bf16.msra.mxu0 %v6695_v53 }
 0x18e   : > { %6105 = vmatprep.subr.bf16.mxu0 %v6696_v18 }
 0x190   : > { %1507 = vmatmul.mubr.bf16.gmra.mrb[4].mxu0 %v7284_v50 }
 0x191   : > { %1514 = vmatprep.mubr.bf16.mxu0 %v7265_v35  ;;  %6106 = vmatpush3.bf16.msra.mxu0 %v6696_v18  ;;  %v6701_v18 = vld [vmem:[#allocation7 + $0x178] sm:$0xff]  }
 0x192   : > { %6107 = vmatprep.subr.bf16.mxu0 %v6697_v29 }
 0x193   : > { %v7671_v39 = vpop.f32.mrb[8].mxu0 }
 0x194   : > { %v935_v37 = vpop.f32.mrb[9].mxu0 }
 0x195   : > { %v7673_v9 = vpop.f32.mrb[10].mxu0  ;;  %6108 = vmatpush3.bf16.msra.mxu0 %v6697_v29 }
 0x196   : > { %v938_v47 = vpop.f32.mrb[11].mxu0  ;;  %6109 = vmatprep.subr.bf16.mxu0 %v6698_v62 }
 0x198   : > { %1515 = vmatmul.mubr.bf16.gmra.mrb[108].mxu0 %v7296_v58 }
 0x199   : > { %1522 = vmatprep.mubr.bf16.mxu0 %v7273_v41  ;;  %6110 = vmatpush3.bf16.msra.mxu0 %v6698_v62 }
 0x19a   : > { %6111 = vmatprep.subr.bf16.mxu0 %v6699_v51 }
 0x19b   : > { %v7677_v35 = vpop.f32.mrb[12].mxu0 }
 0x19c   : > { %v943_v5 = vpop.f32.mrb[13].mxu0 }
 0x19d   : > { %v7679_v22 = vpop.f32.mrb[14].mxu0  ;;  %6112 = vmatpush3.bf16.msra.mxu0 %v6699_v51 }
 0x19e   : > { %v946_v53 = vpop.f32.mrb[15].mxu0  ;;  %6113 = vmatprep.subr.bf16.mxu0 %v6700_v2 }
 0x1a0   : > { %1523 = vmatmul.mubr.bf16.gmra.mrb[112].mxu0 %v7316_v6 }
 0x1a1   : > { %1530 = vmatprep.mubr.bf16.mxu0 %v7291_v55  ;;  %6114 = vmatpush3.bf16.msra.mxu0 %v6700_v2 }
 0x1a2   : > { %6115 = vmatprep.subr.bf16.mxu0 %v6701_v18 }
 0x1a3   : > { %v7683_v29 = vpop.f32.mrb[16].mxu0 }
 0x1a4   : > { %v951_v41 = vpop.f32.mrb[17].mxu0 }
 0x1a5   : > { %v7685_v62 = vpop.f32.mrb[18].mxu0  ;;  %6116 = vmatpush3.bf16.msra.mxu0 %v6701_v18 }
 0x1a6   : > { %v954_v37 = vpop.f32.mrb[19].mxu0  ;;  %2121 = vmatprep.subr.bf16.mxu0 %v9319_v0 }
 0x1a8   : > { %1531 = vmatmul.mubr.bf16.gmra.mrb[116].mxu0 %v7332_v12 }
 0x1a9   : > { %1538 = vmatprep.mubr.bf16.mxu0 %v7299_v60 }
 0x1ab   : > { %v7690_v47 = vpop.f32.mrb[20].mxu0 }
 0x1ac   : > { %v959_v51 = vpop.f32.mrb[21].mxu0 }
 0x1ad   : > { %v7692_v5 = vpop.f32.mrb[22].mxu0 }
 0x1ae   : > { %v962_v55 = vpop.f32.mrb[23].mxu0 }
 0x1b0   : > { %1539 = vmatmul.mubr.bf16.gmra.mrb[120].mxu0 %v7352_v23  ;;  %v7773_v23 = vld [vmem:[#allocation7 + $0x220] sm:$0xff]  }
 0x1b1   : > { %1546 = vmatprep.mubr.bf16.mxu0 %v7319_v7  ;;  %9410 = vst [vmem:[#allocation35_spill] sm:$0xff] %v7773_v23 }
 0x1b3   : > { %v7696_v2 = vpop.f32.mrb[24].mxu0 }
 0x1b4   : > { %v967_v53 = vpop.f32.mrb[25].mxu0 }
 0x1b5   : > { %v7698_v18 = vpop.f32.mrb[26].mxu0 }
 0x1b6   : > { %v970_v41 = vpop.f32.mrb[27].mxu0 }
 0x1b8   : > { %1547 = vmatmul.mubr.bf16.gmra.mrb[124].mxu0 %v7368_v27 }
 0x1b9   : > { %1554 = vmatprep.mubr.bf16.mxu0 %v7335_v13 }
 0x1bb   : > { %v7702_v60 = vpop.f32.mrb[28].mxu0 }
 0x1bc   : > { %v975_v37 = vpop.f32.mrb[29].mxu0 }
 0x1bd   : > { %v7704_v51 = vpop.f32.mrb[30].mxu0 }
 0x1be   : > { %v978_v55 = vpop.f32.mrb[31].mxu0 }
 0x1c0   : > { %1555 = vmatmul.mubr.bf16.gmra.mrb[128].mxu0 %v7379_v33 }
 0x1c1   : > { %1562 = vmatprep.mubr.bf16.mxu0 %v7364_v26 }
 0x1c3   : > { %v7708_v7 = vpop.f32.mrb[32].mxu0 }
 0x1c4   : > { %v983_v53 = vpop.f32.mrb[33].mxu0 }
 0x1c5   : > { %v7710_v0 = vpop.f32.mrb[34].mxu0 }
 0x1c6   : > { %v986_v41 = vpop.f32.mrb[35].mxu0 }
 0x1c8   : > { %1563 = vmatmul.mubr.bf16.gmra.mrb[132].mxu0 %v7394_v42 }
 0x1c9   : > { %1570 = vmatprep.mubr.bf16.mxu0 %v7375_v32 }
 0x1cb   : > { %v7714_v13 = vpop.f32.mrb[36].mxu0 }
 0x1cc   : > { %v991_v37 = vpop.f32.mrb[37].mxu0 }
 0x1cd   : > { %v7716_v27 = vpop.f32.mrb[38].mxu0 }
 0x1ce   : > { %v994_v55 = vpop.f32.mrb[39].mxu0 }
 0x1d0   : > { %1571 = vmatmul.mubr.bf16.gmra.mrb[136].mxu0 %v7409_v52  ;;  %v7731_v52 = vld [vmem:[#allocation7 + $0x200] sm:$0xff]  }
 0x1d1   : > { %1578 = vmatprep.mubr.bf16.mxu0 %v7390_v40  ;;  %6349 = vmatprep.subr.bf16.mxu1 %v7731_v52 }
 0x1d2   : > { %6357 = vmatpush3.bf16.msra.mxu1 %v7731_v52 }
 0x1d3   : > { %v7720_v26 = vpop.f32.mrb[40].mxu0 }
 0x1d4   : > { %v999_v53 = vpop.f32.mrb[41].mxu0 }
 0x1d5   : > { %v7722_v33 = vpop.f32.mrb[42].mxu0 }
 0x1d6   : > { %v1002_v41 = vpop.f32.mrb[43].mxu0 }
 0x1d8   : > { %1579 = vmatmul.mubr.bf16.gmra.mrb[140].mxu0 %v7420_v59  ;;  %v7747_v59 = vld [vmem:[#allocation7 + $0x208] sm:$0xff]  }
 0x1d9   : > { %1586 = vmatprep.mubr.bf16.mxu0 %v7404_v48  ;;  %9407 = vst [vmem:[#allocation32_spill] sm:$0xff] %v7747_v59  ;;  %6350 = vmatprep.subr.bf16.mxu1 %v7747_v59 }
 0x1da   : > { %6358 = vmatpush3.bf16.msra.mxu1 %v7747_v59 }
 0x1db   : > { %v7726_v32 = vpop.f32.mrb[44].mxu0 }
 0x1dc   : > { %v1007_v37 = vpop.f32.mrb[45].mxu0 }
 0x1dd   : > { %v7728_v42 = vpop.f32.mrb[46].mxu0 }
 0x1de   : > { %v1010_v55 = vpop.f32.mrb[47].mxu0 }
 0x1e0   : > { %1587 = vmatmul.mubr.bf16.gmra.mrb[144].mxu0 %v7435_v14 }
 0x1e1   : > { %1594 = vmatprep.mubr.bf16.mxu0 %v7426_v4 }
 0x1e3   : > { %v7735_v40 = vpop.f32.mrb[48].mxu0 }
 0x1e4   : > { %v1015_v53 = vpop.f32.mrb[49].mxu0 }
 0x1e5   : > { %v7738_v48 = vpop.f32.mrb[50].mxu0 }
 0x1e6   : > { %v1018_v41 = vpop.f32.mrb[51].mxu0 }
 0x1e8   : > { %1595 = vmatmul.mubr.bf16.gmra.mrb[148].mxu0 %v7450_v25 }
 0x1e9   : > { %1602 = vmatprep.mubr.bf16.mxu0 %v7441_v19 }
 0x1eb   : > { %v7742_v37 = vpop.f32.mrb[52].mxu0 }
 0x1ec   : > { %v1023_v55 = vpop.f32.mrb[53].mxu0 }
 0x1ed   : > { %v7744_v14 = vpop.f32.mrb[54].mxu0  ;;  %v7756_v55 = vld [vmem:[#allocation7 + $0x210] sm:$0xff]  }
 0x1ee   : > { %v1026_v4 = vpop.f32.mrb[55].mxu0  ;;  %9408 = vst [vmem:[#allocation33_spill] sm:$0xff] %v7756_v55  ;;  %6351 = vmatprep.subr.bf16.mxu1 %v7756_v55 }
 0x1ef   : > { %6359 = vmatpush3.bf16.msra.mxu1 %v7756_v55 }
 0x1f0   : > { %1603 = vmatmul.mubr.bf16.gmra.mrb[152].mxu0 %v7465_v44 }
 0x1f1   : > { %1610 = vmatprep.mubr.bf16.mxu0 %v7456_v34  ;;  %v7762_v34 = vld [vmem:[#allocation7 + $0x218] sm:$0xff]  }
 0x1f2   : > { %9409 = vst [vmem:[#allocation34_spill] sm:$0xff] %v7762_v34  ;;  %6352 = vmatprep.subr.bf16.mxu1 %v7762_v34 }
 0x1f3   : > { %v7751_v53 = vpop.f32.mrb[56].mxu0  ;;  %6360 = vmatpush3.bf16.msra.mxu1 %v7762_v34  ;;  %v7791_v34 = vld [vmem:[#allocation7 + $0x230] sm:$0xff]  }
 0x1f4   : > { %v1031_v19 = vpop.f32.mrb[57].mxu0  ;;  %6353 = vmatprep.subr.bf16.mxu1 %v7773_v23 }
 0x1f5   : > { %v7754_v41 = vpop.f32.mrb[58].mxu0 }
 0x1f6   : > { %v1034_v25 = vpop.f32.mrb[59].mxu0 }
 0x1f7   : > { %v7771_v25 = vld [vmem:[%s7224_s9 + $0x90] sm:$0xff]   ;;  %6361 = vmatpush3.bf16.msra.mxu1 %v7773_v23 }
 0x1f8   : > { %1611 = vmatmul.mubr.bf16.gmra.mrb[156].mxu0 %v7480_v21  ;;  %v535_v23 = vshll.u32 %v7771_v25, 16 }
 0x1f9   : > { %1618 = vmatprep.mubr.bf16.mxu0 %v7471_v1  ;;  %v9341_v1 = vshrl.u32 %v7771_v25, 16 }
 0x1fb   : > { %v7764_v4 = vpop.f32.mrb[60].mxu0 }
 0x1fc   : > { %v1039_v19 = vpop.f32.mrb[61].mxu0 }
 0x1fd   : > { %v7768_v44 = vpop.f32.mrb[62].mxu0  ;;  %v7780_v19 = vld [vmem:[#allocation7 + $0x228] sm:$0xff]  }
 0x1fe   : > { %v1042_v21 = vpop.f32.mrb[63].mxu0  ;;  %9411 = vst [vmem:[#allocation36_spill] sm:$0xff] %v7780_v19  ;;  %6354 = vmatprep.subr.bf16.mxu1 %v7780_v19 }
 0x1ff   : > { %6362 = vmatpush3.bf16.msra.mxu1 %v7780_v19  ;;  %v7797_v19 = vld [vmem:[#allocation7 + $0x238] sm:$0xff]  }
 0x200   : > { %1619 = vmatmul.mubr.bf16.gmra.mrb[160].mxu0 %v7495_v8  ;;  %v534_v8 = vrot.slane %v9341_v1, 7  ;;  %6355 = vmatprep.subr.bf16.mxu1 %v7791_v34 }
 0x201   : > { %1626 = vmatprep.mubr.bf16.mxu0 %v7486_v43 }
 0x203   : > { %v7782_v12 = vpop.f32.mrb[64].mxu0  ;;  %6363 = vmatpush3.bf16.msra.mxu1 %v7791_v34 }
 0x204   : > { %v1047_v6 = vpop.f32.mrb[65].mxu0  ;;  %6356 = vmatprep.subr.bf16.mxu1 %v7797_v19 }
 0x205   : > { %v7786_v21 = vpop.f32.mrb[66].mxu0  ;;  %v537_v6 = vor.u32 %v535_v23, %v534_v8  ;;  %v6704_v8 = vld [vmem:[#allocation7 + $0x188] sm:$0xff]  }
 0x206   : > { %v1050_v43 = vpop.f32.mrb[67].mxu0 }
 0x207   : > { %6364 = vmatpush3.bf16.msra.mxu1 %v7797_v19  ;;  %v7803_v43 = vsel %vm7252_vm2, 0, %v537_v6 }
 0x208   : > { %1627 = vmatmul.mubr.bf16.gmra.mrb[164].mxu0 %v7506_v28  ;;  %9412 = vst [vmem:[#allocation37_spill] sm:$0xff] %v7803_v43 }
 0x209   : > { %1634 = vmatprep.mubr.bf16.mxu0 %v7771_v25 }
 0x20a   : > { %6182 = vmatmul.mubr.bf16.vlgmr.msra.gmra.mrb[0].mxu1 %v7584_v31 }
 0x20b   : > { %v1053_v58 = vpop.f32.mrb[68].mxu0  ;;  %6185 = vmatprep.mubr.bf16.mxu1 %v7591_v30 }
 0x20c   : > { %v1055_v1 = vpop.f32.mrb[69].mxu0  ;;  %v6703_v58 = vld [vmem:[#allocation7 + $0x180] sm:$0xff]  }
 0x20d   : > { %v1056_v55 = vpop.f32.mrb[70].mxu0 }
 0x20e   : > { %v1058_v59 = vpop.f32.mrb[71].mxu0 }
 0x20f   : > { %v9413_v59 = vmov 0  }
 0x210   : > { %1635 = vmatmul.mubr.bf16.gmra.mrb[168].mxu0 %v7803_v43  ;;  %v6705_v43 = vld [vmem:[#allocation7 + $0x190] sm:$0xff]  }
 0x211   : > { %6117 = vmatprep.mubr.bf16.mxu0 %v7515_v57 }
 0x212   : > { %6186 = vmatmul.mubr.bf16.gmra.mrb[4].mxu1 %v7604_v63 }
 0x213   : > { %6189 = vmatprep.mubr.bf16.mxu1 %v7611_v45 }
 0x218   : > { %6118 = vmatmul.mubr.bf16.vlgmr.msra.gmra.mrb[4].mxu0 %v7520_v15 }
 0x219   : > { %2122 = vmatpush1.bf16.msra.mxu0 %v6703_v58  ;;  %6121 = vmatprep.mubr.bf16.mxu0 %v7532_v61 }
 0x21a   : > { %2123 = vmatprep.subr.bf16.mxu0 %v9413_v59  ;;  %6190 = vmatmul.mubr.bf16.gmra.mrb[8].mxu1 %v7624_v49 }
 0x21b   : > { %v6071_v55 = vpop.f32.mrb[72].mxu0  ;;  %6193 = vmatprep.mubr.bf16.mxu1 %v7631_v3 }
 0x21c   : > { %v7815_v1 = vadd.f32 %v6071_v55, %v7677_v35  ;;  %v1110_v6 = vpop.f32.mrb[73].mxu0  ;;  %v6707_v55 = vld [vmem:[#allocation7 + $0x1a0] sm:$0xff]  }
 0x21d   : > { %v7818_v57 = vadd.f32 %v1110_v6, %v7671_v39  ;;  %v6072_v16 = vpop.f32.mrb[74].mxu0  ;;  %2124 = vmatpush1.bf16.msra.mxu0 %v6704_v8  ;;  %v6706_v39 = vld [vmem:[#allocation7 + $0x198] sm:$0xff]  }
 0x21e   : > { %v7821_v15 = vadd.f32 %v6072_v16, %v7679_v22  ;;  %v1113_v58 = vpop.f32.mrb[75].mxu0  ;;  %2125 = vmatprep.subr.bf16.mxu0 %v9413_v59 }
 0x21f   : > { %v7825_v61 = vadd.f32 %v1113_v58, %v7673_v9 }
 0x220   : > { %6122 = vmatmul.mubr.bf16.gmra.mrb[172].mxu0 %v7539_v36 }
 0x221   : > { %9414 = vst [vmem:[#allocation38_spill] sm:$0xff] %v7825_v61  ;;  %2126 = vmatpush1.bf16.msra.mxu0 %v6705_v43  ;;  %6125 = vmatprep.mubr.bf16.mxu0 %v7552_v10  ;;  %v624_v61 = vrot.slane %v535_v23, 1 }
 0x222   : > { %2127 = vmatprep.subr.bf16.mxu0 %v9413_v59  ;;  %6194 = vmatmul.mubr.bf16.gmra.mrb[12].mxu1 %v7644_v56 }
 0x223   : > { %v6075_v16 = vpop.f32.mrb[76].mxu0  ;;  %6197 = vmatprep.mubr.bf16.mxu1 %v7650_v11 }
 0x224   : > { %v7833_v35 = vadd.f32 %v6075_v16, %v7690_v47  ;;  %v1126_v22 = vpop.f32.mrb[77].mxu0 }
 0x225   : > { %v7836_v9 = vadd.f32 %v1126_v22, %v7683_v29  ;;  %v6076_v8 = vpop.f32.mrb[78].mxu0  ;;  %2128 = vmatpush1.bf16.msra.mxu0 %v6706_v39  ;;  %v6708_v29 = vld [vmem:[#allocation7 + $0x1a8] sm:$0xff]  }
 0x226   : > { %v7839_v6 = vadd.f32 %v6076_v8, %v7692_v5  ;;  %v1129_v43 = vpop.f32.mrb[79].mxu0  ;;  %2129 = vmatprep.subr.bf16.mxu0 %v9413_v59  ;;  %v9416_v5 = vshrl.u32 %v7771_v25, 16  ;;  %v6709_v8 = vld [vmem:[#allocation7 + $0x1b0] sm:$0xff]  }
 0x227   : > { %v7843_v58 = vadd.f32 %v1129_v43, %v7685_v62 }
 0x228   : > { %6126 = vmatmul.mubr.bf16.gmra.mrb[176].mxu0 %v7559_v46  ;;  %v625_v39 = vor.u32 %v624_v61, %v9416_v5  ;;  %v6711_v5 = vld [vmem:[#allocation7 + $0x1c0] sm:$0xff]  }
 0x229   : > { %9415 = vst [vmem:[#allocation39_spill] sm:$0xff] %v7843_v58  ;;  %2130 = vmatpush1.bf16.msra.mxu0 %v6707_v55  ;;  %6129 = vmatprep.mubr.bf16.mxu0 %v7568_v17 }
 0x22a   : > { %2131 = vmatprep.subr.bf16.mxu0 %v9413_v59  ;;  %v7867_v61 = vsel %vm7346_vm5, %v625_v39, 0  ;;  %6198 = vmatmul.mubr.bf16.gmra.mrb[16].mxu1 %v7660_v38 }
 0x22b   : > { %v6079_v47 = vpop.f32.mrb[80].mxu0  ;;  %6201 = vmatprep.mubr.bf16.mxu1 %v7867_v61 }
 0x22c   : > { %v7853_v62 = vadd.f32 %v6079_v47, %v7702_v60  ;;  %v1142_v23 = vpop.f32.mrb[81].mxu0 }
 0x22d   : > { %v7856_v16 = vadd.f32 %v1142_v23, %v7696_v2  ;;  %v6080_v22 = vpop.f32.mrb[82].mxu0  ;;  %2132 = vmatpush1.bf16.msra.mxu0 %v6708_v29  ;;  %v6710_v2 = vld [vmem:[#allocation7 + $0x1b8] sm:$0xff]  }
 0x22e   : > { %v7859_v55 = vadd.f32 %v6080_v22, %v7704_v51  ;;  %v1145_v43 = vpop.f32.mrb[83].mxu0  ;;  %2133 = vmatprep.subr.bf16.mxu0 %v9413_v59 }
 0x22f   : > { %v7863_v58 = vadd.f32 %v1145_v43, %v7698_v18 }
 0x230   : > { %6130 = vmatmul.mubr.bf16.gmra.mrb[180].mxu0 %v7356_v24 }
 0x231   : > { %2134 = vmatpush1.bf16.msra.mxu0 %v6709_v8  ;;  %6133 = vmatprep.mubr.bf16.mxu0 %v7584_v31 }
 0x232   : > { %2135 = vmatprep.subr.bf16.mxu0 %v9413_v59 }
 0x233   : > { %v6083_v60 = vpop.f32.mrb[84].mxu0 }
 0x234   : > { %v7875_v18 = vadd.f32 %v6083_v60, %v7714_v13  ;;  %v1158_v51 = vpop.f32.mrb[85].mxu0  ;;  %v6712_v13 = vld [vmem:[#allocation7 + $0x1c8] sm:$0xff]  }
 0x235   : > { %v7878_v29 = vadd.f32 %v1158_v51, %v7708_v7  ;;  %v6084_v47 = vpop.f32.mrb[86].mxu0  ;;  %2136 = vmatpush1.bf16.msra.mxu0 %v6710_v2 }
 0x236   : > { %v7881_v24 = vadd.f32 %v6084_v47, %v7716_v27  ;;  %v1161_v39 = vpop.f32.mrb[87].mxu0  ;;  %2137 = vmatprep.subr.bf16.mxu0 %v9413_v59 }
 0x237   : > { %v7885_v31 = vadd.f32 %v1161_v39, %v7710_v0  ;;  %v6713_v0 = vld [vmem:[#allocation7 + $0x1d0] sm:$0xff]  }
 0x238   : > { %6134 = vmatmul.mubr.bf16.gmra.mrb[184].mxu0 %v7591_v30 }
 0x239   : > { %2138 = vmatpush1.bf16.msra.mxu0 %v6711_v5  ;;  %6137 = vmatprep.mubr.bf16.mxu0 %v7604_v63 }
 0x23a   : > { %2139 = vmatprep.subr.bf16.mxu0 %v9413_v59 }
 0x23b   : > { %v6087_v7 = vpop.f32.mrb[88].mxu0 }
 0x23c   : > { %v7891_v23 = vadd.f32 %v6087_v7, %v7726_v32  ;;  %v1174_v27 = vpop.f32.mrb[89].mxu0  ;;  %v6714_v32 = vld [vmem:[#allocation7 + $0x1d8] sm:$0xff]  }
 0x23d   : > { %v7894_v22 = vadd.f32 %v1174_v27, %v7720_v26  ;;  %v6088_v8 = vpop.f32.mrb[90].mxu0  ;;  %2140 = vmatpush1.bf16.msra.mxu0 %v6712_v13 }
 0x23e   : > { %v7897_v43 = vadd.f32 %v6088_v8, %v7728_v42  ;;  %v1177_v30 = vpop.f32.mrb[91].mxu0  ;;  %2141 = vmatprep.subr.bf16.mxu0 %v9413_v59 }
 0x23f   : > { %v7901_v63 = vadd.f32 %v1177_v30, %v7722_v33  ;;  %v6715_v33 = vld [vmem:[#allocation7 + $0x1e0] sm:$0xff]  }
 0x240   : > { %6138 = vmatmul.mubr.bf16.gmra.mrb[188].mxu0 %v7611_v45 }
 0x241   : > { %2142 = vmatpush1.bf16.msra.mxu0 %v6713_v0  ;;  %6141 = vmatprep.mubr.bf16.mxu0 %v7624_v49 }
 0x242   : > { %2143 = vmatprep.subr.bf16.mxu0 %v9413_v59 }
 0x243   : > { %v6091_v26 = vpop.f32.mrb[92].mxu0 }
 0x244   : > { %v7907_v2 = vadd.f32 %v6091_v26, %v7742_v37  ;;  %v1190_v42 = vpop.f32.mrb[93].mxu0  ;;  %v6716_v37 = vld [vmem:[#allocation7 + $0x1e8] sm:$0xff]  }
 0x245   : > { %v7910_v60 = vadd.f32 %v1190_v42, %v7735_v40  ;;  %v6092_v51 = vpop.f32.mrb[94].mxu0  ;;  %2144 = vmatpush1.bf16.msra.mxu0 %v6714_v32 }
 0x246   : > { %v7913_v47 = vadd.f32 %v6092_v51, %v7744_v14  ;;  %v1193_v45 = vpop.f32.mrb[95].mxu0  ;;  %2145 = vmatprep.subr.bf16.mxu0 %v9413_v59 }
 0x247   : > { %v7917_v49 = vadd.f32 %v1193_v45, %v7738_v48  ;;  %v6717_v48 = vld [vmem:[#allocation7 + $0x1f0] sm:$0xff]  }
 0x248   : > { %9417 = vst [vmem:[#allocation40_spill] sm:$0xff] %v7913_v47  ;;  %6142 = vmatmul.mubr.bf16.gmra.mrb[192].mxu0 %v7631_v3 }
 0x249   : > { %9418 = vst [vmem:[#allocation41_spill] sm:$0xff] %v7917_v49  ;;  %6145 = vmatprep.mubr.bf16.mxu0 %v7644_v56  ;;  %2146 = vmatpush1.bf16.msra.mxu0 %v6715_v33  ;;  %v9444_v49 = vld [vmem:[#allocation29_spill] sm:$0xff] }
 0x24a   : > { %2147 = vmatprep.subr.bf16.mxu0 %v9413_v59 }
 0x24b   : > { %v6095_v40 = vpop.f32.mrb[96].mxu0 }
 0x24c   : > { %v7923_v5 = vadd.f32 %v6095_v40, %v7764_v4  ;;  %v1206_v14 = vpop.f32.mrb[97].mxu0  ;;  %v9426_v40 = vld [vmem:[#allocation33_spill] sm:$0xff] }
 0x24d   : > { %v7926_v39 = vadd.f32 %v1206_v14, %v7751_v53  ;;  %v6096_v13 = vpop.f32.mrb[98].mxu0  ;;  %2148 = vmatpush1.bf16.msra.mxu0 %v6716_v37  ;;  %v6718_v53 = vld [vmem:[#allocation7 + $0x1f8] sm:$0xff]   ;;  %v9425_v37 = vld [vmem:[#allocation32_spill] sm:$0xff]  ;;  %v9427_v14 = vld [vmem:[#allocation15_spill] sm:$0xff] }
 0x24e   : > { %9419 = vst [vmem:[#allocation42_spill] sm:$0xff] %v7923_v5  ;;  %v7929_v7 = vadd.f32 %v6096_v13, %v7768_v44  ;;  %v1209_v3 = vpop.f32.mrb[99].mxu0  ;;  %2149 = vmatprep.subr.bf16.mxu0 %v9413_v59  ;;  %v6803_v13 = vld [vmem:[%s7224_s9 + $0x20] sm:$0xff]  }
 0x24f   : > { %9420 = vst [vmem:[#allocation43_spill] sm:$0xff] %v7926_v39  ;;  %v7933_v56 = vadd.f32 %v1209_v3, %v7754_v41  ;;  %v7943_v41 = vld [vmem:[%s7224_s9 + $0x98] sm:$0xff]  }
 0x250   : > { %9421 = vst [vmem:[#allocation44_spill] sm:$0xff] %v7929_v7  ;;  %6146 = vmatmul.mubr.bf16.gmra.mrb[196].mxu0 %v7650_v11 }
 0x251   : > { %9422 = vst [vmem:[#allocation45_spill] sm:$0xff] %v7933_v56  ;;  %6149 = vmatprep.mubr.bf16.mxu0 %v7660_v38  ;;  %2150 = vmatpush1.bf16.msra.mxu0 %v6717_v48  ;;  %v542_v38 = vshll.u32 %v7943_v41, 16 }
 0x252   : > { %2151 = vmatprep.subr.bf16.mxu0 %v9413_v59 }
 0x253   : > { %v6099_v4 = vpop.f32.mrb[100].mxu0  ;;  %v626_v30 = vrot.slane %v542_v38, 1 }
 0x254   : > { %v1222_v27 = vpop.f32.mrb[101].mxu0  ;;  %v9429_v4 = vld [vmem:[#allocation35_spill] sm:$0xff] }
 0x255   : > { %v7939_v44 = vadd.f32 %v1222_v27, %v7782_v12  ;;  %v6100_v8 = vpop.f32.mrb[102].mxu0  ;;  %2152 = vmatpush1.bf16.msra.mxu0 %v6718_v53  ;;  %v539_v12 = vshrl.u32 %v7943_v41, 16  ;;  %v9430_v27 = vld [vmem:[#allocation16_spill] sm:$0xff] }
 0x256   : > { %v1225_v0 = vpop.f32.mrb[103].mxu0  ;;  %6153 = vmatprep.subr.bf16.mxu0 %v7731_v52  ;;  %v6804_v8 = vld [vmem:[%s7224_s9 + $0x28] sm:$0xff]  }
 0x257   : > { %9423 = vst [vmem:[#allocation46_spill] sm:$0xff] %v7939_v44  ;;  %v7946_v11 = vadd.f32 %v1225_v0, %v7786_v21  ;;  %v627_v42 = vor.u32 %v626_v30, %v539_v12  ;;  %v541_v45 = vrot.slane %v539_v12, 7  ;;  %v9431_v0 = vld [vmem:[#allocation36_spill] sm:$0xff] }
 0x258   : > { %6150 = vmatmul.mubr.bf16.gmra.mrb[200].mxu0 %v7867_v61 }
 0x259   : > { %9424 = vst [vmem:[#allocation47_spill] sm:$0xff] %v7946_v11  ;;  %2153 = vmatprep.mubr.bf16.mxu0 %v7666_v54  ;;  %v670_v21 = vsel %vm7346_vm5, %v627_v42, 0  ;;  %v7955_v61 = vor.u32 %v542_v38, %v541_v45  ;;  %v6802_v54 = vld [vmem:[%s7224_s9 + $0x18] sm:$0xff]   ;;  %v6805_v42 = vld [vmem:[%s7224_s9 + $0x30] sm:$0xff]  }
 0x25a   : > { %6202 = vmatmul.mubr.bf16.gmra.mrb[20].mxu1 %v670_v21 }
 0x25b   : > { %v1500_v32 = vpop.f32.mrb[104].mxu0  ;;  %3256 = vmatprep.mubr.bf16.mxu1 %v9413_v59 }
 0x25c   : > { %v1502_v26 = vpop.f32.mrb[105].mxu0 }
 0x25d   : > { %v1503_v51 = vpop.f32.mrb[106].mxu0  ;;  %v9432_v26 = vld [vmem:[#allocation17_spill] sm:$0xff] }
 0x25e   : > { %v1505_v33 = vpop.f32.mrb[107].mxu0 }
 0x260   : > { %2154 = vmatmul.mubr.bf16.vlgmr.msra.gmra.mrb[204].mxu0 %v7284_v50  ;;  %v9428_v50 = vld [vmem:[#allocation34_spill] sm:$0xff] }
 0x261   : > { %6154 = vmatpush3.bf16.msra.mxu0 %v7731_v52  ;;  %2161 = vmatprep.mubr.bf16.mxu0 %v6802_v54  ;;  %v9433_v54 = vld [vmem:[#allocation19_spill] sm:$0xff] }
 0x262   : > { %6155 = vmatprep.subr.bf16.mxu0 %v9425_v37 }
 0x265   : > { %6156 = vmatpush3.bf16.msra.mxu0 %v9425_v37  ;;  %v6806_v37 = vld [vmem:[%s7224_s9 + $0x38] sm:$0xff]  }
 0x266   : > { %6157 = vmatprep.subr.bf16.mxu0 %v9426_v40 }
 0x268   : > { %2162 = vmatmul.mubr.bf16.gmra.mrb[4].mxu0 %v9427_v14 }
 0x269   : > { %2169 = vmatprep.mubr.bf16.mxu0 %v6803_v13  ;;  %6158 = vmatpush3.bf16.msra.mxu0 %v9426_v40 }
 0x26a   : > { %6159 = vmatprep.subr.bf16.mxu0 %v9428_v50 }
 0x26b   : > { %v7967_v48 = vpop.f32.mrb[108].mxu0 }
 0x26c   : > { %v1518_v52 = vpop.f32.mrb[109].mxu0 }
 0x26d   : > { %v7969_v3 = vpop.f32.mrb[110].mxu0  ;;  %6160 = vmatpush3.bf16.msra.mxu0 %v9428_v50  ;;  %v9434_v50 = vld [vmem:[#allocation20_spill] sm:$0xff]  ;;  %v6807_v52 = vld [vmem:[%s7224_s9 + $0x40] sm:$0xff]  }
 0x26e   : > { %v1521_v53 = vpop.f32.mrb[111].mxu0  ;;  %6161 = vmatprep.subr.bf16.mxu0 %v9429_v4 }
 0x270   : > { %2170 = vmatmul.mubr.bf16.gmra.mrb[208].mxu0 %v9430_v27 }
 0x271   : > { %2177 = vmatprep.mubr.bf16.mxu0 %v6804_v8  ;;  %6162 = vmatpush3.bf16.msra.mxu0 %v9429_v4  ;;  %v9435_v8 = vld [vmem:[#allocation21_spill] sm:$0xff] }
 0x272   : > { %6163 = vmatprep.subr.bf16.mxu0 %v9431_v0 }
 0x273   : > { %v7977_v38 = vpop.f32.mrb[112].mxu0 }
 0x274   : > { %v1526_v12 = vpop.f32.mrb[113].mxu0 }
 0x275   : > { %v7979_v30 = vpop.f32.mrb[114].mxu0  ;;  %6164 = vmatpush3.bf16.msra.mxu0 %v9431_v0  ;;  %v6808_v0 = vld [vmem:[%s7224_s9 + $0x48] sm:$0xff]  }
 0x276   : > { %v1529_v32 = vpop.f32.mrb[115].mxu0  ;;  %6165 = vmatprep.subr.bf16.mxu0 %v7791_v34 }
 0x278   : > { %2178 = vmatmul.mubr.bf16.gmra.mrb[212].mxu0 %v9432_v26 }
 0x279   : > { %2185 = vmatprep.mubr.bf16.mxu0 %v6805_v42  ;;  %6166 = vmatpush3.bf16.msra.mxu0 %v7791_v34 }
 0x27a   : > { %6167 = vmatprep.subr.bf16.mxu0 %v7797_v19 }
 0x27b   : > { %v7987_v51 = vpop.f32.mrb[116].mxu0 }
 0x27c   : > { %v1534_v33 = vpop.f32.mrb[117].mxu0 }
 0x27d   : > { %v7989_v45 = vpop.f32.mrb[118].mxu0  ;;  %6168 = vmatpush3.bf16.msra.mxu0 %v7797_v19  ;;  %v9436_v33 = vld [vmem:[#allocation22_spill] sm:$0xff] }
 0x27e   : > { %v1537_v21 = vpop.f32.mrb[119].mxu0 }
 0x27f   : > { %v6809_v21 = vld [vmem:[%s7224_s9 + $0x50] sm:$0xff]  }
 0x280   : > { %2186 = vmatmul.mubr.bf16.gmra.mrb[216].mxu0 %v9433_v54 }
 0x281   : > { %2193 = vmatprep.mubr.bf16.mxu0 %v6806_v37 }
 0x283   : > { %v7994_v40 = vpop.f32.mrb[120].mxu0 }
 0x284   : > { %v1542_v14 = vpop.f32.mrb[121].mxu0 }
 0x285   : > { %v7996_v13 = vpop.f32.mrb[122].mxu0 }
 0x286   : > { %v1545_v34 = vpop.f32.mrb[123].mxu0 }
 0x288   : > { %2194 = vmatmul.mubr.bf16.gmra.mrb[220].mxu0 %v9434_v50  ;;  %v9437_v50 = vld [vmem:[#allocation23_spill] sm:$0xff] }
 0x289   : > { %2201 = vmatprep.mubr.bf16.mxu0 %v6807_v52  ;;  %v6810_v52 = vld [vmem:[%s7224_s9 + $0x58] sm:$0xff]  }
 0x28b   : > { %v8000_v53 = vpop.f32.mrb[124].mxu0 }
 0x28c   : > { %v1550_v19 = vpop.f32.mrb[125].mxu0 }
 0x28d   : > { %v8002_v4 = vpop.f32.mrb[126].mxu0 }
 0x28e   : > { %v1553_v27 = vpop.f32.mrb[127].mxu0 }
 0x290   : > { %2202 = vmatmul.mubr.bf16.gmra.mrb[224].mxu0 %v9435_v8 }
 0x291   : > { %2209 = vmatprep.mubr.bf16.mxu0 %v6808_v0 }
 0x293   : > { %v8006_v12 = vpop.f32.mrb[128].mxu0 }
 0x294   : > { %v1558_v32 = vpop.f32.mrb[129].mxu0 }
 0x295   : > { %v8008_v26 = vpop.f32.mrb[130].mxu0  ;;  %v9438_v32 = vld [vmem:[#allocation24_spill] sm:$0xff] }
 0x296   : > { %v1561_v42 = vpop.f32.mrb[131].mxu0 }
 0x297   : > { %v6811_v42 = vld [vmem:[%s7224_s9 + $0x60] sm:$0xff]  }
 0x298   : > { %2210 = vmatmul.mubr.bf16.gmra.mrb[228].mxu0 %v9436_v33 }
 0x299   : > { %2217 = vmatprep.mubr.bf16.mxu0 %v6809_v21 }
 0x29b   : > { %v8012_v54 = vpop.f32.mrb[132].mxu0 }
 0x29c   : > { %v1566_v37 = vpop.f32.mrb[133].mxu0 }
 0x29d   : > { %v8014_v14 = vpop.f32.mrb[134].mxu0 }
 0x29e   : > { %v1569_v34 = vpop.f32.mrb[135].mxu0 }
 0x2a0   : > { %2218 = vmatmul.mubr.bf16.gmra.mrb[232].mxu0 %v9437_v50  ;;  %v9439_v50 = vld [vmem:[#allocation25_spill] sm:$0xff] }
 0x2a1   : > { %2225 = vmatprep.mubr.bf16.mxu0 %v6810_v52  ;;  %v6812_v52 = vld [vmem:[%s7224_s9 + $0x68] sm:$0xff]  }
 0x2a3   : > { %v8018_v19 = vpop.f32.mrb[136].mxu0 }
 0x2a4   : > { %v1574_v27 = vpop.f32.mrb[137].mxu0 }
 0x2a5   : > { %v8020_v8 = vpop.f32.mrb[138].mxu0 }
 0x2a6   : > { %v1577_v0 = vpop.f32.mrb[139].mxu0 }
 0x2a8   : > { %2226 = vmatmul.mubr.bf16.gmra.mrb[236].mxu0 %v9438_v32  ;;  %v9440_v32 = vld [vmem:[#allocation26_spill] sm:$0xff] }
 0x2a9   : > { %2233 = vmatprep.mubr.bf16.mxu0 %v6811_v42  ;;  %v6813_v42 = vld [vmem:[%s7224_s9 + $0x70] sm:$0xff]  }
 0x2ab   : > { %v8024_v33 = vpop.f32.mrb[140].mxu0 }
 0x2ac   : > { %v1582_v21 = vpop.f32.mrb[141].mxu0 }
 0x2ad   : > { %v8026_v37 = vpop.f32.mrb[142].mxu0 }
 0x2ae   : > { %v1585_v34 = vpop.f32.mrb[143].mxu0 }
 0x2b0   : > { %2234 = vmatmul.mubr.bf16.gmra.mrb[240].mxu0 %v9439_v50  ;;  %v9441_v50 = vld [vmem:[#allocation27_spill] sm:$0xff] }
 0x2b1   : > { %2241 = vmatprep.mubr.bf16.mxu0 %v6812_v52  ;;  %v6814_v52 = vld [vmem:[%s7224_s9 + $0x78] sm:$0xff]  }
 0x2b3   : > { %v8030_v27 = vpop.f32.mrb[144].mxu0 }
 0x2b4   : > { %v1590_v20 = vpop.f32.mrb[145].mxu0 }
 0x2b5   : > { %v8032_v0 = vpop.f32.mrb[146].mxu0 }
 0x2b6   : > { %v1593_v59 = vpop.f32.mrb[147].mxu0 }
 0x2b8   : > { %2242 = vmatmul.mubr.bf16.gmra.mrb[244].mxu0 %v9440_v32  ;;  %v9442_v32 = vld [vmem:[#allocation28_spill] sm:$0xff] }
 0x2b9   : > { %2249 = vmatprep.mubr.bf16.mxu0 %v6813_v42  ;;  %v6815_v42 = vld [vmem:[%s7224_s9 + $0x80] sm:$0xff]  }
 0x2bb   : > { %v8036_v21 = vpop.f32.mrb[148].mxu0 }
 0x2bc   : > { %v1598_v11 = vpop.f32.mrb[149].mxu0 }
 0x2bd   : > { %v8038_v34 = vpop.f32.mrb[150].mxu0 }
 0x2be   : > { %v1601_v44 = vpop.f32.mrb[151].mxu0 }
 0x2c0   : > { %2250 = vmatmul.mubr.bf16.gmra.mrb[248].mxu0 %v9441_v50  ;;  %v6816_v50 = vld [vmem:[%s7224_s9 + $0x88] sm:$0xff]   ;;  %s9248_s9 = scalar_lea.hbm %s9305_s4, %s5467_s6 }
 0x2c1   : > { %2257 = vmatprep.mubr.bf16.mxu0 %v6814_v52 }
 0x2c3   : > { %v8042_v20 = vpop.f32.mrb[152].mxu0 }
 0x2c4   : > { %v1606_v56 = vpop.f32.mrb[153].mxu0 }
 0x2c5   : > { %v8044_v59 = vpop.f32.mrb[154].mxu0 }
 0x2c6   : > { %v1609_v7 = vpop.f32.mrb[155].mxu0 }
 0x2c8   : > { %2258 = vmatmul.mubr.bf16.gmra.mrb[252].mxu0 %v9442_v32 }
 0x2c9   : > { %2265 = vmatprep.mubr.bf16.mxu0 %v6815_v42 }
 0x2cb   : > { %v8048_v39 = vpop.f32.mrb[156].mxu0 }
 0x2cc   : > { %v1614_v11 = vpop.f32.mrb[157].mxu0 }
 0x2cd   : > { %v8050_v5 = vpop.f32.mrb[158].mxu0 }
 0x2ce   : > { %9443 = vst [vmem:[#allocation32_spill] sm:$0xff] %v8050_v5  ;;  %v1617_v44 = vpop.f32.mrb[159].mxu0  ;;  %v9447_v5 = vld [vmem:[#allocation37_spill] sm:$0xff] }
 0x2d0   : > { %2266 = vmatmul.mubr.bf16.gmra.mrb[0].mxu0 %v9444_v49 }
 0x2d1   : > { %2273 = vmatprep.mubr.bf16.mxu0 %v6816_v50 }
 0x2d3   : > { %v8054_v52 = vpop.f32.mrb[160].mxu0 }
 0x2d4   : > { %v1622_v56 = vpop.f32.mrb[161].mxu0 }
 0x2d5   : > { %v8056_v47 = vpop.f32.mrb[162].mxu0 }
 0x2d6   : > { %9445 = vst [vmem:[#allocation33_spill] sm:$0xff] %v8056_v47  ;;  %v1625_v7 = vpop.f32.mrb[163].mxu0 }
 0x2d8   : > { %2274 = vmatmul.mubr.bf16.gmra.mrb[8].mxu0 %v7506_v28 }
 0x2d9   : > { %2281 = vmatprep.mubr.bf16.mxu0 %v7771_v25 }
 0x2db   : > { %v8060_v32 = vpop.f32.mrb[164].mxu0 }
 0x2dc   : > { %9446 = vst [vmem:[#allocation15_spill] sm:$0xff] %v8060_v32  ;;  %v1630_v42 = vpop.f32.mrb[165].mxu0 }
 0x2dd   : > { %v8062_v11 = vpop.f32.mrb[166].mxu0  ;;  %v8066_v49 = vpop.f32.mrb[0].mxu1  ;;  %v587_v42 = vsel %vm7252_vm2, 0, %v7955_v61 }
 0x2de   : > { %v1633_v44 = vpop.f32.mrb[167].mxu0  ;;  %9448 = vst [vmem:[#allocation34_spill] sm:$0xff] %v8066_v49  ;;  %v8068_v56 = vpop.f32.mrb[1].mxu1 }
 0x2df   : > { %9449 = vst [vmem:[#allocation35_spill] sm:$0xff] %v8068_v56  ;;  %v8070_v47 = vpop.f32.mrb[2].mxu1 }
 0x2e0   : > { %2282 = vmatmul.mubr.bf16.gmra.mrb[12].mxu0 %v9447_v5  ;;  %9450 = vst [vmem:[#allocation16_spill] sm:$0xff] %v8070_v47  ;;  %v8075_v32 = vpop.f32.mrb[3].mxu1  ;;  %v9452_v5 = vld [vmem:[#allocation30_spill] sm:$0xff] }
 0x2e1   : > { %2289 = vmatprep.mubr.bf16.mxu0 %v7943_v41  ;;  %v9453_v41 = vld [vmem:[#allocation31_spill] sm:$0xff] }
 0x2e3   : > { %v1636_v50 = vpop.f32.mrb[168].mxu0 }
 0x2e4   : > { %v1638_v7 = vpop.f32.mrb[169].mxu0 }
 0x2e5   : > { %v1639_v28 = vpop.f32.mrb[170].mxu0  ;;  %v8080_v50 = vpop.f32.mrb[4].mxu1 }
 0x2e6   : > { %v1641_v44 = vpop.f32.mrb[171].mxu0  ;;  %9454 = vst [vmem:[#allocation36_spill] sm:$0xff] %v8080_v50  ;;  %v8082_v49 = vpop.f32.mrb[5].mxu1 }
 0x2e7   : > { %9455 = vst [vmem:[#allocation17_spill] sm:$0xff] %v8082_v49  ;;  %v8085_v56 = vpop.f32.mrb[6].mxu1  ;;  %v9482_v25 = vld [vmem:[#allocation16_spill] sm:$0xff] }
 0x2e8   : > { %2290 = vmatmul.mubr.bf16.gmra.mrb[16].mxu0 %v587_v42  ;;  %v8088_v42 = vpop.f32.mrb[7].mxu1 }
 0x2e9   : > { %6169 = vmatprep.mubr.bf16.mxu0 %v9452_v5 }
 0x2f0   : > { %6170 = vmatmul.mubr.bf16.vlgmr.msra.gmra.mrb[4].mxu0 %v9453_v41 }
 0x2f1   : > { %6173 = vmatprep.mubr.bf16.mxu0 %v7539_v36 }
 0x2f3   : > { %v6123_v7 = vpop.f32.mrb[172].mxu0 }
 0x2f4   : > { %v1702_v28 = vadd.f32 %v6123_v7, %v7977_v38  ;;  %v1693_v47 = vpop.f32.mrb[173].mxu0 }
 0x2f5   : > { %v1694_v61 = vadd.f32 %v1693_v47, %v7967_v48  ;;  %v6124_v44 = vpop.f32.mrb[174].mxu0  ;;  %v9456_v47 = vld [vmem:[#allocation38_spill] sm:$0xff] }
 0x2f6   : > { %v8091_v5 = vadd.f32 %v1702_v28, %v7815_v1  ;;  %v1705_v36 = vadd.f32 %v6124_v44, %v7979_v30  ;;  %v1696_v41 = vpop.f32.mrb[175].mxu0 }
 0x2f7   : > { %v8095_v50 = vadd.f32 %v1694_v61, %v7818_v57  ;;  %v1697_v49 = vadd.f32 %v1696_v41, %v7969_v3 }
 0x2f8   : > { %v8099_v38 = vadd.f32 %v1705_v36, %v7821_v15  ;;  %6174 = vmatmul.mubr.bf16.gmra.mrb[20].mxu0 %v7552_v10 }
 0x2f9   : > { %v8103_v48 = vadd.f32 %v1697_v49, %v9456_v47  ;;  %6177 = vmatprep.mubr.bf16.mxu0 %v7559_v46 }
 0x2fb   : > { %9457 = vst [vmem:[#allocation19_spill] sm:$0xff] %v8103_v48  ;;  %v6127_v1 = vpop.f32.mrb[176].mxu0 }
 0x2fc   : > { %v1718_v7 = vadd.f32 %v6127_v1, %v7994_v40  ;;  %v1709_v30 = vpop.f32.mrb[177].mxu0  ;;  %v9461_v40 = vld [vmem:[#allocation39_spill] sm:$0xff] }
 0x2fd   : > { %v1710_v28 = vadd.f32 %v1709_v30, %v7987_v51  ;;  %v6128_v57 = vpop.f32.mrb[178].mxu0  ;;  %v8123_v51 = vpop.f32.mrb[8].mxu1 }
 0x2fe   : > { %v8109_v61 = vadd.f32 %v1718_v7, %v7833_v35  ;;  %v1721_v15 = vadd.f32 %v6128_v57, %v7996_v13  ;;  %v1712_v3 = vpop.f32.mrb[179].mxu0  ;;  %v8125_v36 = vpop.f32.mrb[9].mxu1 }
 0x2ff   : > { %v8113_v10 = vadd.f32 %v1710_v28, %v7836_v9  ;;  %v1713_v49 = vadd.f32 %v1712_v3, %v7989_v45  ;;  %v8128_v9 = vpop.f32.mrb[10].mxu1 }
 0x300   : > { %9458 = vst [vmem:[#allocation20_spill] sm:$0xff] %v8109_v61  ;;  %v8117_v46 = vadd.f32 %v1721_v15, %v7839_v6  ;;  %6178 = vmatmul.mubr.bf16.gmra.mrb[24].mxu0 %v7568_v17  ;;  %v8131_v6 = vpop.f32.mrb[11].mxu1 }
 0x301   : > { %9459 = vst [vmem:[#allocation21_spill] sm:$0xff] %v8113_v10  ;;  %v8121_v44 = vadd.f32 %v1713_v49, %v9461_v40 }
 0x302   : > { %9460 = vst [vmem:[#allocation22_spill] sm:$0xff] %v8117_v46  ;;  %v9480_v46 = vld [vmem:[#allocation35_spill] sm:$0xff] }
 0x303   : > { %9462 = vst [vmem:[#allocation23_spill] sm:$0xff] %v8121_v44  ;;  %v6131_v35 = vpop.f32.mrb[180].mxu0 }
 0x304   : > { %v1734_v13 = vadd.f32 %v6131_v35, %v8006_v12  ;;  %v1725_v41 = vpop.f32.mrb[181].mxu0  ;;  %v8163_v35 = vpop.f32.mrb[12].mxu1 }
 0x305   : > { %v1726_v45 = vadd.f32 %v1725_v41, %v8000_v53  ;;  %v6132_v47 = vpop.f32.mrb[182].mxu0 }
 0x306   : > { %v8134_v17 = vadd.f32 %v1734_v13, %v7853_v62  ;;  %v1737_v1 = vadd.f32 %v6132_v47, %v8008_v26  ;;  %v1728_v7 = vpop.f32.mrb[183].mxu0  ;;  %v8165_v13 = vpop.f32.mrb[13].mxu1 }
 0x307   : > { %v8138_v30 = vadd.f32 %v1726_v45, %v7856_v16  ;;  %v1729_v28 = vadd.f32 %v1728_v7, %v8002_v4  ;;  %v8168_v41 = vpop.f32.mrb[14].mxu1 }
 0x308   : > { %v8142_v12 = vadd.f32 %v1737_v1, %v7859_v55 }
 0x309   : > { %v8145_v57 = vadd.f32 %v1729_v28, %v7863_v58 }
 0x30b   : > { %v6135_v53 = vpop.f32.mrb[184].mxu0 }
 0x30c   : > { %v1750_v15 = vadd.f32 %v6135_v53, %v8018_v19  ;;  %v1741_v3 = vpop.f32.mrb[185].mxu0 }
 0x30d   : > { %v1742_v62 = vadd.f32 %v1741_v3, %v8012_v54  ;;  %v6136_v49 = vpop.f32.mrb[186].mxu0 }
 0x30e   : > { %v8150_v26 = vadd.f32 %v1750_v15, %v7875_v18  ;;  %v1753_v16 = vadd.f32 %v6136_v49, %v8020_v8  ;;  %v1744_v40 = vpop.f32.mrb[187].mxu0 }
 0x30f   : > { %v8154_v4 = vadd.f32 %v1742_v62, %v7878_v29  ;;  %v1745_v55 = vadd.f32 %v1744_v40, %v8014_v14  ;;  %v8171_v14 = vpop.f32.mrb[15].mxu1 }
 0x310   : > { %v8158_v58 = vadd.f32 %v1753_v16, %v7881_v24  ;;  %v9464_v16 = vld [vmem:[#allocation41_spill] sm:$0xff]  ;;  %v8203_v40 = vpop.f32.mrb[16].mxu1 }
 0x311   : > { %v8161_v19 = vadd.f32 %v1745_v55, %v7885_v31  ;;  %v8205_v55 = vpop.f32.mrb[17].mxu1 }
 0x313   : > { %v6139_v54 = vpop.f32.mrb[188].mxu0 }
 0x314   : > { %v1766_v18 = vadd.f32 %v6139_v54, %v8030_v27  ;;  %v1757_v8 = vpop.f32.mrb[189].mxu0  ;;  %v8208_v54 = vpop.f32.mrb[18].mxu1 }
 0x315   : > { %v1758_v29 = vadd.f32 %v1757_v8, %v8024_v33  ;;  %v6140_v45 = vpop.f32.mrb[190].mxu0  ;;  %v9465_v8 = vld [vmem:[#allocation42_spill] sm:$0xff] }
 0x316   : > { %v8174_v24 = vadd.f32 %v1766_v18, %v7891_v23  ;;  %v1769_v31 = vadd.f32 %v6140_v45, %v8032_v0  ;;  %v1760_v47 = vpop.f32.mrb[191].mxu0  ;;  %v9466_v45 = vld [vmem:[#allocation33_spill] sm:$0xff] }
 0x317   : > { %v8178_v1 = vadd.f32 %v1758_v29, %v7894_v22  ;;  %v1761_v7 = vadd.f32 %v1760_v47, %v8026_v37 }
 0x318   : > { %v8182_v27 = vadd.f32 %v1769_v31, %v7897_v43 }
 0x319   : > { %v8185_v28 = vadd.f32 %v1761_v7, %v7901_v63  ;;  %v9463_v63 = vld [vmem:[#allocation40_spill] sm:$0xff]  ;;  %v9467_v7 = vld [vmem:[#allocation43_spill] sm:$0xff] }
 0x31b   : > { %v6143_v33 = vpop.f32.mrb[192].mxu0 }
 0x31c   : > { %v1782_v53 = vadd.f32 %v6143_v33, %v8042_v20  ;;  %v1773_v15 = vpop.f32.mrb[193].mxu0 }
 0x31d   : > { %v1774_v23 = vadd.f32 %v1773_v15, %v8036_v21  ;;  %v6144_v3 = vpop.f32.mrb[194].mxu0 }
 0x31e   : > { %v8190_v0 = vadd.f32 %v1782_v53, %v7907_v2  ;;  %v1785_v22 = vadd.f32 %v6144_v3, %v8044_v59  ;;  %v1776_v62 = vpop.f32.mrb[195].mxu0  ;;  %v9468_v53 = vld [vmem:[#allocation32_spill] sm:$0xff]  ;;  %v6728_v3 = vld [vmem:[#allocation9 + $0x40] sm:$0xff]  }
 0x31f   : > { %v8194_v37 = vadd.f32 %v1774_v23, %v7910_v60  ;;  %v1777_v43 = vadd.f32 %v1776_v62, %v8038_v34  ;;  %v8211_v34 = vpop.f32.mrb[19].mxu1  ;;  %5641 = vmatprep.subr.bf16.mxu1 %v6728_v3 }
 0x320   : > { %v8198_v49 = vadd.f32 %v1785_v22, %v9463_v63  ;;  %v9470_v22 = vld [vmem:[#allocation45_spill] sm:$0xff]  ;;  %v6729_v63 = vld [vmem:[#allocation9] sm:$0xff]  }
 0x321   : > { %v8201_v20 = vadd.f32 %v1777_v43, %v9464_v16  ;;  %v9471_v16 = vld [vmem:[#allocation15_spill] sm:$0xff]  ;;  %5642 = vmatpush3.bf16.msra.mxu1 %v6729_v63 }
 0x323   : > { %v6147_v21 = vpop.f32.mrb[196].mxu0 }
 0x324   : > { %v1798_v2 = vadd.f32 %v6147_v21, %v8054_v52  ;;  %v1789_v59 = vpop.f32.mrb[197].mxu0  ;;  %v9469_v52 = vld [vmem:[#allocation44_spill] sm:$0xff] }
 0x325   : > { %v1790_v60 = vadd.f32 %v1789_v59, %v8048_v39  ;;  %v6148_v18 = vpop.f32.mrb[198].mxu0 }
 0x326   : > { %v8214_v29 = vadd.f32 %v1798_v2, %v9465_v8  ;;  %v1801_v31 = vadd.f32 %v6148_v18, %v9466_v45  ;;  %v1792_v47 = vpop.f32.mrb[199].mxu0  ;;  %v6730_v45 = vld [vmem:[#allocation9 + $0x48] sm:$0xff]  }
 0x327   : > { %v8218_v33 = vadd.f32 %v1790_v60, %v9467_v7  ;;  %v1793_v15 = vadd.f32 %v1792_v47, %v9468_v53  ;;  %v9472_v60 = vld [vmem:[#allocation46_spill] sm:$0xff]  ;;  %v9473_v47 = vld [vmem:[#allocation47_spill] sm:$0xff]  ;;  %5643 = vmatprep.subr.bf16.mxu1 %v6730_v45 }
 0x328   : > { %v8222_v23 = vadd.f32 %v1801_v31, %v9469_v52  ;;  %v6731_v31 = vld [vmem:[#allocation9 + $0x8] sm:$0xff]   ;;  %v6732_v52 = vld [vmem:[#allocation9 + $0x50] sm:$0xff]  }
 0x329   : > { %v8225_v39 = vadd.f32 %v1793_v15, %v9470_v22  ;;  %5644 = vmatpush3.bf16.msra.mxu1 %v6731_v31  ;;  %v6739_v45 = vld [vmem:[#allocation9 + $0x28] sm:$0xff]  }
 0x32a   : > { %5645 = vmatprep.subr.bf16.mxu1 %v6732_v52 }
 0x32b   : > { %v6151_v62 = vpop.f32.mrb[200].mxu0 }
 0x32c   : > { %v1805_v43 = vpop.f32.mrb[201].mxu0  ;;  %v6733_v62 = vld [vmem:[#allocation9 + $0x10] sm:$0xff]  }
 0x32d   : > { %v1806_v21 = vadd.f32 %v1805_v43, %v9471_v16  ;;  %v6152_v2 = vpop.f32.mrb[202].mxu0  ;;  %v6203_v53 = vpop.f32.mrb[20].mxu1  ;;  %5646 = vmatpush3.bf16.msra.mxu1 %v6733_v62  ;;  %v6742_v62 = vld [vmem:[#allocation9 + $0x78] sm:$0xff]  }
 0x32e   : > { %v1808_v59 = vpop.f32.mrb[203].mxu0  ;;  %v8235_v3 = vpop.f32.mrb[21].mxu1  ;;  %v6735_v2 = vld [vmem:[#allocation9 + $0x18] sm:$0xff]  }
 0x32f   : > { %v8229_v18 = vadd.f32 %v1806_v21, %v9472_v60  ;;  %v1809_v8 = vadd.f32 %v1808_v59, %v8062_v11  ;;  %v6204_v43 = vpop.f32.mrb[22].mxu1  ;;  %v6734_v21 = vld [vmem:[#allocation9 + $0x58] sm:$0xff]   ;;  %v6736_v59 = vld [vmem:[#allocation9 + $0x60] sm:$0xff]  }
 0x330   : > { %v8237_v16 = vpop.f32.mrb[23].mxu1  ;;  %5647 = vmatprep.subr.bf16.mxu1 %v6734_v21  ;;  %v6737_v60 = vld [vmem:[#allocation9 + $0x20] sm:$0xff]   ;;  %v6743_v43 = vld [vmem:[#allocation9 + $0x38] sm:$0xff]  }
 0x331   : > { %v8233_v7 = vadd.f32 %v1809_v8, %v9473_v47  ;;  %5648 = vmatpush3.bf16.msra.mxu1 %v6735_v2  ;;  %v6738_v8 = vld [vmem:[#allocation9 + $0x68] sm:$0xff]   ;;  %v6740_v47 = vld [vmem:[#allocation9 + $0x70] sm:$0xff]  }
 0x332   : > { %5649 = vmatprep.subr.bf16.mxu1 %v6736_v59 }
 0x333   : > { %v2155_v15 = vpop.f32.mrb[204].mxu0 }
 0x334   : > { %v2157_v22 = vpop.f32.mrb[205].mxu0  ;;  %v6741_v15 = vld [vmem:[#allocation9 + $0x30] sm:$0xff]  }
 0x335   : > { %v2158_v63 = vpop.f32.mrb[206].mxu0  ;;  %5650 = vmatpush3.bf16.msra.mxu1 %v6737_v60 }
 0x336   : > { %v2160_v11 = vpop.f32.mrb[207].mxu0  ;;  %5651 = vmatprep.subr.bf16.mxu1 %v6738_v8  ;;  %v9474_v63 = vmov 0  }
 0x337   : > { %v2801_v11 = vrot.slane %v9474_v63, 7  ;;  %v6745_v63 = vld [vmem:[#allocation9 + $0x88] sm:$0xff]  }
 0x339   : > { %5652 = vmatpush3.bf16.msra.mxu1 %v6739_v45  ;;  %v8248_v59 = vsel %vm7252_vm2, 0, %v2801_v11 }
 0x33a   : > { %5653 = vmatprep.subr.bf16.mxu1 %v6740_v47  ;;  %9475 = vst [vmem:[#allocation24_spill] sm:$0xff] %v8248_v59 }
 0x33d   : > { %5654 = vmatpush3.bf16.msra.mxu1 %v6741_v15 }
 0x33e   : > { %5655 = vmatprep.subr.bf16.mxu1 %v6742_v62 }
 0x341   : > { %5656 = vmatpush3.bf16.msra.mxu1 %v6743_v43 }
 0x343   : > { %v8239_v31 = vpop.f32.mrb[208].mxu0 }
 0x344   : > { %v2173_v53 = vpop.f32.mrb[209].mxu0  ;;  %3257 = vmatmul.mubr.bf16.vlgmr.msra.gmra.mrb[24].mxu1 %v8248_v59 }
 0x345   : > { %v8241_v52 = vpop.f32.mrb[210].mxu0 }
 0x346   : > { %v2176_v22 = vpop.f32.mrb[211].mxu0 }
 0x347   : > { %v6744_v22 = vld [vmem:[#allocation9 + $0x80] sm:$0xff]  }
 0x348   : > { %6205 = vmatprep.subr.bf16.mxu1 %v6744_v22 }
 0x349   : > { %6206 = vmatpush3.bf16.msra.mxu1 %v6744_v22 }
 0x34a   : > { %6207 = vmatprep.subr.bf16.mxu1 %v6745_v63 }
 0x34b   : > { %v8244_v21 = vpop.f32.mrb[212].mxu0 }
 0x34c   : > { %v2181_v2 = vpop.f32.mrb[213].mxu0 }
 0x34d   : > { %v8250_v60 = vpop.f32.mrb[214].mxu0  ;;  %6208 = vmatpush3.bf16.msra.mxu1 %v6745_v63 }
 0x34e   : > { %v2184_v8 = vpop.f32.mrb[215].mxu0 }
 0x353   : > { %v8253_v45 = vpop.f32.mrb[216].mxu0 }
 0x354   : > { %9476 = vst [vmem:[#allocation25_spill] sm:$0xff] %v8253_v45  ;;  %v2189_v47 = vpop.f32.mrb[217].mxu0 }
 0x355   : > { %v8255_v53 = vpop.f32.mrb[218].mxu0  ;;  %v8265_v47 = vld [vmem:[%s9304_s3] ss:$0 sm:$0xff] }
 0x356   : > { %9477 = vst [vmem:[#allocation26_spill] sm:$0xff] %v8255_v53  ;;  %v2192_v15 = vpop.f32.mrb[219].mxu0 }
 0x35b   : > { %v8257_v62 = vpop.f32.mrb[220].mxu0 }
 0x35c   : > { %9478 = vst [vmem:[#allocation27_spill] sm:$0xff] %v8257_v62  ;;  %v2197_v43 = vpop.f32.mrb[221].mxu0 }
 0x35d   : > { %v8259_v2 = vpop.f32.mrb[222].mxu0 }
 0x35e   : > { %9479 = vst [vmem:[#allocation28_spill] sm:$0xff] %v8259_v2  ;;  %v2200_v11 = vpop.f32.mrb[223].mxu0 }
 0x35f   : > { %v8272_v11 = vld [vmem:[%s9304_s3 + $0x1] ss:$0 sm:$0xff] }
 0x363   : > { %v2203_v44 = vpop.f32.mrb[224].mxu0 }
 0x364   : > { %v2381_v59 = vadd.f32 %v9480_v46, %v2203_v44  ;;  %v2205_v8 = vpop.f32.mrb[225].mxu0 }
 0x365   : > { %v2206_v15 = vpop.f32.mrb[226].mxu0 }
 0x366   : > { %v2523_v53 = vadd.f32 %v2381_v59, %v8138_v30  ;;  %v2384_v22 = vadd.f32 %v8075_v32, %v2206_v15  ;;  %v2208_v43 = vpop.f32.mrb[227].mxu0  ;;  %v9481_v30 = vld [vmem:[#allocation34_spill] sm:$0xff] }
 0x368   : > { %v2636_v46 = vmul.f32 %v8265_v47, %v2523_v53  ;;  %v2524_v44 = vadd.f32 %v2384_v22, %v8145_v57 }
 0x36a   : > { %v2677_v8 = vadd.f32 %v8272_v11, %v2636_v46  ;;  %v2637_v10 = vmul.f32 %v8265_v47, %v2524_v44 }
 0x36b   : > { %v2211_v2 = vpop.f32.mrb[228].mxu0 }
 0x36c   : > { %v2678_v63 = vadd.f32 %v8272_v11, %v2637_v10  ;;  %v2389_v59 = vadd.f32 %v9481_v30, %v2211_v2  ;;  %v2213_v32 = vpop.f32.mrb[229].mxu0  ;;  %v2713_v43 = vmax.f32 %v2677_v8, 0.0  ;;  %v6746_v2 = vld [vmem:[#allocation9 + $0x90] sm:$0xff]  }
 0x36d   : > { %v2214_v15 = vpop.f32.mrb[230].mxu0  ;;  %6209 = vmatprep.subr.bf16.mxu1 %v6746_v2 }
 0x36e   : > { %v2714_v61 = vmax.f32 %v2678_v63, 0.0  ;;  %v2525_v45 = vadd.f32 %v2389_v59, %v8134_v17  ;;  %v2392_v62 = vadd.f32 %v9482_v25, %v2214_v15  ;;  %v2216_v53 = vpop.f32.mrb[231].mxu0  ;;  %v9483_v17 = vld [vmem:[#allocation17_spill] sm:$0xff]  ;;  %6210 = vmatpush3.bf16.msra.mxu1 %v6746_v2 }
 0x370   : > { %v8282_v48 = vpack.c.bf16 %v2714_v61, %v2713_v43  ;;  %v2638_v57 = vmul.f32 %v8265_v47, %v2525_v45  ;;  %v2526_v22 = vadd.f32 %v2392_v62, %v8142_v12 }
 0x372   : > { %v2679_v46 = vadd.f32 %v8272_v11, %v2638_v57  ;;  %v2639_v10 = vmul.f32 %v8265_v47, %v2526_v22  ;;  %v2844_v44 = vshll.u32 %v8282_v48, 16  ;;  %v2841_v45 = vshrl.u32 %v8282_v48, 16 }
 0x373   : > { %v2219_v8 = vpop.f32.mrb[232].mxu0 }
 0x374   : > { %v2680_v63 = vadd.f32 %v8272_v11, %v2639_v10  ;;  %v2397_v30 = vadd.f32 %v9483_v17, %v2219_v8  ;;  %v2221_v25 = vpop.f32.mrb[233].mxu0  ;;  %v2972_v12 = vrot.slane %v2844_v44, 1  ;;  %v2715_v62 = vmax.f32 %v2679_v46, 0.0 }
 0x375   : > { %v2222_v61 = vpop.f32.mrb[234].mxu0 }
 0x376   : > { %v2716_v59 = vmax.f32 %v2680_v63, 0.0  ;;  %v2527_v32 = vadd.f32 %v2397_v30, %v8154_v4  ;;  %v2400_v15 = vadd.f32 %v8088_v42, %v2222_v61  ;;  %v2224_v43 = vpop.f32.mrb[235].mxu0  ;;  %v8298_v53 = vor.u32 %v2972_v12, %v2841_v45  ;;  %v9484_v63 = vld [vmem:[#allocation36_spill] sm:$0xff] }
 0x378   : > { %v8300_v57 = vpack.c.bf16 %v2716_v59, %v2715_v62  ;;  %v2640_v22 = vmul.f32 %v8265_v47, %v2527_v32  ;;  %v2528_v10 = vadd.f32 %v2400_v15, %v8161_v19 }
 0x37a   : > { %v2681_v2 = vadd.f32 %v8272_v11, %v2640_v22  ;;  %v2641_v46 = vmul.f32 %v8265_v47, %v2528_v10  ;;  %v2851_v8 = vshll.u32 %v8300_v57, 16  ;;  %v2848_v61 = vshrl.u32 %v8300_v57, 16 }
 0x37b   : > { %v2227_v4 = vpop.f32.mrb[236].mxu0 }
 0x37c   : > { %v2682_v42 = vadd.f32 %v8272_v11, %v2641_v46  ;;  %v2405_v17 = vadd.f32 %v9484_v63, %v2227_v4  ;;  %v2229_v30 = vpop.f32.mrb[237].mxu0  ;;  %v2974_v12 = vrot.slane %v2851_v8, 1  ;;  %v2717_v62 = vmax.f32 %v2681_v2, 0.0 }
 0x37d   : > { %v2230_v25 = vpop.f32.mrb[238].mxu0 }
 0x37e   : > { %v2718_v19 = vmax.f32 %v2682_v42, 0.0  ;;  %v2529_v59 = vadd.f32 %v2405_v17, %v8150_v26  ;;  %v2408_v32 = vadd.f32 %v8085_v56, %v2230_v25  ;;  %v2232_v15 = vpop.f32.mrb[239].mxu0  ;;  %v8316_v43 = vor.u32 %v2974_v12, %v2848_v61  ;;  %v6747_v42 = vld [vmem:[#allocation9 + $0x98] sm:$0xff]  }
 0x37f   : > { %6211 = vmatprep.subr.bf16.mxu1 %v6747_v42 }
 0x380   : > { %v8318_v22 = vpack.c.bf16 %v2718_v19, %v2717_v62  ;;  %v2642_v10 = vmul.f32 %v8265_v47, %v2529_v59  ;;  %v2530_v46 = vadd.f32 %v2408_v32, %v8158_v58  ;;  %6212 = vmatpush3.bf16.msra.mxu1 %v6747_v42 }
 0x382   : > { %v2683_v4 = vadd.f32 %v8272_v11, %v2642_v10  ;;  %v2643_v2 = vmul.f32 %v8265_v47, %v2530_v46  ;;  %v2858_v26 = vshll.u32 %v8318_v22, 16  ;;  %v2855_v12 = vshrl.u32 %v8318_v22, 16 }
 0x383   : > { %v2235_v63 = vpop.f32.mrb[240].mxu0 }
 0x384   : > { %v2684_v56 = vadd.f32 %v8272_v11, %v2643_v2  ;;  %v2413_v17 = vadd.f32 %v8125_v36, %v2235_v63  ;;  %v2237_v30 = vpop.f32.mrb[241].mxu0  ;;  %v2976_v58 = vrot.slane %v2858_v26, 1  ;;  %v2719_v62 = vmax.f32 %v2683_v4, 0.0 }
 0x385   : > { %v2238_v25 = vpop.f32.mrb[242].mxu0 }
 0x386   : > { %v2720_v19 = vmax.f32 %v2684_v56, 0.0  ;;  %v2531_v59 = vadd.f32 %v2413_v17, %v8178_v1  ;;  %v2416_v32 = vadd.f32 %v8131_v6, %v2238_v25  ;;  %v2240_v15 = vpop.f32.mrb[243].mxu0  ;;  %v8334_v10 = vor.u32 %v2976_v58, %v2855_v12 }
 0x388   : > { %v8336_v36 = vpack.c.bf16 %v2720_v19, %v2719_v62  ;;  %v2644_v46 = vmul.f32 %v8265_v47, %v2531_v59  ;;  %v2532_v2 = vadd.f32 %v2416_v32, %v8185_v28 }
 0x38a   : > { %v2685_v42 = vadd.f32 %v8272_v11, %v2644_v46  ;;  %v2645_v4 = vmul.f32 %v8265_v47, %v2532_v2  ;;  %v2865_v63 = vshll.u32 %v8336_v36, 16  ;;  %v2862_v25 = vshrl.u32 %v8336_v36, 16 }
 0x38b   : > { %v2243_v1 = vpop.f32.mrb[244].mxu0 }
 0x38c   : > { %v2686_v6 = vadd.f32 %v8272_v11, %v2645_v4  ;;  %v2421_v56 = vadd.f32 %v8123_v51, %v2243_v1  ;;  %v2245_v17 = vpop.f32.mrb[245].mxu0  ;;  %v2978_v58 = vrot.slane %v2865_v63, 1  ;;  %v2721_v62 = vmax.f32 %v2685_v42, 0.0  ;;  %v6748_v1 = vld [vmem:[#allocation9 + $0xa0] sm:$0xff]  }
 0x38d   : > { %v2246_v30 = vpop.f32.mrb[246].mxu0  ;;  %6213 = vmatprep.subr.bf16.mxu1 %v6748_v1 }
 0x38e   : > { %v2722_v28 = vmax.f32 %v2686_v6, 0.0  ;;  %v2533_v19 = vadd.f32 %v2421_v56, %v8174_v24  ;;  %v2424_v59 = vadd.f32 %v8128_v9, %v2246_v30  ;;  %v2248_v32 = vpop.f32.mrb[247].mxu0  ;;  %v8352_v15 = vor.u32 %v2978_v58, %v2862_v25  ;;  %6214 = vmatpush3.bf16.msra.mxu1 %v6748_v1 }
 0x390   : > { %v8354_v46 = vpack.c.bf16 %v2722_v28, %v2721_v62  ;;  %v2646_v51 = vmul.f32 %v8265_v47, %v2533_v19  ;;  %v2534_v2 = vadd.f32 %v2424_v59, %v8182_v27 }
 0x392   : > { %v2687_v4 = vadd.f32 %v8272_v11, %v2646_v51  ;;  %v2647_v42 = vmul.f32 %v8265_v47, %v2534_v2  ;;  %v2872_v24 = vshll.u32 %v8354_v46, 16  ;;  %v2869_v58 = vshrl.u32 %v8354_v46, 16 }
 0x393   : > { %v2251_v6 = vpop.f32.mrb[248].mxu0 }
 0x394   : > { %v2688_v9 = vadd.f32 %v8272_v11, %v2647_v42  ;;  %v2429_v56 = vadd.f32 %v8165_v13, %v2251_v6  ;;  %v2253_v17 = vpop.f32.mrb[249].mxu0  ;;  %v2980_v27 = vrot.slane %v2872_v24, 1  ;;  %v2723_v62 = vmax.f32 %v2687_v4, 0.0 }
 0x395   : > { %v2254_v30 = vpop.f32.mrb[250].mxu0 }
 0x396   : > { %v2724_v28 = vmax.f32 %v2688_v9, 0.0  ;;  %v2535_v19 = vadd.f32 %v2429_v56, %v8194_v37  ;;  %v2432_v59 = vadd.f32 %v8171_v14, %v2254_v30  ;;  %v2256_v32 = vpop.f32.mrb[251].mxu0  ;;  %v8370_v51 = vor.u32 %v2980_v27, %v2869_v58 }
 0x398   : > { %v8372_v13 = vpack.c.bf16 %v2724_v28, %v2723_v62  ;;  %v2648_v2 = vmul.f32 %v8265_v47, %v2535_v19  ;;  %v2536_v42 = vadd.f32 %v2432_v59, %v8201_v20 }
 0x39a   : > { %v2689_v1 = vadd.f32 %v8272_v11, %v2648_v2  ;;  %v2649_v4 = vmul.f32 %v8265_v47, %v2536_v42  ;;  %v2879_v6 = vshll.u32 %v8372_v13, 16  ;;  %v2876_v30 = vshrl.u32 %v8372_v13, 16 }
 0x39b   : > { %v2259_v37 = vpop.f32.mrb[252].mxu0 }
 0x39c   : > { %v2690_v14 = vadd.f32 %v8272_v11, %v2649_v4  ;;  %v2437_v9 = vadd.f32 %v8163_v35, %v2259_v37  ;;  %v2261_v56 = vpop.f32.mrb[253].mxu0  ;;  %v2982_v27 = vrot.slane %v2879_v6, 1  ;;  %v2725_v62 = vmax.f32 %v2689_v1, 0.0  ;;  %v6749_v37 = vld [vmem:[#allocation9 + $0xa8] sm:$0xff]  }
 0x39d   : > { %v2262_v17 = vpop.f32.mrb[254].mxu0  ;;  %6215 = vmatprep.subr.bf16.mxu1 %v6749_v37 }
 0x39e   : > { %v2726_v20 = vmax.f32 %v2690_v14, 0.0  ;;  %v2537_v28 = vadd.f32 %v2437_v9, %v8190_v0  ;;  %v2440_v19 = vadd.f32 %v8168_v41, %v2262_v17  ;;  %v2264_v59 = vpop.f32.mrb[255].mxu0  ;;  %v8388_v32 = vor.u32 %v2982_v27, %v2876_v30  ;;  %6216 = vmatpush3.bf16.msra.mxu1 %v6749_v37 }
 0x3a0   : > { %v8390_v2 = vpack.c.bf16 %v2726_v20, %v2725_v62  ;;  %v2650_v35 = vmul.f32 %v8265_v47, %v2537_v28  ;;  %v2538_v42 = vadd.f32 %v2440_v19, %v8198_v49 }
 0x3a2   : > { %v2691_v4 = vadd.f32 %v8272_v11, %v2650_v35  ;;  %v2651_v1 = vmul.f32 %v8265_v47, %v2538_v42  ;;  %v9360_v0 = vshll.u32 %v8390_v2, 16  ;;  %v2883_v27 = vshrl.u32 %v8390_v2, 16 }
 0x3a3   : > { %v2267_v14 = vpop.f32.mrb[0].mxu0 }
 0x3a4   : > { %v2692_v41 = vadd.f32 %v8272_v11, %v2651_v1  ;;  %v2445_v9 = vadd.f32 %v8205_v55, %v2267_v14  ;;  %v2269_v56 = vpop.f32.mrb[1].mxu0  ;;  %v2984_v49 = vrot.slane %v9360_v0, 1  ;;  %v2727_v62 = vmax.f32 %v2691_v4, 0.0 }
 0x3a5   : > { %v2270_v17 = vpop.f32.mrb[2].mxu0 }
 0x3a6   : > { %v2728_v20 = vmax.f32 %v2692_v41, 0.0  ;;  %v2539_v28 = vadd.f32 %v2445_v9, %v8218_v33  ;;  %v2448_v19 = vadd.f32 %v8211_v34, %v2270_v17  ;;  %v2272_v59 = vpop.f32.mrb[3].mxu0  ;;  %v8406_v35 = vor.u32 %v2984_v49, %v2883_v27 }
 0x3a8   : > { %v8408_v55 = vpack.c.bf16 %v2728_v20, %v2727_v62  ;;  %v2652_v42 = vmul.f32 %v8265_v47, %v2539_v28  ;;  %v2540_v1 = vadd.f32 %v2448_v19, %v8225_v39 }
 0x3aa   : > { %v2693_v37 = vadd.f32 %v8272_v11, %v2652_v42  ;;  %v2653_v4 = vmul.f32 %v8265_v47, %v2540_v1  ;;  %v9358_v14 = vshll.u32 %v8408_v55, 16  ;;  %v9359_v17 = vshrl.u32 %v8408_v55, 16 }
 0x3ab   : > { %v2275_v33 = vpop.f32.mrb[8].mxu0 }
 0x3ac   : > { %v2694_v34 = vadd.f32 %v8272_v11, %v2653_v4  ;;  %v2453_v41 = vadd.f32 %v8203_v40, %v2275_v33  ;;  %v2277_v9 = vpop.f32.mrb[9].mxu0  ;;  %v2986_v49 = vrot.slane %v9358_v14, 1  ;;  %v2729_v62 = vmax.f32 %v2693_v37, 0.0  ;;  %v6750_v33 = vld [vmem:[#allocation9 + $0xb0] sm:$0xff]   ;;  %v9493_v14 = vld [vmem:[#allocation26_spill] sm:$0xff] }
 0x3ad   : > { %v2278_v56 = vpop.f32.mrb[10].mxu0  ;;  %6217 = vmatprep.subr.bf16.mxu1 %v6750_v33 }
 0x3ae   : > { %v2730_v39 = vmax.f32 %v2694_v34, 0.0  ;;  %v2541_v20 = vadd.f32 %v2453_v41, %v8214_v29  ;;  %v2456_v28 = vadd.f32 %v8208_v54, %v2278_v56  ;;  %v2280_v19 = vpop.f32.mrb[11].mxu0  ;;  %v8424_v59 = vor.u32 %v2986_v49, %v9359_v17  ;;  %6218 = vmatpush3.bf16.msra.mxu1 %v6750_v33 }
 0x3b0   : > { %v8426_v42 = vpack.c.bf16 %v2730_v39, %v2729_v62  ;;  %v2654_v40 = vmul.f32 %v8265_v47, %v2541_v20  ;;  %v2542_v1 = vadd.f32 %v2456_v28, %v8222_v23 }
 0x3b2   : > { %9485 = vst [vmem:[#allocation29_spill] sm:$0xff] %v8426_v42  ;;  %v2695_v4 = vadd.f32 %v8272_v11, %v2654_v40  ;;  %v2655_v37 = vmul.f32 %v8265_v47, %v2542_v1  ;;  %v9356_v29 = vshll.u32 %v8426_v42, 16  ;;  %v9357_v49 = vshrl.u32 %v8426_v42, 16 }
 0x3b3   : > { %v2283_v34 = vpop.f32.mrb[12].mxu0 }
 0x3b4   : > { %v2696_v54 = vadd.f32 %v8272_v11, %v2655_v37  ;;  %v2461_v41 = vadd.f32 %v8235_v3, %v2283_v34  ;;  %v2285_v9 = vpop.f32.mrb[13].mxu0  ;;  %v2988_v23 = vrot.slane %v9356_v29, 1  ;;  %v2731_v62 = vmax.f32 %v2695_v4, 0.0 }
 0x3b5   : > { %v2286_v56 = vpop.f32.mrb[14].mxu0 }
 0x3b6   : > { %v2732_v39 = vmax.f32 %v2696_v54, 0.0  ;;  %v2543_v20 = vadd.f32 %v2461_v41, %v8229_v18  ;;  %v2464_v28 = vadd.f32 %v8237_v16, %v2286_v56  ;;  %v2288_v19 = vpop.f32.mrb[15].mxu0  ;;  %v8442_v40 = vor.u32 %v2988_v23, %v9357_v49  ;;  %v9492_v49 = vld [vmem:[#allocation21_spill] sm:$0xff] }
 0x3b8   : > { %v8444_v3 = vpack.c.bf16 %v2732_v39, %v2731_v62  ;;  %v2656_v1 = vmul.f32 %v8265_v47, %v2543_v20  ;;  %v2544_v37 = vadd.f32 %v2464_v28, %v8233_v7  ;;  %v6751_v62 = vld [vmem:[#allocation9 + $0xb8] sm:$0xff]  }
 0x3b9   : > { %6219 = vmatprep.subr.bf16.mxu1 %v6751_v62 }
 0x3ba   : > { %v2697_v33 = vadd.f32 %v8272_v11, %v2656_v1  ;;  %v2657_v4 = vmul.f32 %v8265_v47, %v2544_v37  ;;  %6220 = vmatpush3.bf16.msra.mxu1 %v6751_v62 }
 0x3bb   : > { %v2291_v34 = vpop.f32.mrb[16].mxu0 }
 0x3bc   : > { %v2698_v18 = vadd.f32 %v8272_v11, %v2657_v4  ;;  %v2293_v54 = vpop.f32.mrb[17].mxu0  ;;  %v2733_v41 = vmax.f32 %v2697_v33, 0.0 }
 0x3bd   : > { %v2294_v16 = vpop.f32.mrb[18].mxu0 }
 0x3be   : > { %v2734_v9 = vmax.f32 %v2698_v18, 0.0  ;;  %v2296_v56 = vpop.f32.mrb[19].mxu0 }
 0x3c0   : > { %v8451_v23 = vpack.c.bf16 %v2734_v9, %v2733_v41 }
 0x3c3   : > { %v6171_v39 = vpop.f32.mrb[4].mxu0 }
 0x3c4   : > { %v2626_v20 = vmul.f32 %v6171_v39, %v8265_v47  ;;  %v2332_v19 = vpop.f32.mrb[5].mxu0 }
 0x3c5   : > { %v6172_v7 = vpop.f32.mrb[6].mxu0 }
 0x3c6   : > { %v2667_v28 = vadd.f32 %v8272_v11, %v2626_v20  ;;  %v2627_v1 = vmul.f32 %v6172_v7, %v8265_v47  ;;  %v2335_v37 = vpop.f32.mrb[7].mxu0 }
 0x3c8   : > { %v2668_v4 = vadd.f32 %v8272_v11, %v2627_v1  ;;  %v2703_v33 = vmax.f32 %v2667_v28, 0.0 }
 0x3ca   : > { %v2704_v34 = vmax.f32 %v2668_v4, 0.0 }
 0x3cb   : > { %v6175_v18 = vpop.f32.mrb[20].mxu0 }
 0x3cc   : > { %v8457_v54 = vpack.c.bf16 %v2704_v34, %v2703_v33  ;;  %v2357_v16 = vadd.f32 %v6175_v18, %v8244_v21  ;;  %v2348_v41 = vpop.f32.mrb[21].mxu0 }
 0x3cd   : > { %v2349_v9 = vadd.f32 %v2348_v41, %v8239_v31  ;;  %v6176_v56 = vpop.f32.mrb[22].mxu0 }
 0x3ce   : > { %v2517_v62 = vadd.f32 %v2357_v16, %v8091_v5  ;;  %v2360_v39 = vadd.f32 %v6176_v56, %v8250_v60  ;;  %v2351_v20 = vpop.f32.mrb[23].mxu0  ;;  %3264 = vmatprep.mubr.bf16.mxu1 %v8457_v54  ;;  %v2806_v19 = vshrl.u32 %v8457_v54, 16  ;;  %v2809_v7 = vshll.u32 %v8457_v54, 16  ;;  %v9486_v60 = vld [vmem:[#allocation19_spill] sm:$0xff] }
 0x3cf   : > { %v2515_v28 = vadd.f32 %v2349_v9, %v8095_v50  ;;  %v2352_v1 = vadd.f32 %v2351_v20, %v8241_v52  ;;  %v6752_v50 = vld [vmem:[#allocation9 + $0x100] sm:$0xff]  }
 0x3d0   : > { %v2630_v21 = vmul.f32 %v8265_v47, %v2517_v62  ;;  %v2518_v31 = vadd.f32 %v2360_v39, %v8099_v38  ;;  %v2808_v37 = vrot.slane %v2806_v19, 7  ;;  %v2962_v4 = vrot.slane %v2809_v7, 1  ;;  %v9487_v62 = vld [vmem:[#allocation27_spill] sm:$0xff]  ;;  %5777 = vmatprep.subr.bf16.mxu1 %v6752_v50 }
 0x3d1   : > { %v2628_v5 = vmul.f32 %v8265_v47, %v2515_v28  ;;  %v2516_v33 = vadd.f32 %v2352_v1, %v9486_v60  ;;  %v6779_v28 = vld [vmem:[#allocation9 + $0x188] sm:$0xff]  }
 0x3d2   : > { %v2671_v34 = vadd.f32 %v8272_v11, %v2630_v21  ;;  %v2631_v18 = vmul.f32 %v8265_v47, %v2518_v31  ;;  %v2811_v16 = vor.u32 %v2809_v7, %v2808_v37  ;;  %v8474_v41 = vor.u32 %v2962_v4, %v2806_v19  ;;  %v9489_v19 = vld [vmem:[#allocation25_spill] sm:$0xff] }
 0x3d3   : > { %v2669_v52 = vadd.f32 %v8272_v11, %v2628_v5  ;;  %v2629_v9 = vmul.f32 %v8265_v47, %v2516_v33  ;;  %v6179_v56 = vpop.f32.mrb[24].mxu0  ;;  %v9490_v5 = vld [vmem:[#allocation20_spill] sm:$0xff] }
 0x3d4   : > { %v2672_v38 = vadd.f32 %v8272_v11, %v2631_v18  ;;  %v2373_v39 = vadd.f32 %v6179_v56, %v9487_v62  ;;  %v2364_v20 = vpop.f32.mrb[25].mxu0  ;;  %v8482_v1 = vsel %vm7252_vm2, 0, %v2811_v16  ;;  %v2707_v37 = vmax.f32 %v2671_v34, 0.0  ;;  %v9491_v33 = vld [vmem:[#allocation28_spill] sm:$0xff] }
 0x3d5   : > { %v2670_v7 = vadd.f32 %v8272_v11, %v2629_v9  ;;  %v2365_v21 = vadd.f32 %v2364_v20, %v9489_v19  ;;  %v6180_v31 = vpop.f32.mrb[26].mxu0  ;;  %3265 = vmatmul.mubr.bf16.gmra.mrb[28].mxu1 %v8482_v1  ;;  %v2705_v62 = vmax.f32 %v2669_v52, 0.0  ;;  %v9494_v20 = vld [vmem:[#allocation22_spill] sm:$0xff] }
 0x3d6   : > { %v2708_v4 = vmax.f32 %v2672_v38, 0.0  ;;  %v2521_v60 = vadd.f32 %v2373_v39, %v9490_v5  ;;  %v2376_v18 = vadd.f32 %v6180_v31, %v9491_v33  ;;  %v2367_v56 = vpop.f32.mrb[27].mxu0  ;;  %v9495_v38 = vld [vmem:[#allocation23_spill] sm:$0xff] }
 0x3d7   : > { %v2706_v29 = vmax.f32 %v2670_v7, 0.0  ;;  %v2519_v16 = vadd.f32 %v2365_v21, %v9492_v49  ;;  %v2368_v50 = vadd.f32 %v2367_v56, %v9493_v14 }
 0x3d8   : > { %v8491_v17 = vpack.c.bf16 %v2708_v4, %v2707_v37  ;;  %v2634_v9 = vmul.f32 %v8265_v47, %v2521_v60  ;;  %v2522_v19 = vadd.f32 %v2376_v18, %v9494_v20 }
 0x3d9   : > { %v8495_v0 = vpack.c.bf16 %v2706_v29, %v2705_v62  ;;  %v2632_v34 = vmul.f32 %v8265_v47, %v2519_v16  ;;  %v2520_v39 = vadd.f32 %v2368_v50, %v9495_v38 }
 0x3da   : > { %v2675_v31 = vadd.f32 %v8272_v11, %v2634_v9  ;;  %v2635_v52 = vmul.f32 %v8265_v47, %v2522_v19  ;;  %v2823_v49 = vshll.u32 %v8491_v17, 16  ;;  %v2820_v4 = vshrl.u32 %v8491_v17, 16 }
 0x3db   : > { %v2673_v14 = vadd.f32 %v8272_v11, %v2632_v34  ;;  %v2633_v7 = vmul.f32 %v8265_v47, %v2520_v39  ;;  %3272 = vmatprep.mubr.bf16.mxu1 %v8495_v0  ;;  %v2813_v21 = vshrl.u32 %v8495_v0, 16  ;;  %v2816_v29 = vshll.u32 %v8495_v0, 16 }
 0x3dc   : > { %v2676_v37 = vadd.f32 %v8272_v11, %v2635_v52  ;;  %v2966_v5 = vrot.slane %v2823_v49, 1  ;;  %v2711_v56 = vmax.f32 %v2675_v31, 0.0 }
 0x3dd   : > { %v2674_v60 = vadd.f32 %v8272_v11, %v2633_v7  ;;  %v2815_v33 = vrot.slane %v2813_v21, 7  ;;  %v2964_v18 = vrot.slane %v2816_v29, 1  ;;  %v2709_v47 = vmax.f32 %v2673_v14, 0.0 }
 0x3de   : > { %v2712_v62 = vmax.f32 %v2676_v37, 0.0  ;;  %v8510_v16 = vor.u32 %v2966_v5, %v2820_v4  ;;  %v2822_v11 = vrot.slane %v2820_v4, 7 }
 0x3df   : > { %v2710_v50 = vmax.f32 %v2674_v60, 0.0  ;;  %v2818_v9 = vor.u32 %v2816_v29, %v2815_v33  ;;  %v8512_v20 = vor.u32 %v2964_v18, %v2813_v21 }
 0x3e0   : > { %v8514_v19 = vpack.c.bf16 %v2712_v62, %v2711_v56  ;;  %v2825_v7 = vor.u32 %v2823_v49, %v2822_v11  ;;  %v2850_v11 = vrot.slane %v2848_v61, 7 }
 0x3e1   : > { %v8516_v34 = vpack.c.bf16 %v2710_v50, %v2709_v47  ;;  %v8520_v38 = vsel %vm7252_vm2, 0, %v2818_v9  ;;  %v2843_v47 = vrot.slane %v2841_v45, 7 }
 0x3e2   : > { %3273 = vmatmul.mubr.bf16.gmra.mrb[32].mxu1 %v8520_v38  ;;  %v2837_v39 = vshll.u32 %v8514_v19, 16  ;;  %v2834_v52 = vshrl.u32 %v8514_v19, 16  ;;  %v8534_v4 = vsel %vm7252_vm2, 0, %v2825_v7  ;;  %v2853_v45 = vor.u32 %v2851_v8, %v2850_v11 }
 0x3e3   : > { %3280 = vmatprep.mubr.bf16.mxu1 %v8491_v17  ;;  %v2830_v31 = vshll.u32 %v8516_v34, 16  ;;  %v2827_v21 = vshrl.u32 %v8516_v34, 16  ;;  %v2846_v50 = vor.u32 %v2844_v44, %v2843_v47  ;;  %v2857_v44 = vrot.slane %v2855_v12, 7 }
 0x3e4   : > { %v2970_v14 = vrot.slane %v2837_v39, 1  ;;  %v2836_v18 = vrot.slane %v2834_v52, 7  ;;  %v2864_v8 = vrot.slane %v2862_v25, 7 }
 0x3e5   : > { %v2968_v29 = vrot.slane %v2830_v31, 1  ;;  %v2829_v60 = vrot.slane %v2827_v21, 7  ;;  %v8556_v9 = vsel %vm7252_vm2, 0, %v2846_v50  ;;  %v2860_v61 = vor.u32 %v2858_v26, %v2857_v44 }
 0x3e6   : > { %v8528_v37 = vor.u32 %v2970_v14, %v2834_v52  ;;  %v2839_v56 = vor.u32 %v2837_v39, %v2836_v18  ;;  %v8566_v39 = vsel %vm7252_vm2, 0, %v2853_v45  ;;  %v2867_v12 = vor.u32 %v2865_v63, %v2864_v8 }
 0x3e7   : > { %v8530_v5 = vor.u32 %v2968_v29, %v2827_v21  ;;  %v2832_v33 = vor.u32 %v2830_v31, %v2829_v60  ;;  %v8576_v31 = vsel %vm7252_vm2, 0, %v2860_v61  ;;  %v2871_v26 = vrot.slane %v2869_v58, 7 }
 0x3e8   : > { %v8546_v62 = vsel %vm7252_vm2, 0, %v2839_v56  ;;  %v8586_v52 = vsel %vm7252_vm2, 0, %v2867_v12  ;;  %v2878_v63 = vrot.slane %v2876_v30, 7  ;;  %v2885_v30 = vrot.slane %v2883_v27, 7 }
 0x3e9   : > { %v8540_v49 = vsel %vm7252_vm2, 0, %v2832_v33  ;;  %v2874_v25 = vor.u32 %v2872_v24, %v2871_v26  ;;  %v9496_v56 = vshll.u32 %v8390_v2, 16  ;;  %v9497_v50 = vshrl.u32 %v8408_v55, 16 }
 0x3ea   : > { %3281 = vmatmul.mubr.bf16.gmra.mrb[36].mxu1 %v8534_v4  ;;  %v2881_v60 = vor.u32 %v2879_v6, %v2878_v63  ;;  %v9498_v27 = vshll.u32 %v8408_v55, 16  ;;  %v9499_v61 = vshrl.u32 %v8426_v42, 16  ;;  %v9500_v12 = vshll.u32 %v8426_v42, 16 }
 0x3eb   : > { %3288 = vmatprep.mubr.bf16.mxu1 %v8516_v34  ;;  %v8596_v14 = vsel %vm7252_vm2, 0, %v2874_v25  ;;  %v2888_v47 = vor.u32 %v9496_v56, %v2885_v30  ;;  %v2892_v11 = vrot.slane %v9497_v50, 7  ;;  %v2904_v25 = vshrl.u32 %v8444_v3, 16  ;;  %v6753_v50 = vld [vmem:[#allocation9 + $0xc0] sm:$0xff]  }
 0x3ec   : > { %v8610_v18 = vsel %vm7252_vm2, 0, %v2881_v60  ;;  %v2899_v8 = vrot.slane %v9499_v61, 7  ;;  %v6755_v61 = vld [vmem:[#allocation9 + $0xc8] sm:$0xff]   ;;  %v6796_v30 = vld [vmem:[#allocation9 + $0x220] sm:$0xff]  }
 0x3ed   : > { %v8620_v6 = vsel %vm7252_vm2, 0, %v2888_v47  ;;  %v2895_v45 = vor.u32 %v9498_v27, %v2892_v11  ;;  %v6754_v11 = vld [vmem:[#allocation9 + $0x108] sm:$0xff]   ;;  %v8664_v27 = vsel %vm7346_vm5, %v8474_v41, 0  ;;  %v8676_v41 = vsel %vm7346_vm5, %v8510_v16, 0 }
 0x3ee   : > { %v2902_v26 = vor.u32 %v9500_v12, %v2899_v8  ;;  %v6756_v8 = vld [vmem:[#allocation9 + $0x110] sm:$0xff]   ;;  %v8688_v16 = vsel %vm7346_vm5, %v8528_v37, 0  ;;  %v8700_v37 = vsel %vm7346_vm5, %v8316_v43, 0  ;;  %v8712_v43 = vsel %vm7346_vm5, %v8352_v15, 0 }
 0x3ef   : > { %v8630_v44 = vsel %vm7252_vm2, 0, %v2895_v45  ;;  %v8670_v45 = vsel %vm7346_vm5, %v8512_v20, 0  ;;  %v6757_v12 = vld [vmem:[#allocation9 + $0xd0] sm:$0xff]   ;;  %v8682_v20 = vsel %vm7346_vm5, %v8530_v5, 0  ;;  %v8694_v5 = vsel %vm7346_vm5, %v8298_v53, 0 }
 0x3f0   : > { %v8641_v63 = vsel %vm7252_vm2, 0, %v2902_v26  ;;  %v6758_v26 = vld [vmem:[#allocation9 + $0x118] sm:$0xff]   ;;  %v8706_v53 = vsel %vm7346_vm5, %v8334_v10, 0  ;;  %v8718_v10 = vsel %vm7346_vm5, %v8370_v51, 0  ;;  %v8730_v15 = vsel %vm7346_vm5, %v8406_v35, 0 }
 0x3f1   : > { %v8736_v51 = vsel %vm7346_vm5, %v8424_v59, 0  ;;  %v6769_v59 = vld [vmem:[#allocation9 + $0x148] sm:$0xff]  }
 0x3f2   : > { %3289 = vmatmul.mubr.bf16.gmra.mrb[40].mxu1 %v8540_v49 }
 0x3f3   : > { %3296 = vmatprep.mubr.bf16.mxu1 %v8514_v19 }
 0x3fa   : > { %3297 = vmatmul.mubr.bf16.gmra.mrb[44].mxu1 %v8546_v62 }
 0x3fb   : > { %3304 = vmatprep.mubr.bf16.mxu1 %v8282_v48 }
 0x402   : > { %3305 = vmatmul.mubr.bf16.gmra.mrb[48].mxu1 %v8556_v9 }
 0x403   : > { %3312 = vmatprep.mubr.bf16.mxu1 %v8300_v57 }
 0x40a   : > { %3313 = vmatmul.mubr.bf16.gmra.mrb[52].mxu1 %v8566_v39 }
 0x40b   : > { %3320 = vmatprep.mubr.bf16.mxu1 %v8318_v22 }
 0x412   : > { %3321 = vmatmul.mubr.bf16.gmra.mrb[56].mxu1 %v8576_v31 }
 0x413   : > { %3328 = vmatprep.mubr.bf16.mxu1 %v8336_v36 }
 0x417   : > { %v5657_v7 = vpop.f32.mrb[24].mxu1 }
 0x418   : > { %v5658_v58 = vpop.f32.mrb[25].mxu1 }
 0x419   : > { %v8602_v21 = vadd.f32 %v5658_v58, %v5657_v7  ;;  %v5660_v29 = vpop.f32.mrb[26].mxu1  ;;  %v2906_v7 = vrot.slane %v2904_v25, 7  ;;  %v2907_v58 = vshll.u32 %v8444_v3, 16 }
 0x41a   : > { %3329 = vmatmul.mubr.bf16.gmra.mrb[60].mxu1 %v8586_v52  ;;  %v5661_v24 = vpop.f32.mrb[27].mxu1 }
 0x41b   : > { %3336 = vmatprep.mubr.bf16.mxu1 %v8354_v46  ;;  %v8606_v33 = vadd.f32 %v5661_v24, %v5660_v29  ;;  %v9501_v29 = vmov 0   ;;  %v2909_v24 = vor.u32 %v2907_v58, %v2906_v7  ;;  %v6759_v7 = vld [vmem:[#allocation9 + $0xd8] sm:$0xff]  }
 0x41c   : > { %v2960_v60 = vrot.slane %v9501_v29, 1 }
 0x41d   : > { %v8657_v47 = vsel %vm7252_vm2, 0, %v2909_v24  ;;  %v6761_v24 = vld [vmem:[#allocation9 + $0xe0] sm:$0xff]  }
 0x41e   : > { %v8653_v56 = vsel %vm7346_vm5, %v2960_v60, 0  ;;  %9504 = vst [vmem:[#allocation30_spill] sm:$0xff] %v8657_v47  ;;  %v6760_v60 = vld [vmem:[#allocation9 + $0x120] sm:$0xff]  }
 0x41f   : > { %9503 = vst [vmem:[#allocation37_spill] sm:$0xff] %v8653_v56 }
 0x422   : > { %3337 = vmatmul.mubr.bf16.gmra.mrb[64].mxu1 %v8596_v14 }
 0x423   : > { %3344 = vmatprep.mubr.bf16.mxu1 %v8372_v13 }
 0x42a   : > { %3345 = vmatmul.mubr.bf16.gmra.mrb[68].mxu1 %v8610_v18 }
 0x42b   : > { %3352 = vmatprep.mubr.bf16.mxu1 %v8390_v2 }
 0x432   : > { %3353 = vmatmul.mubr.bf16.gmra.mrb[72].mxu1 %v8620_v6 }
 0x433   : > { %3360 = vmatprep.mubr.bf16.mxu1 %v8408_v55 }
 0x43a   : > { %3361 = vmatmul.mubr.bf16.gmra.mrb[76].mxu1 %v8630_v44 }
 0x43b   : > { %3368 = vmatprep.mubr.bf16.mxu1 %v8426_v42 }
 0x442   : > { %3369 = vmatmul.mubr.bf16.gmra.mrb[80].mxu1 %v8641_v63 }
 0x443   : > { %3376 = vmatprep.mubr.bf16.mxu1 %v8444_v3 }
 0x44a   : > { %3377 = vmatmul.mubr.bf16.gmra.mrb[84].mxu1 %v8657_v47 }
 0x44b   : > { %6221 = vmatprep.mubr.bf16.mxu1 %v8653_v56 }
 0x452   : > { %6222 = vmatmul.mubr.bf16.vlgmr.msra.gmra.mrb[88].mxu1 %v8664_v27 }
 0x453   : > { %6225 = vmatprep.mubr.bf16.mxu1 %v8670_v45  ;;  %5778 = vmatpush3.bf16.msra.mxu1 %v6753_v50  ;;  %v6762_v50 = vld [vmem:[#allocation9 + $0x128] sm:$0xff]  }
 0x454   : > { %5779 = vmatprep.subr.bf16.mxu1 %v6754_v11  ;;  %v6763_v11 = vld [vmem:[#allocation9 + $0xe8] sm:$0xff]  }
 0x457   : > { %5780 = vmatpush3.bf16.msra.mxu1 %v6755_v61  ;;  %v6764_v61 = vld [vmem:[#allocation9 + $0x130] sm:$0xff]  }
 0x458   : > { %5781 = vmatprep.subr.bf16.mxu1 %v6756_v8  ;;  %v6765_v8 = vld [vmem:[#allocation9 + $0xf0] sm:$0xff]  }
 0x45a   : > { %6226 = vmatmul.mubr.bf16.gmra.mrb[92].mxu1 %v8676_v41 }
 0x45b   : > { %6229 = vmatprep.mubr.bf16.mxu1 %v8682_v20  ;;  %5782 = vmatpush3.bf16.msra.mxu1 %v6757_v12  ;;  %v6766_v12 = vld [vmem:[#allocation9 + $0x138] sm:$0xff]  }
 0x45c   : > { %5783 = vmatprep.subr.bf16.mxu1 %v6758_v26  ;;  %v6767_v26 = vld [vmem:[#allocation9 + $0xf8] sm:$0xff]  }
 0x45f   : > { %5784 = vmatpush3.bf16.msra.mxu1 %v6759_v7  ;;  %v6768_v7 = vld [vmem:[#allocation9 + $0x140] sm:$0xff]  }
 0x460   : > { %5785 = vmatprep.subr.bf16.mxu1 %v6760_v60  ;;  %v8724_v60 = vsel %vm7346_vm5, %v8388_v32, 0  ;;  %v8744_v32 = vsel %vm7346_vm5, %v8442_v40, 0  ;;  %v6770_v40 = vld [vmem:[#allocation9 + $0x150] sm:$0xff]  }
 0x462   : > { %6230 = vmatmul.mubr.bf16.gmra.mrb[96].mxu1 %v8688_v16 }
 0x463   : > { %6233 = vmatprep.mubr.bf16.mxu1 %v8694_v5  ;;  %5786 = vmatpush3.bf16.msra.mxu1 %v6761_v24  ;;  %v2990_v24 = vrot.slane %v2907_v58, 1  ;;  %v6771_v58 = vld [vmem:[#allocation9 + $0x158] sm:$0xff]  }
 0x464   : > { %5787 = vmatprep.subr.bf16.mxu1 %v6762_v50 }
 0x465   : > { %v2991_v35 = vor.u32 %v2990_v24, %v2904_v25  ;;  %v6772_v25 = vld [vmem:[#allocation9 + $0x160] sm:$0xff]  }
 0x467   : > { %5788 = vmatpush3.bf16.msra.mxu1 %v6763_v11  ;;  %v8751_v50 = vsel %vm7346_vm5, %v2991_v35, 0  ;;  %v6776_v35 = vld [vmem:[#allocation9 + $0x1c0] sm:$0xff]  }
 0x468   : > { %5789 = vmatprep.subr.bf16.mxu1 %v6764_v61  ;;  %v6775_v61 = vld [vmem:[#allocation9 + $0x178] sm:$0xff]  }
 0x46a   : > { %6234 = vmatmul.mubr.bf16.gmra.mrb[100].mxu1 %v8700_v37 }
 0x46b   : > { %6237 = vmatprep.mubr.bf16.mxu1 %v8706_v53  ;;  %5790 = vmatpush3.bf16.msra.mxu1 %v6765_v8 }
 0x46c   : > { %5791 = vmatprep.subr.bf16.mxu1 %v6766_v12 }
 0x46f   : > { %5792 = vmatpush3.bf16.msra.mxu1 %v6767_v26 }
 0x470   : > { %6253 = vmatprep.subr.bf16.mxu1 %v6768_v7 }
 0x472   : > { %6238 = vmatmul.mubr.bf16.gmra.mrb[104].mxu1 %v8712_v43 }
 0x473   : > { %6241 = vmatprep.mubr.bf16.mxu1 %v8718_v10 }
 0x47a   : > { %6242 = vmatmul.mubr.bf16.gmra.mrb[108].mxu1 %v8724_v60 }
 0x47b   : > { %6245 = vmatprep.mubr.bf16.mxu1 %v8730_v15 }
 0x482   : > { %6246 = vmatmul.mubr.bf16.gmra.mrb[112].mxu1 %v8736_v51 }
 0x483   : > { %6249 = vmatprep.mubr.bf16.mxu1 %v8744_v32 }
 0x48a   : > { %6250 = vmatmul.mubr.bf16.gmra.mrb[116].mxu1 %v8751_v50 }
 0x48b   : > { %3803 = vmatprep.mubr.bf16.mxu1 %v8457_v54  ;;  %v6773_v54 = vld [vmem:[#allocation9 + $0x168] sm:$0xff]  }
 0x492   : > { %3804 = vmatmul.mubr.bf16.vlgmr.msra.gmra.mrb[120].mxu1 %v8482_v1  ;;  %v6774_v1 = vld [vmem:[#allocation9 + $0x170] sm:$0xff]  }
 0x493   : > { %3811 = vmatprep.mubr.bf16.mxu1 %v8495_v0  ;;  %6254 = vmatpush3.bf16.msra.mxu1 %v6768_v7 }
 0x494   : > { %6255 = vmatprep.subr.bf16.mxu1 %v6769_v59 }
 0x497   : > { %6256 = vmatpush3.bf16.msra.mxu1 %v6769_v59 }
 0x498   : > { %6257 = vmatprep.subr.bf16.mxu1 %v6770_v40 }
 0x49a   : > { %3812 = vmatmul.mubr.bf16.gmra.mrb[124].mxu1 %v8520_v38 }
 0x49b   : > { %3819 = vmatprep.mubr.bf16.mxu1 %v8491_v17  ;;  %6258 = vmatpush3.bf16.msra.mxu1 %v6770_v40 }
 0x49c   : > { %6259 = vmatprep.subr.bf16.mxu1 %v6771_v58 }
 0x49f   : > { %6260 = vmatpush3.bf16.msra.mxu1 %v6771_v58 }
 0x4a0   : > { %6261 = vmatprep.subr.bf16.mxu1 %v6772_v25 }
 0x4a2   : > { %3820 = vmatmul.mubr.bf16.gmra.mrb[128].mxu1 %v8534_v4 }
 0x4a3   : > { %3827 = vmatprep.mubr.bf16.mxu1 %v8516_v34  ;;  %6262 = vmatpush3.bf16.msra.mxu1 %v6772_v25 }
 0x4a4   : > { %6263 = vmatprep.subr.bf16.mxu1 %v6773_v54 }
 0x4a7   : > { %6264 = vmatpush3.bf16.msra.mxu1 %v6773_v54 }
 0x4a8   : > { %v5663_v11 = vpop.f32.mrb[28].mxu1  ;;  %6265 = vmatprep.subr.bf16.mxu1 %v6774_v1 }
 0x4a9   : > { %v5664_v8 = vpop.f32.mrb[29].mxu1 }
 0x4aa   : > { %v8761_v12 = vadd.f32 %v5664_v8, %v5663_v11  ;;  %v5666_v26 = vpop.f32.mrb[30].mxu1  ;;  %3828 = vmatmul.mubr.bf16.gmra.mrb[132].mxu1 %v8540_v49 }
 0x4ab   : > { %v5667_v7 = vpop.f32.mrb[31].mxu1  ;;  %3835 = vmatprep.mubr.bf16.mxu1 %v8514_v19  ;;  %6266 = vmatpush3.bf16.msra.mxu1 %v6774_v1 }
 0x4ac   : > { %v8765_v24 = vadd.f32 %v5667_v7, %v5666_v26  ;;  %6267 = vmatprep.subr.bf16.mxu1 %v6775_v61 }
 0x4af   : > { %6268 = vmatpush3.bf16.msra.mxu1 %v6775_v61 }
 0x4b0   : > { %5913 = vmatprep.subr.bf16.mxu1 %v6776_v35 }
 0x4b2   : > { %3836 = vmatmul.mubr.bf16.gmra.mrb[136].mxu1 %v8546_v62 }
 0x4b3   : > { %3843 = vmatprep.mubr.bf16.mxu1 %v8282_v48 }
 0x4b5   : > { %v5669_v59 = vpop.f32.mrb[32].mxu1 }
 0x4b6   : > { %v5670_v40 = vpop.f32.mrb[33].mxu1 }
 0x4b7   : > { %v8769_v58 = vadd.f32 %v5670_v40, %v5669_v59  ;;  %v5672_v25 = vpop.f32.mrb[34].mxu1 }
 0x4b8   : > { %v5673_v54 = vpop.f32.mrb[35].mxu1 }
 0x4b9   : > { %v8771_v11 = vadd.f32 %v5673_v54, %v5672_v25 }
 0x4ba   : > { %3844 = vmatmul.mubr.bf16.gmra.mrb[140].mxu1 %v8556_v9 }
 0x4bb   : > { %3851 = vmatprep.mubr.bf16.mxu1 %v8300_v57 }
 0x4bd   : > { %v5675_v1 = vpop.f32.mrb[36].mxu1 }
 0x4be   : > { %v5676_v8 = vpop.f32.mrb[37].mxu1 }
 0x4bf   : > { %v8775_v61 = vadd.f32 %v5676_v8, %v5675_v1  ;;  %v5678_v26 = vpop.f32.mrb[38].mxu1 }
 0x4c0   : > { %v5679_v7 = vpop.f32.mrb[39].mxu1 }
 0x4c1   : > { %9505 = vst [vmem:[#allocation31_spill] sm:$0xff] %v8775_v61  ;;  %v8777_v35 = vadd.f32 %v5679_v7, %v5678_v26 }
 0x4c2   : > { %3852 = vmatmul.mubr.bf16.gmra.mrb[144].mxu1 %v8566_v39 }
 0x4c3   : > { %9506 = vst [vmem:[#allocation38_spill] sm:$0xff] %v8777_v35  ;;  %3859 = vmatprep.mubr.bf16.mxu1 %v8318_v22 }
 0x4c5   : > { %v5681_v59 = vpop.f32.mrb[40].mxu1 }
 0x4c6   : > { %v5682_v40 = vpop.f32.mrb[41].mxu1 }
 0x4c7   : > { %v8781_v25 = vadd.f32 %v5682_v40, %v5681_v59  ;;  %v5684_v54 = vpop.f32.mrb[42].mxu1 }
 0x4c8   : > { %v5685_v56 = vpop.f32.mrb[43].mxu1 }
 0x4c9   : > { %9507 = vst [vmem:[#allocation39_spill] sm:$0xff] %v8781_v25  ;;  %v8783_v29 = vadd.f32 %v5685_v56, %v5684_v54 }
 0x4ca   : > { %3860 = vmatmul.mubr.bf16.gmra.mrb[148].mxu1 %v8576_v31 }
 0x4cb   : > { %9508 = vst [vmem:[#allocation40_spill] sm:$0xff] %v8783_v29  ;;  %3867 = vmatprep.mubr.bf16.mxu1 %v8336_v36 }
 0x4cd   : > { %v5687_v1 = vpop.f32.mrb[44].mxu1 }
 0x4ce   : > { %v5688_v8 = vpop.f32.mrb[45].mxu1 }
 0x4cf   : > { %v8787_v26 = vadd.f32 %v5688_v8, %v5687_v1  ;;  %v5690_v7 = vpop.f32.mrb[46].mxu1 }
 0x4d0   : > { %v5691_v35 = vpop.f32.mrb[47].mxu1 }
 0x4d1   : > { %9509 = vst [vmem:[#allocation41_spill] sm:$0xff] %v8787_v26  ;;  %v8789_v61 = vadd.f32 %v5691_v35, %v5690_v7 }
 0x4d2   : > { %3868 = vmatmul.mubr.bf16.gmra.mrb[152].mxu1 %v8586_v52 }
 0x4d3   : > { %9510 = vst [vmem:[#allocation42_spill] sm:$0xff] %v8789_v61  ;;  %3875 = vmatprep.mubr.bf16.mxu1 %v8354_v46 }
 0x4d5   : > { %v5693_v59 = vpop.f32.mrb[48].mxu1 }
 0x4d6   : > { %v5694_v40 = vpop.f32.mrb[49].mxu1 }
 0x4d7   : > { %v8793_v56 = vadd.f32 %v5694_v40, %v5693_v59  ;;  %v5696_v54 = vpop.f32.mrb[50].mxu1 }
 0x4d8   : > { %v5697_v29 = vpop.f32.mrb[51].mxu1 }
 0x4d9   : > { %9511 = vst [vmem:[#allocation33_spill] sm:$0xff] %v8793_v56  ;;  %v8795_v25 = vadd.f32 %v5697_v29, %v5696_v54 }
 0x4da   : > { %3876 = vmatmul.mubr.bf16.gmra.mrb[156].mxu1 %v8596_v14 }
 0x4db   : > { %9512 = vst [vmem:[#allocation43_spill] sm:$0xff] %v8795_v25  ;;  %3883 = vmatprep.mubr.bf16.mxu1 %v8372_v13 }
 0x4dd   : > { %v5699_v1 = vpop.f32.mrb[52].mxu1 }
 0x4de   : > { %v5700_v8 = vpop.f32.mrb[53].mxu1 }
 0x4df   : > { %v8799_v35 = vadd.f32 %v5700_v8, %v5699_v1  ;;  %v5702_v7 = vpop.f32.mrb[54].mxu1 }
 0x4e0   : > { %v5703_v61 = vpop.f32.mrb[55].mxu1 }
 0x4e1   : > { %9513 = vst [vmem:[#allocation32_spill] sm:$0xff] %v8799_v35  ;;  %v8801_v26 = vadd.f32 %v5703_v61, %v5702_v7 }
 0x4e2   : > { %3884 = vmatmul.mubr.bf16.gmra.mrb[160].mxu1 %v8610_v18 }
 0x4e3   : > { %9514 = vst [vmem:[#allocation44_spill] sm:$0xff] %v8801_v26  ;;  %3891 = vmatprep.mubr.bf16.mxu1 %v8390_v2 }
 0x4e5   : > { %v5705_v59 = vpop.f32.mrb[56].mxu1 }
 0x4e6   : > { %v5706_v40 = vpop.f32.mrb[57].mxu1 }
 0x4e7   : > { %v8805_v29 = vadd.f32 %v5706_v40, %v5705_v59  ;;  %v5708_v54 = vpop.f32.mrb[58].mxu1 }
 0x4e8   : > { %v5709_v25 = vpop.f32.mrb[59].mxu1 }
 0x4e9   : > { %9515 = vst [vmem:[#allocation45_spill] sm:$0xff] %v8805_v29  ;;  %v8807_v56 = vadd.f32 %v5709_v25, %v5708_v54 }
 0x4ea   : > { %3892 = vmatmul.mubr.bf16.gmra.mrb[164].mxu1 %v8620_v6 }
 0x4eb   : > { %9516 = vst [vmem:[#allocation15_spill] sm:$0xff] %v8807_v56  ;;  %3899 = vmatprep.mubr.bf16.mxu1 %v8408_v55 }
 0x4ed   : > { %v5711_v1 = vpop.f32.mrb[60].mxu1 }
 0x4ee   : > { %v5712_v8 = vpop.f32.mrb[61].mxu1 }
 0x4ef   : > { %v8811_v61 = vadd.f32 %v5712_v8, %v5711_v1  ;;  %v5714_v7 = vpop.f32.mrb[62].mxu1 }
 0x4f0   : > { %v5715_v26 = vpop.f32.mrb[63].mxu1 }
 0x4f1   : > { %9517 = vst [vmem:[#allocation46_spill] sm:$0xff] %v8811_v61  ;;  %v8813_v35 = vadd.f32 %v5715_v26, %v5714_v7  ;;  %v9363_v26 = vshrl.u32 %v8451_v23, 16 }
 0x4f2   : > { %3900 = vmatmul.mubr.bf16.gmra.mrb[168].mxu1 %v8630_v44 }
 0x4f3   : > { %9518 = vst [vmem:[#allocation47_spill] sm:$0xff] %v8813_v35  ;;  %3907 = vmatprep.mubr.bf16.mxu1 %v8426_v42 }
 0x4f5   : > { %v5717_v59 = vpop.f32.mrb[64].mxu1 }
 0x4f6   : > { %v5718_v40 = vpop.f32.mrb[65].mxu1 }
 0x4f7   : > { %v8817_v25 = vadd.f32 %v5718_v40, %v5717_v59  ;;  %v5720_v54 = vpop.f32.mrb[66].mxu1  ;;  %v2913_v59 = vrot.slane %v9363_v26, 7 }
 0x4f8   : > { %v5721_v56 = vpop.f32.mrb[67].mxu1 }
 0x4f9   : > { %v8819_v29 = vadd.f32 %v5721_v56, %v5720_v54  ;;  %v9365_v56 = vshll.u32 %v8451_v23, 16 }
 0x4fa   : > { %3908 = vmatmul.mubr.bf16.gmra.mrb[172].mxu1 %v8641_v63 }
 0x4fb   : > { %9519 = vst [vmem:[#allocation35_spill] sm:$0xff] %v8819_v29  ;;  %3915 = vmatprep.mubr.bf16.mxu1 %v8444_v3  ;;  %v2916_v54 = vor.u32 %v9365_v56, %v2913_v59  ;;  %v6777_v56 = vld [vmem:[#allocation9 + $0x180] sm:$0xff]  }
 0x4fd   : > { %v5723_v1 = vpop.f32.mrb[68].mxu1 }
 0x4fe   : > { %v5724_v8 = vpop.f32.mrb[69].mxu1 }
 0x4ff   : > { %v8824_v7 = vadd.f32 %v5724_v8, %v5723_v1  ;;  %v5726_v35 = vpop.f32.mrb[70].mxu1 }
 0x500   : > { %v5727_v61 = vpop.f32.mrb[71].mxu1 }
 0x501   : > { %9520 = vst [vmem:[#allocation34_spill] sm:$0xff] %v8824_v7  ;;  %v8826_v42 = vadd.f32 %v5727_v61, %v5726_v35  ;;  %v8841_v61 = vsel %vm7252_vm2, 0, %v2916_v54 }
 0x502   : > { %3916 = vmatmul.mubr.bf16.gmra.mrb[176].mxu1 %v8657_v47 }
 0x503   : > { %9521 = vst [vmem:[#allocation16_spill] sm:$0xff] %v8826_v42  ;;  %3923 = vmatprep.mubr.bf16.mxu1 %v8451_v23 }
 0x505   : > { %v5729_v40 = vpop.f32.mrb[72].mxu1 }
 0x506   : > { %v5730_v29 = vpop.f32.mrb[73].mxu1 }
 0x507   : > { %v8835_v1 = vadd.f32 %v5730_v29, %v5729_v40  ;;  %v5732_v8 = vpop.f32.mrb[74].mxu1  ;;  %v6778_v40 = vld [vmem:[#allocation9 + $0x1c8] sm:$0xff]  }
 0x508   : > { %v5733_v7 = vpop.f32.mrb[75].mxu1 }
 0x509   : > { %9522 = vst [vmem:[#allocation17_spill] sm:$0xff] %v8835_v1  ;;  %v8837_v35 = vadd.f32 %v5733_v7, %v5732_v8  ;;  %v6780_v7 = vld [vmem:[#allocation9 + $0x1d0] sm:$0xff]  }
 0x50a   : > { %3924 = vmatmul.mubr.bf16.gmra.mrb[180].mxu1 %v8841_v61 }
 0x50b   : > { %9523 = vst [vmem:[#allocation36_spill] sm:$0xff] %v8837_v35  ;;  %6269 = vmatprep.mubr.bf16.mxu1 %v8664_v27  ;;  %v6782_v35 = vld [vmem:[#allocation9 + $0x1d8] sm:$0xff]  }
 0x50d   : > { %v5735_v26 = vpop.f32.mrb[76].mxu1 }
 0x50e   : > { %v5736_v42 = vpop.f32.mrb[77].mxu1 }
 0x50f   : > { %v8845_v47 = vadd.f32 %v5736_v42, %v5735_v26  ;;  %v5738_v59 = vpop.f32.mrb[78].mxu1  ;;  %v6781_v26 = vld [vmem:[#allocation9 + $0x190] sm:$0xff]  }
 0x510   : > { %v5739_v29 = vpop.f32.mrb[79].mxu1 }
 0x511   : > { %9524 = vst [vmem:[#allocation19_spill] sm:$0xff] %v8845_v47  ;;  %v8847_v1 = vadd.f32 %v5739_v29, %v5738_v59  ;;  %v6784_v29 = vld [vmem:[#allocation9 + $0x1e0] sm:$0xff]  }
 0x512   : > { %6270 = vmatmul.mubr.bf16.vlgmr.msra.gmra.mrb[88].mxu1 %v8670_v45 }
 0x513   : > { %9525 = vst [vmem:[#allocation27_spill] sm:$0xff] %v8847_v1  ;;  %6273 = vmatprep.mubr.bf16.mxu1 %v8676_v41  ;;  %5914 = vmatpush3.bf16.msra.mxu1 %v6777_v56  ;;  %v6783_v56 = vld [vmem:[#allocation9 + $0x198] sm:$0xff]  }
 0x514   : > { %5915 = vmatprep.subr.bf16.mxu1 %v6778_v40 }
 0x515   : > { %v5741_v54 = vpop.f32.mrb[80].mxu1 }
 0x516   : > { %v5742_v27 = vpop.f32.mrb[81].mxu1 }
 0x517   : > { %v8851_v8 = vadd.f32 %v5742_v27, %v5741_v54  ;;  %v5744_v42 = vpop.f32.mrb[82].mxu1  ;;  %5916 = vmatpush3.bf16.msra.mxu1 %v6779_v28  ;;  %v6785_v28 = vld [vmem:[#allocation9 + $0x1a0] sm:$0xff]  }
 0x518   : > { %v5745_v47 = vpop.f32.mrb[83].mxu1  ;;  %5917 = vmatprep.subr.bf16.mxu1 %v6780_v7  ;;  %v6786_v7 = vld [vmem:[#allocation9 + $0x1e8] sm:$0xff]  }
 0x519   : > { %9526 = vst [vmem:[#allocation14_spill] sm:$0xff] %v8851_v8  ;;  %v8853_v59 = vadd.f32 %v5745_v47, %v5744_v42  ;;  %v6787_v42 = vld [vmem:[#allocation9 + $0x1a8] sm:$0xff]  }
 0x51a   : > { %6274 = vmatmul.mubr.bf16.gmra.mrb[92].mxu1 %v8682_v20 }
 0x51b   : > { %6277 = vmatprep.mubr.bf16.mxu1 %v8688_v16  ;;  %5918 = vmatpush3.bf16.msra.mxu1 %v6781_v26  ;;  %v6789_v26 = vld [vmem:[#allocation9 + $0x1b0] sm:$0xff]  }
 0x51c   : > { %5919 = vmatprep.subr.bf16.mxu1 %v6782_v35  ;;  %v6788_v35 = vld [vmem:[#allocation9 + $0x1f0] sm:$0xff]  }
 0x51d   : > { %v5747_v40 = vpop.f32.mrb[84].mxu1 }
 0x51e   : > { %v5748_v1 = vpop.f32.mrb[85].mxu1 }
 0x51f   : > { %v8857_v54 = vadd.f32 %v5748_v1, %v5747_v40  ;;  %v5750_v27 = vpop.f32.mrb[86].mxu1  ;;  %5920 = vmatpush3.bf16.msra.mxu1 %v6783_v56  ;;  %v6790_v1 = vld [vmem:[#allocation9 + $0x1f8] sm:$0xff]  }
 0x520   : > { %v5751_v8 = vpop.f32.mrb[87].mxu1  ;;  %5921 = vmatprep.subr.bf16.mxu1 %v6784_v29  ;;  %v6791_v56 = vld [vmem:[#allocation9 + $0x1b8] sm:$0xff]   ;;  %v9527_v29 = vshll.u32 %v8451_v23, 16 }
 0x521   : > { %v8859_v47 = vadd.f32 %v5751_v8, %v5750_v27  ;;  %v6792_v8 = vld [vmem:[#allocation9 + $0x200] sm:$0xff]   ;;  %v9528_v27 = vshrl.u32 %v8451_v23, 16 }
 0x522   : > { %6278 = vmatmul.mubr.bf16.gmra.mrb[96].mxu1 %v8694_v5  ;;  %v2992_v40 = vrot.slane %v9527_v29, 1 }
 0x523   : > { %6281 = vmatprep.mubr.bf16.mxu1 %v8700_v37  ;;  %5922 = vmatpush3.bf16.msra.mxu1 %v6785_v28 }
 0x524   : > { %5923 = vmatprep.subr.bf16.mxu1 %v6786_v7  ;;  %v2993_v28 = vor.u32 %v2992_v40, %v9528_v27 }
 0x526   : > { %v8877_v7 = vsel %vm7346_vm5, %v2993_v28, 0 }
 0x527   : > { %5924 = vmatpush3.bf16.msra.mxu1 %v6787_v42  ;;  %v6793_v42 = vld [vmem:[#allocation9 + $0x208] sm:$0xff]  }
 0x528   : > { %5925 = vmatprep.subr.bf16.mxu1 %v6788_v35  ;;  %v6794_v35 = vld [vmem:[#allocation9 + $0x210] sm:$0xff]  }
 0x52a   : > { %6282 = vmatmul.mubr.bf16.gmra.mrb[100].mxu1 %v8706_v53 }
 0x52b   : > { %6285 = vmatprep.mubr.bf16.mxu1 %v8712_v43  ;;  %5926 = vmatpush3.bf16.msra.mxu1 %v6789_v26  ;;  %v6795_v26 = vld [vmem:[#allocation9 + $0x218] sm:$0xff]  }
 0x52c   : > { %5927 = vmatprep.subr.bf16.mxu1 %v6790_v1 }
 0x52f   : > { %5928 = vmatpush3.bf16.msra.mxu1 %v6791_v56 }
 0x530   : > { %6301 = vmatprep.subr.bf16.mxu1 %v6792_v8 }
 0x532   : > { %6286 = vmatmul.mubr.bf16.gmra.mrb[104].mxu1 %v8718_v10 }
 0x533   : > { %6289 = vmatprep.mubr.bf16.mxu1 %v8724_v60 }
 0x53a   : > { %6290 = vmatmul.mubr.bf16.gmra.mrb[108].mxu1 %v8730_v15 }
 0x53b   : > { %6293 = vmatprep.mubr.bf16.mxu1 %v8736_v51 }
 0x542   : > { %6294 = vmatmul.mubr.bf16.gmra.mrb[112].mxu1 %v8744_v32 }
 0x543   : > { %6297 = vmatprep.mubr.bf16.mxu1 %v8751_v50 }
 0x54a   : > { %6298 = vmatmul.mubr.bf16.gmra.mrb[116].mxu1 %v8877_v7 }
 0x54b   : > { %4414 = vmatprep.mubr.bf16.mxu1 %v8495_v0  ;;  %v6797_v0 = vld [vmem:[#allocation9 + $0x228] sm:$0xff]  }
 0x552   : > { %4415 = vmatmul.mubr.bf16.vlgmr.msra.gmra.mrb[184].mxu1 %v8520_v38 }
 0x553   : > { %4422 = vmatprep.mubr.bf16.mxu1 %v8491_v17  ;;  %6302 = vmatpush3.bf16.msra.mxu1 %v6792_v8  ;;  %v6798_v17 = vld [vmem:[#allocation9 + $0x230] sm:$0xff]  }
 0x554   : > { %6303 = vmatprep.subr.bf16.mxu1 %v6793_v42 }
 0x557   : > { %6304 = vmatpush3.bf16.msra.mxu1 %v6793_v42 }
 0x558   : > { %6305 = vmatprep.subr.bf16.mxu1 %v6794_v35 }
 0x55a   : > { %4423 = vmatmul.mubr.bf16.gmra.mrb[188].mxu1 %v8534_v4 }
 0x55b   : > { %4430 = vmatprep.mubr.bf16.mxu1 %v8516_v34  ;;  %6306 = vmatpush3.bf16.msra.mxu1 %v6794_v35  ;;  %v6799_v34 = vld [vmem:[#allocation9 + $0x238] sm:$0xff]  }
 0x55c   : > { %6307 = vmatprep.subr.bf16.mxu1 %v6795_v26 }
 0x55f   : > { %6308 = vmatpush3.bf16.msra.mxu1 %v6795_v26 }
 0x560   : > { %6309 = vmatprep.subr.bf16.mxu1 %v6796_v30 }
 0x562   : > { %4431 = vmatmul.mubr.bf16.gmra.mrb[192].mxu1 %v8540_v49 }
 0x563   : > { %4438 = vmatprep.mubr.bf16.mxu1 %v8514_v19  ;;  %6310 = vmatpush3.bf16.msra.mxu1 %v6796_v30 }
 0x564   : > { %6311 = vmatprep.subr.bf16.mxu1 %v6797_v0 }
 0x565   : > { %v5793_v38 = vpop.f32.mrb[120].mxu1 }
 0x566   : > { %v5794_v1 = vpop.f32.mrb[121].mxu1 }
 0x567   : > { %v5795_v56 = vadd.f32 %v5794_v1, %v5793_v38  ;;  %v5796_v8 = vpop.f32.mrb[122].mxu1  ;;  %6312 = vmatpush3.bf16.msra.mxu1 %v6797_v0 }
 0x568   : > { %v5797_v4 = vpop.f32.mrb[123].mxu1  ;;  %6313 = vmatprep.subr.bf16.mxu1 %v6798_v17 }
 0x569   : > { %v8888_v29 = vadd.f32 %v5795_v56, %v8602_v21  ;;  %v5798_v40 = vadd.f32 %v5797_v4, %v5796_v8  ;;  %v9529_v4 = vld [vmem:[#allocation31_spill] sm:$0xff] }
 0x56a   : > { %4439 = vmatmul.mubr.bf16.gmra.mrb[196].mxu1 %v8546_v62 }
 0x56b   : > { %v8892_v49 = vadd.f32 %v5798_v40, %v8606_v33  ;;  %4446 = vmatprep.mubr.bf16.mxu1 %v8282_v48  ;;  %6314 = vmatpush3.bf16.msra.mxu1 %v6798_v17 }
 0x56c   : > { %6315 = vmatprep.subr.bf16.mxu1 %v6799_v34 }
 0x56d   : > { %v5799_v19 = vpop.f32.mrb[124].mxu1 }
 0x56e   : > { %v5800_v27 = vpop.f32.mrb[125].mxu1 }
 0x56f   : > { %v5801_v28 = vadd.f32 %v5800_v27, %v5799_v19  ;;  %v5802_v42 = vpop.f32.mrb[126].mxu1  ;;  %6316 = vmatpush3.bf16.msra.mxu1 %v6799_v34 }
 0x570   : > { %v5803_v35 = vpop.f32.mrb[127].mxu1 }
 0x571   : > { %v8896_v26 = vadd.f32 %v5801_v28, %v8761_v12  ;;  %v5804_v21 = vadd.f32 %v5803_v35, %v5802_v42  ;;  %v9531_v42 = vld [vmem:[#allocation39_spill] sm:$0xff] }
 0x572   : > { %4447 = vmatmul.mubr.bf16.gmra.mrb[200].mxu1 %v8556_v9 }
 0x573   : > { %v8900_v62 = vadd.f32 %v5804_v21, %v8765_v24  ;;  %4454 = vmatprep.mubr.bf16.mxu1 %v8300_v57 }
 0x575   : > { %v5805_v48 = vpop.f32.mrb[128].mxu1 }
 0x576   : > { %v5806_v33 = vpop.f32.mrb[129].mxu1 }
 0x577   : > { %v5807_v30 = vadd.f32 %v5806_v33, %v5805_v48  ;;  %v5808_v0 = vpop.f32.mrb[130].mxu1  ;;  %v9532_v48 = vld [vmem:[#allocation40_spill] sm:$0xff] }
 0x578   : > { %v5809_v17 = vpop.f32.mrb[131].mxu1 }
 0x579   : > { %v8904_v38 = vadd.f32 %v5807_v30, %v8769_v58  ;;  %v5810_v1 = vadd.f32 %v5809_v17, %v5808_v0  ;;  %v9530_v58 = vld [vmem:[#allocation38_spill] sm:$0xff] }
 0x57a   : > { %4455 = vmatmul.mubr.bf16.gmra.mrb[204].mxu1 %v8566_v39 }
 0x57b   : > { %v8908_v12 = vadd.f32 %v5810_v1, %v8771_v11  ;;  %4462 = vmatprep.mubr.bf16.mxu1 %v8318_v22  ;;  %v9533_v1 = vld [vmem:[#allocation41_spill] sm:$0xff] }
 0x57d   : > { %v5811_v9 = vpop.f32.mrb[132].mxu1 }
 0x57e   : > { %v5812_v24 = vpop.f32.mrb[133].mxu1 }
 0x57f   : > { %v5813_v56 = vadd.f32 %v5812_v24, %v5811_v9  ;;  %v5814_v57 = vpop.f32.mrb[134].mxu1 }
 0x580   : > { %v5815_v8 = vpop.f32.mrb[135].mxu1 }
 0x581   : > { %v8912_v34 = vadd.f32 %v5813_v56, %v9529_v4  ;;  %v5816_v40 = vadd.f32 %v5815_v8, %v5814_v57  ;;  %v9534_v56 = vld [vmem:[#allocation42_spill] sm:$0xff] }
 0x582   : > { %4463 = vmatmul.mubr.bf16.gmra.mrb[208].mxu1 %v8576_v31 }
 0x583   : > { %v8916_v19 = vadd.f32 %v5816_v40, %v9530_v58  ;;  %4470 = vmatprep.mubr.bf16.mxu1 %v8336_v36  ;;  %v9535_v58 = vld [vmem:[#allocation33_spill] sm:$0xff] }
 0x585   : > { %v5817_v39 = vpop.f32.mrb[136].mxu1 }
 0x586   : > { %v5818_v11 = vpop.f32.mrb[137].mxu1 }
 0x587   : > { %v5819_v27 = vadd.f32 %v5818_v11, %v5817_v39  ;;  %v5820_v22 = vpop.f32.mrb[138].mxu1 }
 0x588   : > { %v5821_v28 = vpop.f32.mrb[139].mxu1 }
 0x589   : > { %v8920_v35 = vadd.f32 %v5819_v27, %v9531_v42  ;;  %v5822_v21 = vadd.f32 %v5821_v28, %v5820_v22  ;;  %v9536_v27 = vld [vmem:[#allocation43_spill] sm:$0xff] }
 0x58a   : > { %4471 = vmatmul.mubr.bf16.gmra.mrb[212].mxu1 %v8586_v52 }
 0x58b   : > { %v8924_v33 = vadd.f32 %v5822_v21, %v9532_v48  ;;  %4478 = vmatprep.mubr.bf16.mxu1 %v8354_v46  ;;  %v9537_v48 = vld [vmem:[#allocation32_spill] sm:$0xff] }
 0x58d   : > { %v5823_v31 = vpop.f32.mrb[140].mxu1 }
 0x58e   : > { %v5824_v30 = vpop.f32.mrb[141].mxu1 }
 0x58f   : > { %v5825_v0 = vadd.f32 %v5824_v30, %v5823_v31  ;;  %v5826_v36 = vpop.f32.mrb[142].mxu1 }
 0x590   : > { %v5827_v17 = vpop.f32.mrb[143].mxu1 }
 0x591   : > { %v8928_v9 = vadd.f32 %v5825_v0, %v9533_v1  ;;  %v5828_v24 = vadd.f32 %v5827_v17, %v5826_v36  ;;  %v9538_v0 = vld [vmem:[#allocation44_spill] sm:$0xff] }
 0x592   : > { %4479 = vmatmul.mubr.bf16.gmra.mrb[216].mxu1 %v8596_v14 }
 0x593   : > { %v8932_v57 = vadd.f32 %v5828_v24, %v9534_v56  ;;  %4486 = vmatprep.mubr.bf16.mxu1 %v8372_v13  ;;  %v9539_v56 = vld [vmem:[#allocation45_spill] sm:$0xff] }
 0x595   : > { %v5829_v52 = vpop.f32.mrb[144].mxu1 }
 0x596   : > { %v5830_v8 = vpop.f32.mrb[145].mxu1 }
 0x597   : > { %v5831_v4 = vadd.f32 %v5830_v8, %v5829_v52  ;;  %v5832_v46 = vpop.f32.mrb[146].mxu1 }
 0x598   : > { %v5833_v40 = vpop.f32.mrb[147].mxu1 }
 0x599   : > { %v8936_v39 = vadd.f32 %v5831_v4, %v9535_v58  ;;  %v5834_v11 = vadd.f32 %v5833_v40, %v5832_v46  ;;  %v9540_v4 = vld [vmem:[#allocation15_spill] sm:$0xff] }
 0x59a   : > { %4487 = vmatmul.mubr.bf16.gmra.mrb[220].mxu1 %v8610_v18 }
 0x59b   : > { %v8940_v22 = vadd.f32 %v5834_v11, %v9536_v27  ;;  %4494 = vmatprep.mubr.bf16.mxu1 %v8390_v2 }
 0x59d   : > { %v5835_v14 = vpop.f32.mrb[148].mxu1 }
 0x59e   : > { %v5836_v28 = vpop.f32.mrb[149].mxu1 }
 0x59f   : > { %v5837_v42 = vadd.f32 %v5836_v28, %v5835_v14  ;;  %v5838_v13 = vpop.f32.mrb[150].mxu1  ;;  %v9542_v14 = vld [vmem:[#allocation46_spill] sm:$0xff] }
 0x5a0   : > { %v5839_v21 = vpop.f32.mrb[151].mxu1 }
 0x5a1   : > { %v8944_v31 = vadd.f32 %v5837_v42, %v9537_v48  ;;  %v5840_v30 = vadd.f32 %v5839_v21, %v5838_v13  ;;  %v9543_v13 = vld [vmem:[#allocation47_spill] sm:$0xff] }
 0x5a2   : > { %4495 = vmatmul.mubr.bf16.gmra.mrb[224].mxu1 %v8620_v6  ;;  %v9541_v6 = vld [vmem:[#allocation29_spill] sm:$0xff] }
 0x5a3   : > { %v8948_v36 = vadd.f32 %v5840_v30, %v9538_v0  ;;  %4502 = vmatprep.mubr.bf16.mxu1 %v8408_v55 }
 0x5a5   : > { %v5841_v18 = vpop.f32.mrb[152].mxu1 }
 0x5a6   : > { %v5842_v17 = vpop.f32.mrb[153].mxu1 }
 0x5a7   : > { %v5843_v1 = vadd.f32 %v5842_v17, %v5841_v18  ;;  %v5844_v2 = vpop.f32.mrb[154].mxu1 }
 0x5a8   : > { %v5845_v24 = vpop.f32.mrb[155].mxu1 }
 0x5a9   : > { %v8952_v52 = vadd.f32 %v5843_v1, %v9539_v56  ;;  %v5846_v8 = vadd.f32 %v5845_v24, %v5844_v2  ;;  %v9544_v2 = vld [vmem:[#allocation30_spill] sm:$0xff]  ;;  %v9545_v24 = vld [vmem:[#allocation35_spill] sm:$0xff] }
 0x5aa   : > { %4503 = vmatmul.mubr.bf16.gmra.mrb[228].mxu1 %v8630_v44 }
 0x5ab   : > { %v8956_v46 = vadd.f32 %v5846_v8, %v9540_v4  ;;  %4510 = vmatprep.mubr.bf16.mxu1 %v9541_v6 }
 0x5ad   : > { %v5847_v40 = vpop.f32.mrb[156].mxu1 }
 0x5ae   : > { %v5848_v58 = vpop.f32.mrb[157].mxu1 }
 0x5af   : > { %v5849_v11 = vadd.f32 %v5848_v58, %v5847_v40  ;;  %v5850_v55 = vpop.f32.mrb[158].mxu1  ;;  %v9546_v40 = vld [vmem:[#allocation34_spill] sm:$0xff] }
 0x5b0   : > { %v5851_v27 = vpop.f32.mrb[159].mxu1 }
 0x5b1   : > { %v8960_v28 = vadd.f32 %v5849_v11, %v9542_v14  ;;  %v5852_v42 = vadd.f32 %v5851_v27, %v5850_v55  ;;  %v9548_v27 = vmov 0  }
 0x5b2   : > { %4511 = vmatmul.mubr.bf16.gmra.mrb[232].mxu1 %v8641_v63 }
 0x5b3   : > { %v8964_v21 = vadd.f32 %v5852_v42, %v9543_v13  ;;  %4518 = vmatprep.mubr.bf16.mxu1 %v8444_v3 }
 0x5b5   : > { %v5853_v44 = vpop.f32.mrb[160].mxu1 }
 0x5b6   : > { %v5854_v48 = vpop.f32.mrb[161].mxu1 }
 0x5b7   : > { %v5855_v30 = vadd.f32 %v5854_v48, %v5853_v44  ;;  %v5856_v0 = vpop.f32.mrb[162].mxu1  ;;  %v9549_v48 = vld [vmem:[#allocation17_spill] sm:$0xff] }
 0x5b8   : > { %v5857_v18 = vpop.f32.mrb[163].mxu1 }
 0x5b9   : > { %v8968_v17 = vadd.f32 %v5855_v30, %v8817_v25  ;;  %v5858_v1 = vadd.f32 %v5857_v18, %v5856_v0  ;;  %v9547_v25 = vld [vmem:[#allocation16_spill] sm:$0xff] }
 0x5ba   : > { %4519 = vmatmul.mubr.bf16.gmra.mrb[236].mxu1 %v9544_v2  ;;  %v9550_v18 = vld [vmem:[#allocation24_spill] sm:$0xff] }
 0x5bb   : > { %v8972_v56 = vadd.f32 %v5858_v1, %v9545_v24  ;;  %4526 = vmatprep.mubr.bf16.mxu1 %v8451_v23  ;;  %v9551_v1 = vld [vmem:[#allocation36_spill] sm:$0xff] }
 0x5bd   : > { %v5859_v63 = vpop.f32.mrb[164].mxu1 }
 0x5be   : > { %v5860_v8 = vpop.f32.mrb[165].mxu1 }
 0x5bf   : > { %v5861_v4 = vadd.f32 %v5860_v8, %v5859_v63  ;;  %v5862_v3 = vpop.f32.mrb[166].mxu1 }
 0x5c0   : > { %v5863_v6 = vpop.f32.mrb[167].mxu1 }
 0x5c1   : > { %v8976_v58 = vadd.f32 %v5861_v4, %v9546_v40  ;;  %v5864_v11 = vadd.f32 %v5863_v6, %v5862_v3  ;;  %v9552_v3 = vld [vmem:[#allocation19_spill] sm:$0xff] }
 0x5c2   : > { %4527 = vmatmul.mubr.bf16.gmra.mrb[240].mxu1 %v8841_v61 }
 0x5c3   : > { %v8980_v55 = vadd.f32 %v5864_v11, %v9547_v25  ;;  %4534 = vmatprep.mubr.bf16.mxu1 %v9548_v27  ;;  %v9553_v11 = vld [vmem:[#allocation27_spill] sm:$0xff] }
 0x5c5   : > { %v5865_v14 = vpop.f32.mrb[168].mxu1 }
 0x5c6   : > { %v5866_v42 = vpop.f32.mrb[169].mxu1 }
 0x5c7   : > { %v5867_v13 = vadd.f32 %v5866_v42, %v5865_v14  ;;  %v5868_v23 = vpop.f32.mrb[170].mxu1 }
 0x5c8   : > { %v5869_v44 = vpop.f32.mrb[171].mxu1 }
 0x5c9   : > { %v8984_v30 = vadd.f32 %v5867_v13, %v9549_v48  ;;  %v5870_v0 = vadd.f32 %v5869_v44, %v5868_v23  ;;  %v9554_v23 = vld [vmem:[#allocation14_spill] sm:$0xff] }
 0x5ca   : > { %4535 = vmatmul.mubr.bf16.gmra.mrb[244].mxu1 %v9550_v18 }
 0x5cb   : > { %v8988_v2 = vadd.f32 %v5870_v0, %v9551_v1  ;;  %6317 = vmatprep.mubr.bf16.mxu1 %v8670_v45 }
 0x5cd   : > { %v5871_v61 = vpop.f32.mrb[172].mxu1 }
 0x5ce   : > { %v5872_v24 = vpop.f32.mrb[173].mxu1 }
 0x5cf   : > { %v5873_v63 = vadd.f32 %v5872_v24, %v5871_v61  ;;  %v5874_v8 = vpop.f32.mrb[174].mxu1 }
 0x5d0   : > { %v5875_v4 = vpop.f32.mrb[175].mxu1 }
 0x5d1   : > { %v8992_v6 = vadd.f32 %v5873_v63, %v9552_v3  ;;  %v5876_v40 = vadd.f32 %v5875_v4, %v5874_v8 }
 0x5d2   : > { %6318 = vmatmul.mubr.bf16.vlgmr.msra.gmra.mrb[88].mxu1 %v8676_v41 }
 0x5d3   : > { %v8996_v25 = vadd.f32 %v5876_v40, %v9553_v11  ;;  %6321 = vmatprep.mubr.bf16.mxu1 %v8682_v20 }
 0x5d5   : > { %v5877_v27 = vpop.f32.mrb[176].mxu1 }
 0x5d6   : > { %v5878_v14 = vpop.f32.mrb[177].mxu1 }
 0x5d7   : > { %v5879_v42 = vadd.f32 %v5878_v14, %v5877_v27  ;;  %v5880_v45 = vpop.f32.mrb[178].mxu1 }
 0x5d8   : > { %v5881_v13 = vpop.f32.mrb[179].mxu1 }
 0x5d9   : > { %v9000_v44 = vadd.f32 %v5879_v42, %v9554_v23  ;;  %v5882_v48 = vadd.f32 %v5881_v13, %v5880_v45 }
 0x5da   : > { %6322 = vmatmul.mubr.bf16.gmra.mrb[92].mxu1 %v8688_v16  ;;  %v9555_v16 = vld [vmem:[#allocation37_spill] sm:$0xff] }
 0x5db   : > { %v9004_v0 = vadd.f32 %v5882_v48, %v8853_v59  ;;  %6325 = vmatprep.mubr.bf16.mxu1 %v8694_v5 }
 0x5dd   : > { %v5883_v41 = vpop.f32.mrb[180].mxu1 }
 0x5de   : > { %v5884_v18 = vpop.f32.mrb[181].mxu1 }
 0x5df   : > { %v5885_v1 = vadd.f32 %v5884_v18, %v5883_v41  ;;  %v5886_v20 = vpop.f32.mrb[182].mxu1 }
 0x5e0   : > { %v5887_v61 = vpop.f32.mrb[183].mxu1 }
 0x5e1   : > { %v9008_v24 = vadd.f32 %v5885_v1, %v8857_v54  ;;  %v5888_v63 = vadd.f32 %v5887_v61, %v5886_v20 }
 0x5e2   : > { %6326 = vmatmul.mubr.bf16.gmra.mrb[96].mxu1 %v8700_v37 }
 0x5e3   : > { %v9012_v8 = vadd.f32 %v5888_v63, %v8859_v47  ;;  %6329 = vmatprep.mubr.bf16.mxu1 %v8706_v53 }
 0x5ea   : > { %6330 = vmatmul.mubr.bf16.gmra.mrb[100].mxu1 %v8712_v43 }
 0x5eb   : > { %6333 = vmatprep.mubr.bf16.mxu1 %v8718_v10 }
 0x5f2   : > { %6334 = vmatmul.mubr.bf16.gmra.mrb[104].mxu1 %v8724_v60 }
 0x5f3   : > { %6337 = vmatprep.mubr.bf16.mxu1 %v8730_v15 }
 0x5fa   : > { %6338 = vmatmul.mubr.bf16.gmra.mrb[108].mxu1 %v8736_v51 }
 0x5fb   : > { %6341 = vmatprep.mubr.bf16.mxu1 %v8744_v32 }
 0x602   : > { %6342 = vmatmul.mubr.bf16.gmra.mrb[112].mxu1 %v8751_v50 }
 0x603   : > { %6345 = vmatprep.mubr.bf16.mxu1 %v8877_v7 }
 0x60a   : > { %6346 = vmatmul.mubr.bf16.gmra.mrb[116].mxu1 %v9555_v16 }
 0x625   : > { %v5929_v5 = vpop.f32.mrb[184].mxu1 }
 0x626   : > { %v5930_v37 = vpop.f32.mrb[185].mxu1 }
 0x627   : > { %v5931_v53 = vadd.f32 %v5930_v37, %v5929_v5  ;;  %v5932_v43 = vpop.f32.mrb[186].mxu1 }
 0x628   : > { %v5933_v59 = vpop.f32.mrb[187].mxu1 }
 0x629   : > { %v5934_v10 = vadd.f32 %v5933_v59, %v5932_v43  ;;  %v9025_v60 = vadd.f32 %v8888_v29, %v5931_v53 }
 0x62b   : > { %v9028_v15 = vadd.f32 %v8892_v49, %v5934_v10 }
 0x62d   : > { %v5935_v51 = vpop.f32.mrb[188].mxu1 }
 0x62e   : > { %v5936_v32 = vpop.f32.mrb[189].mxu1 }
 0x62f   : > { %v5937_v54 = vadd.f32 %v5936_v32, %v5935_v51  ;;  %v5938_v50 = vpop.f32.mrb[190].mxu1 }
 0x630   : > { %v5939_v47 = vpop.f32.mrb[191].mxu1 }
 0x631   : > { %v5940_v7 = vadd.f32 %v5939_v47, %v5938_v50  ;;  %v9031_v4 = vadd.f32 %v8896_v26, %v5937_v54 }
 0x633   : > { %v9034_v3 = vadd.f32 %v8900_v62, %v5940_v7 }
 0x635   : > { %v5941_v40 = vpop.f32.mrb[192].mxu1 }
 0x636   : > { %v5942_v11 = vpop.f32.mrb[193].mxu1 }
 0x637   : > { %v5943_v27 = vadd.f32 %v5942_v11, %v5941_v40  ;;  %v5944_v29 = vpop.f32.mrb[194].mxu1 }
 0x638   : > { %v5945_v14 = vpop.f32.mrb[195].mxu1 }
 0x639   : > { %v5946_v42 = vadd.f32 %v5945_v14, %v5944_v29  ;;  %v9037_v49 = vadd.f32 %v8904_v38, %v5943_v27 }
 0x63b   : > { %v9040_v45 = vadd.f32 %v8908_v12, %v5946_v42 }
 0x63d   : > { %v5947_v13 = vpop.f32.mrb[196].mxu1 }
 0x63e   : > { %v5948_v23 = vpop.f32.mrb[197].mxu1 }
 0x63f   : > { %v5949_v48 = vadd.f32 %v5948_v23, %v5947_v13  ;;  %v5950_v26 = vpop.f32.mrb[198].mxu1 }
 0x640   : > { %v5951_v41 = vpop.f32.mrb[199].mxu1 }
 0x641   : > { %v5952_v18 = vadd.f32 %v5951_v41, %v5950_v26  ;;  %v9043_v62 = vadd.f32 %v8912_v34, %v5949_v48 }
 0x643   : > { %v9046_v1 = vadd.f32 %v8916_v19, %v5952_v18 }
 0x645   : > { %v5953_v20 = vpop.f32.mrb[200].mxu1 }
 0x646   : > { %v5954_v61 = vpop.f32.mrb[201].mxu1 }
 0x647   : > { %v5955_v63 = vadd.f32 %v5954_v61, %v5953_v20  ;;  %v5956_v38 = vpop.f32.mrb[202].mxu1 }
 0x648   : > { %v5957_v16 = vpop.f32.mrb[203].mxu1 }
 0x649   : > { %v5958_v5 = vadd.f32 %v5957_v16, %v5956_v38  ;;  %v9049_v12 = vadd.f32 %v8920_v35, %v5955_v63 }
 0x64b   : > { %v9052_v37 = vadd.f32 %v8924_v33, %v5958_v5 }
 0x64d   : > { %v5959_v53 = vpop.f32.mrb[204].mxu1 }
 0x64e   : > { %v5960_v43 = vpop.f32.mrb[205].mxu1 }
 0x64f   : > { %v5961_v59 = vadd.f32 %v5960_v43, %v5959_v53  ;;  %v5962_v34 = vpop.f32.mrb[206].mxu1 }
 0x650   : > { %v5963_v10 = vpop.f32.mrb[207].mxu1 }
 0x651   : > { %v5964_v51 = vadd.f32 %v5963_v10, %v5962_v34  ;;  %v9055_v19 = vadd.f32 %v8928_v9, %v5961_v59 }
 0x653   : > { %v9058_v32 = vadd.f32 %v8932_v57, %v5964_v51 }
 0x655   : > { %v5965_v54 = vpop.f32.mrb[208].mxu1 }
 0x656   : > { %v5966_v50 = vpop.f32.mrb[209].mxu1 }
 0x657   : > { %v5967_v47 = vadd.f32 %v5966_v50, %v5965_v54  ;;  %v5968_v35 = vpop.f32.mrb[210].mxu1 }
 0x658   : > { %v5969_v7 = vpop.f32.mrb[211].mxu1 }
 0x659   : > { %v5970_v40 = vadd.f32 %v5969_v7, %v5968_v35  ;;  %v9061_v33 = vadd.f32 %v8936_v39, %v5967_v47 }
 0x65b   : > { %v9064_v11 = vadd.f32 %v8940_v22, %v5970_v40 }
 0x65d   : > { %v5971_v27 = vpop.f32.mrb[212].mxu1 }
 0x65e   : > { %v5972_v29 = vpop.f32.mrb[213].mxu1 }
 0x65f   : > { %v5973_v14 = vadd.f32 %v5972_v29, %v5971_v27  ;;  %v5974_v9 = vpop.f32.mrb[214].mxu1 }
 0x660   : > { %v5975_v42 = vpop.f32.mrb[215].mxu1 }
 0x661   : > { %v5976_v13 = vadd.f32 %v5975_v42, %v5974_v9  ;;  %v9067_v57 = vadd.f32 %v8944_v31, %v5973_v14 }
 0x663   : > { %v9070_v23 = vadd.f32 %v8948_v36, %v5976_v13 }
 0x665   : > { %v5977_v48 = vpop.f32.mrb[216].mxu1 }
 0x666   : > { %v5978_v26 = vpop.f32.mrb[217].mxu1 }
 0x667   : > { %v5979_v41 = vadd.f32 %v5978_v26, %v5977_v48  ;;  %v5980_v39 = vpop.f32.mrb[218].mxu1 }
 0x668   : > { %v5981_v18 = vpop.f32.mrb[219].mxu1 }
 0x669   : > { %v5982_v20 = vadd.f32 %v5981_v18, %v5980_v39  ;;  %v9073_v22 = vadd.f32 %v8952_v52, %v5979_v41 }
 0x66b   : > { %v9076_v61 = vadd.f32 %v8956_v46, %v5982_v20 }
 0x66d   : > { %v5983_v63 = vpop.f32.mrb[220].mxu1 }
 0x66e   : > { %v5984_v38 = vpop.f32.mrb[221].mxu1 }
 0x66f   : > { %v5985_v16 = vadd.f32 %v5984_v38, %v5983_v63  ;;  %v5986_v31 = vpop.f32.mrb[222].mxu1 }
 0x670   : > { %v5987_v5 = vpop.f32.mrb[223].mxu1 }
 0x671   : > { %v5988_v53 = vadd.f32 %v5987_v5, %v5986_v31  ;;  %v9079_v36 = vadd.f32 %v8960_v28, %v5985_v16 }
 0x673   : > { %v9082_v43 = vadd.f32 %v8964_v21, %v5988_v53 }
 0x675   : > { %v5989_v59 = vpop.f32.mrb[224].mxu1 }
 0x676   : > { %v5990_v34 = vpop.f32.mrb[225].mxu1 }
 0x677   : > { %v5991_v10 = vadd.f32 %v5990_v34, %v5989_v59  ;;  %v5992_v52 = vpop.f32.mrb[226].mxu1 }
 0x678   : > { %v5993_v51 = vpop.f32.mrb[227].mxu1 }
 0x679   : > { %v5994_v54 = vadd.f32 %v5993_v51, %v5992_v52  ;;  %v9085_v46 = vadd.f32 %v8968_v17, %v5991_v10 }
 0x67b   : > { %v9088_v50 = vadd.f32 %v8972_v56, %v5994_v54 }
 0x67d   : > { %v5995_v47 = vpop.f32.mrb[228].mxu1 }
 0x67e   : > { %v5996_v35 = vpop.f32.mrb[229].mxu1 }
 0x67f   : > { %v5997_v7 = vadd.f32 %v5996_v35, %v5995_v47  ;;  %v5998_v28 = vpop.f32.mrb[230].mxu1 }
 0x680   : > { %v5999_v40 = vpop.f32.mrb[231].mxu1 }
 0x681   : > { %v6000_v27 = vadd.f32 %v5999_v40, %v5998_v28  ;;  %v9091_v21 = vadd.f32 %v8976_v58, %v5997_v7  ;;  %v9129_v40 = vld [vmem:[%s9304_s3 + $0x3] ss:$0 sm:$0xff] }
 0x683   : > { %v9094_v29 = vadd.f32 %v8980_v55, %v6000_v27 }
 0x685   : > { %v6001_v14 = vpop.f32.mrb[232].mxu1 }
 0x686   : > { %v6002_v9 = vpop.f32.mrb[233].mxu1 }
 0x687   : > { %v6003_v42 = vadd.f32 %v6002_v9, %v6001_v14  ;;  %v6004_v17 = vpop.f32.mrb[234].mxu1 }
 0x688   : > { %v6005_v13 = vpop.f32.mrb[235].mxu1 }
 0x689   : > { %v6006_v48 = vadd.f32 %v6005_v13, %v6004_v17  ;;  %v9097_v56 = vadd.f32 %v8984_v30, %v6003_v42 }
 0x68b   : > { %v9100_v26 = vadd.f32 %v8988_v2, %v6006_v48 }
 0x68d   : > { %v6007_v41 = vpop.f32.mrb[236].mxu1 }
 0x68e   : > { %v6008_v39 = vpop.f32.mrb[237].mxu1 }
 0x68f   : > { %v6009_v18 = vadd.f32 %v6008_v39, %v6007_v41  ;;  %v6010_v58 = vpop.f32.mrb[238].mxu1 }
 0x690   : > { %v6011_v20 = vpop.f32.mrb[239].mxu1 }
 0x691   : > { %v6012_v63 = vadd.f32 %v6011_v20, %v6010_v58  ;;  %v9103_v55 = vadd.f32 %v8992_v6, %v6009_v18 }
 0x693   : > { %v9106_v38 = vadd.f32 %v8996_v25, %v6012_v63 }
 0x695   : > { %v6013_v16 = vpop.f32.mrb[240].mxu1 }
 0x696   : > { %v6014_v31 = vpop.f32.mrb[241].mxu1 }
 0x697   : > { %v6015_v5 = vadd.f32 %v6014_v31, %v6013_v16  ;;  %v6016_v30 = vpop.f32.mrb[242].mxu1 }
 0x698   : > { %v6017_v53 = vpop.f32.mrb[243].mxu1 }
 0x699   : > { %v6018_v59 = vadd.f32 %v6017_v53, %v6016_v30  ;;  %v9109_v2 = vadd.f32 %v9000_v44, %v6015_v5  ;;  %v9123_v44 = vld [vmem:[%s9304_s3 + $0x2] ss:$0 sm:$0xff] }
 0x69b   : > { %v9112_v34 = vadd.f32 %v9004_v0, %v6018_v59 }
 0x69d   : > { %v6019_v10 = vpop.f32.mrb[244].mxu1 }
 0x69e   : > { %v6020_v52 = vpop.f32.mrb[245].mxu1 }
 0x69f   : > { %v6021_v51 = vadd.f32 %v6020_v52, %v6019_v10  ;;  %v6022_v6 = vpop.f32.mrb[246].mxu1 }
 0x6a0   : > { %v6023_v54 = vpop.f32.mrb[247].mxu1 }
 0x6a1   : > { %v6024_v47 = vadd.f32 %v6023_v54, %v6022_v6  ;;  %v9115_v25 = vadd.f32 %v9008_v24, %v6021_v51 }
 0x6a3   : > { %v9118_v35 = vadd.f32 %v9012_v8, %v6024_v47 }
 0x6a5   : > { %v6319_v7 = vpop.f32.mrb[88].mxu1 }
 0x6a6   : > { %v6367_v0 = vadd.f32 %v9031_v4, %v6319_v7  ;;  %v4577_v28 = vpop.f32.mrb[89].mxu1 }
 0x6a7   : > { %v6370_v24 = vadd.f32 %v9025_v60, %v4577_v28  ;;  %v6320_v27 = vpop.f32.mrb[90].mxu1 }
 0x6a8   : > { %v4839_v8 = vmul.f32 %v6367_v0, %v9123_v44  ;;  %v6373_v14 = vadd.f32 %v9034_v3, %v6320_v27  ;;  %v4580_v9 = vpop.f32.mrb[91].mxu1 }
 0x6a9   : > { %v4837_v42 = vmul.f32 %v6370_v24, %v9123_v44  ;;  %v6376_v17 = vadd.f32 %v9028_v15, %v4580_v9 }
 0x6aa   : > { %v4876_v4 = vadd.f32 %v9129_v40, %v4839_v8  ;;  %v4840_v13 = vmul.f32 %v6373_v14, %v9123_v44 }
 0x6ab   : > { %v4874_v48 = vadd.f32 %v9129_v40, %v4837_v42  ;;  %v4838_v41 = vmul.f32 %v6376_v17, %v9123_v44 }
 0x6ac   : > { %v4877_v60 = vadd.f32 %v9129_v40, %v4840_v13  ;;  %v4908_v3 = vmax.f32 %v4876_v4, 0.0 }
 0x6ad   : > { %v4875_v39 = vadd.f32 %v9129_v40, %v4838_v41  ;;  %v6323_v18 = vpop.f32.mrb[92].mxu1  ;;  %v4906_v15 = vmax.f32 %v4874_v48, 0.0 }
 0x6ae   : > { %v4909_v58 = vmax.f32 %v4877_v60, 0.0  ;;  %v6379_v20 = vadd.f32 %v9043_v62, %v6323_v18  ;;  %v4593_v63 = vpop.f32.mrb[93].mxu1 }
 0x6af   : > { %v4907_v16 = vmax.f32 %v4875_v39, 0.0  ;;  %v6382_v31 = vadd.f32 %v9037_v49, %v4593_v63  ;;  %v6324_v5 = vpop.f32.mrb[94].mxu1 }
 0x6b0   : > { %v5476_v30 = vpack.c.bf16 %v4909_v58, %v4908_v3  ;;  %v4843_v53 = vmul.f32 %v6379_v20, %v9123_v44  ;;  %v6385_v59 = vadd.f32 %v9046_v1, %v6324_v5  ;;  %v4596_v10 = vpop.f32.mrb[95].mxu1 }
 0x6b1   : > { %v5471_v52 = vpack.c.bf16 %v4907_v16, %v4906_v15  ;;  %v4841_v51 = vmul.f32 %v6382_v31, %v9123_v44  ;;  %v6388_v6 = vadd.f32 %v9040_v45, %v4596_v10 }
 0x6b2   : > { %5548 = vst [vmem:[%s9149_s5 + $0x8] sm:$0xff] %v5476_v30   ;;  %v4880_v62 = vadd.f32 %v9129_v40, %v4843_v53  ;;  %v4844_v49 = vmul.f32 %v6385_v59, %v9123_v44 }
 0x6b3   : > { %5472 = vst [vmem:[%s9149_s5] sm:$0xff] %v5471_v52   ;;  %v4878_v54 = vadd.f32 %v9129_v40, %v4841_v51  ;;  %v4842_v1 = vmul.f32 %v6388_v6, %v9123_v44 }
 0x6b4   : > { %v4881_v47 = vadd.f32 %v9129_v40, %v4844_v49  ;;  %v4912_v45 = vmax.f32 %v4880_v62, 0.0 }
 0x6b5   : > { %v4879_v7 = vadd.f32 %v9129_v40, %v4842_v1  ;;  %v6327_v0 = vpop.f32.mrb[96].mxu1  ;;  %v4910_v8 = vmax.f32 %v4878_v54, 0.0 }
 0x6b6   : > { %v4913_v28 = vmax.f32 %v4881_v47, 0.0  ;;  %v6391_v24 = vadd.f32 %v9055_v19, %v6327_v0  ;;  %v4609_v27 = vpop.f32.mrb[97].mxu1 }
 0x6b7   : > { %v4911_v14 = vmax.f32 %v4879_v7, 0.0  ;;  %v6394_v9 = vadd.f32 %v9049_v12, %v4609_v27  ;;  %v6328_v42 = vpop.f32.mrb[98].mxu1 }
 0x6b8   : > { %v5486_v17 = vpack.c.bf16 %v4913_v28, %v4912_v45  ;;  %v4847_v4 = vmul.f32 %v6391_v24, %v9123_v44  ;;  %v6397_v13 = vadd.f32 %v9058_v32, %v6328_v42  ;;  %v4612_v48 = vpop.f32.mrb[99].mxu1 }
 0x6b9   : > { %v5481_v41 = vpack.c.bf16 %v4911_v14, %v4910_v8  ;;  %v4845_v60 = vmul.f32 %v6394_v9, %v9123_v44  ;;  %v6400_v39 = vadd.f32 %v9052_v37, %v4612_v48 }
 0x6ba   : > { %5550 = vst [vmem:[%s9149_s5 + $0x18] sm:$0xff] %v5486_v17   ;;  %v4884_v19 = vadd.f32 %v9129_v40, %v4847_v4  ;;  %v4848_v18 = vmul.f32 %v6397_v13, %v9123_v44 }
 0x6bb   : > { %5549 = vst [vmem:[%s9149_s5 + $0x10] sm:$0xff] %v5481_v41   ;;  %v4882_v12 = vadd.f32 %v9129_v40, %v4845_v60  ;;  %v4846_v3 = vmul.f32 %v6400_v39, %v9123_v44 }
 0x6bc   : > { %v4885_v58 = vadd.f32 %v9129_v40, %v4848_v18  ;;  %v4916_v63 = vmax.f32 %v4884_v19, 0.0 }
 0x6bd   : > { %v4883_v32 = vadd.f32 %v9129_v40, %v4846_v3  ;;  %v6331_v20 = vpop.f32.mrb[100].mxu1  ;;  %v4914_v31 = vmax.f32 %v4882_v12, 0.0 }
 0x6be   : > { %v4917_v15 = vmax.f32 %v4885_v58, 0.0  ;;  %v6403_v37 = vadd.f32 %v9067_v57, %v6331_v20  ;;  %v4625_v16 = vpop.f32.mrb[101].mxu1 }
 0x6bf   : > { %v4915_v5 = vmax.f32 %v4883_v32, 0.0  ;;  %v6406_v30 = vadd.f32 %v9061_v33, %v4625_v16  ;;  %v6332_v53 = vpop.f32.mrb[102].mxu1 }
 0x6c0   : > { %v5496_v59 = vpack.c.bf16 %v4917_v15, %v4916_v63  ;;  %v4851_v10 = vmul.f32 %v6403_v37, %v9123_v44  ;;  %v6409_v52 = vadd.f32 %v9070_v23, %v6332_v53  ;;  %v4628_v51 = vpop.f32.mrb[103].mxu1 }
 0x6c1   : > { %v5491_v6 = vpack.c.bf16 %v4915_v5, %v4914_v31  ;;  %v4849_v62 = vmul.f32 %v6406_v30, %v9123_v44  ;;  %v6412_v49 = vadd.f32 %v9064_v11, %v4628_v51 }
 0x6c2   : > { %5552 = vst [vmem:[%s9149_s5 + $0x28] sm:$0xff] %v5496_v59   ;;  %v4888_v57 = vadd.f32 %v9129_v40, %v4851_v10  ;;  %v4852_v54 = vmul.f32 %v6409_v52, %v9123_v44 }
 0x6c3   : > { %5551 = vst [vmem:[%s9149_s5 + $0x20] sm:$0xff] %v5491_v6   ;;  %v4886_v33 = vadd.f32 %v9129_v40, %v4849_v62  ;;  %v4850_v1 = vmul.f32 %v6412_v49, %v9123_v44 }
 0x6c4   : > { %v4889_v47 = vadd.f32 %v9129_v40, %v4852_v54  ;;  %v4920_v0 = vmax.f32 %v4888_v57, 0.0 }
 0x6c5   : > { %v4887_v23 = vadd.f32 %v9129_v40, %v4850_v1  ;;  %v6335_v7 = vpop.f32.mrb[104].mxu1  ;;  %v4918_v24 = vmax.f32 %v4886_v33, 0.0 }
 0x6c6   : > { %v4921_v45 = vmax.f32 %v4889_v47, 0.0  ;;  %v6415_v11 = vadd.f32 %v9079_v36, %v6335_v7  ;;  %v4641_v28 = vpop.f32.mrb[105].mxu1 }
 0x6c7   : > { %v4919_v27 = vmax.f32 %v4887_v23, 0.0  ;;  %v6418_v8 = vadd.f32 %v9073_v22, %v4641_v28  ;;  %v6336_v14 = vpop.f32.mrb[106].mxu1 }
 0x6c8   : > { %v5506_v9 = vpack.c.bf16 %v4921_v45, %v4920_v0  ;;  %v4855_v42 = vmul.f32 %v6415_v11, %v9123_v44  ;;  %v6421_v17 = vadd.f32 %v9082_v43, %v6336_v14  ;;  %v4644_v4 = vpop.f32.mrb[107].mxu1 }
 0x6c9   : > { %v5501_v13 = vpack.c.bf16 %v4919_v27, %v4918_v24  ;;  %v4853_v48 = vmul.f32 %v6418_v8, %v9123_v44  ;;  %v6424_v41 = vadd.f32 %v9076_v61, %v4644_v4 }
 0x6ca   : > { %5554 = vst [vmem:[%s9149_s5 + $0x38] sm:$0xff] %v5506_v9   ;;  %v4892_v36 = vadd.f32 %v9129_v40, %v4855_v42  ;;  %v4856_v60 = vmul.f32 %v6421_v17, %v9123_v44 }
 0x6cb   : > { %5553 = vst [vmem:[%s9149_s5 + $0x30] sm:$0xff] %v5501_v13   ;;  %v4890_v22 = vadd.f32 %v9129_v40, %v4853_v48  ;;  %v4854_v39 = vmul.f32 %v6424_v41, %v9123_v44 }
 0x6cc   : > { %v4893_v19 = vadd.f32 %v9129_v40, %v4856_v60  ;;  %v4924_v12 = vmax.f32 %v4892_v36, 0.0 }
 0x6cd   : > { %v4891_v43 = vadd.f32 %v9129_v40, %v4854_v39  ;;  %v6339_v18 = vpop.f32.mrb[108].mxu1  ;;  %v4922_v32 = vmax.f32 %v4890_v22, 0.0 }
 0x6ce   : > { %v4925_v3 = vmax.f32 %v4893_v19, 0.0  ;;  %v6427_v61 = vadd.f32 %v9091_v21, %v6339_v18  ;;  %v4657_v58 = vpop.f32.mrb[109].mxu1 }
 0x6cf   : > { %v4923_v20 = vmax.f32 %v4891_v43, 0.0  ;;  %v6430_v63 = vadd.f32 %v9085_v46, %v4657_v58  ;;  %v6340_v15 = vpop.f32.mrb[110].mxu1 }
 0x6d0   : > { %v5516_v37 = vpack.c.bf16 %v4925_v3, %v4924_v12  ;;  %v4859_v16 = vmul.f32 %v6427_v61, %v9123_v44  ;;  %v6433_v31 = vadd.f32 %v9094_v29, %v6340_v15  ;;  %v4660_v5 = vpop.f32.mrb[111].mxu1 }
 0x6d1   : > { %v5511_v30 = vpack.c.bf16 %v4923_v20, %v4922_v32  ;;  %v4857_v53 = vmul.f32 %v6430_v63, %v9123_v44  ;;  %v6436_v59 = vadd.f32 %v9088_v50, %v4660_v5 }
 0x6d2   : > { %5556 = vst [vmem:[%s9149_s5 + $0x48] sm:$0xff] %v5516_v37   ;;  %v4896_v21 = vadd.f32 %v9129_v40, %v4859_v16  ;;  %v4860_v10 = vmul.f32 %v6433_v31, %v9123_v44 }
 0x6d3   : > { %5555 = vst [vmem:[%s9149_s5 + $0x40] sm:$0xff] %v5511_v30   ;;  %v4894_v46 = vadd.f32 %v9129_v40, %v4857_v53  ;;  %v4858_v52 = vmul.f32 %v6436_v59, %v9123_v44 }
 0x6d4   : > { %v4897_v51 = vadd.f32 %v9129_v40, %v4860_v10  ;;  %v4928_v62 = vmax.f32 %v4896_v21, 0.0 }
 0x6d5   : > { %v4895_v29 = vadd.f32 %v9129_v40, %v4858_v52  ;;  %v6343_v6 = vpop.f32.mrb[112].mxu1  ;;  %v4926_v54 = vmax.f32 %v4894_v46, 0.0 }
 0x6d6   : > { %v4929_v49 = vmax.f32 %v4897_v51, 0.0  ;;  %v6439_v50 = vadd.f32 %v9103_v55, %v6343_v6  ;;  %v4673_v57 = vpop.f32.mrb[113].mxu1 }
 0x6d7   : > { %v4927_v33 = vmax.f32 %v4895_v29, 0.0  ;;  %v6442_v1 = vadd.f32 %v9097_v56, %v4673_v57  ;;  %v6344_v47 = vpop.f32.mrb[114].mxu1 }
 0x6d8   : > { %v5526_v23 = vpack.c.bf16 %v4929_v49, %v4928_v62  ;;  %v4863_v7 = vmul.f32 %v6439_v50, %v9123_v44  ;;  %v6445_v0 = vadd.f32 %v9106_v38, %v6344_v47  ;;  %v4676_v45 = vpop.f32.mrb[115].mxu1 }
 0x6d9   : > { %v5521_v11 = vpack.c.bf16 %v4927_v33, %v4926_v54  ;;  %v4861_v28 = vmul.f32 %v6442_v1, %v9123_v44  ;;  %v6448_v24 = vadd.f32 %v9100_v26, %v4676_v45 }
 0x6da   : > { %5558 = vst [vmem:[%s9149_s5 + $0x58] sm:$0xff] %v5526_v23   ;;  %v4900_v55 = vadd.f32 %v9129_v40, %v4863_v7  ;;  %v4864_v27 = vmul.f32 %v6445_v0, %v9123_v44 }
 0x6db   : > { %5557 = vst [vmem:[%s9149_s5 + $0x50] sm:$0xff] %v5521_v11   ;;  %v4898_v56 = vadd.f32 %v9129_v40, %v4861_v28  ;;  %v4862_v8 = vmul.f32 %v6448_v24, %v9123_v44 }
 0x6dc   : > { %v4901_v14 = vadd.f32 %v9129_v40, %v4864_v27  ;;  %v4932_v42 = vmax.f32 %v4900_v55, 0.0 }
 0x6dd   : > { %v4899_v38 = vadd.f32 %v9129_v40, %v4862_v8  ;;  %v6347_v9 = vpop.f32.mrb[116].mxu1  ;;  %v4930_v13 = vmax.f32 %v4898_v56, 0.0 }
 0x6de   : > { %v4933_v17 = vmax.f32 %v4901_v14, 0.0  ;;  %v6451_v26 = vadd.f32 %v9115_v25, %v6347_v9  ;;  %v4689_v4 = vpop.f32.mrb[117].mxu1 }
 0x6df   : > { %v4931_v48 = vmax.f32 %v4899_v38, 0.0  ;;  %v6454_v41 = vadd.f32 %v9109_v2, %v4689_v4  ;;  %v6348_v36 = vpop.f32.mrb[118].mxu1 }
 0x6e0   : > { %v5536_v60 = vpack.c.bf16 %v4933_v17, %v4932_v42  ;;  %v4867_v22 = vmul.f32 %v6451_v26, %v9123_v44  ;;  %v6457_v39 = vadd.f32 %v9118_v35, %v6348_v36  ;;  %v4692_v19 = vpop.f32.mrb[119].mxu1 }
 0x6e1   : > { %v5531_v43 = vpack.c.bf16 %v4931_v48, %v4930_v13  ;;  %v4865_v18 = vmul.f32 %v6454_v41, %v9123_v44  ;;  %v6460_v25 = vadd.f32 %v9112_v34, %v4692_v19 }
 0x6e2   : > { %5560 = vst [vmem:[%s9149_s5 + $0x68] sm:$0xff] %v5536_v60   ;;  %v4904_v12 = vadd.f32 %v9129_v40, %v4867_v22  ;;  %v4868_v3 = vmul.f32 %v6457_v39, %v9123_v44 }
 0x6e3   : > { %5559 = vst [vmem:[%s9149_s5 + $0x60] sm:$0xff] %v5531_v43   ;;  %v4902_v2 = vadd.f32 %v9129_v40, %v4865_v18  ;;  %v4866_v61 = vmul.f32 %v6460_v25, %v9123_v44 }
 0x6e4   : > { %v4905_v35 = vadd.f32 %v9129_v40, %v4868_v3  ;;  %v4936_v34 = vmax.f32 %v4904_v12, 0.0 }
 0x6e5   : > { %v4903_v58 = vadd.f32 %v9129_v40, %v4866_v61  ;;  %v4934_v20 = vmax.f32 %v4902_v2, 0.0 }
 0x6e6   : > { %v4937_v32 = vmax.f32 %v4905_v35, 0.0 }
 0x6e7   : > { %v4935_v63 = vmax.f32 %v4903_v58, 0.0 }
 0x6e8   : > { %v5546_v15 = vpack.c.bf16 %v4937_v32, %v4936_v34 }
 0x6e9   : > { %v5541_v44 = vpack.c.bf16 %v4935_v63, %v4934_v20 }
 0x6ea   : > { %5562 = vst [vmem:[%s9149_s5 + $0x78] sm:$0xff] %v5546_v15  }
 0x6eb   : > { %5561 = vst [vmem:[%s9149_s5 + $0x70] sm:$0xff] %v5541_v44  }
 0x6ec   : > { %6916 = shalt.err (!%p6913_p2)
}
 0x6ed   : > { %s6917_s10 = scalar_lea.hbm %s9248_s9, 2048  ;;  %s6921_s8 = scalar_lea.hbm %s9305_s4, 4096 }
 0x6ee   : > { %p6918_p0 = scmp.ne.s32.totalorder %s9248_s9, %s6917_s10  ;;  %p6922_p6 = scmp.lt.u32.totalorder %s9248_s9, %s9305_s4 }
 0x6ef   : > { %p6923_p7 = scmp.lt.u32.totalorder %s6921_s8, %s6917_s10  ;;  %p6925_p8 = scmp.lt.u32.totalorder %s6917_s10, %s9248_s9 }
 0x6f0   : > { %p6919_p4 = pnand %p6918_p0, %p9556_p12 }
 0x6f1   : > { %p6924_p11 = por %p6923_p7, %p6922_p6 }
 0x6f2   : > { %p6920_p13 = pneg %p6919_p4 }
 0x6f3   : > { %p6926_p1 = por %p6925_p8, %p6924_p11 }
 0x6f5   : > { %p6927_p10 = pnand %p6926_p1, %p6920_p13 }
 0x6f7   : > { %6930 = shalt.err (!%p6927_p10)
}
 0x6f8   : > { %s6998_s6 = smov 64   ;;  %s6999_s13 = smov 4  }
 0x6f9   : > { %6558 = dma.vmem_to_hbm [thread:$0]  (%p9556_p12), %s9250_s21, 2048, %s9248_s9, %s5099_s18, %s6998_s6, %s6998_s6, %s6999_s13  }
 0x6fa PF: > { %s5130_s24 = sand.u32 1, %s6969_s15   ;;  %p9557_p3 = scmp.ne.s32.totalorder %s9369_s26, 0 }
 0x6fb   : > { %p9558_p5 = scmp.ge.s32.totalorder %s6989_s20, 2  ;;  %s5131_s23 = scalar_lea.sflag [#allocation6], %s5130_s24 }
 0x6fd   : > { %p6572_p9 = pnand %p9558_p5, %p9557_p3 }
 0x6ff   : > { %6964 = dma.done.wait (!%p6572_p9), %s5131_s23, 2048  }
 0x700   : > { %6966 = vsyncadd (!%p6572_p9), %s5131_s23, 4294965248  ;;  %s21_s20 = sadd.s32 1, %s6989_s20   ;;  %s9559_s15 = smov %s6973_s16 }
 0x701   : > { %p18_p2 = scmp.ge.s32.totalorder %s21_s20, 4   ;;  %s9560_s16 = smov %s6977_s17 }
 0x702   : > { %s9561_s17 = smov %s7176_s11  ;;  %s9562_s18 = smov %s6985_s19 }
 0x703   : > { %s9563_s19 = smov %s9565_s30  ;;  %20 = sbr.rel (!%p18_p2) target bundleno = 7 (0x7), region = 98 }
 0x70a   :  { %5136 = vsyncpa [#allocation5], 1 }
 0x70b   :  { %5138 = vsyncpa [#allocation5 + $0x1], 1 }
 0x70c   :  { %5139 = vsyncpa [#allocation8], 1 }
 0x70d   :  { %5140 = vsyncpa [#allocation6], 1 }
 0x70e   :  { %5142 = vsyncpa [#allocation6 + $0x1], 1 }

</bundles_post_ra>
